<compile_context>
chip_gen: v7x
topology: tpu7x:2x2x1
jax: 0.10.0
libtpu: 0.0.40
codegen_flags: <defaults>
</compile_context>

<pallas_src>
import functools

import jax
import jax.numpy as jnp
from jax.experimental import pallas as pl
from jax.experimental.pallas import tpu as pltpu


# Fixed geometry implied by fc1 = Linear(128 * (225 // 4), 128).
_L_IN = 225          # input length
_L1 = 112            # length after pool1 (floor(225 / 2))
_L2 = 56             # length after pool2
_C1 = 64             # conv1 output channels
_C2 = 128            # conv2 output channels
_HID = 128           # fc1 output features
_NC_PAD = 128        # fc2 output padded to a full lane width
_B_BLK = 8           # samples per conv-stage grid step


def _round_up(x, m):
  return (x + m - 1) // m * m


# ----------------------------- conv stage kernel ---------------------------- #

def _conv_kernel(pat_ref, w1_ref, s1_ref, sh1_ref, w2_ref, s2_ref, sh2_ref,
                 out_ref, sbuf):
  """conv1+bn1+relu+pool1 -> conv2+bn2+relu+pool2 for one block of B samples.

  pat_ref : (B, 224, F)   bf16 conv1 im2col patches; position axis ordered
            m = q*112 + r*56 + l  <->  conv1 output position t = 4l + 2r + q
            (q = parity inside pool1 pair, r = pool1-output parity, l = pool2 pos).
  w1_ref  : (F, 64)       bf16 conv1 weights, row f = k*Cin + c.
  w2_ref  : (3, 64, 128)  bf16 conv2 weights per tap.
  s*/sh*  : (1, C)        f32 folded BatchNorm scale / shift (conv bias folded in).
  out_ref : (B, 56, 128)  bf16 pooled conv2 output (lane-dense channels-last).
  sbuf    : (B, 128, 64)  f32 scratch staging the two shifted conv2 taps.
  """
  b = pat_ref.shape[0]
  f = pat_ref.shape[2]

  # ---- conv1 + bn1: ONE MXU matmul over all samples / positions / parities ----
  x = pat_ref[...].reshape(b * 224, f)
  h1 = jnp.dot(x, w1_ref[...], preferred_element_type=jnp.float32)     # (b*224, 64)
  h1 = h1 * s1_ref[...] + sh1_ref[...]
  h1 = h1.reshape(b, 224, _C1)

  # ---- pool1 (+relu): q=0 rows vs q=1 rows are contiguous aligned halves ----
  p1 = jnp.maximum(jnp.maximum(h1[:, :_L1, :], h1[:, _L1:, :]), 0.0)   # (b, 112, 64)
  ev = p1[:, :_L2, :]      # E[l] = pool1 output at even position 2l
  od = p1[:, _L2:, :]      # O[l] = pool1 output at odd  position 2l+1

  # ---- conv2 shifted taps (padding=1) staged in VMEM: reads stay contiguous ----
  zrow = jnp.zeros((b, 1, _C1), jnp.float32)
  sbuf[:, 0:1, :] = zrow
  sbuf[:, 1:57, :] = od
  sbuf[:, 64:120, :] = ev
  sbuf[:, 120:121, :] = zrow
  o_m1 = sbuf[:, 0:56, :]       # O[l-1]  (zero at l=0)
  e_p1 = sbuf[:, 65:121, :]     # E[l+1]  (zero at l=55)

  # ---- conv2 + bn2 + relu + pool2; M = b*56 stacked along sublanes, bf16 MXU ----
  e_f = ev.reshape(b * _L2, _C1).astype(jnp.bfloat16)
  o_f = od.reshape(b * _L2, _C1).astype(jnp.bfloat16)
  om_f = o_m1.reshape(b * _L2, _C1).astype(jnp.bfloat16)
  ep_f = e_p1.reshape(b * _L2, _C1).astype(jnp.bfloat16)
  w20 = w2_ref[0]
  w21 = w2_ref[1]
  w22 = w2_ref[2]
  # even output positions j=2l use (O[l-1], E[l], O[l]); odd j=2l+1 use (E[l], O[l], E[l+1]).
  even = (jnp.dot(om_f, w20, preferred_element_type=jnp.float32)
          + jnp.dot(e_f, w21, preferred_element_type=jnp.float32)
          + jnp.dot(o_f, w22, preferred_element_type=jnp.float32))
  odd = (jnp.dot(e_f, w20, preferred_element_type=jnp.float32)
         + jnp.dot(o_f, w21, preferred_element_type=jnp.float32)
         + jnp.dot(ep_f, w22, preferred_element_type=jnp.float32))
  even = even * s2_ref[...] + sh2_ref[...]
  odd = odd * s2_ref[...] + sh2_ref[...]
  out = jnp.maximum(jnp.maximum(even, odd), 0.0)                       # (b*56, 128)
  out_ref[...] = out.reshape(b, _L2, _C2).astype(out_ref.dtype)


def _head_kernel(x_ref, w1_ref, b1_ref, w2_ref, b2_ref, o_ref):
  """fc1 + relu (+ eval-mode dropout = identity) + fc2 for one block of batch rows."""
  h = jnp.dot(x_ref[...], w1_ref[...], preferred_element_type=jnp.float32)
  h = jnp.maximum(h + b1_ref[...], 0.0)
  o_ref[...] = (jnp.dot(h, w2_ref[...], preferred_element_type=jnp.float32)
                + b2_ref[...]).astype(o_ref.dtype)


# ------------------------------ pallas_call wrappers ------------------------ #

def _conv_stage(pat, pp, b_blk):
  """pat: (N_pad, 224, F) bf16 im2col patches -> (N_pad, 56, 128) bf16 pooled conv2."""
  n_pad, _, f = pat.shape
  return pl.pallas_call(
      _conv_kernel,
      out_shape=jax.ShapeDtypeStruct((n_pad, _L2, _C2), jnp.bfloat16),
      grid=(n_pad // b_blk,),
      in_specs=[
          pl.BlockSpec((b_blk, 224, f), lambda i: (i, 0, 0)),
          pl.BlockSpec((f, _C1), lambda i: (0, 0)),
          pl.BlockSpec((1, _C1), lambda i: (0, 0)),
          pl.BlockSpec((1, _C1), lambda i: (0, 0)),
          pl.BlockSpec((3, _C1, _C2), lambda i: (0, 0, 0)),
          pl.BlockSpec((1, _C2), lambda i: (0, 0)),
          pl.BlockSpec((1, _C2), lambda i: (0, 0)),
      ],
      out_specs=pl.BlockSpec((b_blk, _L2, _C2), lambda i: (i, 0, 0)),
      scratch_shapes=[pltpu.VMEM((b_blk, 128, _C1), jnp.float32)],
      compiler_params=pltpu.CompilerParams(
          dimension_semantics=("parallel",)),
  )(pat, pp["w1m"], pp["s1"], pp["sh1"], pp["w2p"], pp["s2"], pp["sh2"])


def _head_block(n_pad):
  for bm in (256, 128, 64, 32, 16, 8):
    if n_pad % bm == 0:
      return bm
  return n_pad


def _head_stage(flat, pp):
  """flat: (N_pad, 7168) bf16 (length-major l*128 + c) -> (N_pad, 128) f32 padded logits."""
  n_pad, k = flat.shape
  bm = _head_block(n_pad)
  return pl.pallas_call(
      _head_kernel,
      out_shape=jax.ShapeDtypeStruct((n_pad, _NC_PAD), jnp.float32),
      grid=(n_pad // bm,),
      in_specs=[
          pl.BlockSpec((bm, k), lambda i: (i, 0)),
          pl.BlockSpec((k, _HID), lambda i: (0, 0)),       # grid-invariant, VMEM resident
          pl.BlockSpec((1, _HID), lambda i: (0, 0)),
          pl.BlockSpec((_HID, _NC_PAD), lambda i: (0, 0)),
          pl.BlockSpec((1, _NC_PAD), lambda i: (0, 0)),
      ],
      out_specs=pl.BlockSpec((bm, _NC_PAD), lambda i: (i, 0)),
      compiler_params=pltpu.CompilerParams(
          dimension_semantics=("parallel",)),
  )(flat, pp["fc1_wp"], pp["fc1_b"], pp["fc2_wp"], pp["fc2_bp"])


# ------------------------------ parameter prep ------------------------------ #

def prepare_params(p, eps=1e-5):
  """One-time host-side transform of raw (PyTorch-layout) params into kernel layouts."""
  # Fold conv bias + eval-mode BatchNorm into per-channel scale/shift.
  s1 = p["bn1_g"] / jnp.sqrt(p["bn1_v"] + eps)
  sh1 = (p["b1"] - p["bn1_m"]) * s1 + p["bn1_b"]
  s2 = p["bn2_g"] / jnp.sqrt(p["bn2_v"] + eps)
  sh2 = (p["b2"] - p["bn2_m"]) * s2 + p["bn2_b"]

  cin = int(p["w1"].shape[1])
  f = 5 * cin
  f_pad = _round_up(f, 8)
  # conv1 weights -> (F, 64), row f = k*Cin + c, matching the im2col feature order.
  w1m = jnp.transpose(p["w1"], (2, 1, 0)).reshape(f, _C1)
  w1m = jnp.pad(w1m, ((0, f_pad - f), (0, 0))).astype(jnp.bfloat16)
  # conv2 weights -> (K=3, Cin=64, Cout=128) per-tap matmul RHS.
  w2p = jnp.transpose(p["w2"], (2, 1, 0)).astype(jnp.bfloat16)

  # fc1: permute input columns from PyTorch channel-major (c*56 + l) to the
  # length-major (l*128 + c) order produced by flattening the (N, 56, 128) conv output.
  w_fc1 = p["fc1_w"].reshape(_HID, _C2, _L2)                            # (out, c, l)
  fc1_wp = jnp.transpose(w_fc1, (2, 1, 0)).reshape(_L2 * _C2, _HID)     # (7168, 128)
  fc1_wp = fc1_wp.astype(jnp.bfloat16)

  # fc2: pad the class dimension to a full lane-dense 128-wide output.
  nc = int(p["fc2_w"].shape[0])
  fc2_wp = jnp.pad(p["fc2_w"].T, ((0, 0), (0, _NC_PAD - nc)))           # (128, 128) f32
  fc2_bp = jnp.pad(p["fc2_b"], (0, _NC_PAD - nc)).reshape(1, _NC_PAD)

  return dict(
      w1m=w1m, s1=s1.reshape(1, _C1), sh1=sh1.reshape(1, _C1),
      w2p=w2p, s2=s2.reshape(1, _C2), sh2=sh2.reshape(1, _C2),
      fc1_wp=fc1_wp, fc1_b=p["fc1_b"].reshape(1, _HID),
      fc2_wp=fc2_wp, fc2_bp=fc2_bp, num_classes=nc)


def _build_conv1_patches(x):
  """x: (N, Cin, 225) -> (N, 224, F_pad) bf16 im2col patches for conv1 (k=5, pad=2).

  Position axis ordered m = q*112 + r*56 + l  <->  conv1 output position t = 4l + 2r + q,
  so pool1 / pool2 / conv2-tap accesses in the kernel are contiguous aligned slices.
  """
  n, cin, length = x.shape
  assert length == _L_IN
  xt = jnp.transpose(x, (0, 2, 1)).astype(jnp.float32)        # (N, 225, Cin)
  xp = jnp.pad(xt, ((0, 0), (2, 2), (0, 0)))                  # (N, 229, Cin)
  taps = [xp[:, k:k + 224, :] for k in range(5)]              # conv1 positions 0..223
  pat = jnp.stack(taps, axis=2).reshape(n, 224, 5 * cin)      # feature f = k*Cin + c
  pat = pat.reshape(n, _L2, 2, 2, 5 * cin)                    # [n, l, r, q, f]
  pat = jnp.transpose(pat, (0, 3, 2, 1, 4))                   # [n, q, r, l, f]
  pat = pat.reshape(n, 224, 5 * cin)
  f_pad = _round_up(5 * cin, 8)
  if f_pad != 5 * cin:
    pat = jnp.pad(pat, ((0, 0), (0, 0), (0, f_pad - 5 * cin)))
  return pat.astype(jnp.bfloat16)


# ------------------------------ forward pass -------------------------------- #

def cnn1d_forward(x, pp, b_blk=_B_BLK):
  """x: (N, input_channels=2, L=225) float32 -> logits (N, num_classes)."""
  n = x.shape[0]
  pat = _build_conv1_patches(x)                               # (N, 224, F) bf16
  n_pad = _round_up(n, b_blk)
  if n_pad != n:
    pat = jnp.pad(pat, ((0, n_pad - n), (0, 0), (0, 0)))
  pooled2 = _conv_stage(pat, pp, b_blk)                       # (N_pad, 56, 128) bf16
  flat = pooled2.reshape(n_pad, _L2 * _C2)                    # free row-major view
  logits = _head_stage(flat, pp)                              # (N_pad, 128) f32
  return logits[:n, :pp["num_classes"]]


# ------------------------------ reference (pure JAX) ------------------------ #

def _reference_forward(x, p, eps=1e-5):
  hi = jax.lax.Precision.HIGHEST

  def bn(h, g, b, m, v):
    return ((h - m[None, :, None]) / jnp.sqrt(v[None, :, None] + eps)
            * g[None, :, None] + b[None, :, None])

  h = jax.lax.conv_general_dilated(x, p["w1"], (1,), [(2, 2)],
                                   dimension_numbers=("NCH", "OIH", "NCH"),
                                   precision=hi)
  h = h + p["b1"][None, :, None]
  h = jnp.maximum(bn(h, p["bn1_g"], p["bn1_b"], p["bn1_m"], p["bn1_v"]), 0.0)
  h = jnp.maximum(h[:, :, 0:224:2], h[:, :, 1:225:2])          # (N, 64, 112)
  h = jax.lax.conv_general_dilated(h, p["w2"], (1,), [(1, 1)],
                                   dimension_numbers=("NCH", "OIH", "NCH"),
                                   precision=hi)
  h = h + p["b2"][None, :, None]
  h = jnp.maximum(bn(h, p["bn2_g"], p["bn2_b"], p["bn2_m"], p["bn2_v"]), 0.0)
  h = jnp.maximum(h[:, :, 0:112:2], h[:, :, 1:112:2])          # (N, 128, 56)
  flat = h.reshape(x.shape[0], -1)                             # channel-major flatten
  f1 = jnp.maximum(jnp.dot(flat, p["fc1_w"].T, precision=hi) + p["fc1_b"], 0.0)
  return jnp.dot(f1, p["fc2_w"].T, precision=hi) + p["fc2_b"]


# ------------------------------ params / main ------------------------------- #

def init_params(key, input_channels=2, num_classes=6):
  ks = jax.random.split(key, 8)
  def w_init(k, shape, fan_in):
    return (jax.random.normal(k, shape, jnp.float32) / jnp.sqrt(fan_in)).astype(jnp.float32)
  return {
      "w1": w_init(ks[0], (64, input_channels, 5), input_channels * 5),
      "b1": 0.01 * jax.random.normal(ks[1], (64,), jnp.float32),
      "bn1_g": jnp.ones((64,), jnp.float32), "bn1_b": jnp.zeros((64,), jnp.float32),
      "bn1_m": jnp.zeros((64,), jnp.float32), "bn1_v": jnp.ones((64,), jnp.float32),
      "w2": w_init(ks[2], (128, 64, 3), 64 * 3),
      "b2": 0.01 * jax.random.normal(ks[3], (128,), jnp.float32),
      "bn2_g": jnp.ones((128,), jnp.float32), "bn2_b": jnp.zeros((128,), jnp.float32),
      "bn2_m": jnp.zeros((128,), jnp.float32), "bn2_v": jnp.ones((128,), jnp.float32),
      "fc1_w": w_init(ks[4], (128, 128 * 56), 128 * 56),
      "fc1_b": 0.01 * jax.random.normal(ks[5], (128,), jnp.float32),
      "fc2_w": w_init(ks[6], (num_classes, 128), 128),
      "fc2_b": 0.01 * jax.random.normal(ks[7], (num_classes,), jnp.float32),
  }


if __name__ == "__main__":
  key = jax.random.PRNGKey(0)
  kp, kx = jax.random.split(key)
  params = init_params(kp, input_channels=2, num_classes=6)
  prepped = prepare_params(params)                 # one-time layout transform

  # The fc1 layer (128 * (225 // 4) inputs) pins the sequence length to 225.
  x = jax.random.normal(kx, (2, 2, 225), jnp.float32)

  fwd = jax.jit(functools.partial(cnn1d_forward, pp=prepped))
  out = jax.block_until_ready(fwd(x))

  assert out.shape == (2, 6), out.shape
  assert bool(jnp.all(jnp.isfinite(out)))

  ref = jax.block_until_ready(jax.jit(_reference_forward)(x, params))
  assert bool(jnp.allclose(out, ref, rtol=5e-2, atol=5e-2)), (out, ref)

  print("KERNEL_OK")
</pallas_src>

<mosaic_0001>
module attributes {stable_mosaic.version = 11 : i64} {
  func.func @_conv_kernel(%arg0: i32, %arg1: memref<8x224x16xbf16, #tpu.memory_space<vmem>>, %arg2: memref<16x64xbf16, #tpu.memory_space<vmem>>, %arg3: memref<1x64xf32, #tpu.memory_space<vmem>>, %arg4: memref<1x64xf32, #tpu.memory_space<vmem>>, %arg5: memref<3x64x128xbf16, #tpu.memory_space<vmem>>, %arg6: memref<1x128xf32, #tpu.memory_space<vmem>>, %arg7: memref<1x128xf32, #tpu.memory_space<vmem>>, %arg8: memref<8x56x128xbf16, #tpu.memory_space<vmem>>, %arg9: memref<8x128x64xf32, #tpu.memory_space<vmem>>) attributes {dimension_semantics = [#tpu.dimension_semantics<parallel>], iteration_bounds = array<i64: 1>, scalar_prefetch = 0 : i64, scratch_operands = 1 : i64, tpu.core_type = #tpu.core_type<tc>, window_params = [{transform_indices = @transform_0, window_bounds = array<i64: 8, 224, 16>}, {pipeline_mode = #tpu.pipeline_mode<synchronous>, transform_indices = @transform_1, window_bounds = array<i64: 16, 64>}, {pipeline_mode = #tpu.pipeline_mode<synchronous>, transform_indices = @transform_2, window_bounds = array<i64: 1, 64>}, {pipeline_mode = #tpu.pipeline_mode<synchronous>, transform_indices = @transform_3, window_bounds = array<i64: 1, 64>}, {pipeline_mode = #tpu.pipeline_mode<synchronous>, transform_indices = @transform_4, window_bounds = array<i64: 3, 64, 128>}, {pipeline_mode = #tpu.pipeline_mode<synchronous>, transform_indices = @transform_5, window_bounds = array<i64: 1, 128>}, {pipeline_mode = #tpu.pipeline_mode<synchronous>, transform_indices = @transform_6, window_bounds = array<i64: 1, 128>}, {transform_indices = @transform_7, window_bounds = array<i64: 8, 56, 128>}]} {
    %c0 = arith.constant 0 : index
    %c0_0 = arith.constant 0 : index
    %c0_1 = arith.constant 0 : index
    %0 = vector.load %arg1[%c0, %c0_0, %c0_1] : memref<8x224x16xbf16, #tpu.memory_space<vmem>>, vector<8x224x16xbf16>
    %1 = vector.shape_cast %0 : vector<8x224x16xbf16> to vector<1792x16xbf16>
    %c0_2 = arith.constant 0 : index
    %c0_3 = arith.constant 0 : index
    %2 = vector.load %arg2[%c0_2, %c0_3] : memref<16x64xbf16, #tpu.memory_space<vmem>>, vector<16x64xbf16>
    %cst = arith.constant dense<0.000000e+00> : vector<1792x64xf32>
    %3 = tpu.matmul %1, %2, %cst {dimension_numbers = #tpu.dot_dimension_numbers<[1], [0], [0], [1], [0, 0, 1, 1], [], []>} : vector<1792x16xbf16>, vector<16x64xbf16>, vector<1792x64xf32> -> vector<1792x64xf32>
    %c0_4 = arith.constant 0 : index
    %c0_5 = arith.constant 0 : index
    %4 = vector.load %arg3[%c0_4, %c0_5] : memref<1x64xf32, #tpu.memory_space<vmem>>, vector<1x64xf32>
    %5 = vector.broadcast %4 : vector<1x64xf32> to vector<1792x64xf32>
    %6 = arith.mulf %3, %5 : vector<1792x64xf32>
    %c0_6 = arith.constant 0 : index
    %c0_7 = arith.constant 0 : index
    %7 = vector.load %arg4[%c0_6, %c0_7] : memref<1x64xf32, #tpu.memory_space<vmem>>, vector<1x64xf32>
    %8 = vector.broadcast %7 : vector<1x64xf32> to vector<1792x64xf32>
    %9 = arith.addf %6, %8 : vector<1792x64xf32>
    %10 = vector.shape_cast %9 : vector<1792x64xf32> to vector<8x224x64xf32>
    %11 = vector.extract_strided_slice %10 {offsets = [0, 0, 0], sizes = [8, 112, 64], strides = [1, 1, 1]} : vector<8x224x64xf32> to vector<8x112x64xf32>
    %12 = vector.extract_strided_slice %10 {offsets = [0, 112, 0], sizes = [8, 112, 64], strides = [1, 1, 1]} : vector<8x224x64xf32> to vector<8x112x64xf32>
    %13 = arith.maximumf %11, %12 : vector<8x112x64xf32>
    %cst_8 = arith.constant 0.000000e+00 : f32
    %14 = vector.broadcast %cst_8 : f32 to vector<8x112x64xf32>
    %15 = arith.maximumf %13, %14 : vector<8x112x64xf32>
    %16 = vector.extract_strided_slice %15 {offsets = [0, 0, 0], sizes = [8, 56, 64], strides = [1, 1, 1]} : vector<8x112x64xf32> to vector<8x56x64xf32>
    %17 = vector.extract_strided_slice %15 {offsets = [0, 56, 0], sizes = [8, 56, 64], strides = [1, 1, 1]} : vector<8x112x64xf32> to vector<8x56x64xf32>
    %cst_9 = arith.constant 0.000000e+00 : f32
    %18 = vector.broadcast %cst_9 : f32 to vector<8x1x64xf32>
    %c0_10 = arith.constant 0 : index
    %c0_11 = arith.constant 0 : index
    %c0_12 = arith.constant 0 : index
    %19 = vector.load %arg9[%c0_10, %c0_11, %c0_12] : memref<8x128x64xf32, #tpu.memory_space<vmem>>, vector<8x1x64xf32>
    tpu.vector_store %arg9[%c0_10, %c0_11, %c0_12], %18 {strides = array<i32>} : memref<8x128x64xf32, #tpu.memory_space<vmem>>, vector<8x1x64xf32>,
    %c0_13 = arith.constant 0 : index
    %c1 = arith.constant 1 : index
    %c0_14 = arith.constant 0 : index
    %20 = vector.load %arg9[%c0_13, %c1, %c0_14] : memref<8x128x64xf32, #tpu.memory_space<vmem>>, vector<8x56x64xf32>
    tpu.vector_store %arg9[%c0_13, %c1, %c0_14], %17 {strides = array<i32>} : memref<8x128x64xf32, #tpu.memory_space<vmem>>, vector<8x56x64xf32>,
    %c0_15 = arith.constant 0 : index
    %c64 = arith.constant 64 : index
    %c0_16 = arith.constant 0 : index
    %21 = vector.load %arg9[%c0_15, %c64, %c0_16] : memref<8x128x64xf32, #tpu.memory_space<vmem>>, vector<8x56x64xf32>
    tpu.vector_store %arg9[%c0_15, %c64, %c0_16], %16 {strides = array<i32>} : memref<8x128x64xf32, #tpu.memory_space<vmem>>, vector<8x56x64xf32>,
    %c0_17 = arith.constant 0 : index
    %c120 = arith.constant 120 : index
    %c0_18 = arith.constant 0 : index
    %22 = vector.load %arg9[%c0_17, %c120, %c0_18] : memref<8x128x64xf32, #tpu.memory_space<vmem>>, vector<8x1x64xf32>
    tpu.vector_store %arg9[%c0_17, %c120, %c0_18], %18 {strides = array<i32>} : memref<8x128x64xf32, #tpu.memory_space<vmem>>, vector<8x1x64xf32>,
    %c0_19 = arith.constant 0 : index
    %c0_20 = arith.constant 0 : index
    %c0_21 = arith.constant 0 : index
    %23 = vector.load %arg9[%c0_19, %c0_20, %c0_21] : memref<8x128x64xf32, #tpu.memory_space<vmem>>, vector<8x56x64xf32>
    %c0_22 = arith.constant 0 : index
    %c65 = arith.constant 65 : index
    %c0_23 = arith.constant 0 : index
    %24 = vector.load %arg9[%c0_22, %c65, %c0_23] : memref<8x128x64xf32, #tpu.memory_space<vmem>>, vector<8x56x64xf32>
    %25 = vector.shape_cast %16 : vector<8x56x64xf32> to vector<448x64xf32>
    %26 = arith.truncf %25 : vector<448x64xf32> to vector<448x64xbf16>
    %27 = vector.shape_cast %17 : vector<8x56x64xf32> to vector<448x64xf32>
    %28 = arith.truncf %27 : vector<448x64xf32> to vector<448x64xbf16>
    %29 = vector.shape_cast %23 : vector<8x56x64xf32> to vector<448x64xf32>
    %30 = arith.truncf %29 : vector<448x64xf32> to vector<448x64xbf16>
    %31 = vector.shape_cast %24 : vector<8x56x64xf32> to vector<448x64xf32>
    %32 = arith.truncf %31 : vector<448x64xf32> to vector<448x64xbf16>
    %c0_24 = arith.constant 0 : index
    %c0_25 = arith.constant 0 : index
    %c0_26 = arith.constant 0 : index
    %33 = vector.load %arg5[%c0_24, %c0_25, %c0_26] : memref<3x64x128xbf16, #tpu.memory_space<vmem>>, vector<1x64x128xbf16>
    %34 = vector.shape_cast %33 : vector<1x64x128xbf16> to vector<64x128xbf16>
    %c1_27 = arith.constant 1 : index
    %c0_28 = arith.constant 0 : index
    %c0_29 = arith.constant 0 : index
    %35 = vector.load %arg5[%c1_27, %c0_28, %c0_29] : memref<3x64x128xbf16, #tpu.memory_space<vmem>>, vector<1x64x128xbf16>
    %36 = vector.shape_cast %35 : vector<1x64x128xbf16> to vector<64x128xbf16>
    %c2 = arith.constant 2 : index
    %c0_30 = arith.constant 0 : index
    %c0_31 = arith.constant 0 : index
    %37 = vector.load %arg5[%c2, %c0_30, %c0_31] : memref<3x64x128xbf16, #tpu.memory_space<vmem>>, vector<1x64x128xbf16>
    %38 = vector.shape_cast %37 : vector<1x64x128xbf16> to vector<64x128xbf16>
    %cst_32 = arith.constant dense<0.000000e+00> : vector<448x128xf32>
    %39 = tpu.matmul %30, %34, %cst_32 {dimension_numbers = #tpu.dot_dimension_numbers<[1], [0], [0], [1], [0, 0, 1, 1], [], []>} : vector<448x64xbf16>, vector<64x128xbf16>, vector<448x128xf32> -> vector<448x128xf32>
    %cst_33 = arith.constant dense<0.000000e+00> : vector<448x128xf32>
    %40 = tpu.matmul %26, %36, %cst_33 {dimension_numbers = #tpu.dot_dimension_numbers<[1], [0], [0], [1], [0, 0, 1, 1], [], []>} : vector<448x64xbf16>, vector<64x128xbf16>, vector<448x128xf32> -> vector<448x128xf32>
    %41 = arith.addf %39, %40 : vector<448x128xf32>
    %cst_34 = arith.constant dense<0.000000e+00> : vector<448x128xf32>
    %42 = tpu.matmul %28, %38, %cst_34 {dimension_numbers = #tpu.dot_dimension_numbers<[1], [0], [0], [1], [0, 0, 1, 1], [], []>} : vector<448x64xbf16>, vector<64x128xbf16>, vector<448x128xf32> -> vector<448x128xf32>
    %43 = arith.addf %41, %42 : vector<448x128xf32>
    %cst_35 = arith.constant dense<0.000000e+00> : vector<448x128xf32>
    %44 = tpu.matmul %26, %34, %cst_35 {dimension_numbers = #tpu.dot_dimension_numbers<[1], [0], [0], [1], [0, 0, 1, 1], [], []>} : vector<448x64xbf16>, vector<64x128xbf16>, vector<448x128xf32> -> vector<448x128xf32>
    %cst_36 = arith.constant dense<0.000000e+00> : vector<448x128xf32>
    %45 = tpu.matmul %28, %36, %cst_36 {dimension_numbers = #tpu.dot_dimension_numbers<[1], [0], [0], [1], [0, 0, 1, 1], [], []>} : vector<448x64xbf16>, vector<64x128xbf16>, vector<448x128xf32> -> vector<448x128xf32>
    %46 = arith.addf %44, %45 : vector<448x128xf32>
    %cst_37 = arith.constant dense<0.000000e+00> : vector<448x128xf32>
    %47 = tpu.matmul %32, %38, %cst_37 {dimension_numbers = #tpu.dot_dimension_numbers<[1], [0], [0], [1], [0, 0, 1, 1], [], []>} : vector<448x64xbf16>, vector<64x128xbf16>, vector<448x128xf32> -> vector<448x128xf32>
    %48 = arith.addf %46, %47 : vector<448x128xf32>
    %c0_38 = arith.constant 0 : index
    %c0_39 = arith.constant 0 : index
    %49 = vector.load %arg6[%c0_38, %c0_39] : memref<1x128xf32, #tpu.memory_space<vmem>>, vector<1x128xf32>
    %50 = vector.broadcast %49 : vector<1x128xf32> to vector<448x128xf32>
    %51 = arith.mulf %43, %50 : vector<448x128xf32>
    %c0_40 = arith.constant 0 : index
    %c0_41 = arith.constant 0 : index
    %52 = vector.load %arg7[%c0_40, %c0_41] : memref<1x128xf32, #tpu.memory_space<vmem>>, vector<1x128xf32>
    %53 = vector.broadcast %52 : vector<1x128xf32> to vector<448x128xf32>
    %54 = arith.addf %51, %53 : vector<448x128xf32>
    %c0_42 = arith.constant 0 : index
    %c0_43 = arith.constant 0 : index
    %55 = vector.load %arg6[%c0_42, %c0_43] : memref<1x128xf32, #tpu.memory_space<vmem>>, vector<1x128xf32>
    %56 = vector.broadcast %55 : vector<1x128xf32> to vector<448x128xf32>
    %57 = arith.mulf %48, %56 : vector<448x128xf32>
    %c0_44 = arith.constant 0 : index
    %c0_45 = arith.constant 0 : index
    %58 = vector.load %arg7[%c0_44, %c0_45] : memref<1x128xf32, #tpu.memory_space<vmem>>, vector<1x128xf32>
    %59 = vector.broadcast %58 : vector<1x128xf32> to vector<448x128xf32>
    %60 = arith.addf %57, %59 : vector<448x128xf32>
    %61 = arith.maximumf %54, %60 : vector<448x128xf32>
    %cst_46 = arith.constant 0.000000e+00 : f32
    %62 = vector.broadcast %cst_46 : f32 to vector<448x128xf32>
    %63 = arith.maximumf %61, %62 : vector<448x128xf32>
    %64 = vector.shape_cast %63 : vector<448x128xf32> to vector<8x56x128xf32>
    %65 = arith.truncf %64 : vector<8x56x128xf32> to vector<8x56x128xbf16>
    %c0_47 = arith.constant 0 : index
    %c0_48 = arith.constant 0 : index
    %c0_49 = arith.constant 0 : index
    %66 = vector.load %arg8[%c0_47, %c0_48, %c0_49] : memref<8x56x128xbf16, #tpu.memory_space<vmem>>, vector<8x56x128xbf16>
    tpu.vector_store %arg8[%c0_47, %c0_48, %c0_49], %65 {strides = array<i32>} : memref<8x56x128xbf16, #tpu.memory_space<vmem>>, vector<8x56x128xbf16>,
    return
  }
  func.func @transform_0(%arg0: i32) -> (i32, i32, i32) {
    %c0_i32 = arith.constant 0 : i32
    %c0_i32_0 = arith.constant 0 : i32
    %c0_i32_1 = arith.constant 0 : i32
    return %arg0, %c0_i32, %c0_i32_0 : i32, i32, i32
  }
  func.func @transform_1(%arg0: i32) -> (i32, i32) {
    %c0_i32 = arith.constant 0 : i32
    %c0_i32_0 = arith.constant 0 : i32
    %c0_i32_1 = arith.constant 0 : i32
    return %c0_i32, %c0_i32_0 : i32, i32
  }
  func.func @transform_2(%arg0: i32) -> (i32, i32) {
    %c0_i32 = arith.constant 0 : i32
    %c0_i32_0 = arith.constant 0 : i32
    %c0_i32_1 = arith.constant 0 : i32
    return %c0_i32, %c0_i32_0 : i32, i32
  }
  func.func @transform_3(%arg0: i32) -> (i32, i32) {
    %c0_i32 = arith.constant 0 : i32
    %c0_i32_0 = arith.constant 0 : i32
    %c0_i32_1 = arith.constant 0 : i32
    return %c0_i32, %c0_i32_0 : i32, i32
  }
  func.func @transform_4(%arg0: i32) -> (i32, i32, i32) {
    %c0_i32 = arith.constant 0 : i32
    %c0_i32_0 = arith.constant 0 : i32
    %c0_i32_1 = arith.constant 0 : i32
    %c0_i32_2 = arith.constant 0 : i32
    return %c0_i32, %c0_i32_0, %c0_i32_1 : i32, i32, i32
  }
  func.func @transform_5(%arg0: i32) -> (i32, i32) {
    %c0_i32 = arith.constant 0 : i32
    %c0_i32_0 = arith.constant 0 : i32
    %c0_i32_1 = arith.constant 0 : i32
    return %c0_i32, %c0_i32_0 : i32, i32
  }
  func.func @transform_6(%arg0: i32) -> (i32, i32) {
    %c0_i32 = arith.constant 0 : i32
    %c0_i32_0 = arith.constant 0 : i32
    %c0_i32_1 = arith.constant 0 : i32
    return %c0_i32, %c0_i32_0 : i32, i32
  }
  func.func @transform_7(%arg0: i32) -> (i32, i32, i32) {
    %c0_i32 = arith.constant 0 : i32
    %c0_i32_0 = arith.constant 0 : i32
    %c0_i32_1 = arith.constant 0 : i32
    return %arg0, %c0_i32, %c0_i32_0 : i32, i32, i32
  }
}

module attributes {stable_mosaic.version = 11 : i64} {
  func.func @_head_kernel(%arg0: i32, %arg1: memref<8x7168xbf16, #tpu.memory_space<vmem>>, %arg2: memref<7168x128xbf16, #tpu.memory_space<vmem>>, %arg3: memref<1x128xf32, #tpu.memory_space<vmem>>, %arg4: memref<128x128xf32, #tpu.memory_space<vmem>>, %arg5: memref<1x128xf32, #tpu.memory_space<vmem>>, %arg6: memref<8x128xf32, #tpu.memory_space<vmem>>) attributes {dimension_semantics = [#tpu.dimension_semantics<parallel>], iteration_bounds = array<i64: 1>, scalar_prefetch = 0 : i64, scratch_operands = 0 : i64, tpu.core_type = #tpu.core_type<tc>, window_params = [{transform_indices = @transform_0, window_bounds = array<i64: 8, 7168>}, {pipeline_mode = #tpu.pipeline_mode<synchronous>, transform_indices = @transform_1, window_bounds = array<i64: 7168, 128>}, {pipeline_mode = #tpu.pipeline_mode<synchronous>, transform_indices = @transform_2, window_bounds = array<i64: 1, 128>}, {pipeline_mode = #tpu.pipeline_mode<synchronous>, transform_indices = @transform_3, window_bounds = array<i64: 128, 128>}, {pipeline_mode = #tpu.pipeline_mode<synchronous>, transform_indices = @transform_4, window_bounds = array<i64: 1, 128>}, {transform_indices = @transform_5, window_bounds = array<i64: 8, 128>}]} {
    %c0 = arith.constant 0 : index
    %c0_0 = arith.constant 0 : index
    %0 = vector.load %arg1[%c0, %c0_0] : memref<8x7168xbf16, #tpu.memory_space<vmem>>, vector<8x7168xbf16>
    %c0_1 = arith.constant 0 : index
    %c0_2 = arith.constant 0 : index
    %1 = vector.load %arg2[%c0_1, %c0_2] : memref<7168x128xbf16, #tpu.memory_space<vmem>>, vector<7168x128xbf16>
    %cst = arith.constant dense<0.000000e+00> : vector<8x128xf32>
    %2 = tpu.matmul %0, %1, %cst {dimension_numbers = #tpu.dot_dimension_numbers<[1], [0], [0], [1], [0, 0, 1, 1], [], []>} : vector<8x7168xbf16>, vector<7168x128xbf16>, vector<8x128xf32> -> vector<8x128xf32>
    %c0_3 = arith.constant 0 : index
    %c0_4 = arith.constant 0 : index
    %3 = vector.load %arg3[%c0_3, %c0_4] : memref<1x128xf32, #tpu.memory_space<vmem>>, vector<1x128xf32>
    %4 = vector.broadcast %3 : vector<1x128xf32> to vector<8x128xf32>
    %5 = arith.addf %2, %4 : vector<8x128xf32>
    %cst_5 = arith.constant 0.000000e+00 : f32
    %6 = vector.broadcast %cst_5 : f32 to vector<8x128xf32>
    %7 = arith.maximumf %5, %6 : vector<8x128xf32>
    %c0_6 = arith.constant 0 : index
    %c0_7 = arith.constant 0 : index
    %8 = vector.load %arg4[%c0_6, %c0_7] : memref<128x128xf32, #tpu.memory_space<vmem>>, vector<128x128xf32>
    %cst_8 = arith.constant dense<0.000000e+00> : vector<8x128xf32>
    %9 = tpu.matmul %7, %8, %cst_8 {dimension_numbers = #tpu.dot_dimension_numbers<[1], [0], [0], [1], [0, 0, 1, 1], [], []>} : vector<8x128xf32>, vector<128x128xf32>, vector<8x128xf32> -> vector<8x128xf32>
    %c0_9 = arith.constant 0 : index
    %c0_10 = arith.constant 0 : index
    %10 = vector.load %arg5[%c0_9, %c0_10] : memref<1x128xf32, #tpu.memory_space<vmem>>, vector<1x128xf32>
    %11 = vector.broadcast %10 : vector<1x128xf32> to vector<8x128xf32>
    %12 = arith.addf %9, %11 : vector<8x128xf32>
    %c0_11 = arith.constant 0 : index
    %c0_12 = arith.constant 0 : index
    %13 = vector.load %arg6[%c0_11, %c0_12] : memref<8x128xf32, #tpu.memory_space<vmem>>, vector<8x128xf32>
    tpu.vector_store %arg6[%c0_11, %c0_12], %12 {strides = array<i32>} : memref<8x128xf32, #tpu.memory_space<vmem>>, vector<8x128xf32>,
    return
  }
  func.func @transform_0(%arg0: i32) -> (i32, i32) {
    %c0_i32 = arith.constant 0 : i32
    %c0_i32_0 = arith.constant 0 : i32
    return %arg0, %c0_i32 : i32, i32
  }
  func.func @transform_1(%arg0: i32) -> (i32, i32) {
    %c0_i32 = arith.constant 0 : i32
    %c0_i32_0 = arith.constant 0 : i32
    %c0_i32_1 = arith.constant 0 : i32
    return %c0_i32, %c0_i32_0 : i32, i32
  }
  func.func @transform_2(%arg0: i32) -> (i32, i32) {
    %c0_i32 = arith.constant 0 : i32
    %c0_i32_0 = arith.constant 0 : i32
    %c0_i32_1 = arith.constant 0 : i32
    return %c0_i32, %c0_i32_0 : i32, i32
  }
  func.func @transform_3(%arg0: i32) -> (i32, i32) {
    %c0_i32 = arith.constant 0 : i32
    %c0_i32_0 = arith.constant 0 : i32
    %c0_i32_1 = arith.constant 0 : i32
    return %c0_i32, %c0_i32_0 : i32, i32
  }
  func.func @transform_4(%arg0: i32) -> (i32, i32) {
    %c0_i32 = arith.constant 0 : i32
    %c0_i32_0 = arith.constant 0 : i32
    %c0_i32_1 = arith.constant 0 : i32
    return %c0_i32, %c0_i32_0 : i32, i32
  }
  func.func @transform_5(%arg0: i32) -> (i32, i32) {
    %c0_i32 = arith.constant 0 : i32
    %c0_i32_0 = arith.constant 0 : i32
    return %arg0, %c0_i32 : i32, i32
  }
}

</mosaic_0001>

<bundles_post_ra>
// kernel: cnn1d_forward.2
= control target key start
LH: loop header
LB: loop body
LE: loop exit
PB: predicated region body
PF: predicated region fallthrough
CT: control target
= control target key end

     0   :  { %vm819_vm0 = vcmask 130048   ;;  %vm2771_vm1 = vcmask 516096   ;;  %v7840_v38 = vmov 0.0   ;;  %vm2780_vm2 = vcmask 523264   ;;  %s10263_s1 = inlined_call_operand.vmem [shape: bf16[16,64], index: 1, kind: input, shape index: {}]   ;;  %s10264_s0 = inlined_call_operand.vmem [shape: bf16[8,224,16], index: 0, kind: input, shape index: {}]   ;;  %s10265_s4 = inlined_call_operand.vmem [shape: bf16[3,64,128], index: 4, kind: input, shape index: {}]   ;;  %s10266_s2 = inlined_call_operand.vmem [shape: f32[1,64], index: 2, kind: input, shape index: {}]   ;;  %s10267_s3 = inlined_call_operand.vmem [shape: f32[1,64], index: 3, kind: input, shape index: {}]   ;;  %s10268_s5 = inlined_call_operand.vmem [shape: f32[1,128], index: 5, kind: input, shape index: {}]   ;;  %s10269_s6 = inlined_call_operand.vmem [shape: f32[1,128], index: 6, kind: input, shape index: {}]   ;;  %s10270_s7 = inlined_call_operand.vmem [shape: bf16[8,56,128], index: 7, kind: output, shape index: {}]  }
   0x1   :  { %v7699_v0 = vld [vmem:[%s10263_s1] sm:$0xff]   ;;  %v7701_v2 = vld [vmem:[%s10264_s0 + $0x8] sm:$0xff]   ;;  %v7702_v3 = vld [vmem:[%s10264_s0 + $0x10] sm:$0xff]   ;;  %2772 = vst.msk [vmem:[#allocation2] sm:$0x1] %vm2771_vm1, %v7840_v38 }
   0x2   :  { %v7700_v1 = vld [vmem:[%s10264_s0] sm:$0xff]   ;;  %6864 = vmatprep.subr.bf16.mxu0 %v7699_v0  ;;  %v7703_v4 = vld [vmem:[%s10264_s0 + $0x18] sm:$0xff]   ;;  %v7705_v6 = vld [vmem:[%s10264_s0 + $0x28] sm:$0xff]   ;;  %2773 = vst.msk [vmem:[#allocation2 + $0x80] sm:$0x1] %vm2771_vm1, %v7840_v38 }
   0x3   :  { %6865 = vmatpush3.bf16.msra.mxu0 %v7699_v0  ;;  %6866 = vmatprep.mubr.msk.bf16.mxu0 %vm819_vm0, %v7700_v1  ;;  %v7704_v5 = vld [vmem:[%s10264_s0 + $0x20] sm:$0xff]   ;;  %v7706_v7 = vld [vmem:[%s10264_s0 + $0x30] sm:$0xff]   ;;  %v7707_v8 = vld [vmem:[%s10264_s0 + $0x38] sm:$0xff]   ;;  %2774 = vst.msk [vmem:[#allocation2 + $0x100] sm:$0x1] %vm2771_vm1, %v7840_v38 }
   0x4   :  { %v7708_v9 = vld [vmem:[%s10264_s0 + $0x40] sm:$0xff]   ;;  %v7709_v10 = vld [vmem:[%s10264_s0 + $0x48] sm:$0xff]   ;;  %v7710_v11 = vld [vmem:[%s10264_s0 + $0x50] sm:$0xff]   ;;  %2775 = vst.msk [vmem:[#allocation2 + $0x180] sm:$0x1] %vm2771_vm1, %v7840_v38 }
   0x5   :  { %v7711_v12 = vld [vmem:[%s10264_s0 + $0x58] sm:$0xff]   ;;  %v7712_v13 = vld [vmem:[%s10264_s0 + $0x60] sm:$0xff]   ;;  %v7713_v14 = vld [vmem:[%s10264_s0 + $0x68] sm:$0xff]   ;;  %2776 = vst.msk [vmem:[#allocation2 + $0x200] sm:$0x1] %vm2771_vm1, %v7840_v38 }
   0x6   :  { %6867 = vmatmul.mubr.msk.bf16.vlgmr.msra.gmra.mrb[0].mxu0 %vm819_vm0, %v7701_v2  ;;  %v7714_v15 = vld [vmem:[%s10264_s0 + $0x70] sm:$0xff]   ;;  %v7715_v16 = vld [vmem:[%s10264_s0 + $0x78] sm:$0xff]   ;;  %v7716_v17 = vld [vmem:[%s10264_s0 + $0x80] sm:$0xff]   ;;  %2777 = vst.msk [vmem:[#allocation2 + $0x280] sm:$0x1] %vm2771_vm1, %v7840_v38 }
   0x7   :  { %6870 = vmatprep.mubr.msk.bf16.mxu0 %vm819_vm0, %v7702_v3  ;;  %v7717_v18 = vld [vmem:[%s10264_s0 + $0x88] sm:$0xff]   ;;  %v7718_v19 = vld [vmem:[%s10264_s0 + $0x90] sm:$0xff]   ;;  %v7719_v20 = vld [vmem:[%s10264_s0 + $0x98] sm:$0xff]   ;;  %2778 = vst.msk [vmem:[#allocation2 + $0x300] sm:$0x1] %vm2771_vm1, %v7840_v38 }
   0x8   :  { %v7720_v21 = vld [vmem:[%s10264_s0 + $0xa0] sm:$0xff]   ;;  %v7721_v22 = vld [vmem:[%s10264_s0 + $0xa8] sm:$0xff]   ;;  %v7722_v23 = vld [vmem:[%s10264_s0 + $0xb0] sm:$0xff]   ;;  %2779 = vst.msk [vmem:[#allocation2 + $0x380] sm:$0x1] %vm2771_vm1, %v7840_v38 }
   0x9   :  { %v7723_v24 = vld [vmem:[%s10264_s0 + $0xb8] sm:$0xff]   ;;  %v7724_v25 = vld [vmem:[%s10264_s0 + $0xc0] sm:$0xff]   ;;  %v7725_v26 = vld [vmem:[%s10264_s0 + $0xc8] sm:$0xff]   ;;  %2893 = vst.msk [vmem:[#allocation2 + $0x78] sm:$0x1] %vm2771_vm1, %v7840_v38 }
   0xa   :  { %v7726_v27 = vld [vmem:[%s10264_s0 + $0xd0] sm:$0xff]   ;;  %v7727_v28 = vld [vmem:[%s10264_s0 + $0xd8] sm:$0xff]   ;;  %v7728_v29 = vld [vmem:[%s10264_s0 + $0xe0] sm:$0xff]   ;;  %2894 = vst.msk [vmem:[#allocation2 + $0xf8] sm:$0x1] %vm2771_vm1, %v7840_v38 }
   0xb   :  { %v7729_v30 = vld [vmem:[%s10264_s0 + $0xe8] sm:$0xff]   ;;  %v7730_v31 = vld [vmem:[%s10264_s0 + $0xf0] sm:$0xff]   ;;  %v7731_v32 = vld [vmem:[%s10264_s0 + $0xf8] sm:$0xff]   ;;  %2895 = vst.msk [vmem:[#allocation2 + $0x178] sm:$0x1] %vm2771_vm1, %v7840_v38 }
   0xc   :  { %v7732_v33 = vld [vmem:[%s10264_s0 + $0x100] sm:$0xff]   ;;  %v7733_v34 = vld [vmem:[%s10264_s0 + $0x108] sm:$0xff]   ;;  %v7734_v35 = vld [vmem:[%s10264_s0 + $0x110] sm:$0xff]   ;;  %2896 = vst.msk [vmem:[#allocation2 + $0x1f8] sm:$0x1] %vm2771_vm1, %v7840_v38 }
   0xd   :  { %v7735_v36 = vld [vmem:[%s10264_s0 + $0x118] sm:$0xff]   ;;  %v7736_v37 = vld [vmem:[%s10264_s0 + $0x120] sm:$0xff]   ;;  %2897 = vst.msk [vmem:[#allocation2 + $0x278] sm:$0x1] %vm2771_vm1, %v7840_v38  ;;  %2898 = vst.msk [vmem:[#allocation2 + $0x2f8] sm:$0x1] %vm2771_vm1, %v7840_v38 }
   0xe   :  { %6871 = vmatmul.mubr.msk.bf16.gmra.mrb[4].mxu0 %vm819_vm0, %v7703_v4  ;;  %2899 = vst.msk [vmem:[#allocation2 + $0x378] sm:$0x1] %vm2771_vm1, %v7840_v38  ;;  %2900 = vst.msk [vmem:[#allocation2 + $0x3f8] sm:$0x1] %vm2771_vm1, %v7840_v38  ;;  %v7767_v39 = vld [vmem:[%s10265_s4] sm:$0xff]   ;;  %v7769_v40 = vld [vmem:[%s10265_s4 + $0x8] sm:$0xff]  }
   0xf   :  { %6874 = vmatprep.mubr.msk.bf16.mxu0 %vm819_vm0, %v7704_v5  ;;  %7154 = vmatprep.subr.bf16.mxu1 %v7767_v39  ;;  %v7737_v41 = vld [vmem:[%s10264_s0 + $0x128] sm:$0xff]   ;;  %v7738_v42 = vld [vmem:[%s10264_s0 + $0x130] sm:$0xff]   ;;  %v7773_v44 = vld [vmem:[%s10265_s4 + $0x18] sm:$0xff]  }
  0x10   :  { %7155 = vmatpush3.bf16.msra.mxu1 %v7767_v39  ;;  %v7771_v43 = vld [vmem:[%s10265_s4 + $0x10] sm:$0xff]   ;;  %v7739_v45 = vld [vmem:[%s10264_s0 + $0x138] sm:$0xff]   ;;  %v7740_v46 = vld [vmem:[%s10264_s0 + $0x140] sm:$0xff]  }
  0x11   :  { %7156 = vmatprep.subr.bf16.mxu1 %v7769_v40  ;;  %v7741_v47 = vld [vmem:[%s10264_s0 + $0x148] sm:$0xff]   ;;  %v7742_v48 = vld [vmem:[%s10264_s0 + $0x150] sm:$0xff]   ;;  %v7743_v49 = vld [vmem:[%s10264_s0 + $0x158] sm:$0xff]  }
  0x12   :  { %v7744_v50 = vld [vmem:[%s10264_s0 + $0x160] sm:$0xff]   ;;  %v7745_v51 = vld [vmem:[%s10264_s0 + $0x168] sm:$0xff]   ;;  %v7746_v52 = vld [vmem:[%s10264_s0 + $0x170] sm:$0xff]  }
  0x13   :  { %v7747_v53 = vld [vmem:[%s10264_s0 + $0x178] sm:$0xff]   ;;  %v7748_v54 = vld [vmem:[%s10264_s0 + $0x180] sm:$0xff]   ;;  %v7749_v55 = vld [vmem:[%s10264_s0 + $0x188] sm:$0xff]  }
  0x14   :  { %7157 = vmatpush3.bf16.msra.mxu1 %v7769_v40  ;;  %v7750_v56 = vld [vmem:[%s10264_s0 + $0x190] sm:$0xff]   ;;  %v7751_v57 = vld [vmem:[%s10264_s0 + $0x198] sm:$0xff]   ;;  %v7752_v58 = vld [vmem:[%s10264_s0 + $0x1a0] sm:$0xff]  }
  0x15   :  { %7158 = vmatprep.subr.bf16.mxu1 %v7771_v43  ;;  %v7753_v59 = vld [vmem:[%s10264_s0 + $0x1a8] sm:$0xff]   ;;  %v7754_v60 = vld [vmem:[%s10264_s0 + $0x1b0] sm:$0xff]   ;;  %v7755_v63 = vld [vmem:[%s10264_s0 + $0x1b8] sm:$0xff]  }
  0x16   :  { %6875 = vmatmul.mubr.msk.bf16.gmra.mrb[8].mxu0 %vm819_vm0, %v7705_v6  ;;  %v7756_v1 = vld [vmem:[%s10264_s0 + $0x1c0] sm:$0xff]   ;;  %v7757_v5 = vld [vmem:[%s10264_s0 + $0x1c8] sm:$0xff]  }
  0x17   :  { %6878 = vmatprep.mubr.msk.bf16.mxu0 %vm819_vm0, %v7706_v7  ;;  %v7758_v7 = vld [vmem:[%s10264_s0 + $0x1d0] sm:$0xff]  }
  0x18   :  { %7159 = vmatpush3.bf16.msra.mxu1 %v7771_v43 }
  0x19   :  { %7160 = vmatprep.subr.bf16.mxu1 %v7773_v44 }
  0x1c   :  { %7161 = vmatpush3.bf16.msra.mxu1 %v7773_v44 }
  0x1e   :  { %6879 = vmatmul.mubr.msk.bf16.gmra.mrb[12].mxu0 %vm819_vm0, %v7707_v8 }
  0x1f   :  { %6882 = vmatprep.mubr.msk.bf16.mxu0 %vm819_vm0, %v7708_v9 }
  0x26   :  { %6883 = vmatmul.mubr.msk.bf16.gmra.mrb[16].mxu0 %vm819_vm0, %v7709_v10 }
  0x27   :  { %6886 = vmatprep.mubr.msk.bf16.mxu0 %vm819_vm0, %v7710_v11  ;;  %v7759_v11 = vld [vmem:[%s10264_s0 + $0x1d8] sm:$0xff]  }
  0x2e   :  { %6887 = vmatmul.mubr.msk.bf16.gmra.mrb[20].mxu0 %vm819_vm0, %v7711_v12 }
  0x2f   :  { %6890 = vmatprep.mubr.msk.bf16.mxu0 %vm819_vm0, %v7712_v13  ;;  %v7760_v13 = vld [vmem:[%s10264_s0 + $0x1e0] sm:$0xff]  }
  0x36   :  { %6891 = vmatmul.mubr.msk.bf16.gmra.mrb[24].mxu0 %vm819_vm0, %v7713_v14 }
  0x37   :  { %6894 = vmatprep.mubr.msk.bf16.mxu0 %vm819_vm0, %v7714_v15  ;;  %v8167_v15 = vld [vmem:[%s10266_s2] ss:$0 sm:$0xff] }
  0x3e   :  { %6895 = vmatmul.mubr.msk.bf16.gmra.mrb[28].mxu0 %vm819_vm0, %v7715_v16 }
  0x3f   :  { %6898 = vmatprep.mubr.msk.bf16.mxu0 %vm819_vm0, %v7716_v17  ;;  %v8175_v17 = vld [vmem:[%s10267_s3] ss:$0 sm:$0xff] }
  0x46   :  { %6899 = vmatmul.mubr.msk.bf16.gmra.mrb[32].mxu0 %vm819_vm0, %v7717_v18 }
  0x47   :  { %6902 = vmatprep.mubr.msk.bf16.mxu0 %vm819_vm0, %v7718_v19 }
  0x4e   :  { %6903 = vmatmul.mubr.msk.bf16.gmra.mrb[36].mxu0 %vm819_vm0, %v7719_v20 }
  0x4f   :  { %6906 = vmatprep.mubr.msk.bf16.mxu0 %vm819_vm0, %v7720_v21 }
  0x56   :  { %6907 = vmatmul.mubr.msk.bf16.gmra.mrb[40].mxu0 %vm819_vm0, %v7721_v22  ;;  %v7761_v22 = vld [vmem:[%s10264_s0 + $0x1e8] sm:$0xff]  }
  0x57   :  { %6910 = vmatprep.mubr.msk.bf16.mxu0 %vm819_vm0, %v7722_v23 }
  0x5e   :  { %6911 = vmatmul.mubr.msk.bf16.gmra.mrb[44].mxu0 %vm819_vm0, %v7723_v24  ;;  %v7762_v24 = vld [vmem:[%s10264_s0 + $0x1f0] sm:$0xff]  }
  0x5f   :  { %6914 = vmatprep.mubr.msk.bf16.mxu0 %vm819_vm0, %v7724_v25 }
  0x66   :  { %6915 = vmatmul.mubr.msk.bf16.gmra.mrb[48].mxu0 %vm819_vm0, %v7725_v26 }
  0x67   :  { %6918 = vmatprep.mubr.msk.bf16.mxu0 %vm819_vm0, %v7726_v27 }
  0x6e   :  { %6919 = vmatmul.mubr.msk.bf16.gmra.mrb[52].mxu0 %vm819_vm0, %v7727_v28 }
  0x6f   :  { %6922 = vmatprep.mubr.msk.bf16.mxu0 %vm819_vm0, %v7728_v29 }
  0x76   :  { %6923 = vmatmul.mubr.msk.bf16.gmra.mrb[56].mxu0 %vm819_vm0, %v7729_v30 }
  0x77   :  { %6926 = vmatprep.mubr.msk.bf16.mxu0 %vm819_vm0, %v7730_v31 }
  0x7e   :  { %6927 = vmatmul.mubr.msk.bf16.gmra.mrb[60].mxu0 %vm819_vm0, %v7731_v32 }
  0x7f   :  { %6930 = vmatprep.mubr.msk.bf16.mxu0 %vm819_vm0, %v7732_v33 }
  0x86   :  { %6931 = vmatmul.mubr.msk.bf16.gmra.mrb[64].mxu0 %vm819_vm0, %v7733_v34 }
  0x87   :  { %6934 = vmatprep.mubr.msk.bf16.mxu0 %vm819_vm0, %v7734_v35 }
  0x8e   :  { %6935 = vmatmul.mubr.msk.bf16.gmra.mrb[68].mxu0 %vm819_vm0, %v7735_v36 }
  0x8f   :  { %6938 = vmatprep.mubr.msk.bf16.mxu0 %vm819_vm0, %v7736_v37 }
  0x96   :  { %6939 = vmatmul.mubr.msk.bf16.gmra.mrb[72].mxu0 %vm819_vm0, %v7737_v41  ;;  %v7763_v41 = vld [vmem:[%s10264_s0 + $0x1f8] sm:$0xff]  }
  0x97   :  { %6942 = vmatprep.mubr.msk.bf16.mxu0 %vm819_vm0, %v7738_v42 }
  0x9e   :  { %6943 = vmatmul.mubr.msk.bf16.gmra.mrb[76].mxu0 %vm819_vm0, %v7739_v45  ;;  %v7764_v45 = vld [vmem:[%s10264_s0 + $0x200] sm:$0xff]  }
  0x9f   :  { %6946 = vmatprep.mubr.msk.bf16.mxu0 %vm819_vm0, %v7740_v46 }
  0xa6   :  { %6947 = vmatmul.mubr.msk.bf16.gmra.mrb[80].mxu0 %vm819_vm0, %v7741_v47 }
  0xa7   :  { %6950 = vmatprep.mubr.msk.bf16.mxu0 %vm819_vm0, %v7742_v48 }
  0xae   :  { %6951 = vmatmul.mubr.msk.bf16.gmra.mrb[84].mxu0 %vm819_vm0, %v7743_v49 }
  0xaf   :  { %6954 = vmatprep.mubr.msk.bf16.mxu0 %vm819_vm0, %v7744_v50 }
  0xb6   :  { %6955 = vmatmul.mubr.msk.bf16.gmra.mrb[88].mxu0 %vm819_vm0, %v7745_v51 }
  0xb7   :  { %6958 = vmatprep.mubr.msk.bf16.mxu0 %vm819_vm0, %v7746_v52 }
  0xbe   :  { %6959 = vmatmul.mubr.msk.bf16.gmra.mrb[92].mxu0 %vm819_vm0, %v7747_v53 }
  0xbf   :  { %6962 = vmatprep.mubr.msk.bf16.mxu0 %vm819_vm0, %v7748_v54 }
  0xc6   :  { %6963 = vmatmul.mubr.msk.bf16.gmra.mrb[96].mxu0 %vm819_vm0, %v7749_v55 }
  0xc7   :  { %6966 = vmatprep.mubr.msk.bf16.mxu0 %vm819_vm0, %v7750_v56 }
  0xce   :  { %6967 = vmatmul.mubr.msk.bf16.gmra.mrb[100].mxu0 %vm819_vm0, %v7751_v57 }
  0xcf   :  { %6970 = vmatprep.mubr.msk.bf16.mxu0 %vm819_vm0, %v7752_v58 }
  0xd6   :  { %6971 = vmatmul.mubr.msk.bf16.gmra.mrb[104].mxu0 %vm819_vm0, %v7753_v59 }
  0xd7   :  { %6974 = vmatprep.mubr.msk.bf16.mxu0 %vm819_vm0, %v7754_v60 }
  0xd9   :  { %v6868_v61 = vpop.f32.mrb[0].mxu0 }
  0xda   :  { %v1190_v62 = vpop.f32.mrb[1].mxu0  ;;  %v2094_v35 = vmul.f32 %v6868_v61, %v8167_v15 }
  0xdb   :  { %v6869_v0 = vpop.f32.mrb[2].mxu0  ;;  %v2092_v16 = vmul.f32 %v8167_v15, %v1190_v62 }
  0xdc   :  { %v1193_v2 = vpop.f32.mrb[3].mxu0  ;;  %v2095_v42 = vmul.f32 %v6869_v0, %v8167_v15  ;;  %v2325_v51 = vadd.f32 %v8175_v17, %v2094_v35 }
  0xdd   :  { %v2093_v19 = vmul.f32 %v8167_v15, %v1193_v2  ;;  %v2323_v25 = vadd.f32 %v8175_v17, %v2092_v16 }
  0xde   :  { %6975 = vmatmul.mubr.msk.bf16.gmra.mrb[108].mxu0 %vm819_vm0, %v7755_v63  ;;  %v2326_v57 = vadd.f32 %v8175_v17, %v2095_v42 }
  0xdf   :  { %6978 = vmatprep.mubr.msk.bf16.mxu0 %vm819_vm0, %v7756_v1  ;;  %v2324_v29 = vadd.f32 %v8175_v17, %v2093_v19 }
  0xe1   :  { %v8140_v3 = vpop.f32.mrb[4].mxu0 }
  0xe2   :  { %v1206_v4 = vpop.f32.mrb[5].mxu0  ;;  %v2098_v63 = vmul.f32 %v8140_v3, %v8167_v15 }
  0xe3   :  { %v8145_v6 = vpop.f32.mrb[6].mxu0  ;;  %v2096_v32 = vmul.f32 %v8167_v15, %v1206_v4 }
  0xe4   :  { %v1209_v8 = vpop.f32.mrb[7].mxu0 }
  0xe5   :  { %v2097_v37 = vmul.f32 %v8167_v15, %v1209_v8  ;;  %v2327_v46 = vadd.f32 %v8175_v17, %v2096_v32 }
  0xe6   :  { %6979 = vmatmul.mubr.msk.bf16.gmra.mrb[112].mxu0 %vm819_vm0, %v7757_v5 }
  0xe7   :  { %6982 = vmatprep.mubr.msk.bf16.mxu0 %vm819_vm0, %v7758_v7  ;;  %v2328_v54 = vadd.f32 %v8175_v17, %v2097_v37 }
  0xe9   :  { %v8152_v9 = vpop.f32.mrb[8].mxu0 }
  0xea   :  { %v1222_v10 = vpop.f32.mrb[9].mxu0  ;;  %v2102_v37 = vmul.f32 %v8152_v9, %v8167_v15 }
  0xeb   :  { %v8157_v12 = vpop.f32.mrb[10].mxu0  ;;  %v2100_v60 = vmul.f32 %v8167_v15, %v1222_v10  ;;  %v7765_v10 = vld [vmem:[%s10264_s0 + $0x208] sm:$0xff]  }
  0xec   :  { %v8162_v14 = vpop.f32.mrb[11].mxu0  ;;  %v2103_v9 = vmul.f32 %v8157_v12, %v8167_v15 }
  0xed   :  { %v2101_v4 = vmul.f32 %v8167_v15, %v8162_v14  ;;  %v7766_v14 = vld [vmem:[%s10264_s0 + $0x210] sm:$0xff]  }
  0xee   :  { %6983 = vmatmul.mubr.msk.bf16.gmra.mrb[116].mxu0 %vm819_vm0, %v7759_v11  ;;  %v2099_v11 = vmul.f32 %v8145_v6, %v8167_v15 }
  0xef   :  { %6986 = vmatprep.mubr.msk.bf16.mxu0 %vm819_vm0, %v7760_v13 }
  0xf1   :  { %v6880_v18 = vpop.f32.mrb[12].mxu0 }
  0xf2   :  { %v2106_v20 = vmul.f32 %v6880_v18, %v8167_v15  ;;  %v8179_v21 = vpop.f32.mrb[13].mxu0  ;;  %v2331_v18 = vadd.f32 %v8175_v17, %v2100_v60 }
  0xf3   :  { %v6881_v23 = vpop.f32.mrb[14].mxu0 }
  0xf4   :  { %v2337_v26 = vadd.f32 %v8175_v17, %v2106_v20  ;;  %v2107_v27 = vmul.f32 %v6881_v23, %v8167_v15  ;;  %v8190_v28 = vpop.f32.mrb[15].mxu0  ;;  %v2329_v23 = vadd.f32 %v8175_v17, %v2098_v63 }
  0xf6   :  { %v2547_v30 = vmax.f32 %v2323_v25, %v2337_v26  ;;  %v2338_v31 = vadd.f32 %v8175_v17, %v2107_v27  ;;  %6987 = vmatmul.mubr.msk.bf16.gmra.mrb[120].mxu0 %vm819_vm0, %v7761_v22  ;;  %v2332_v27 = vadd.f32 %v8175_v17, %v2101_v4 }
  0xf7   :  { %6990 = vmatprep.mubr.msk.bf16.mxu0 %vm819_vm0, %v7762_v24 }
  0xf8   :  { %v2659_v33 = vmax.f32 %v2547_v30, 0.0  ;;  %v2548_v34 = vmax.f32 %v2324_v29, %v2338_v31  ;;  %v2330_v31 = vadd.f32 %v8175_v17, %v2099_v11 }
  0xf9   :  { %v6884_v36 = vpop.f32.mrb[16].mxu0 }
  0xfa   :  { %2837 = vst.msk [vmem:[#allocation2 + $0x40] sm:$0xff] %vm2780_vm2, %v2659_v33  ;;  %v2660_v38 = vmax.f32 %v2548_v34, 0.0  ;;  %v2110_v39 = vmul.f32 %v6884_v36, %v8167_v15  ;;  %v1254_v40 = vpop.f32.mrb[17].mxu0  ;;  %v2104_v34 = vmul.f32 %v8167_v15, %v8179_v21  ;;  %v7768_v21 = vld [vmem:[%s10264_s0 + $0x218] sm:$0xff]  }
  0xfb   :  { %v2108_v43 = vmul.f32 %v8167_v15, %v1254_v40  ;;  %v6885_v44 = vpop.f32.mrb[18].mxu0 }
  0xfc   :  { %2838 = vst.msk [vmem:[#allocation2 + $0x48] sm:$0xff] %vm2780_vm2, %v2660_v38  ;;  %v2341_v47 = vadd.f32 %v8175_v17, %v2110_v39  ;;  %v2111_v48 = vmul.f32 %v6885_v44, %v8167_v15  ;;  %v1257_v49 = vpop.f32.mrb[19].mxu0  ;;  %v8213_v50 = vpack.c.bf16 %v2660_v38, %v2659_v33 }
  0xfd   :  { %v2339_v52 = vadd.f32 %v8175_v17, %v2108_v43  ;;  %v2109_v53 = vmul.f32 %v8167_v15, %v1257_v49 }
  0xfe   :  { %v2551_v55 = vmax.f32 %v2327_v46, %v2341_v47  ;;  %v2342_v56 = vadd.f32 %v8175_v17, %v2111_v48  ;;  %6991 = vmatmul.mubr.msk.bf16.gmra.mrb[124].mxu0 %vm819_vm0, %v7763_v41  ;;  %v2105_v41 = vmul.f32 %v8167_v15, %v8190_v28  ;;  %v7770_v47 = vld [vmem:[%s10264_s0 + $0x220] sm:$0xff]   ;;  %v2335_v48 = vadd.f32 %v8175_v17, %v2104_v34 }
  0xff   :  { %v2549_v58 = vmax.f32 %v2325_v51, %v2339_v52  ;;  %v2340_v59 = vadd.f32 %v8175_v17, %v2109_v53  ;;  %6994 = vmatprep.mubr.msk.bf16.mxu0 %vm819_vm0, %v7764_v45  ;;  %v2333_v52 = vadd.f32 %v8175_v17, %v2102_v37  ;;  %v7777_v37 = vld [vmem:[%s10264_s0 + $0x248] sm:$0xff]  }
 0x100   :  { %v2663_v61 = vmax.f32 %v2551_v55, 0.0  ;;  %v2552_v62 = vmax.f32 %v2328_v54, %v2342_v56  ;;  %v2336_v56 = vadd.f32 %v8175_v17, %v2105_v41 }
 0x101   :  { %v2661_v0 = vmax.f32 %v2549_v58, 0.0  ;;  %v2550_v1 = vmax.f32 %v2326_v57, %v2340_v59  ;;  %v6888_v2 = vpop.f32.mrb[20].mxu0  ;;  %v2334_v59 = vadd.f32 %v8175_v17, %v2103_v9 }
 0x102   :  { %2841 = vst.msk [vmem:[#allocation2 + $0x60] sm:$0xff] %vm2780_vm2, %v2663_v61  ;;  %v2664_v5 = vmax.f32 %v2552_v62, 0.0  ;;  %v2114_v7 = vmul.f32 %v6888_v2, %v8167_v15  ;;  %v1270_v8 = vpop.f32.mrb[21].mxu0 }
 0x103   :  { %2839 = vst.msk [vmem:[#allocation2 + $0x50] sm:$0xff] %vm2780_vm2, %v2661_v0  ;;  %v2662_v3 = vmax.f32 %v2550_v1, 0.0  ;;  %v2112_v13 = vmul.f32 %v8167_v15, %v1270_v8  ;;  %v6889_v16 = vpop.f32.mrb[22].mxu0 }
 0x104   :  { %2842 = vst.msk [vmem:[#allocation2 + $0x68] sm:$0xff] %vm2780_vm2, %v2664_v5  ;;  %v2345_v19 = vadd.f32 %v8175_v17, %v2114_v7  ;;  %v2115_v20 = vmul.f32 %v6889_v16, %v8167_v15  ;;  %v1273_v22 = vpop.f32.mrb[23].mxu0  ;;  %v8245_v6 = vpack.c.bf16 %v2664_v5, %v2663_v61  ;;  %v7772_v7 = vld [vmem:[%s10264_s0 + $0x228] sm:$0xff]  }
 0x105   :  { %2840 = vst.msk [vmem:[#allocation2 + $0x58] sm:$0xff] %vm2780_vm2, %v2662_v3  ;;  %v8249_v24 = vpack.c.bf16 %v2662_v3, %v2661_v0  ;;  %v2343_v25 = vadd.f32 %v8175_v17, %v2112_v13  ;;  %v2113_v26 = vmul.f32 %v8167_v15, %v1273_v22  ;;  %v7774_v3 = vld [vmem:[%s10264_s0 + $0x230] sm:$0xff]  }
 0x106   :  { %v2555_v29 = vmax.f32 %v2331_v18, %v2345_v19  ;;  %v2346_v30 = vadd.f32 %v8175_v17, %v2115_v20  ;;  %6995 = vmatmul.mubr.msk.bf16.gmra.mrb[128].mxu0 %vm819_vm0, %v7765_v10 }
 0x107   :  { %v2553_v32 = vmax.f32 %v2329_v23, %v2343_v25  ;;  %v2344_v33 = vadd.f32 %v8175_v17, %v2113_v26  ;;  %6998 = vmatprep.mubr.msk.bf16.mxu0 %vm819_vm0, %v7766_v14  ;;  %v7775_v26 = vld [vmem:[%s10264_s0 + $0x238] sm:$0xff]  }
 0x108   :  { %v2667_v35 = vmax.f32 %v2555_v29, 0.0  ;;  %v2556_v36 = vmax.f32 %v2332_v27, %v2346_v30  ;;  %v7776_v30 = vld [vmem:[%s10264_s0 + $0x240] sm:$0xff]  }
 0x109   :  { %v8263_v38 = vmax.f32 %v2553_v32, 0.0  ;;  %v2554_v39 = vmax.f32 %v2330_v31, %v2344_v33  ;;  %v6892_v40 = vpop.f32.mrb[24].mxu0 }
 0x10a   :  { %2782 = vst.msk [vmem:[#allocation2 + $0x9] sm:$0xff] %vm2780_vm2, %v2667_v35  ;;  %v2668_v42 = vmax.f32 %v2556_v36, 0.0  ;;  %v2118_v43 = vmul.f32 %v6892_v40, %v8167_v15  ;;  %v1286_v44 = vpop.f32.mrb[25].mxu0  ;;  %v7778_v40 = vld [vmem:[%s10264_s0 + $0x250] sm:$0xff]  }
 0x10b   :  { %2843 = vst.msk [vmem:[#allocation2 + $0x70] sm:$0xff] %vm2780_vm2, %v8263_v38  ;;  %v2666_v45 = vmax.f32 %v2554_v39, 0.0  ;;  %v2116_v46 = vmul.f32 %v8167_v15, %v1286_v44  ;;  %v6893_v28 = vpop.f32.mrb[26].mxu0 }
 0x10c   :  { %2783 = vst.msk [vmem:[#allocation2 + $0x11] sm:$0xff] %vm2780_vm2, %v2668_v42  ;;  %v2349_v49 = vadd.f32 %v8175_v17, %v2118_v43  ;;  %v2119_v51 = vmul.f32 %v6893_v28, %v8167_v15  ;;  %v1289_v12 = vpop.f32.mrb[27].mxu0  ;;  %v7780_v28 = vld [vmem:[%s10264_s0 + $0x260] sm:$0xff]  }
 0x10d   :  { %2781 = vst.msk [vmem:[#allocation2 + $0x1] sm:$0xff] %vm2780_vm2, %v2666_v45  ;;  %v2347_v53 = vadd.f32 %v8175_v17, %v2116_v46  ;;  %v2117_v54 = vmul.f32 %v8167_v15, %v1289_v12  ;;  %v8288_v55 = vpack.c.bf16 %v2667_v35, %v2666_v45  ;;  %v7779_v45 = vld [vmem:[%s10264_s0 + $0x258] sm:$0xff]  }
 0x10e   :  { %v2559_v57 = vmax.f32 %v2335_v48, %v2349_v49  ;;  %v2350_v58 = vadd.f32 %v8175_v17, %v2119_v51  ;;  %6999 = vmatmul.mubr.msk.bf16.gmra.mrb[132].mxu0 %vm819_vm0, %v7768_v21 }
 0x10f   :  { %v2557_v60 = vmax.f32 %v2333_v52, %v2347_v53  ;;  %v2348_v61 = vadd.f32 %v8175_v17, %v2117_v54  ;;  %7002 = vmatprep.mubr.msk.bf16.mxu0 %vm819_vm0, %v7770_v47 }
 0x110   :  { %v2671_v62 = vmax.f32 %v2559_v57, 0.0  ;;  %v2560_v63 = vmax.f32 %v2336_v56, %v2350_v58 }
 0x111   :  { %v2669_v0 = vmax.f32 %v2557_v60, 0.0  ;;  %v2558_v1 = vmax.f32 %v2334_v59, %v2348_v61  ;;  %v8296_v2 = vpop.f32.mrb[28].mxu0 }
 0x112   :  { %2786 = vst.msk [vmem:[#allocation2 + $0x29] sm:$0xff] %vm2780_vm2, %v2671_v62  ;;  %v8299_v4 = vmax.f32 %v2560_v63, 0.0  ;;  %v1302_v5 = vpop.f32.mrb[29].mxu0  ;;  %v2122_v58 = vmul.f32 %v8296_v2, %v8167_v15 }
 0x113   :  { %2784 = vst.msk [vmem:[#allocation2 + $0x19] sm:$0xff] %vm2780_vm2, %v2669_v0  ;;  %v8305_v8 = vpack.c.bf16 %v2669_v0, %v2668_v42  ;;  %v2670_v10 = vmax.f32 %v2558_v1, 0.0  ;;  %v8307_v11 = vpop.f32.mrb[30].mxu0  ;;  %v2903_v23 = vld [vmem:[#allocation2 + $0x10] sm:$0xff]  ;;  %v2120_v42 = vmul.f32 %v8167_v15, %v1302_v5  ;;  %v7781_v1 = vld [vmem:[%s10264_s0 + $0x268] sm:$0xff]  }
 0x114   :  { %2787 = vst.msk [vmem:[#allocation2 + $0x31] sm:$0xff] %vm2780_vm2, %v8299_v4  ;;  %v1305_v13 = vpop.f32.mrb[31].mxu0  ;;  %v2901_v16 = vld [vmem:[#allocation2] sm:$0xff]  ;;  %v2902_v14 = vld [vmem:[#allocation2 + $0x8] sm:$0xff]  ;;  %v2123_v5 = vmul.f32 %v8307_v11, %v8167_v15 }
 0x115   :  { %2785 = vst.msk [vmem:[#allocation2 + $0x21] sm:$0xff] %vm2780_vm2, %v2670_v10  ;;  %v8315_v18 = vpack.c.bf16 %v2671_v62, %v2670_v10  ;;  %v3069_v19 = vpack.c.bf16 %v2902_v14, %v2901_v16  ;;  %v2121_v44 = vmul.f32 %v8167_v15, %v1305_v13  ;;  %v2351_v47 = vadd.f32 %v8175_v17, %v2120_v42  ;;  %v7782_v10 = vld [vmem:[%s10264_s0 + $0x270] sm:$0xff]  }
 0x116   :  { %7003 = vmatmul.mubr.msk.bf16.gmra.mrb[136].mxu0 %vm819_vm0, %v7772_v7  ;;  %v2353_v14 = vadd.f32 %v8175_v17, %v2122_v58 }
 0x117   :  { %7162 = vmatprep.mubr.msk.bf16.mxu1 %vm2780_vm2, %v3069_v19  ;;  %7006 = vmatprep.mubr.msk.bf16.mxu0 %vm819_vm0, %v7774_v3  ;;  %v2352_v12 = vadd.f32 %v8175_v17, %v2121_v44  ;;  %v7815_v44 = vld [vmem:[%s10265_s4 + $0x28] sm:$0xff]  }
 0x119   :  { %v8320_v20 = vpop.f32.mrb[32].mxu0 }
 0x11a   :  { %v1318_v22 = vpop.f32.mrb[33].mxu0  ;;  %v2904_v25 = vld [vmem:[#allocation2 + $0x18] sm:$0xff] }
 0x11b   :  { %v8325_v27 = vpop.f32.mrb[34].mxu0  ;;  %v3070_v29 = vpack.c.bf16 %v2904_v25, %v2903_v23  ;;  %v2124_v54 = vmul.f32 %v8167_v15, %v1318_v22  ;;  %v7814_v22 = vld [vmem:[%s10265_s4 + $0x20] sm:$0xff]  }
 0x11c   :  { %v1321_v31 = vpop.f32.mrb[35].mxu0  ;;  %v2905_v32 = vld [vmem:[#allocation2 + $0x20] sm:$0xff]  ;;  %v2906_v33 = vld [vmem:[#allocation2 + $0x28] sm:$0xff]  ;;  %7090 = vmatprep.subr.bf16.mxu0 %v7814_v22 }
 0x11d   :  { %7163 = vmatmul.mubr.msk.bf16.vlgmr.msra.gmra.mrb[0].mxu1 %vm2780_vm2, %v3070_v29  ;;  %v3071_v34 = vpack.c.bf16 %v2906_v33, %v2905_v32  ;;  %v2125_v60 = vmul.f32 %v8167_v15, %v1321_v31  ;;  %v2354_v29 = vadd.f32 %v8175_v17, %v2123_v5  ;;  %7091 = vmatpush3.bf16.msra.mxu0 %v7814_v22 }
 0x11e   :  { %7007 = vmatmul.mubr.msk.bf16.gmra.mrb[140].mxu0 %vm819_vm0, %v7775_v26  ;;  %7092 = vmatprep.subr.bf16.mxu0 %v7815_v44 }
 0x11f   :  { %7166 = vmatprep.mubr.msk.bf16.mxu1 %vm2780_vm2, %v3071_v34  ;;  %7010 = vmatprep.mubr.msk.bf16.mxu0 %vm819_vm0, %v7776_v30  ;;  %v2356_v23 = vadd.f32 %v8175_v17, %v2125_v60  ;;  %v7818_v60 = vld [vmem:[%s10265_s4 + $0x30] sm:$0xff]  }
 0x121   :  { %v8334_v35 = vpop.f32.mrb[36].mxu0  ;;  %7093 = vmatpush3.bf16.msra.mxu0 %v7815_v44 }
 0x122   :  { %v1334_v36 = vpop.f32.mrb[37].mxu0  ;;  %7094 = vmatprep.subr.bf16.mxu0 %v7818_v60 }
 0x123   :  { %v8339_v39 = vpop.f32.mrb[38].mxu0  ;;  %v2128_v32 = vmul.f32 %v8167_v15, %v1334_v36 }
 0x124   :  { %v8344_v41 = vpop.f32.mrb[39].mxu0 }
 0x125   :  { %7095 = vmatpush3.bf16.msra.mxu0 %v7818_v60 }
 0x126   :  { %7011 = vmatmul.mubr.msk.bf16.gmra.mrb[144].mxu0 %vm819_vm0, %v7777_v37  ;;  %v2126_v37 = vmul.f32 %v8320_v20, %v8167_v15  ;;  %v7783_v20 = vld [vmem:[%s10264_s0 + $0x278] sm:$0xff]  }
 0x127   :  { %7014 = vmatprep.mubr.msk.bf16.mxu0 %vm819_vm0, %v7778_v40 }
 0x129   :  { %v6908_v43 = vpop.f32.mrb[40].mxu0 }
 0x12a   :  { %v2134_v21 = vmul.f32 %v6908_v43, %v8167_v15  ;;  %v8351_v9 = vpop.f32.mrb[41].mxu0 }
 0x12b   :  { %v6909_v46 = vpop.f32.mrb[42].mxu0 }
 0x12c   :  { %v2365_v48 = vadd.f32 %v8175_v17, %v2134_v21  ;;  %v2135_v49 = vmul.f32 %v6909_v46, %v8167_v15  ;;  %v8362_v51 = vpop.f32.mrb[43].mxu0  ;;  %v2129_v21 = vmul.f32 %v8167_v15, %v8344_v41 }
 0x12e   :  { %v2561_v52 = vmax.f32 %v2351_v47, %v2365_v48  ;;  %v2366_v53 = vadd.f32 %v8175_v17, %v2135_v49  ;;  %7015 = vmatmul.mubr.msk.bf16.gmra.mrb[148].mxu0 %vm819_vm0, %v7779_v45 }
 0x12f   :  { %7018 = vmatprep.mubr.msk.bf16.mxu0 %vm819_vm0, %v7780_v28  ;;  %v2127_v28 = vmul.f32 %v8325_v27, %v8167_v15 }
 0x130   :  { %v2673_v56 = vmax.f32 %v2561_v52, 0.0  ;;  %v2562_v57 = vmax.f32 %v2352_v12, %v2366_v53  ;;  %v7784_v12 = vld [vmem:[%s10264_s0 + $0x280] sm:$0xff]   ;;  %v2359_v52 = vadd.f32 %v8175_v17, %v2128_v32 }
 0x131   :  { %v6912_v59 = vpop.f32.mrb[44].mxu0 }
 0x132   :  { %2844 = vst.msk [vmem:[#allocation2 + $0xc0] sm:$0xff] %vm2780_vm2, %v2673_v56  ;;  %v8374_v61 = vpack.c.bf16 %v2673_v56, %v8263_v38  ;;  %v2674_v62 = vmax.f32 %v2562_v57, 0.0  ;;  %v2138_v63 = vmul.f32 %v6912_v59, %v8167_v15  ;;  %v1366_v0 = vpop.f32.mrb[45].mxu0  ;;  %v2355_v38 = vadd.f32 %v8175_v17, %v2124_v54 }
 0x133   :  { %v2136_v2 = vmul.f32 %v8167_v15, %v1366_v0  ;;  %v6913_v7 = vpop.f32.mrb[46].mxu0  ;;  %v2357_v56 = vadd.f32 %v8175_v17, %v2126_v37 }
 0x134   :  { %2845 = vst.msk [vmem:[#allocation2 + $0xc8] sm:$0xff] %vm2780_vm2, %v2674_v62  ;;  %v2369_v3 = vadd.f32 %v8175_v17, %v2138_v63  ;;  %v2139_v13 = vmul.f32 %v6913_v7, %v8167_v15  ;;  %v1369_v16 = vpop.f32.mrb[47].mxu0  ;;  %v2132_v7 = vmul.f32 %v8167_v15, %v8351_v9 }
 0x135   :  { %v2367_v11 = vadd.f32 %v8175_v17, %v2136_v2  ;;  %v2137_v19 = vmul.f32 %v8167_v15, %v1369_v16 }
 0x136   :  { %v2565_v25 = vmax.f32 %v2355_v38, %v2369_v3  ;;  %v2370_v26 = vadd.f32 %v8175_v17, %v2139_v13  ;;  %7019 = vmatmul.mubr.msk.bf16.gmra.mrb[152].mxu0 %vm819_vm0, %v7781_v1  ;;  %v2358_v1 = vadd.f32 %v8175_v17, %v2127_v28  ;;  %v2130_v3 = vmul.f32 %v8334_v35, %v8167_v15  ;;  %v7785_v35 = vld [vmem:[%s10264_s0 + $0x288] sm:$0xff]  }
 0x137   :  { %v2563_v30 = vmax.f32 %v2353_v14, %v2367_v11  ;;  %v2368_v31 = vadd.f32 %v8175_v17, %v2137_v19  ;;  %7022 = vmatprep.mubr.msk.bf16.mxu0 %vm819_vm0, %v7782_v10  ;;  %v7819_v11 = vld [vmem:[%s10265_s4 + $0x38] sm:$0xff]   ;;  %v2133_v19 = vmul.f32 %v8167_v15, %v8362_v51  ;;  %v2363_v32 = vadd.f32 %v8175_v17, %v2132_v7 }
 0x138   :  { %v2677_v33 = vmax.f32 %v2565_v25, 0.0  ;;  %v2566_v34 = vmax.f32 %v2356_v23, %v2370_v26  ;;  %v2131_v25 = vmul.f32 %v8339_v39, %v8167_v15  ;;  %7096 = vmatprep.subr.bf16.mxu0 %v7819_v11 }
 0x139   :  { %v2675_v40 = vmax.f32 %v2563_v30, 0.0  ;;  %v2564_v42 = vmax.f32 %v2354_v29, %v2368_v31  ;;  %v6916_v43 = vpop.f32.mrb[48].mxu0  ;;  %v7786_v31 = vld [vmem:[%s10264_s0 + $0x290] sm:$0xff]   ;;  %7097 = vmatpush3.bf16.msra.mxu0 %v7819_v11 }
 0x13a   :  { %2848 = vst.msk [vmem:[#allocation2 + $0xe0] sm:$0xff] %vm2780_vm2, %v2677_v33  ;;  %v2678_v45 = vmax.f32 %v2566_v34, 0.0  ;;  %v2142_v36 = vmul.f32 %v6916_v43, %v8167_v15  ;;  %v1382_v46 = vpop.f32.mrb[49].mxu0 }
 0x13b   :  { %2846 = vst.msk [vmem:[#allocation2 + $0xd0] sm:$0xff] %vm2780_vm2, %v2675_v40  ;;  %v8418_v47 = vpack.c.bf16 %v2675_v40, %v2674_v62  ;;  %v2676_v48 = vmax.f32 %v2564_v42, 0.0  ;;  %v2140_v41 = vmul.f32 %v8167_v15, %v1382_v46  ;;  %v6917_v49 = vpop.f32.mrb[50].mxu0  ;;  %v2360_v62 = vadd.f32 %v8175_v17, %v2129_v21 }
 0x13c   :  { %2849 = vst.msk [vmem:[#allocation2 + $0xe8] sm:$0xff] %vm2780_vm2, %v2678_v45  ;;  %v2373_v53 = vadd.f32 %v8175_v17, %v2142_v36  ;;  %v2143_v27 = vmul.f32 %v6917_v49, %v8167_v15  ;;  %v1385_v54 = vpop.f32.mrb[51].mxu0  ;;  %v2361_v40 = vadd.f32 %v8175_v17, %v2130_v3  ;;  %v2364_v21 = vadd.f32 %v8175_v17, %v2133_v19  ;;  %v7789_v3 = vld [vmem:[%s10264_s0 + $0x2a8] sm:$0xff]  }
 0x13d   :  { %2847 = vst.msk [vmem:[#allocation2 + $0xd8] sm:$0xff] %vm2780_vm2, %v2676_v48  ;;  %v8430_v57 = vpack.c.bf16 %v2677_v33, %v2676_v48  ;;  %v2371_v58 = vadd.f32 %v8175_v17, %v2140_v41  ;;  %v2141_v59 = vmul.f32 %v8167_v15, %v1385_v54  ;;  %v2362_v46 = vadd.f32 %v8175_v17, %v2131_v25 }
 0x13e   :  { %v2569_v63 = vmax.f32 %v2359_v52, %v2373_v53  ;;  %v2374_v0 = vadd.f32 %v8175_v17, %v2143_v27  ;;  %7023 = vmatmul.mubr.msk.bf16.gmra.mrb[156].mxu0 %vm819_vm0, %v7783_v20  ;;  %v7787_v27 = vld [vmem:[%s10264_s0 + $0x298] sm:$0xff]  }
 0x13f   :  { %10294 = vst [vmem:[#allocation3_spill] sm:$0xff] %v8430_v57  ;;  %v2567_v5 = vmax.f32 %v2357_v56, %v2371_v58  ;;  %v2372_v2 = vadd.f32 %v8175_v17, %v2141_v59  ;;  %7026 = vmatprep.mubr.msk.bf16.mxu0 %vm819_vm0, %v7784_v12  ;;  %v7788_v59 = vld [vmem:[%s10264_s0 + $0x2a0] sm:$0xff]  }
 0x140   :  { %v2681_v10 = vmax.f32 %v2569_v63, 0.0  ;;  %v2570_v38 = vmax.f32 %v2360_v62, %v2374_v0  ;;  %v2907_v63 = vld [vmem:[#allocation2 + $0x30] sm:$0xff] }
 0x141   :  { %v2679_v13 = vmax.f32 %v2567_v5, 0.0  ;;  %v2568_v16 = vmax.f32 %v2358_v1, %v2372_v2  ;;  %v6920_v14 = vpop.f32.mrb[52].mxu0 }
 0x142   :  { %2789 = vst.msk [vmem:[#allocation2 + $0x89] sm:$0xff] %vm2780_vm2, %v2681_v10  ;;  %v2682_v22 = vmax.f32 %v2570_v38, 0.0  ;;  %v2146_v9 = vmul.f32 %v6920_v14, %v8167_v15  ;;  %v1398_v23 = vpop.f32.mrb[53].mxu0  ;;  %v7790_v14 = vld [vmem:[%s10264_s0 + $0x2b0] sm:$0xff]  }
 0x143   :  { %2850 = vst.msk [vmem:[#allocation2 + $0xf0] sm:$0xff] %vm2780_vm2, %v2679_v13  ;;  %v8460_v26 = vpack.c.bf16 %v2679_v13, %v2678_v45  ;;  %v2680_v29 = vmax.f32 %v2568_v16, 0.0  ;;  %v2144_v51 = vmul.f32 %v8167_v15, %v1398_v23  ;;  %v6921_v30 = vpop.f32.mrb[54].mxu0 }
 0x144   :  { %2790 = vst.msk [vmem:[#allocation2 + $0x91] sm:$0xff] %vm2780_vm2, %v2682_v22  ;;  %v8468_v33 = vpack.c.bf16 %v2682_v22, %v2681_v10  ;;  %v2377_v39 = vadd.f32 %v8175_v17, %v2146_v9  ;;  %v2147_v34 = vmul.f32 %v6921_v30, %v8167_v15  ;;  %v1401_v37 = vpop.f32.mrb[55].mxu0 }
 0x145   :  { %10295 = vst [vmem:[#allocation4_spill] sm:$0xff] %v8460_v26  ;;  %2788 = vst.msk [vmem:[#allocation2 + $0x81] sm:$0xff] %vm2780_vm2, %v2680_v29  ;;  %v8475_v42 = vpack.c.bf16 %v2680_v29, %v8299_v4  ;;  %v2375_v43 = vadd.f32 %v8175_v17, %v2144_v51  ;;  %v2145_v44 = vmul.f32 %v8167_v15, %v1401_v37  ;;  %v7791_v51 = vld [vmem:[%s10264_s0 + $0x2b8] sm:$0xff]  }
 0x146   :  { %v2573_v45 = vmax.f32 %v2363_v32, %v2377_v39  ;;  %v2378_v36 = vadd.f32 %v8175_v17, %v2147_v34  ;;  %7027 = vmatmul.mubr.msk.bf16.gmra.mrb[160].mxu0 %vm819_vm0, %v7785_v35 }
 0x147   :  { %v2571_v20 = vmax.f32 %v2361_v40, %v2375_v43  ;;  %v2376_v28 = vadd.f32 %v8175_v17, %v2145_v44  ;;  %7030 = vmatprep.mubr.msk.bf16.mxu0 %vm819_vm0, %v7786_v31  ;;  %v7792_v31 = vld [vmem:[%s10264_s0 + $0x2c0] sm:$0xff]   ;;  %v7793_v44 = vld [vmem:[%s10264_s0 + $0x2c8] sm:$0xff]  }
 0x148   :  { %v2685_v4 = vmax.f32 %v2573_v45, 0.0  ;;  %v2574_v48 = vmax.f32 %v2364_v21, %v2378_v36  ;;  %v7794_v45 = vld [vmem:[%s10264_s0 + $0x2d0] sm:$0xff]  }
 0x149   :  { %v2683_v41 = vmax.f32 %v2571_v20, 0.0  ;;  %v2572_v49 = vmax.f32 %v2362_v46, %v2376_v28  ;;  %v8485_v12 = vpop.f32.mrb[56].mxu0 }
 0x14a   :  { %2793 = vst.msk [vmem:[#allocation2 + $0xa9] sm:$0xff] %vm2780_vm2, %v2685_v4  ;;  %v2686_v52 = vmax.f32 %v2574_v48, 0.0  ;;  %v1414_v53 = vpop.f32.mrb[57].mxu0 }
 0x14b   :  { %2791 = vst.msk [vmem:[#allocation2 + $0x99] sm:$0xff] %vm2780_vm2, %v2683_v41  ;;  %v2684_v54 = vmax.f32 %v2572_v49, 0.0  ;;  %v8492_v56 = vpop.f32.mrb[58].mxu0  ;;  %v2910_v58 = vld [vmem:[#allocation2 + $0x90] sm:$0xff]  ;;  %v2148_v39 = vmul.f32 %v8167_v15, %v1414_v53 }
 0x14c   :  { %2794 = vst.msk [vmem:[#allocation2 + $0xb1] sm:$0xff] %vm2780_vm2, %v2686_v52  ;;  %v8498_v60 = vpack.c.bf16 %v2686_v52, %v2685_v4  ;;  %v1417_v62 = vpop.f32.mrb[59].mxu0  ;;  %v2908_v0 = vld [vmem:[#allocation2 + $0x80] sm:$0xff]  ;;  %v2909_v1 = vld [vmem:[#allocation2 + $0x88] sm:$0xff] }
 0x14d   :  { %2792 = vst.msk [vmem:[#allocation2 + $0xa1] sm:$0xff] %vm2780_vm2, %v2684_v54  ;;  %v8501_v5 = vpack.c.bf16 %v2684_v54, %v2683_v41  ;;  %v3072_v2 = vpack.c.bf16 %v2908_v0, %v2907_v63  ;;  %v3073_v7 = vpack.c.bf16 %v2910_v58, %v2909_v1  ;;  %v2149_v37 = vmul.f32 %v8167_v15, %v1417_v62  ;;  %v7795_v0 = vld [vmem:[%s10264_s0 + $0x2d8] sm:$0xff]  }
 0x14e   :  { %7031 = vmatmul.mubr.msk.bf16.gmra.mrb[164].mxu0 %vm819_vm0, %v7787_v27  ;;  %v2379_v36 = vadd.f32 %v8175_v17, %v2148_v39  ;;  %v2150_v27 = vmul.f32 %v8485_v12, %v8167_v15  ;;  %v2151_v1 = vmul.f32 %v8492_v56, %v8167_v15  ;;  %v7796_v12 = vld [vmem:[%s10264_s0 + $0x2e0] sm:$0xff]  }
 0x14f   :  { %7167 = vmatmul.mubr.msk.bf16.gmra.mrb[4].mxu1 %vm2780_vm2, %v3072_v2  ;;  %7034 = vmatprep.mubr.msk.bf16.mxu0 %vm819_vm0, %v7788_v59  ;;  %v2380_v4 = vadd.f32 %v8175_v17, %v2149_v37 }
 0x150   :  { %7170 = vmatprep.mubr.msk.bf16.mxu1 %vm2780_vm2, %v3073_v7  ;;  %v2381_v56 = vadd.f32 %v8175_v17, %v2150_v27 }
 0x151   :  { %v8507_v10 = vpop.f32.mrb[60].mxu0 }
 0x152   :  { %v1430_v38 = vpop.f32.mrb[61].mxu0  ;;  %v2911_v19 = vld [vmem:[#allocation2 + $0x98] sm:$0xff] }
 0x153   :  { %v8512_v13 = vpop.f32.mrb[62].mxu0  ;;  %v2914_v16 = vld [vmem:[#allocation2 + $0xb0] sm:$0xff]  ;;  %v2152_v49 = vmul.f32 %v8167_v15, %v1430_v38 }
 0x154   :  { %v1433_v11 = vpop.f32.mrb[63].mxu0  ;;  %v2912_v22 = vld [vmem:[#allocation2 + $0xa0] sm:$0xff]  ;;  %v2913_v9 = vld [vmem:[#allocation2 + $0xa8] sm:$0xff] }
 0x155   :  { %v3074_v23 = vpack.c.bf16 %v2912_v22, %v2911_v19  ;;  %v3075_v35 = vpack.c.bf16 %v2914_v16, %v2913_v9  ;;  %v2153_v58 = vmul.f32 %v8167_v15, %v1433_v11  ;;  %v2383_v38 = vadd.f32 %v8175_v17, %v2152_v49 }
 0x156   :  { %7035 = vmatmul.mubr.msk.bf16.gmra.mrb[168].mxu0 %vm819_vm0, %v7789_v3 }
 0x157   :  { %7171 = vmatmul.mubr.msk.bf16.gmra.mrb[8].mxu1 %vm2780_vm2, %v3074_v23  ;;  %7038 = vmatprep.mubr.msk.bf16.mxu0 %vm819_vm0, %v7790_v14  ;;  %v2384_v9 = vadd.f32 %v8175_v17, %v2153_v58 }
 0x158   :  { %7174 = vmatprep.mubr.msk.bf16.mxu1 %vm2780_vm2, %v3075_v35 }
 0x159   :  { %v8521_v25 = vpop.f32.mrb[64].mxu0 }
 0x15a   :  { %v1446_v29 = vpop.f32.mrb[65].mxu0 }
 0x15b   :  { %v8526_v30 = vpop.f32.mrb[66].mxu0 }
 0x15c   :  { %v1449_v32 = vpop.f32.mrb[67].mxu0 }
 0x15e   :  { %7039 = vmatmul.mubr.msk.bf16.gmra.mrb[172].mxu0 %vm819_vm0, %v7791_v51  ;;  %v2382_v51 = vadd.f32 %v8175_v17, %v2151_v1 }
 0x15f   :  { %7042 = vmatprep.mubr.msk.bf16.mxu0 %vm819_vm0, %v7792_v31 }
 0x161   :  { %v6936_v34 = vpop.f32.mrb[68].mxu0 }
 0x162   :  { %v2162_v40 = vmul.f32 %v6936_v34, %v8167_v15  ;;  %v8536_v43 = vpop.f32.mrb[69].mxu0  ;;  %v2156_v34 = vmul.f32 %v8167_v15, %v1446_v29  ;;  %v7797_v29 = vld [vmem:[%s10264_s0 + $0x2e8] sm:$0xff]  }
 0x163   :  { %v6937_v21 = vpop.f32.mrb[70].mxu0 }
 0x164   :  { %v2393_v46 = vadd.f32 %v8175_v17, %v2162_v40  ;;  %v2163_v20 = vmul.f32 %v6937_v21, %v8167_v15  ;;  %v8547_v28 = vpop.f32.mrb[71].mxu0 }
 0x166   :  { %v2575_v48 = vmax.f32 %v2379_v36, %v2393_v46  ;;  %v2394_v41 = vadd.f32 %v8175_v17, %v2163_v20  ;;  %7043 = vmatmul.mubr.msk.bf16.gmra.mrb[176].mxu0 %vm819_vm0, %v7793_v44  ;;  %v2154_v44 = vmul.f32 %v8507_v10, %v8167_v15  ;;  %v2157_v46 = vmul.f32 %v8167_v15, %v1449_v32  ;;  %v7798_v32 = vld [vmem:[%s10264_s0 + $0x2f0] sm:$0xff]  }
 0x167   :  { %7046 = vmatprep.mubr.msk.bf16.mxu0 %vm819_vm0, %v7794_v45 }
 0x168   :  { %v2687_v52 = vmax.f32 %v2575_v48, 0.0  ;;  %v2576_v53 = vmax.f32 %v2380_v4, %v2394_v41  ;;  %v2155_v41 = vmul.f32 %v8512_v13, %v8167_v15  ;;  %v2388_v1 = vadd.f32 %v8175_v17, %v2157_v46 }
 0x169   :  { %v6940_v54 = vpop.f32.mrb[72].mxu0 }
 0x16a   :  { %2851 = vst.msk [vmem:[#allocation2 + $0x140] sm:$0xff] %vm2780_vm2, %v2687_v52  ;;  %v2688_v59 = vmax.f32 %v2576_v53, 0.0  ;;  %v2166_v62 = vmul.f32 %v6940_v54, %v8167_v15  ;;  %v1478_v63 = vpop.f32.mrb[73].mxu0  ;;  %v2387_v53 = vadd.f32 %v8175_v17, %v2156_v34 }
 0x16b   :  { %v2164_v2 = vmul.f32 %v8167_v15, %v1478_v63  ;;  %v6941_v7 = vpop.f32.mrb[74].mxu0 }
 0x16c   :  { %2852 = vst.msk [vmem:[#allocation2 + $0x148] sm:$0xff] %vm2780_vm2, %v2688_v59  ;;  %v8570_v3 = vpack.c.bf16 %v2688_v59, %v2687_v52  ;;  %v2397_v16 = vadd.f32 %v8175_v17, %v2166_v62  ;;  %v2167_v14 = vmul.f32 %v6941_v7, %v8167_v15  ;;  %v1481_v11 = vpop.f32.mrb[75].mxu0  ;;  %v2385_v59 = vadd.f32 %v8175_v17, %v2154_v44 }
 0x16d   :  { %v2395_v19 = vadd.f32 %v8175_v17, %v2164_v2  ;;  %v2165_v22 = vmul.f32 %v8167_v15, %v1481_v11 }
 0x16e   :  { %10296 = vst [vmem:[#allocation5_spill] sm:$0xff] %v8570_v3  ;;  %v2579_v23 = vmax.f32 %v2383_v38, %v2397_v16  ;;  %v2398_v35 = vadd.f32 %v8175_v17, %v2167_v14  ;;  %7047 = vmatmul.mubr.msk.bf16.gmra.mrb[180].mxu0 %vm819_vm0, %v7795_v0  ;;  %v2160_v14 = vmul.f32 %v8167_v15, %v8536_v43  ;;  %v7799_v43 = vld [vmem:[%s10264_s0 + $0x2f8] sm:$0xff]  }
 0x16f   :  { %v2577_v31 = vmax.f32 %v2381_v56, %v2395_v19  ;;  %v2396_v39 = vadd.f32 %v8175_v17, %v2165_v22  ;;  %7050 = vmatprep.mubr.msk.bf16.mxu0 %vm819_vm0, %v7796_v12  ;;  %v2386_v12 = vadd.f32 %v8175_v17, %v2155_v41  ;;  %v2158_v19 = vmul.f32 %v8521_v25, %v8167_v15 }
 0x170   :  { %v2691_v37 = vmax.f32 %v2579_v23, 0.0  ;;  %v2580_v40 = vmax.f32 %v2384_v9, %v2398_v35  ;;  %v2161_v35 = vmul.f32 %v8167_v15, %v8547_v28  ;;  %v2159_v25 = vmul.f32 %v8526_v30, %v8167_v15 }
 0x171   :  { %v2689_v21 = vmax.f32 %v2577_v31, 0.0  ;;  %v2578_v45 = vmax.f32 %v2382_v51, %v2396_v39  ;;  %v6944_v36 = vpop.f32.mrb[76].mxu0  ;;  %v2391_v44 = vadd.f32 %v8175_v17, %v2160_v14 }
 0x172   :  { %2855 = vst.msk [vmem:[#allocation2 + $0x160] sm:$0xff] %vm2780_vm2, %v2691_v37  ;;  %v2692_v20 = vmax.f32 %v2580_v40, 0.0  ;;  %v2170_v4 = vmul.f32 %v6944_v36, %v8167_v15  ;;  %v1494_v48 = vpop.f32.mrb[77].mxu0  ;;  %v7800_v40 = vld [vmem:[%s10264_s0 + $0x300] sm:$0xff]   ;;  %v2389_v36 = vadd.f32 %v8175_v17, %v2158_v19 }
 0x173   :  { %2853 = vst.msk [vmem:[#allocation2 + $0x150] sm:$0xff] %vm2780_vm2, %v2689_v21  ;;  %v2690_v10 = vmax.f32 %v2578_v45, 0.0  ;;  %v2168_v49 = vmul.f32 %v8167_v15, %v1494_v48  ;;  %v6945_v52 = vpop.f32.mrb[78].mxu0  ;;  %v2392_v48 = vadd.f32 %v8175_v17, %v2161_v35 }
 0x174   :  { %2856 = vst.msk [vmem:[#allocation2 + $0x168] sm:$0xff] %vm2780_vm2, %v2692_v20  ;;  %v8601_v27 = vpack.c.bf16 %v2692_v20, %v2691_v37  ;;  %v2401_v54 = vadd.f32 %v8175_v17, %v2170_v4  ;;  %v2171_v13 = vmul.f32 %v6945_v52, %v8167_v15  ;;  %v1497_v58 = vpop.f32.mrb[79].mxu0 }
 0x175   :  { %2854 = vst.msk [vmem:[#allocation2 + $0x158] sm:$0xff] %vm2780_vm2, %v2690_v10  ;;  %v8607_v62 = vpack.c.bf16 %v2690_v10, %v2689_v21  ;;  %v2399_v63 = vadd.f32 %v8175_v17, %v2168_v49  ;;  %v2169_v0 = vmul.f32 %v8167_v15, %v1497_v58  ;;  %v2390_v10 = vadd.f32 %v8175_v17, %v2159_v25 }
 0x176   :  { %10297 = vst [vmem:[#allocation6_spill] sm:$0xff] %v8601_v27  ;;  %v2583_v2 = vmax.f32 %v2387_v53, %v2401_v54  ;;  %v2402_v7 = vadd.f32 %v8175_v17, %v2171_v13  ;;  %7051 = vmatmul.mubr.msk.bf16.gmra.mrb[184].mxu0 %vm819_vm0, %v7797_v29 }
 0x177   :  { %10298 = vst [vmem:[#allocation7_spill] sm:$0xff] %v8607_v62  ;;  %v2581_v38 = vmax.f32 %v2385_v59, %v2399_v63  ;;  %v2400_v16 = vadd.f32 %v8175_v17, %v2169_v0  ;;  %7054 = vmatprep.mubr.msk.bf16.mxu0 %vm819_vm0, %v7798_v32  ;;  %v7801_v63 = vld [vmem:[%s10264_s0 + $0x308] sm:$0xff]  }
 0x178   :  { %v2695_v11 = vmax.f32 %v2583_v2, 0.0  ;;  %v2584_v56 = vmax.f32 %v2388_v1, %v2402_v7  ;;  %v7802_v2 = vld [vmem:[%s10264_s0 + $0x310] sm:$0xff]  }
 0x179   :  { %v8621_v22 = vmax.f32 %v2581_v38, 0.0  ;;  %v2582_v9 = vmax.f32 %v2386_v12, %v2400_v16  ;;  %v6948_v23 = vpop.f32.mrb[80].mxu0 }
 0x17a   :  { %2796 = vst.msk [vmem:[#allocation2 + $0x109] sm:$0xff] %vm2780_vm2, %v2695_v11  ;;  %v2696_v51 = vmax.f32 %v2584_v56, 0.0  ;;  %v2174_v31 = vmul.f32 %v6948_v23, %v8167_v15  ;;  %v1510_v39 = vpop.f32.mrb[81].mxu0  ;;  %v7803_v23 = vld [vmem:[%s10264_s0 + $0x318] sm:$0xff]  }
 0x17b   :  { %2857 = vst.msk [vmem:[#allocation2 + $0x170] sm:$0xff] %vm2780_vm2, %v8621_v22  ;;  %v2694_v34 = vmax.f32 %v2582_v9, 0.0  ;;  %v2172_v37 = vmul.f32 %v8167_v15, %v1510_v39  ;;  %v6949_v28 = vpop.f32.mrb[82].mxu0 }
 0x17c   :  { %2797 = vst.msk [vmem:[#allocation2 + $0x111] sm:$0xff] %vm2780_vm2, %v2696_v51  ;;  %v2405_v21 = vadd.f32 %v8175_v17, %v2174_v31  ;;  %v2175_v45 = vmul.f32 %v6949_v28, %v8167_v15  ;;  %v1513_v30 = vpop.f32.mrb[83].mxu0  ;;  %v7804_v31 = vld [vmem:[%s10264_s0 + $0x320] sm:$0xff]  }
 0x17d   :  { %2795 = vst.msk [vmem:[#allocation2 + $0x101] sm:$0xff] %vm2780_vm2, %v2694_v34  ;;  %v8644_v46 = vpack.c.bf16 %v2695_v11, %v2694_v34  ;;  %v2403_v20 = vadd.f32 %v8175_v17, %v2172_v37  ;;  %v2173_v4 = vmul.f32 %v8167_v15, %v1513_v30  ;;  %v8707_v30 = vld [vmem:[%s10266_s2] ss:$0 sm:$0xff] }
 0x17e   :  { %v2587_v29 = vmax.f32 %v2391_v44, %v2405_v21  ;;  %v2406_v41 = vadd.f32 %v8175_v17, %v2175_v45  ;;  %7055 = vmatmul.mubr.msk.bf16.gmra.mrb[188].mxu0 %vm819_vm0, %v7799_v43  ;;  %v7806_v21 = vld [vmem:[%s10264_s0 + $0x330] sm:$0xff]  }
 0x17f   :  { %v2585_v49 = vmax.f32 %v2389_v36, %v2403_v20  ;;  %v2404_v52 = vadd.f32 %v8175_v17, %v2173_v4  ;;  %7058 = vmatprep.mubr.msk.bf16.mxu0 %vm819_vm0, %v7800_v40  ;;  %v7805_v40 = vld [vmem:[%s10264_s0 + $0x328] sm:$0xff]  }
 0x180   :  { %v2699_v32 = vmax.f32 %v2587_v29, 0.0  ;;  %v2588_v53 = vmax.f32 %v2392_v48, %v2406_v41  ;;  %v7807_v41 = vld [vmem:[%s10264_s0 + $0x338] sm:$0xff]  }
 0x181   :  { %v2697_v54 = vmax.f32 %v2585_v49, 0.0  ;;  %v2586_v13 = vmax.f32 %v2390_v10, %v2404_v52  ;;  %v8654_v58 = vpop.f32.mrb[84].mxu0  ;;  %v7808_v49 = vld [vmem:[%s10264_s0 + $0x340] sm:$0xff]  }
 0x182   :  { %2800 = vst.msk [vmem:[#allocation2 + $0x129] sm:$0xff] %vm2780_vm2, %v2699_v32  ;;  %v8657_v15 = vmax.f32 %v2588_v53, 0.0  ;;  %v1526_v59 = vpop.f32.mrb[85].mxu0  ;;  %v8723_v52 = vld [vmem:[%s10267_s3] ss:$0 sm:$0xff] }
 0x183   :  { %2798 = vst.msk [vmem:[#allocation2 + $0x119] sm:$0xff] %vm2780_vm2, %v2697_v54  ;;  %v8663_v17 = vpack.c.bf16 %v2697_v54, %v2696_v51  ;;  %v2698_v0 = vmax.f32 %v2586_v13, 0.0  ;;  %v8665_v1 = vpop.f32.mrb[86].mxu0  ;;  %v2917_v19 = vld [vmem:[#allocation2 + $0x110] sm:$0xff]  ;;  %v2176_v36 = vmul.f32 %v8707_v30, %v1526_v59 }
 0x184   :  { %2801 = vst.msk [vmem:[#allocation2 + $0x131] sm:$0xff] %vm2780_vm2, %v8657_v15  ;;  %v1529_v7 = vpop.f32.mrb[87].mxu0  ;;  %v2915_v12 = vld [vmem:[#allocation2 + $0x100] sm:$0xff]  ;;  %v2916_v38 = vld [vmem:[#allocation2 + $0x108] sm:$0xff] }
 0x185   :  { %2799 = vst.msk [vmem:[#allocation2 + $0x121] sm:$0xff] %vm2780_vm2, %v2698_v0  ;;  %v8673_v16 = vpack.c.bf16 %v2699_v32, %v2698_v0  ;;  %v3076_v14 = vpack.c.bf16 %v2916_v38, %v2915_v12  ;;  %v2177_v4 = vmul.f32 %v8707_v30, %v1529_v7  ;;  %v2407_v32 = vadd.f32 %v8723_v52, %v2176_v36 }
 0x186   :  { %7059 = vmatmul.mubr.msk.bf16.gmra.mrb[192].mxu0 %vm819_vm0, %v7801_v63  ;;  %v2178_v38 = vmul.f32 %v8707_v30, %v8654_v58 }
 0x187   :  { %7175 = vmatmul.mubr.msk.bf16.gmra.mrb[12].mxu1 %vm2780_vm2, %v3076_v14  ;;  %7062 = vmatprep.mubr.msk.bf16.mxu0 %vm819_vm0, %v7802_v2  ;;  %v2408_v59 = vadd.f32 %v8723_v52, %v2177_v4 }
 0x188   :  { %v2409_v36 = vadd.f32 %v8723_v52, %v2178_v38 }
 0x189   :  { %v8678_v11 = vpop.f32.mrb[88].mxu0 }
 0x18a   :  { %v1542_v56 = vpop.f32.mrb[89].mxu0  ;;  %v2918_v9 = vld [vmem:[#allocation2 + $0x118] sm:$0xff] }
 0x18b   :  { %v8683_v35 = vpop.f32.mrb[90].mxu0  ;;  %v3077_v51 = vpack.c.bf16 %v2918_v9, %v2917_v19  ;;  %v2180_v2 = vmul.f32 %v8707_v30, %v1542_v56  ;;  %v7809_v56 = vld [vmem:[%s10264_s0 + $0x348] sm:$0xff]  }
 0x18c   :  { %v1545_v39 = vpop.f32.mrb[91].mxu0  ;;  %v2919_v43 = vld [vmem:[#allocation2 + $0x120] sm:$0xff]  ;;  %v2920_v25 = vld [vmem:[#allocation2 + $0x128] sm:$0xff] }
 0x18d   :  { %7178 = vmatprep.mubr.msk.bf16.mxu1 %vm2780_vm2, %v3077_v51  ;;  %v3078_v34 = vpack.c.bf16 %v2920_v25, %v2919_v43  ;;  %v2181_v19 = vmul.f32 %v8707_v30, %v1545_v39  ;;  %v2179_v43 = vmul.f32 %v8707_v30, %v8665_v1  ;;  %v7810_v39 = vld [vmem:[%s10264_s0 + $0x350] sm:$0xff]  }
 0x18e   :  { %7063 = vmatmul.mubr.msk.bf16.gmra.mrb[196].mxu0 %vm819_vm0, %v7803_v23 }
 0x18f   :  { %7179 = vmatmul.mubr.msk.bf16.gmra.mrb[16].mxu1 %vm2780_vm2, %v3078_v34  ;;  %7066 = vmatprep.mubr.msk.bf16.mxu0 %vm819_vm0, %v7804_v31  ;;  %v2412_v4 = vadd.f32 %v8723_v52, %v2181_v19 }
 0x191   :  { %v8692_v37 = vpop.f32.mrb[92].mxu0 }
 0x192   :  { %v1558_v28 = vpop.f32.mrb[93].mxu0 }
 0x193   :  { %v8697_v44 = vpop.f32.mrb[94].mxu0 }
 0x194   :  { %v1561_v45 = vpop.f32.mrb[95].mxu0 }
 0x196   :  { %7067 = vmatmul.mubr.msk.bf16.gmra.mrb[200].mxu0 %vm819_vm0, %v7805_v40 }
 0x197   :  { %7070 = vmatprep.mubr.msk.bf16.mxu0 %vm819_vm0, %v7806_v21 }
 0x199   :  { %v6964_v20 = vpop.f32.mrb[96].mxu0 }
 0x19a   :  { %v2190_v48 = vmul.f32 %v8707_v30, %v6964_v20  ;;  %v8712_v29 = vpop.f32.mrb[97].mxu0 }
 0x19b   :  { %v6965_v10 = vpop.f32.mrb[98].mxu0 }
 0x19c   :  { %v2421_v53 = vadd.f32 %v8723_v52, %v2190_v48  ;;  %v2191_v54 = vmul.f32 %v8707_v30, %v6965_v10  ;;  %v8728_v13 = vpop.f32.mrb[99].mxu0  ;;  %v2410_v10 = vadd.f32 %v8723_v52, %v2179_v43  ;;  %v7812_v43 = vld [vmem:[%s10264_s0 + $0x360] sm:$0xff]  }
 0x19e   :  { %v2589_v63 = vmax.f32 %v2407_v32, %v2421_v53  ;;  %v2422_v0 = vadd.f32 %v8723_v52, %v2191_v54  ;;  %7071 = vmatmul.mubr.msk.bf16.gmra.mrb[204].mxu0 %vm819_vm0, %v7807_v41  ;;  %v2184_v53 = vmul.f32 %v8707_v30, %v1558_v28  ;;  %v7811_v28 = vld [vmem:[%s10264_s0 + $0x358] sm:$0xff]  }
 0x19f   :  { %7074 = vmatprep.mubr.msk.bf16.mxu0 %vm819_vm0, %v7808_v49 }
 0x1a0   :  { %v2701_v7 = vmax.f32 %v2589_v63, 0.0  ;;  %v2590_v12 = vmax.f32 %v2408_v59, %v2422_v0  ;;  %v2182_v63 = vmul.f32 %v8707_v30, %v8678_v11 }
 0x1a1   :  { %v6968_v14 = vpop.f32.mrb[100].mxu0 }
 0x1a2   :  { %2858 = vst.msk [vmem:[#allocation2 + $0x1c0] sm:$0xff] %vm2780_vm2, %v2701_v7  ;;  %v8740_v9 = vpack.c.bf16 %v2701_v7, %v8621_v22  ;;  %v2702_v23 = vmax.f32 %v2590_v12, 0.0  ;;  %v2194_v51 = vmul.f32 %v8707_v30, %v6968_v14  ;;  %v1590_v31 = vpop.f32.mrb[101].mxu0  ;;  %v2411_v22 = vadd.f32 %v8723_v52, %v2180_v2 }
 0x1a3   :  { %v2192_v58 = vmul.f32 %v8707_v30, %v1590_v31  ;;  %v6969_v25 = vpop.f32.mrb[102].mxu0  ;;  %v2185_v12 = vmul.f32 %v8707_v30, %v1561_v45 }
 0x1a4   :  { %10299 = vst [vmem:[#allocation8_spill] sm:$0xff] %v8740_v9  ;;  %2859 = vst.msk [vmem:[#allocation2 + $0x1c8] sm:$0xff] %vm2780_vm2, %v2702_v23  ;;  %v2425_v34 = vadd.f32 %v8723_v52, %v2194_v51  ;;  %v2195_v40 = vmul.f32 %v8707_v30, %v6969_v25  ;;  %v1593_v21 = vpop.f32.mrb[103].mxu0  ;;  %v2183_v51 = vmul.f32 %v8707_v30, %v8683_v35 }
 0x1a5   :  { %v2423_v1 = vadd.f32 %v8723_v52, %v2192_v58  ;;  %v2193_v20 = vmul.f32 %v8707_v30, %v1593_v21  ;;  %v2415_v58 = vadd.f32 %v8723_v52, %v2184_v53  ;;  %v2416_v21 = vadd.f32 %v8723_v52, %v2185_v12 }
 0x1a6   :  { %v2593_v48 = vmax.f32 %v2411_v22, %v2425_v34  ;;  %v2426_v41 = vadd.f32 %v8723_v52, %v2195_v40  ;;  %7075 = vmatmul.mubr.msk.bf16.gmra.mrb[208].mxu0 %vm819_vm0, %v7809_v56  ;;  %v2187_v12 = vmul.f32 %v8707_v30, %v8697_v44 }
 0x1a7   :  { %v2591_v49 = vmax.f32 %v2409_v36, %v2423_v1  ;;  %v2424_v32 = vadd.f32 %v8723_v52, %v2193_v20  ;;  %7078 = vmatprep.mubr.msk.bf16.mxu0 %vm819_vm0, %v7810_v39  ;;  %v2414_v20 = vadd.f32 %v8723_v52, %v2183_v51 }
 0x1a8   :  { %v2705_v54 = vmax.f32 %v2593_v48, 0.0  ;;  %v2594_v59 = vmax.f32 %v2412_v4, %v2426_v41  ;;  %v2188_v41 = vmul.f32 %v8707_v30, %v8712_v29  ;;  %v7813_v29 = vld [vmem:[%s10264_s0 + $0x368] sm:$0xff]  }
 0x1a9   :  { %v2703_v0 = vmax.f32 %v2591_v49, 0.0  ;;  %v2592_v2 = vmax.f32 %v2410_v10, %v2424_v32  ;;  %v6972_v7 = vpop.f32.mrb[104].mxu0  ;;  %v2186_v32 = vmul.f32 %v8707_v30, %v8692_v37 }
 0x1aa   :  { %2862 = vst.msk [vmem:[#allocation2 + $0x1e0] sm:$0xff] %vm2780_vm2, %v2705_v54  ;;  %v2706_v38 = vmax.f32 %v2594_v59, 0.0  ;;  %v2198_v14 = vmul.f32 %v8707_v30, %v6972_v7  ;;  %v1606_v19 = vpop.f32.mrb[105].mxu0  ;;  %v2419_v51 = vadd.f32 %v8723_v52, %v2188_v41 }
 0x1ab   :  { %2860 = vst.msk [vmem:[#allocation2 + $0x1d0] sm:$0xff] %vm2780_vm2, %v2703_v0  ;;  %v8777_v11 = vpack.c.bf16 %v2703_v0, %v2702_v23  ;;  %v2704_v31 = vmax.f32 %v2592_v2, 0.0  ;;  %v2196_v45 = vmul.f32 %v8707_v30, %v1606_v19  ;;  %v6973_v56 = vpop.f32.mrb[106].mxu0  ;;  %v2413_v23 = vadd.f32 %v8723_v52, %v2182_v63 }
 0x1ac   :  { %2863 = vst.msk [vmem:[#allocation2 + $0x1e8] sm:$0xff] %vm2780_vm2, %v2706_v38  ;;  %v2429_v25 = vadd.f32 %v8723_v52, %v2198_v14  ;;  %v2199_v35 = vmul.f32 %v8707_v30, %v6973_v56  ;;  %v1609_v39 = vpop.f32.mrb[107].mxu0  ;;  %v2189_v63 = vmul.f32 %v8707_v30, %v8728_v13  ;;  %v2417_v56 = vadd.f32 %v8723_v52, %v2186_v32 }
 0x1ad   :  { %10300 = vst [vmem:[#allocation9_spill] sm:$0xff] %v8777_v11  ;;  %2861 = vst.msk [vmem:[#allocation2 + $0x1d8] sm:$0xff] %vm2780_vm2, %v2704_v31  ;;  %v8789_v22 = vpack.c.bf16 %v2705_v54, %v2704_v31  ;;  %v2427_v34 = vadd.f32 %v8723_v52, %v2196_v45  ;;  %v2197_v40 = vmul.f32 %v8707_v30, %v1609_v39 }
 0x1ae   :  { %v2597_v36 = vmax.f32 %v2415_v58, %v2429_v25  ;;  %v2430_v1 = vadd.f32 %v8723_v52, %v2199_v35  ;;  %7079 = vmatmul.mubr.msk.bf16.gmra.mrb[212].mxu0 %vm819_vm0, %v7811_v28  ;;  %v7816_v28 = vld [vmem:[%s10264_s0 + $0x370] sm:$0xff]   ;;  %v2420_v35 = vadd.f32 %v8723_v52, %v2189_v63 }
 0x1af   :  { %10301 = vst [vmem:[#allocation10_spill] sm:$0xff] %v8789_v22  ;;  %v2595_v4 = vmax.f32 %v2413_v23, %v2427_v34  ;;  %v2428_v48 = vadd.f32 %v8723_v52, %v2197_v40  ;;  %7082 = vmatprep.mubr.msk.bf16.mxu0 %vm819_vm0, %v7812_v43  ;;  %v2418_v34 = vadd.f32 %v8723_v52, %v2187_v12  ;;  %v2921_v63 = vld [vmem:[#allocation2 + $0x130] sm:$0xff] }
 0x1b0   :  { %v2709_v10 = vmax.f32 %v2597_v36, 0.0  ;;  %v2598_v49 = vmax.f32 %v2416_v21, %v2430_v1 }
 0x1b1   :  { %v2707_v53 = vmax.f32 %v2595_v4, 0.0  ;;  %v2596_v54 = vmax.f32 %v2414_v20, %v2428_v48  ;;  %v6976_v59 = vpop.f32.mrb[108].mxu0 }
 0x1b2   :  { %2803 = vst.msk [vmem:[#allocation2 + $0x189] sm:$0xff] %vm2780_vm2, %v2709_v10  ;;  %v2710_v0 = vmax.f32 %v2598_v49, 0.0  ;;  %v2202_v2 = vmul.f32 %v8707_v30, %v6976_v59  ;;  %v1622_v7 = vpop.f32.mrb[109].mxu0 }
 0x1b3   :  { %2864 = vst.msk [vmem:[#allocation2 + $0x1f0] sm:$0xff] %vm2780_vm2, %v2707_v53  ;;  %v8813_v37 = vpack.c.bf16 %v2707_v53, %v2706_v38  ;;  %v2708_v14 = vmax.f32 %v2596_v54, 0.0  ;;  %v2200_v13 = vmul.f32 %v8707_v30, %v1622_v7  ;;  %v6977_v19 = vpop.f32.mrb[110].mxu0 }
 0x1b4   :  { %2804 = vst.msk [vmem:[#allocation2 + $0x191] sm:$0xff] %vm2780_vm2, %v2710_v0  ;;  %v8821_v31 = vpack.c.bf16 %v2710_v0, %v2709_v10  ;;  %v2433_v44 = vadd.f32 %v8723_v52, %v2202_v2  ;;  %v2203_v45 = vmul.f32 %v8707_v30, %v6977_v19  ;;  %v1625_v38 = vpop.f32.mrb[111].mxu0  ;;  %v7817_v10 = vld [vmem:[%s10264_s0 + $0x378] sm:$0xff]  }
 0x1b5   :  { %10302 = vst [vmem:[#allocation11_spill] sm:$0xff] %v8813_v37  ;;  %2802 = vst.msk [vmem:[#allocation2 + $0x181] sm:$0xff] %vm2780_vm2, %v2708_v14  ;;  %v8828_v43 = vpack.c.bf16 %v2708_v14, %v8657_v15  ;;  %v2431_v58 = vadd.f32 %v8723_v52, %v2200_v13  ;;  %v2201_v25 = vmul.f32 %v8707_v30, %v1625_v38  ;;  %v7820_v14 = vld [vmem:[%s10265_s4 + $0x40] sm:$0xff]  }
 0x1b6   :  { %v2601_v39 = vmax.f32 %v2419_v51, %v2433_v44  ;;  %v2434_v23 = vadd.f32 %v8723_v52, %v2203_v45  ;;  %7083 = vmatmul.mubr.msk.bf16.gmra.mrb[216].mxu0 %vm819_vm0, %v7813_v29  ;;  %7218 = vmatprep.subr.bf16.mxu1 %v7820_v14 }
 0x1b7   :  { %v2599_v40 = vmax.f32 %v2417_v56, %v2431_v58  ;;  %v2432_v21 = vadd.f32 %v8723_v52, %v2201_v25  ;;  %7086 = vmatprep.mubr.msk.bf16.mxu0 %vm819_vm0, %v7816_v28  ;;  %7219 = vmatpush3.bf16.msra.mxu1 %v7820_v14 }
 0x1b8   :  { %v2713_v15 = vmax.f32 %v2601_v39, 0.0  ;;  %v2602_v36 = vmax.f32 %v2420_v35, %v2434_v23 }
 0x1b9   :  { %v2711_v1 = vmax.f32 %v2599_v40, 0.0  ;;  %v2600_v20 = vmax.f32 %v2418_v34, %v2432_v21  ;;  %v8838_v4 = vpop.f32.mrb[112].mxu0 }
 0x1ba   :  { %2807 = vst.msk [vmem:[#allocation2 + $0x1a9] sm:$0xff] %vm2780_vm2, %v2713_v15  ;;  %v2714_v48 = vmax.f32 %v2602_v36, 0.0  ;;  %v1638_v41 = vpop.f32.mrb[113].mxu0 }
 0x1bb   :  { %2805 = vst.msk [vmem:[#allocation2 + $0x199] sm:$0xff] %vm2780_vm2, %v2711_v1  ;;  %v2712_v49 = vmax.f32 %v2600_v20, 0.0  ;;  %v8845_v32 = vpop.f32.mrb[114].mxu0  ;;  %v2924_v53 = vld [vmem:[#allocation2 + $0x190] sm:$0xff]  ;;  %v2204_v40 = vmul.f32 %v8707_v30, %v1638_v41 }
 0x1bc   :  { %2808 = vst.msk [vmem:[#allocation2 + $0x1b1] sm:$0xff] %vm2780_vm2, %v2714_v48  ;;  %v8848_v54 = vpack.c.bf16 %v2714_v48, %v2713_v15  ;;  %v1641_v59 = vpop.f32.mrb[115].mxu0  ;;  %v2922_v0 = vld [vmem:[#allocation2 + $0x180] sm:$0xff]  ;;  %v2923_v2 = vld [vmem:[#allocation2 + $0x188] sm:$0xff] }
 0x1bd   :  { %2806 = vst.msk [vmem:[#allocation2 + $0x1a1] sm:$0xff] %vm2780_vm2, %v2712_v49  ;;  %v8851_v7 = vpack.c.bf16 %v2712_v49, %v2711_v1  ;;  %v3079_v29 = vpack.c.bf16 %v2922_v0, %v2921_v63  ;;  %v3080_v12 = vpack.c.bf16 %v2924_v53, %v2923_v2  ;;  %v2205_v15 = vmul.f32 %v8707_v30, %v1641_v59 }
 0x1be   :  { %7087 = vmatmul.mubr.msk.bf16.gmra.mrb[220].mxu0 %vm819_vm0, %v7817_v10  ;;  %v2435_v48 = vadd.f32 %v8723_v52, %v2204_v40 }
 0x1bf   :  { %7098 = vmatprep.mubr.msk.bf16.mxu0 %vm2780_vm2, %v8213_v50  ;;  %7182 = vmatprep.mubr.msk.bf16.mxu1 %vm2780_vm2, %v3079_v29  ;;  %v2436_v63 = vadd.f32 %v8723_v52, %v2205_v15 }
 0x1c0   :  { %7183 = vmatmul.mubr.msk.bf16.gmra.mrb[20].mxu1 %vm2780_vm2, %v3080_v12  ;;  %v2206_v12 = vmul.f32 %v8707_v30, %v8838_v4 }
 0x1c1   :  { %v8861_v13 = vpop.f32.mrb[116].mxu0 }
 0x1c2   :  { %v1654_v19 = vpop.f32.mrb[117].mxu0  ;;  %v2925_v45 = vld [vmem:[#allocation2 + $0x198] sm:$0xff] }
 0x1c3   :  { %v8863_v28 = vpop.f32.mrb[118].mxu0  ;;  %v2928_v51 = vld [vmem:[#allocation2 + $0x1b0] sm:$0xff]  ;;  %v2208_v59 = vmul.f32 %v8707_v30, %v1654_v19 }
 0x1c4   :  { %v1657_v44 = vpop.f32.mrb[119].mxu0  ;;  %v2926_v38 = vld [vmem:[#allocation2 + $0x1a0] sm:$0xff]  ;;  %v2927_v56 = vld [vmem:[#allocation2 + $0x1a8] sm:$0xff] }
 0x1c5   :  { %v3081_v58 = vpack.c.bf16 %v2926_v38, %v2925_v45  ;;  %v3082_v25 = vpack.c.bf16 %v2928_v51, %v2927_v56  ;;  %v2209_v51 = vmul.f32 %v8707_v30, %v1657_v44  ;;  %v2439_v40 = vadd.f32 %v8723_v52, %v2208_v59 }
 0x1c6   :  { %7099 = vmatmul.mubr.msk.bf16.vlgmr.msra.gmra.mrb[224].mxu0 %vm2780_vm2, %v8249_v24 }
 0x1c7   :  { %7102 = vmatprep.mubr.msk.bf16.mxu0 %vm2780_vm2, %v8245_v6  ;;  %7186 = vmatprep.mubr.msk.bf16.mxu1 %vm2780_vm2, %v3081_v58  ;;  %v2207_v58 = vmul.f32 %v8707_v30, %v8845_v32 }
 0x1c8   :  { %7187 = vmatmul.mubr.msk.bf16.gmra.mrb[24].mxu1 %vm2780_vm2, %v3082_v25 }
 0x1c9   :  { %v8871_v35 = vpop.f32.mrb[120].mxu0 }
 0x1ca   :  { %v1670_v39 = vpop.f32.mrb[121].mxu0 }
 0x1cb   :  { %v8873_v23 = vpop.f32.mrb[122].mxu0  ;;  %v2212_v59 = vmul.f32 %v8707_v30, %v1670_v39 }
 0x1cc   :  { %v1673_v34 = vpop.f32.mrb[123].mxu0 }
 0x1ce   :  { %7103 = vmatmul.mubr.msk.bf16.gmra.mrb[228].mxu0 %vm2780_vm2, %v8374_v61 }
 0x1cf   :  { %7106 = vmatprep.mubr.msk.bf16.mxu0 %vm2780_vm2, %v8418_v47 }
 0x1d1   :  { %v6992_v21 = vpop.f32.mrb[124].mxu0 }
 0x1d2   :  { %v2218_v36 = vmul.f32 %v8707_v30, %v6992_v21  ;;  %v8882_v1 = vpop.f32.mrb[125].mxu0 }
 0x1d3   :  { %v6993_v20 = vpop.f32.mrb[126].mxu0 }
 0x1d4   :  { %v2449_v10 = vadd.f32 %v8723_v52, %v2218_v36  ;;  %v2219_v49 = vmul.f32 %v8707_v30, %v6993_v20  ;;  %v8887_v53 = vpop.f32.mrb[127].mxu0  ;;  %v2437_v36 = vadd.f32 %v8723_v52, %v2206_v12  ;;  %v2210_v12 = vmul.f32 %v8707_v30, %v8861_v13 }
 0x1d6   :  { %v2603_v0 = vmax.f32 %v2435_v48, %v2449_v10  ;;  %v2450_v41 = vadd.f32 %v8723_v52, %v2219_v49  ;;  %7107 = vmatmul.mubr.msk.bf16.gmra.mrb[232].mxu0 %vm2780_vm2, %v8430_v57  ;;  %v2440_v48 = vadd.f32 %v8723_v52, %v2209_v51 }
 0x1d7   :  { %7110 = vmatprep.mubr.msk.bf16.mxu0 %vm2780_vm2, %v8460_v26 }
 0x1d8   :  { %v2715_v2 = vmax.f32 %v2603_v0, 0.0  ;;  %v2604_v29 = vmax.f32 %v2436_v63, %v2450_v41  ;;  %v2438_v63 = vadd.f32 %v8723_v52, %v2207_v58 }
 0x1d9   :  { %v6996_v14 = vpop.f32.mrb[128].mxu0 }
 0x1da   :  { %2865 = vst.msk [vmem:[#allocation2 + $0x240] sm:$0xff] %vm2780_vm2, %v2715_v2  ;;  %v2716_v45 = vmax.f32 %v2604_v29, 0.0  ;;  %v2222_v38 = vmul.f32 %v8707_v30, %v6996_v14  ;;  %v1702_v56 = vpop.f32.mrb[129].mxu0 }
 0x1db   :  { %v2220_v25 = vmul.f32 %v8707_v30, %v1702_v56  ;;  %v6997_v19 = vpop.f32.mrb[130].mxu0 }
 0x1dc   :  { %2866 = vst.msk [vmem:[#allocation2 + $0x248] sm:$0xff] %vm2780_vm2, %v2716_v45  ;;  %v8906_v4 = vpack.c.bf16 %v2716_v45, %v2715_v2  ;;  %v2453_v44 = vadd.f32 %v8723_v52, %v2222_v38  ;;  %v2223_v21 = vmul.f32 %v8707_v30, %v6997_v19  ;;  %v1705_v15 = vpop.f32.mrb[131].mxu0  ;;  %v2213_v38 = vmul.f32 %v8707_v30, %v1673_v34 }
 0x1dd   :  { %v2451_v20 = vadd.f32 %v8723_v52, %v2220_v25  ;;  %v2221_v32 = vmul.f32 %v8707_v30, %v1705_v15  ;;  %v2211_v19 = vmul.f32 %v8707_v30, %v8863_v28  ;;  %v7821_v28 = vld [vmem:[%s10265_s4 + $0x48] sm:$0xff]  }
 0x1de   :  { %10303 = vst [vmem:[#allocation12_spill] sm:$0xff] %v8906_v4  ;;  %v2607_v10 = vmax.f32 %v2439_v40, %v2453_v44  ;;  %v2454_v49 = vadd.f32 %v8723_v52, %v2223_v21  ;;  %7111 = vmatmul.mubr.msk.bf16.gmra.mrb[236].mxu0 %vm2780_vm2, %v8570_v3  ;;  %v2443_v44 = vadd.f32 %v8723_v52, %v2212_v59 }
 0x1df   :  { %v2605_v0 = vmax.f32 %v2437_v36, %v2451_v20  ;;  %v2452_v41 = vadd.f32 %v8723_v52, %v2221_v32  ;;  %7114 = vmatprep.mubr.msk.bf16.mxu0 %vm2780_vm2, %v8607_v62  ;;  %v2441_v20 = vadd.f32 %v8723_v52, %v2210_v12  ;;  %7220 = vmatprep.subr.bf16.mxu1 %v7821_v28 }
 0x1e0   :  { %v2719_v2 = vmax.f32 %v2607_v10, 0.0  ;;  %v2608_v29 = vmax.f32 %v2440_v48, %v2454_v49  ;;  %v2444_v49 = vadd.f32 %v8723_v52, %v2213_v38  ;;  %7221 = vmatpush3.bf16.msra.mxu1 %v7821_v28 }
 0x1e1   :  { %v2717_v14 = vmax.f32 %v2605_v0, 0.0  ;;  %v2606_v51 = vmax.f32 %v2438_v63, %v2452_v41  ;;  %v7000_v45 = vpop.f32.mrb[132].mxu0  ;;  %v2442_v41 = vadd.f32 %v8723_v52, %v2211_v19 }
 0x1e2   :  { %2869 = vst.msk [vmem:[#allocation2 + $0x260] sm:$0xff] %vm2780_vm2, %v2719_v2  ;;  %v2720_v56 = vmax.f32 %v2608_v29, 0.0  ;;  %v2226_v58 = vmul.f32 %v8707_v30, %v7000_v45  ;;  %v1718_v25 = vpop.f32.mrb[133].mxu0  ;;  %v2216_v29 = vmul.f32 %v8707_v30, %v8882_v1  ;;  %v2215_v1 = vmul.f32 %v8707_v30, %v8873_v23 }
 0x1e3   :  { %2867 = vst.msk [vmem:[#allocation2 + $0x250] sm:$0xff] %vm2780_vm2, %v2717_v14  ;;  %v2718_v39 = vmax.f32 %v2606_v51, 0.0  ;;  %v2224_v40 = vmul.f32 %v8707_v30, %v1718_v25  ;;  %v7001_v13 = vpop.f32.mrb[134].mxu0  ;;  %v2214_v51 = vmul.f32 %v8707_v30, %v8871_v35 }
 0x1e4   :  { %2870 = vst.msk [vmem:[#allocation2 + $0x268] sm:$0xff] %vm2780_vm2, %v2720_v56  ;;  %v8933_v34 = vpack.c.bf16 %v2720_v56, %v2719_v2  ;;  %v2457_v21 = vadd.f32 %v8723_v52, %v2226_v58  ;;  %v2227_v15 = vmul.f32 %v8707_v30, %v7001_v13  ;;  %v1721_v36 = vpop.f32.mrb[135].mxu0  ;;  %v2217_v58 = vmul.f32 %v8707_v30, %v8887_v53 }
 0x1e5   :  { %2868 = vst.msk [vmem:[#allocation2 + $0x258] sm:$0xff] %vm2780_vm2, %v2718_v39  ;;  %v8942_v32 = vpack.c.bf16 %v2718_v39, %v2717_v14  ;;  %v2455_v48 = vadd.f32 %v8723_v52, %v2224_v40  ;;  %v2225_v10 = vmul.f32 %v8707_v30, %v1721_v36  ;;  %v2445_v36 = vadd.f32 %v8723_v52, %v2214_v51 }
 0x1e6   :  { %10304 = vst [vmem:[#allocation13_spill] sm:$0xff] %v8933_v34  ;;  %v2611_v63 = vmax.f32 %v2443_v44, %v2457_v21  ;;  %v2458_v0 = vadd.f32 %v8723_v52, %v2227_v15  ;;  %7115 = vmatmul.mubr.msk.bf16.gmra.mrb[240].mxu0 %vm2780_vm2, %v8601_v27  ;;  %v2447_v44 = vadd.f32 %v8723_v52, %v2216_v29 }
 0x1e7   :  { %10305 = vst [vmem:[#allocation14_spill] sm:$0xff] %v8942_v32  ;;  %v2609_v59 = vmax.f32 %v2441_v20, %v2455_v48  ;;  %v2456_v2 = vadd.f32 %v8723_v52, %v2225_v10  ;;  %7118 = vmatprep.mubr.msk.bf16.mxu0 %vm2780_vm2, %v8740_v9  ;;  %v2448_v48 = vadd.f32 %v8723_v52, %v2217_v58 }
 0x1e8   :  { %v2723_v12 = vmax.f32 %v2611_v63, 0.0  ;;  %v2612_v14 = vmax.f32 %v2444_v49, %v2458_v0  ;;  %v2446_v63 = vadd.f32 %v8723_v52, %v2215_v1 }
 0x1e9   :  { %v8958_v45 = vmax.f32 %v2609_v59, 0.0  ;;  %v2610_v38 = vmax.f32 %v2442_v41, %v2456_v2  ;;  %v7004_v56 = vpop.f32.mrb[136].mxu0 }
 0x1ea   :  { %2810 = vst.msk [vmem:[#allocation2 + $0x209] sm:$0xff] %vm2780_vm2, %v2723_v12  ;;  %v2724_v25 = vmax.f32 %v2612_v14, 0.0  ;;  %v2230_v19 = vmul.f32 %v8707_v30, %v7004_v56  ;;  %v1734_v39 = vpop.f32.mrb[137].mxu0 }
 0x1eb   :  { %2871 = vst.msk [vmem:[#allocation2 + $0x270] sm:$0xff] %vm2780_vm2, %v8958_v45  ;;  %v2722_v35 = vmax.f32 %v2610_v38, 0.0  ;;  %v2228_v40 = vmul.f32 %v8707_v30, %v1734_v39  ;;  %v7005_v13 = vpop.f32.mrb[138].mxu0 }
 0x1ec   :  { %2811 = vst.msk [vmem:[#allocation2 + $0x211] sm:$0xff] %vm2780_vm2, %v2724_v25  ;;  %v2461_v53 = vadd.f32 %v8723_v52, %v2230_v19  ;;  %v2231_v21 = vmul.f32 %v8707_v30, %v7005_v13  ;;  %v1737_v15 = vpop.f32.mrb[139].mxu0 }
 0x1ed   :  { %2809 = vst.msk [vmem:[#allocation2 + $0x201] sm:$0xff] %vm2780_vm2, %v2722_v35  ;;  %v8975_v23 = vpack.c.bf16 %v2723_v12, %v2722_v35  ;;  %v2459_v28 = vadd.f32 %v8723_v52, %v2228_v40  ;;  %v2229_v20 = vmul.f32 %v8707_v30, %v1737_v15 }
 0x1ee   :  { %v2615_v10 = vmax.f32 %v2447_v44, %v2461_v53  ;;  %v2462_v49 = vadd.f32 %v8723_v52, %v2231_v21  ;;  %7119 = vmatmul.mubr.msk.bf16.gmra.mrb[244].mxu0 %vm2780_vm2, %v8777_v11 }
 0x1ef   :  { %v2613_v0 = vmax.f32 %v2445_v36, %v2459_v28  ;;  %v2460_v41 = vadd.f32 %v8723_v52, %v2229_v20  ;;  %7122 = vmatprep.mubr.msk.bf16.mxu0 %vm2780_vm2, %v8789_v22 }
 0x1f0   :  { %v2727_v59 = vmax.f32 %v2615_v10, 0.0  ;;  %v2616_v2 = vmax.f32 %v2448_v48, %v2462_v49 }
 0x1f1   :  { %v2725_v29 = vmax.f32 %v2613_v0, 0.0  ;;  %v2614_v12 = vmax.f32 %v2446_v63, %v2460_v41  ;;  %v7008_v14 = vpop.f32.mrb[140].mxu0 }
 0x1f2   :  { %2814 = vst.msk [vmem:[#allocation2 + $0x229] sm:$0xff] %vm2780_vm2, %v2727_v59  ;;  %v8988_v51 = vmax.f32 %v2616_v2, 0.0  ;;  %v1750_v38 = vpop.f32.mrb[141].mxu0 }
 0x1f3   :  { %2812 = vst.msk [vmem:[#allocation2 + $0x219] sm:$0xff] %vm2780_vm2, %v2725_v29  ;;  %v8991_v56 = vpack.c.bf16 %v2725_v29, %v2724_v25  ;;  %v2726_v58 = vmax.f32 %v2614_v12, 0.0  ;;  %v7009_v19 = vpop.f32.mrb[142].mxu0  ;;  %v7822_v25 = vld [vmem:[%s10265_s4 + $0x50] sm:$0xff]   ;;  %v2232_v2 = vmul.f32 %v8707_v30, %v1750_v38 }
 0x1f4   :  { %2815 = vst.msk [vmem:[#allocation2 + $0x231] sm:$0xff] %vm2780_vm2, %v8988_v51  ;;  %v1753_v39 = vpop.f32.mrb[143].mxu0  ;;  %v2929_v1 = vld [vmem:[#allocation2 + $0x200] sm:$0xff]  ;;  %v2930_v35 = vld [vmem:[#allocation2 + $0x208] sm:$0xff]  ;;  %7222 = vmatprep.subr.bf16.mxu1 %v7822_v25  ;;  %v2931_v21 = vld [vmem:[#allocation2 + $0x210] sm:$0xff] }
 0x1f5   :  { %2813 = vst.msk [vmem:[#allocation2 + $0x221] sm:$0xff] %vm2780_vm2, %v2726_v58  ;;  %v8996_v40 = vpack.c.bf16 %v2727_v59, %v2726_v58  ;;  %v3083_v13 = vpack.c.bf16 %v2930_v35, %v2929_v1  ;;  %7223 = vmatpush3.bf16.msra.mxu1 %v7822_v25  ;;  %v2233_v12 = vmul.f32 %v8707_v30, %v1753_v39 }
 0x1f6   :  { %7123 = vmatmul.mubr.msk.bf16.gmra.mrb[248].mxu0 %vm2780_vm2, %v8813_v37 }
 0x1f7   :  { %7126 = vmatprep.mubr.msk.bf16.mxu0 %vm2780_vm2, %v8906_v4  ;;  %7190 = vmatprep.mubr.msk.bf16.mxu1 %vm2780_vm2, %v3083_v13  ;;  %v2463_v13 = vadd.f32 %v8723_v52, %v2232_v2 }
 0x1f9   :  { %v9006_v44 = vpop.f32.mrb[144].mxu0 }
 0x1fa   :  { %v1766_v53 = vpop.f32.mrb[145].mxu0  ;;  %v2932_v15 = vld [vmem:[#allocation2 + $0x218] sm:$0xff] }
 0x1fb   :  { %v9008_v36 = vpop.f32.mrb[146].mxu0  ;;  %v3084_v28 = vpack.c.bf16 %v2932_v15, %v2931_v21  ;;  %v2236_v39 = vmul.f32 %v8707_v30, %v1766_v53 }
 0x1fc   :  { %v1769_v20 = vpop.f32.mrb[147].mxu0  ;;  %v2933_v48 = vld [vmem:[#allocation2 + $0x220] sm:$0xff]  ;;  %v2934_v10 = vld [vmem:[#allocation2 + $0x228] sm:$0xff] }
 0x1fd   :  { %7191 = vmatmul.mubr.msk.bf16.gmra.mrb[28].mxu1 %vm2780_vm2, %v3084_v28  ;;  %v3085_v49 = vpack.c.bf16 %v2934_v10, %v2933_v48  ;;  %v2464_v28 = vadd.f32 %v8723_v52, %v2233_v12  ;;  %v2237_v2 = vmul.f32 %v8707_v30, %v1769_v20 }
 0x1fe   :  { %7127 = vmatmul.mubr.msk.bf16.gmra.mrb[252].mxu0 %vm2780_vm2, %v8942_v32 }
 0x1ff   :  { %7130 = vmatprep.mubr.msk.bf16.mxu0 %vm2780_vm2, %v8933_v34  ;;  %7194 = vmatprep.mubr.msk.bf16.mxu1 %vm2780_vm2, %v3085_v49 }
 0x201   :  { %v9016_v63 = vpop.f32.mrb[148].mxu0 }
 0x202   :  { %v1782_v0 = vpop.f32.mrb[149].mxu0 }
 0x203   :  { %v9018_v41 = vpop.f32.mrb[150].mxu0 }
 0x204   :  { %v1785_v59 = vpop.f32.mrb[151].mxu0 }
 0x209   :  { %v7020_v29 = vpop.f32.mrb[152].mxu0 }
 0x20a   :  { %v2246_v58 = vmul.f32 %v8707_v30, %v7020_v29  ;;  %v9023_v1 = vpop.f32.mrb[153].mxu0  ;;  %v2234_v29 = vmul.f32 %v8707_v30, %v7008_v14 }
 0x20b   :  { %v7021_v35 = vpop.f32.mrb[154].mxu0 }
 0x20c   :  { %v2477_v25 = vadd.f32 %v8723_v52, %v2246_v58  ;;  %v2247_v21 = vmul.f32 %v8707_v30, %v7021_v35  ;;  %v9028_v15 = vpop.f32.mrb[155].mxu0 }
 0x20e   :  { %v2617_v48 = vmax.f32 %v2463_v13, %v2477_v25  ;;  %v2478_v38 = vadd.f32 %v8723_v52, %v2247_v21  ;;  %v2235_v25 = vmul.f32 %v8707_v30, %v7009_v19 }
 0x210   :  { %v2729_v10 = vmax.f32 %v2617_v48, 0.0  ;;  %v2618_v49 = vmax.f32 %v2464_v28, %v2478_v38  ;;  %v2467_v28 = vadd.f32 %v8723_v52, %v2236_v39  ;;  %v2468_v38 = vadd.f32 %v8723_v52, %v2237_v2 }
 0x211   :  { %v7024_v34 = vpop.f32.mrb[156].mxu0  ;;  %v2241_v2 = vmul.f32 %v8707_v30, %v1785_v59 }
 0x212   :  { %2872 = vst.msk [vmem:[#allocation2 + $0x2c0] sm:$0xff] %vm2780_vm2, %v2729_v10  ;;  %v9037_v58 = vpack.c.bf16 %v2729_v10, %v8958_v45  ;;  %v2730_v35 = vmax.f32 %v2618_v49, 0.0  ;;  %v2250_v12 = vmul.f32 %v8707_v30, %v7024_v34  ;;  %v1814_v13 = vpop.f32.mrb[157].mxu0  ;;  %v2465_v34 = vadd.f32 %v8723_v52, %v2234_v29 }
 0x213   :  { %v2248_v53 = vmul.f32 %v8707_v30, %v1814_v13  ;;  %v7025_v21 = vpop.f32.mrb[158].mxu0  ;;  %v2466_v49 = vadd.f32 %v8723_v52, %v2235_v25  ;;  %v2238_v29 = vmul.f32 %v8707_v30, %v9006_v44 }
 0x214   :  { %10306 = vst [vmem:[#allocation15_spill] sm:$0xff] %v9037_v58  ;;  %2873 = vst.msk [vmem:[#allocation2 + $0x2c8] sm:$0xff] %vm2780_vm2, %v2730_v35  ;;  %v2481_v14 = vadd.f32 %v8723_v52, %v2250_v12  ;;  %v2251_v20 = vmul.f32 %v8707_v30, %v7025_v21  ;;  %v1817_v48 = vpop.f32.mrb[159].mxu0  ;;  %7131 = vmatmul.mubr.msk.bf16.gmra.mrb[0].mxu0 %vm2780_vm2, %v9037_v58  ;;  %v2240_v21 = vmul.f32 %v8707_v30, %v1782_v0 }
 0x215   :  { %v2479_v45 = vadd.f32 %v8723_v52, %v2248_v53  ;;  %v2249_v19 = vmul.f32 %v8707_v30, %v1817_v48 }
 0x216   :  { %v2621_v10 = vmax.f32 %v2467_v28, %v2481_v14  ;;  %v2482_v39 = vadd.f32 %v8723_v52, %v2251_v20  ;;  %v2239_v20 = vmul.f32 %v8707_v30, %v9008_v36  ;;  %v7823_v36 = vld [vmem:[%s10265_s4 + $0x58] sm:$0xff]  }
 0x217   :  { %v2619_v12 = vmax.f32 %v2465_v34, %v2479_v45  ;;  %v2480_v13 = vadd.f32 %v8723_v52, %v2249_v19  ;;  %v2471_v19 = vadd.f32 %v8723_v52, %v2240_v21  ;;  %7224 = vmatprep.subr.bf16.mxu1 %v7823_v36 }
 0x218   :  { %v2733_v32 = vmax.f32 %v2621_v10, 0.0  ;;  %v2622_v58 = vmax.f32 %v2468_v38, %v2482_v39  ;;  %v2470_v21 = vadd.f32 %v8723_v52, %v2239_v20  ;;  %7225 = vmatpush3.bf16.msra.mxu1 %v7823_v36 }
 0x219   :  { %v2731_v53 = vmax.f32 %v2619_v12, 0.0  ;;  %v2620_v4 = vmax.f32 %v2466_v49, %v2480_v13  ;;  %v7028_v48 = vpop.f32.mrb[160].mxu0  ;;  %v2472_v49 = vadd.f32 %v8723_v52, %v2241_v2  ;;  %v9093_v2 = vld [vmem:[%s10265_s4 + $0x20] sm:$0xff]  }
 0x21a   :  { %2876 = vst.msk [vmem:[#allocation2 + $0x2e0] sm:$0xff] %vm2780_vm2, %v2733_v32  ;;  %v2734_v28 = vmax.f32 %v2622_v58, 0.0  ;;  %v2254_v25 = vmul.f32 %v8707_v30, %v7028_v48  ;;  %v1830_v14 = vpop.f32.mrb[161].mxu0  ;;  %7282 = vmatprep.subr.bf16.mxu1 %v9093_v2 }
 0x21b   :  { %2874 = vst.msk [vmem:[#allocation2 + $0x2d0] sm:$0xff] %vm2780_vm2, %v2731_v53  ;;  %v9064_v0 = vpack.c.bf16 %v2731_v53, %v2730_v35  ;;  %v2732_v34 = vmax.f32 %v2620_v4, 0.0  ;;  %v2252_v44 = vmul.f32 %v8707_v30, %v1830_v14  ;;  %v7029_v45 = vpop.f32.mrb[162].mxu0  ;;  %v2469_v35 = vadd.f32 %v8723_v52, %v2238_v29 }
 0x21c   :  { %2877 = vst.msk [vmem:[#allocation2 + $0x2e8] sm:$0xff] %vm2780_vm2, %v2734_v28  ;;  %v2485_v59 = vadd.f32 %v8723_v52, %v2254_v25  ;;  %v2255_v58 = vmul.f32 %v8707_v30, %v7029_v45  ;;  %v1833_v38 = vpop.f32.mrb[163].mxu0  ;;  %v2242_v14 = vmul.f32 %v8707_v30, %v9016_v63  ;;  %v2245_v45 = vmul.f32 %v8707_v30, %v9028_v15 }
 0x21d   :  { %10307 = vst [vmem:[#allocation16_spill] sm:$0xff] %v9064_v0  ;;  %2875 = vst.msk [vmem:[#allocation2 + $0x2d8] sm:$0xff] %vm2780_vm2, %v2732_v34  ;;  %v9076_v4 = vpack.c.bf16 %v2733_v32, %v2732_v34  ;;  %v2483_v10 = vadd.f32 %v8723_v52, %v2252_v44  ;;  %v2253_v39 = vmul.f32 %v8707_v30, %v1833_v38  ;;  %7134 = vmatprep.mubr.msk.bf16.mxu0 %vm2780_vm2, %v9064_v0  ;;  %v9163_v0 = vld [vmem:[%s10266_s2] ss:$0 sm:$0xff] }
 0x21e   :  { %v2625_v12 = vmax.f32 %v2471_v19, %v2485_v59  ;;  %v2486_v13 = vadd.f32 %v8723_v52, %v2255_v58  ;;  %v2244_v32 = vmul.f32 %v8707_v30, %v9023_v1  ;;  %v2243_v58 = vmul.f32 %v8707_v30, %v9018_v41 }
 0x21f   :  { %10308 = vst [vmem:[#allocation17_spill] sm:$0xff] %v9076_v4  ;;  %v2623_v29 = vmax.f32 %v2469_v35, %v2483_v10  ;;  %v2484_v53 = vadd.f32 %v8723_v52, %v2253_v39  ;;  %7135 = vmatmul.mubr.msk.bf16.gmra.mrb[4].mxu0 %vm2780_vm2, %v9076_v4  ;;  %v2473_v41 = vadd.f32 %v8723_v52, %v2242_v14 }
 0x220   :  { %v2737_v48 = vmax.f32 %v2625_v12, 0.0  ;;  %v2626_v25 = vmax.f32 %v2472_v49, %v2486_v13  ;;  %v2475_v10 = vadd.f32 %v8723_v52, %v2244_v32 }
 0x221   :  { %v2735_v20 = vmax.f32 %v2623_v29, 0.0  ;;  %v2624_v34 = vmax.f32 %v2470_v21, %v2484_v53  ;;  %v7032_v44 = vpop.f32.mrb[164].mxu0  ;;  %v2476_v29 = vadd.f32 %v8723_v52, %v2245_v45 }
 0x222   :  { %2817 = vst.msk [vmem:[#allocation2 + $0x289] sm:$0xff] %vm2780_vm2, %v2737_v48  ;;  %v2738_v1 = vmax.f32 %v2626_v25, 0.0  ;;  %v2258_v19 = vmul.f32 %v8707_v30, %v7032_v44  ;;  %v1846_v59 = vpop.f32.mrb[165].mxu0 }
 0x223   :  { %2878 = vst.msk [vmem:[#allocation2 + $0x2f0] sm:$0xff] %vm2780_vm2, %v2735_v20  ;;  %v9105_v38 = vpack.c.bf16 %v2735_v20, %v2734_v28  ;;  %v2736_v63 = vmax.f32 %v2624_v34, 0.0  ;;  %v2256_v36 = vmul.f32 %v8707_v30, %v1846_v59  ;;  %v7033_v35 = vpop.f32.mrb[166].mxu0 }
 0x224   :  { %2818 = vst.msk [vmem:[#allocation2 + $0x291] sm:$0xff] %vm2780_vm2, %v2738_v1  ;;  %v9110_v15 = vpack.c.bf16 %v2738_v1, %v2737_v48  ;;  %v2489_v39 = vadd.f32 %v8723_v52, %v2258_v19  ;;  %v2259_v49 = vmul.f32 %v8707_v30, %v7033_v35  ;;  %v1849_v12 = vpop.f32.mrb[167].mxu0  ;;  %v2474_v48 = vadd.f32 %v8723_v52, %v2243_v58 }
 0x225   :  { %10309 = vst [vmem:[#allocation18_spill] sm:$0xff] %v9105_v38  ;;  %2816 = vst.msk [vmem:[#allocation2 + $0x281] sm:$0xff] %vm2780_vm2, %v2736_v63  ;;  %v9117_v28 = vpack.c.bf16 %v2736_v63, %v8988_v51  ;;  %v2487_v13 = vadd.f32 %v8723_v52, %v2256_v36  ;;  %v2257_v21 = vmul.f32 %v8707_v30, %v1849_v12  ;;  %7138 = vmatprep.mubr.msk.bf16.mxu0 %vm2780_vm2, %v9105_v38 }
 0x226   :  { %v2629_v53 = vmax.f32 %v2475_v10, %v2489_v39  ;;  %v2490_v32 = vadd.f32 %v8723_v52, %v2259_v49  ;;  %v2935_v10 = vld [vmem:[#allocation2 + $0x230] sm:$0xff] }
 0x227   :  { %v2627_v25 = vmax.f32 %v2473_v41, %v2487_v13  ;;  %v2488_v14 = vadd.f32 %v8723_v52, %v2257_v21 }
 0x228   :  { %v2741_v20 = vmax.f32 %v2629_v53, 0.0  ;;  %v2630_v51 = vmax.f32 %v2476_v29, %v2490_v32 }
 0x229   :  { %v2739_v34 = vmax.f32 %v2627_v25, 0.0  ;;  %v2628_v44 = vmax.f32 %v2474_v48, %v2488_v14  ;;  %v7036_v1 = vpop.f32.mrb[168].mxu0 }
 0x22a   :  { %2821 = vst.msk [vmem:[#allocation2 + $0x2a9] sm:$0xff] %vm2780_vm2, %v2741_v20  ;;  %v2742_v19 = vmax.f32 %v2630_v51, 0.0  ;;  %v1862_v59 = vpop.f32.mrb[169].mxu0 }
 0x22b   :  { %2819 = vst.msk [vmem:[#allocation2 + $0x299] sm:$0xff] %vm2780_vm2, %v2739_v34  ;;  %v2740_v45 = vmax.f32 %v2628_v44, 0.0  ;;  %v7037_v63 = vpop.f32.mrb[170].mxu0  ;;  %v2938_v36 = vld [vmem:[#allocation2 + $0x290] sm:$0xff] }
 0x22c   :  { %2822 = vst.msk [vmem:[#allocation2 + $0x2b1] sm:$0xff] %vm2780_vm2, %v2742_v19  ;;  %v9130_v58 = vpack.c.bf16 %v2742_v19, %v2741_v20  ;;  %v1865_v35 = vpop.f32.mrb[171].mxu0  ;;  %v2936_v39 = vld [vmem:[#allocation2 + $0x280] sm:$0xff]  ;;  %v2937_v49 = vld [vmem:[#allocation2 + $0x288] sm:$0xff] }
 0x22d   :  { %2820 = vst.msk [vmem:[#allocation2 + $0x2a1] sm:$0xff] %vm2780_vm2, %v2740_v45  ;;  %v9133_v12 = vpack.c.bf16 %v2740_v45, %v2739_v34  ;;  %v3086_v41 = vpack.c.bf16 %v2936_v39, %v2935_v10  ;;  %v3087_v13 = vpack.c.bf16 %v2938_v36, %v2937_v49  ;;  %v2260_v10 = vmul.f32 %v8707_v30, %v1862_v59 }
 0x22e   :  { %v2261_v49 = vmul.f32 %v8707_v30, %v1865_v35 }
 0x22f   :  { %7195 = vmatmul.mubr.msk.bf16.gmra.mrb[32].mxu1 %vm2780_vm2, %v3086_v41 }
 0x230   :  { %7198 = vmatprep.mubr.msk.bf16.mxu1 %vm2780_vm2, %v3087_v13 }
 0x231   :  { %v9137_v21 = vpop.f32.mrb[172].mxu0 }
 0x232   :  { %v1878_v29 = vpop.f32.mrb[173].mxu0  ;;  %v2939_v25 = vld [vmem:[#allocation2 + $0x298] sm:$0xff] }
 0x233   :  { %v9139_v53 = vpop.f32.mrb[174].mxu0  ;;  %v2942_v32 = vld [vmem:[#allocation2 + $0x2b0] sm:$0xff]  ;;  %v2264_v35 = vmul.f32 %v8707_v30, %v1878_v29 }
 0x234   :  { %v1881_v48 = vpop.f32.mrb[175].mxu0  ;;  %v2940_v14 = vld [vmem:[#allocation2 + $0x2a0] sm:$0xff]  ;;  %v2941_v20 = vld [vmem:[#allocation2 + $0x2a8] sm:$0xff] }
 0x235   :  { %v3088_v51 = vpack.c.bf16 %v2940_v14, %v2939_v25  ;;  %v3089_v44 = vpack.c.bf16 %v2942_v32, %v2941_v20  ;;  %v2491_v25 = vadd.f32 %v8723_v52, %v2260_v10  ;;  %v2262_v10 = vmul.f32 %v9163_v0, %v7036_v1 }
 0x237   :  { %7199 = vmatmul.mubr.msk.bf16.gmra.mrb[36].mxu1 %vm2780_vm2, %v3088_v51 }
 0x238   :  { %7202 = vmatprep.mubr.msk.bf16.mxu1 %vm2780_vm2, %v3089_v44  ;;  %v2492_v44 = vadd.f32 %v8723_v52, %v2261_v49 }
 0x239   :  { %v9143_v34 = vpop.f32.mrb[176].mxu0 }
 0x23a   :  { %v1894_v19 = vpop.f32.mrb[177].mxu0 }
 0x23b   :  { %v9145_v45 = vpop.f32.mrb[178].mxu0 }
 0x23c   :  { %v1897_v36 = vpop.f32.mrb[179].mxu0 }
 0x241   :  { %v7048_v39 = vpop.f32.mrb[180].mxu0 }
 0x242   :  { %v2274_v41 = vmul.f32 %v8707_v30, %v7048_v39  ;;  %v9150_v13 = vpop.f32.mrb[181].mxu0 }
 0x243   :  { %v7049_v32 = vpop.f32.mrb[182].mxu0 }
 0x244   :  { %v2505_v14 = vadd.f32 %v8723_v52, %v2274_v41  ;;  %v2275_v20 = vmul.f32 %v8707_v30, %v7049_v32  ;;  %v9155_v51 = vpop.f32.mrb[183].mxu0  ;;  %v2265_v32 = vmul.f32 %v9163_v0, %v1881_v48  ;;  %v2263_v30 = vmul.f32 %v9163_v0, %v7037_v63 }
 0x246   :  { %v2631_v38 = vmax.f32 %v2491_v25, %v2505_v14  ;;  %v2506_v59 = vadd.f32 %v8723_v52, %v2275_v20  ;;  %v9174_v14 = vld [vmem:[%s10267_s3] ss:$0 sm:$0xff] }
 0x247   :  { %v2495_v1 = vadd.f32 %v9174_v14, %v2264_v35  ;;  %v2493_v63 = vadd.f32 %v9174_v14, %v2262_v10 }
 0x248   :  { %v2743_v4 = vmax.f32 %v2631_v38, 0.0  ;;  %v2632_v39 = vmax.f32 %v2492_v44, %v2506_v59 }
 0x249   :  { %v7052_v41 = vpop.f32.mrb[184].mxu0 }
 0x24a   :  { %2879 = vst.msk [vmem:[#allocation2 + $0x340] sm:$0xff] %vm2780_vm2, %v2743_v4  ;;  %v2744_v49 = vmax.f32 %v2632_v39, 0.0  ;;  %v2278_v25 = vmul.f32 %v9163_v0, %v7052_v41  ;;  %v1926_v52 = vpop.f32.mrb[185].mxu0 }
 0x24b   :  { %v2276_v38 = vmul.f32 %v9163_v0, %v1926_v52  ;;  %v7053_v29 = vpop.f32.mrb[186].mxu0  ;;  %v2496_v52 = vadd.f32 %v9174_v14, %v2265_v32 }
 0x24c   :  { %2880 = vst.msk [vmem:[#allocation2 + $0x348] sm:$0xff] %vm2780_vm2, %v2744_v49  ;;  %v9178_v48 = vpack.c.bf16 %v2744_v49, %v2743_v4  ;;  %v2509_v20 = vadd.f32 %v9174_v14, %v2278_v25  ;;  %v2279_v44 = vmul.f32 %v9163_v0, %v7053_v29  ;;  %v1929_v59 = vpop.f32.mrb[187].mxu0  ;;  %v2494_v4 = vadd.f32 %v9174_v14, %v2263_v30 }
 0x24d   :  { %v2507_v39 = vadd.f32 %v9174_v14, %v2276_v38  ;;  %v2277_v41 = vmul.f32 %v9163_v0, %v1929_v59  ;;  %v2268_v29 = vmul.f32 %v9163_v0, %v1894_v19  ;;  %v2266_v38 = vmul.f32 %v9163_v0, %v9137_v21 }
 0x24e   :  { %10310 = vst [vmem:[#allocation19_spill] sm:$0xff] %v9178_v48  ;;  %v2635_v37 = vmax.f32 %v2495_v1, %v2509_v20  ;;  %v2510_v35 = vadd.f32 %v9174_v14, %v2279_v44  ;;  %7139 = vmatmul.mubr.msk.bf16.gmra.mrb[8].mxu0 %vm2780_vm2, %v9178_v48  ;;  %v2269_v20 = vmul.f32 %v9163_v0, %v1897_v36 }
 0x24f   :  { %v2633_v49 = vmax.f32 %v2493_v63, %v2507_v39  ;;  %v2508_v25 = vadd.f32 %v9174_v14, %v2277_v41  ;;  %v2267_v39 = vmul.f32 %v9163_v0, %v9139_v53  ;;  %v2499_v41 = vadd.f32 %v9174_v14, %v2268_v29 }
 0x250   :  { %v2747_v10 = vmax.f32 %v2635_v37, 0.0  ;;  %v2636_v22 = vmax.f32 %v2496_v52, %v2510_v35  ;;  %v2500_v29 = vadd.f32 %v9174_v14, %v2269_v20  ;;  %v2270_v20 = vmul.f32 %v9163_v0, %v9143_v34 }
 0x251   :  { %v2745_v59 = vmax.f32 %v2633_v49, 0.0  ;;  %v2634_v32 = vmax.f32 %v2494_v4, %v2508_v25  ;;  %v7056_v1 = vpop.f32.mrb[188].mxu0  ;;  %v2497_v4 = vadd.f32 %v9174_v14, %v2266_v38  ;;  %v2272_v38 = vmul.f32 %v9163_v0, %v9150_v13 }
 0x252   :  { %2883 = vst.msk [vmem:[#allocation2 + $0x360] sm:$0xff] %vm2780_vm2, %v2747_v10  ;;  %v2748_v44 = vmax.f32 %v2636_v22, 0.0  ;;  %v2282_v30 = vmul.f32 %v9163_v0, %v7056_v1  ;;  %v1942_v63 = vpop.f32.mrb[189].mxu0  ;;  %v2498_v1 = vadd.f32 %v9174_v14, %v2267_v39 }
 0x253   :  { %2881 = vst.msk [vmem:[#allocation2 + $0x350] sm:$0xff] %vm2780_vm2, %v2745_v59  ;;  %v2746_v37 = vmax.f32 %v2634_v32, 0.0  ;;  %v2280_v19 = vmul.f32 %v9163_v0, %v1942_v63  ;;  %v7057_v21 = vpop.f32.mrb[190].mxu0 }
 0x254   :  { %2884 = vst.msk [vmem:[#allocation2 + $0x368] sm:$0xff] %vm2780_vm2, %v2748_v44  ;;  %v9203_v36 = vpack.c.bf16 %v2748_v44, %v2747_v10  ;;  %v2513_v22 = vadd.f32 %v9174_v14, %v2282_v30  ;;  %v2283_v52 = vmul.f32 %v9163_v0, %v7057_v21  ;;  %v1945_v35 = vpop.f32.mrb[191].mxu0  ;;  %v2273_v21 = vmul.f32 %v9163_v0, %v9155_v51 }
 0x255   :  { %2882 = vst.msk [vmem:[#allocation2 + $0x358] sm:$0xff] %vm2780_vm2, %v2746_v37  ;;  %v9209_v53 = vpack.c.bf16 %v2746_v37, %v2745_v59  ;;  %v2511_v49 = vadd.f32 %v9174_v14, %v2280_v19  ;;  %v2281_v25 = vmul.f32 %v9163_v0, %v1945_v35 }
 0x256   :  { %10311 = vst [vmem:[#allocation20_spill] sm:$0xff] %v9203_v36  ;;  %v2639_v32 = vmax.f32 %v2499_v41, %v2513_v22  ;;  %v2514_v10 = vadd.f32 %v9174_v14, %v2283_v52  ;;  %v2271_v52 = vmul.f32 %v9163_v0, %v9145_v45 }
 0x257   :  { %10312 = vst [vmem:[#allocation21_spill] sm:$0xff] %v9209_v53  ;;  %v2637_v44 = vmax.f32 %v2497_v4, %v2511_v49  ;;  %v2512_v30 = vadd.f32 %v9174_v14, %v2281_v25  ;;  %7142 = vmatprep.mubr.msk.bf16.mxu0 %vm2780_vm2, %v9209_v53  ;;  %v2503_v49 = vadd.f32 %v9174_v14, %v2272_v38 }
 0x258   :  { %v2751_v59 = vmax.f32 %v2639_v32, 0.0  ;;  %v2640_v63 = vmax.f32 %v2500_v29, %v2514_v10  ;;  %7143 = vmatmul.mubr.msk.bf16.gmra.mrb[12].mxu0 %vm2780_vm2, %v9203_v36  ;;  %v2501_v32 = vadd.f32 %v9174_v14, %v2270_v20 }
 0x259   :  { %v9225_v37 = vmax.f32 %v2637_v44, 0.0  ;;  %v2638_v39 = vmax.f32 %v2498_v1, %v2512_v30  ;;  %v7060_v19 = vpop.f32.mrb[192].mxu0  ;;  %v2504_v44 = vadd.f32 %v9174_v14, %v2273_v21 }
 0x25a   :  { %2824 = vst.msk [vmem:[#allocation2 + $0x309] sm:$0xff] %vm2780_vm2, %v2751_v59  ;;  %v2752_v41 = vmax.f32 %v2640_v63, 0.0  ;;  %v2286_v13 = vmul.f32 %v9163_v0, %v7060_v19  ;;  %v1958_v22 = vpop.f32.mrb[193].mxu0  ;;  %v2502_v63 = vadd.f32 %v9174_v14, %v2271_v52 }
 0x25b   :  { %2885 = vst.msk [vmem:[#allocation2 + $0x370] sm:$0xff] %vm2780_vm2, %v9225_v37  ;;  %v2750_v34 = vmax.f32 %v2638_v39, 0.0  ;;  %v2284_v35 = vmul.f32 %v9163_v0, %v1958_v22  ;;  %v7061_v4 = vpop.f32.mrb[194].mxu0 }
 0x25c   :  { %2825 = vst.msk [vmem:[#allocation2 + $0x311] sm:$0xff] %vm2780_vm2, %v2752_v41  ;;  %v2517_v51 = vadd.f32 %v9174_v14, %v2286_v13  ;;  %v2287_v25 = vmul.f32 %v9163_v0, %v7061_v4  ;;  %v1961_v29 = vpop.f32.mrb[195].mxu0 }
 0x25d   :  { %2823 = vst.msk [vmem:[#allocation2 + $0x301] sm:$0xff] %vm2780_vm2, %v2750_v34  ;;  %v9242_v45 = vpack.c.bf16 %v2751_v59, %v2750_v34  ;;  %v2515_v10 = vadd.f32 %v9174_v14, %v2284_v35  ;;  %v2285_v1 = vmul.f32 %v9163_v0, %v1961_v29 }
 0x25e   :  { %v2643_v30 = vmax.f32 %v2503_v49, %v2517_v51  ;;  %v2518_v38 = vadd.f32 %v9174_v14, %v2287_v25 }
 0x25f   :  { %v2641_v39 = vmax.f32 %v2501_v32, %v2515_v10  ;;  %v2516_v19 = vadd.f32 %v9174_v14, %v2285_v1 }
 0x260   :  { %v2755_v13 = vmax.f32 %v2643_v30, 0.0  ;;  %v2644_v20 = vmax.f32 %v2504_v44, %v2518_v38 }
 0x261   :  { %v2753_v22 = vmax.f32 %v2641_v39, 0.0  ;;  %v2642_v4 = vmax.f32 %v2502_v63, %v2516_v19  ;;  %v7064_v59 = vpop.f32.mrb[196].mxu0 }
 0x262   :  { %2828 = vst.msk [vmem:[#allocation2 + $0x329] sm:$0xff] %vm2780_vm2, %v2755_v13  ;;  %v9251_v34 = vmax.f32 %v2644_v20, 0.0  ;;  %v1974_v35 = vpop.f32.mrb[197].mxu0  ;;  %v2290_v27 = vmul.f32 %v9163_v0, %v7064_v59 }
 0x263   :  { %2826 = vst.msk [vmem:[#allocation2 + $0x319] sm:$0xff] %vm2780_vm2, %v2753_v22  ;;  %v9254_v21 = vpack.c.bf16 %v2753_v22, %v2752_v41  ;;  %v2754_v49 = vmax.f32 %v2642_v4, 0.0  ;;  %v7065_v51 = vpop.f32.mrb[198].mxu0  ;;  %v2945_v30 = vld [vmem:[#allocation2 + $0x310] sm:$0xff] }
 0x264   :  { %2829 = vst.msk [vmem:[#allocation2 + $0x331] sm:$0xff] %vm2780_vm2, %v9251_v34  ;;  %v1977_v52 = vpop.f32.mrb[199].mxu0  ;;  %v2943_v25 = vld [vmem:[#allocation2 + $0x300] sm:$0xff]  ;;  %v2944_v29 = vld [vmem:[#allocation2 + $0x308] sm:$0xff] }
 0x265   :  { %2827 = vst.msk [vmem:[#allocation2 + $0x321] sm:$0xff] %vm2780_vm2, %v2754_v49  ;;  %v9259_v32 = vpack.c.bf16 %v2755_v13, %v2754_v49  ;;  %v3090_v10 = vpack.c.bf16 %v2944_v29, %v2943_v25  ;;  %v2288_v29 = vmul.f32 %v9163_v0, %v1974_v35  ;;  %v2289_v36 = vmul.f32 %v9163_v0, %v1977_v52 }
 0x267   :  { %7203 = vmatmul.mubr.msk.bf16.gmra.mrb[40].mxu1 %vm2780_vm2, %v3090_v10  ;;  %v2520_v48 = vadd.f32 %v9174_v14, %v2289_v36 }
 0x269   :  { %v7068_v1 = vpop.f32.mrb[200].mxu0 }
 0x26a   :  { %v1990_v44 = vpop.f32.mrb[201].mxu0  ;;  %v2946_v41 = vld [vmem:[#allocation2 + $0x318] sm:$0xff] }
 0x26b   :  { %v9262_v38 = vpop.f32.mrb[202].mxu0  ;;  %v3091_v63 = vpack.c.bf16 %v2946_v41, %v2945_v30  ;;  %v2292_v52 = vmul.f32 %v9163_v0, %v1990_v44 }
 0x26c   :  { %v1993_v39 = vpop.f32.mrb[203].mxu0  ;;  %v2947_v19 = vld [vmem:[#allocation2 + $0x320] sm:$0xff]  ;;  %v2948_v20 = vld [vmem:[#allocation2 + $0x328] sm:$0xff] }
 0x26d   :  { %7206 = vmatprep.mubr.msk.bf16.mxu1 %vm2780_vm2, %v3091_v63  ;;  %v3092_v22 = vpack.c.bf16 %v2948_v20, %v2947_v19  ;;  %v2519_v63 = vadd.f32 %v9174_v14, %v2288_v29  ;;  %v2293_v29 = vmul.f32 %v9163_v0, %v1993_v39 }
 0x26f   :  { %7207 = vmatmul.mubr.msk.bf16.gmra.mrb[44].mxu1 %vm2780_vm2, %v3092_v22 }
 0x271   :  { %v9266_v13 = vpop.f32.mrb[204].mxu0 }
 0x272   :  { %v2006_v4 = vpop.f32.mrb[205].mxu0 }
 0x273   :  { %v9268_v49 = vpop.f32.mrb[206].mxu0 }
 0x274   :  { %v2009_v25 = vpop.f32.mrb[207].mxu0 }
 0x279   :  { %v7076_v10 = vpop.f32.mrb[208].mxu0 }
 0x27a   :  { %v2302_v30 = vmul.f32 %v9163_v0, %v7076_v10  ;;  %v9273_v41 = vpop.f32.mrb[209].mxu0 }
 0x27b   :  { %v7077_v53 = vpop.f32.mrb[210].mxu0 }
 0x27c   :  { %v2533_v19 = vadd.f32 %v9174_v14, %v2302_v30  ;;  %v2303_v20 = vmul.f32 %v9163_v0, %v7077_v53  ;;  %v9278_v22 = vpop.f32.mrb[211].mxu0 }
 0x27e   :  { %v2645_v11 = vmax.f32 %v2519_v63, %v2533_v19  ;;  %v2534_v35 = vadd.f32 %v9174_v14, %v2303_v20  ;;  %v2291_v19 = vmul.f32 %v9163_v0, %v7065_v51  ;;  %v2524_v51 = vadd.f32 %v9174_v14, %v2293_v29 }
 0x280   :  { %v2757_v9 = vmax.f32 %v2645_v11, 0.0  ;;  %v2646_v10 = vmax.f32 %v2520_v48, %v2534_v35  ;;  %v2523_v48 = vadd.f32 %v9174_v14, %v2292_v52 }
 0x281   :  { %v7080_v62 = vpop.f32.mrb[212].mxu0 }
 0x282   :  { %2886 = vst.msk [vmem:[#allocation2 + $0x3c0] sm:$0xff] %vm2780_vm2, %v2757_v9  ;;  %v9287_v53 = vpack.c.bf16 %v2757_v9, %v9225_v37  ;;  %v2758_v30 = vmax.f32 %v2646_v10, 0.0  ;;  %v2306_v36 = vmul.f32 %v9163_v0, %v7080_v62  ;;  %v2038_v63 = vpop.f32.mrb[213].mxu0  ;;  %v2521_v62 = vadd.f32 %v9174_v14, %v2290_v27 }
 0x283   :  { %v2304_v44 = vmul.f32 %v9163_v0, %v2038_v63  ;;  %v7081_v11 = vpop.f32.mrb[214].mxu0  ;;  %v2522_v10 = vadd.f32 %v9174_v14, %v2291_v19  ;;  %v2294_v27 = vmul.f32 %v9163_v0, %v7068_v1 }
 0x284   :  { %10313 = vst [vmem:[#allocation22_spill] sm:$0xff] %v9287_v53  ;;  %2887 = vst.msk [vmem:[#allocation2 + $0x3c8] sm:$0xff] %vm2780_vm2, %v2758_v30  ;;  %v2537_v59 = vadd.f32 %v9174_v14, %v2306_v36  ;;  %v2307_v39 = vmul.f32 %v9163_v0, %v7081_v11  ;;  %v2041_v20 = vpop.f32.mrb[215].mxu0  ;;  %7146 = vmatprep.mubr.msk.bf16.mxu0 %vm2780_vm2, %v9287_v53  ;;  %v2296_v11 = vmul.f32 %v9163_v0, %v2006_v4 }
 0x285   :  { %v2535_v9 = vadd.f32 %v9174_v14, %v2304_v44  ;;  %v2305_v37 = vmul.f32 %v9163_v0, %v2041_v20  ;;  %v2297_v20 = vmul.f32 %v9163_v0, %v2009_v25 }
 0x286   :  { %v2649_v35 = vmax.f32 %v2523_v48, %v2537_v59  ;;  %v2538_v52 = vadd.f32 %v9174_v14, %v2307_v39  ;;  %v2295_v59 = vmul.f32 %v9163_v0, %v9262_v38 }
 0x287   :  { %v2647_v36 = vmax.f32 %v2521_v62, %v2535_v9  ;;  %v2536_v63 = vadd.f32 %v9174_v14, %v2305_v37  ;;  %v2527_v9 = vadd.f32 %v9174_v14, %v2296_v11  ;;  %v2525_v37 = vadd.f32 %v9174_v14, %v2294_v27 }
 0x288   :  { %v2761_v3 = vmax.f32 %v2649_v35, 0.0  ;;  %v2650_v53 = vmax.f32 %v2524_v51, %v2538_v52  ;;  %v2528_v51 = vadd.f32 %v9174_v14, %v2297_v20 }
 0x289   :  { %v2759_v26 = vmax.f32 %v2647_v36, 0.0  ;;  %v2648_v44 = vmax.f32 %v2522_v10, %v2536_v63  ;;  %v7084_v57 = vpop.f32.mrb[216].mxu0  ;;  %v2526_v10 = vadd.f32 %v9174_v14, %v2295_v59  ;;  %v2301_v59 = vmul.f32 %v9163_v0, %v9278_v22 }
 0x28a   :  { %2890 = vst.msk [vmem:[#allocation2 + $0x3e0] sm:$0xff] %vm2780_vm2, %v2761_v3  ;;  %v2762_v29 = vmax.f32 %v2650_v53, 0.0  ;;  %v2310_v48 = vmul.f32 %v9163_v0, %v7084_v57  ;;  %v2054_v19 = vpop.f32.mrb[217].mxu0 }
 0x28b   :  { %2888 = vst.msk [vmem:[#allocation2 + $0x3d0] sm:$0xff] %vm2780_vm2, %v2759_v26  ;;  %v9313_v4 = vpack.c.bf16 %v2759_v26, %v2758_v30  ;;  %v2760_v39 = vmax.f32 %v2648_v44, 0.0  ;;  %v2308_v1 = vmul.f32 %v9163_v0, %v2054_v19  ;;  %v7085_v62 = vpop.f32.mrb[218].mxu0  ;;  %v2298_v44 = vmul.f32 %v9163_v0, %v9266_v13 }
 0x28c   :  { %2891 = vst.msk [vmem:[#allocation2 + $0x3e8] sm:$0xff] %vm2780_vm2, %v2762_v29  ;;  %v2541_v25 = vadd.f32 %v9174_v14, %v2310_v48  ;;  %v2311_v57 = vmul.f32 %v9163_v0, %v7085_v62  ;;  %v2057_v53 = vpop.f32.mrb[219].mxu0 }
 0x28d   :  { %10314 = vst [vmem:[#allocation23_spill] sm:$0xff] %v9313_v4  ;;  %2889 = vst.msk [vmem:[#allocation2 + $0x3d8] sm:$0xff] %vm2780_vm2, %v2760_v39  ;;  %v9322_v38 = vpack.c.bf16 %v2761_v3, %v2760_v39  ;;  %v2539_v26 = vadd.f32 %v9174_v14, %v2308_v1  ;;  %v2309_v30 = vmul.f32 %v9163_v0, %v2057_v53  ;;  %7147 = vmatmul.mubr.msk.bf16.gmra.mrb[16].mxu0 %vm2780_vm2, %v9313_v4 }
 0x28e   :  { %v2653_v35 = vmax.f32 %v2527_v9, %v2541_v25  ;;  %v2542_v52 = vadd.f32 %v9174_v14, %v2311_v57  ;;  %v2300_v3 = vmul.f32 %v9163_v0, %v9273_v41  ;;  %v2299_v41 = vmul.f32 %v9163_v0, %v9268_v49 }
 0x28f   :  { %10315 = vst [vmem:[#allocation24_spill] sm:$0xff] %v9322_v38  ;;  %v2651_v36 = vmax.f32 %v2525_v37, %v2539_v26  ;;  %v2540_v63 = vadd.f32 %v9174_v14, %v2309_v30  ;;  %7150 = vmatprep.mubr.msk.bf16.mxu0 %vm2780_vm2, %v9322_v38  ;;  %v2529_v49 = vadd.f32 %v9174_v14, %v2298_v44 }
 0x290   :  { %v2765_v11 = vmax.f32 %v2653_v35, 0.0  ;;  %v2654_v27 = vmax.f32 %v2528_v51, %v2542_v52  ;;  %v2531_v53 = vadd.f32 %v9174_v14, %v2300_v3  ;;  %v2532_v52 = vadd.f32 %v9174_v14, %v2301_v59 }
 0x291   :  { %v2763_v20 = vmax.f32 %v2651_v36, 0.0  ;;  %v2652_v48 = vmax.f32 %v2526_v10, %v2540_v63  ;;  %v7088_v19 = vpop.f32.mrb[220].mxu0  ;;  %v2530_v63 = vadd.f32 %v9174_v14, %v2299_v41  ;;  %v2949_v41 = vld [vmem:[#allocation2 + $0x330] sm:$0xff] }
 0x292   :  { %2831 = vst.msk [vmem:[#allocation2 + $0x389] sm:$0xff] %vm2780_vm2, %v2765_v11  ;;  %v2766_v39 = vmax.f32 %v2654_v27, 0.0  ;;  %v2314_v1 = vmul.f32 %v9163_v0, %v7088_v19  ;;  %v2070_v62 = vpop.f32.mrb[221].mxu0 }
 0x293   :  { %2892 = vst.msk [vmem:[#allocation2 + $0x3f0] sm:$0xff] %vm2780_vm2, %v2763_v20  ;;  %v9345_v9 = vpack.c.bf16 %v2763_v20, %v2762_v29  ;;  %v2764_v13 = vmax.f32 %v2652_v48, 0.0  ;;  %v2312_v25 = vmul.f32 %v9163_v0, %v2070_v62  ;;  %v7089_v57 = vpop.f32.mrb[222].mxu0 }
 0x294   :  { %2832 = vst.msk [vmem:[#allocation2 + $0x391] sm:$0xff] %vm2780_vm2, %v2766_v39  ;;  %v9350_v22 = vpack.c.bf16 %v2766_v39, %v2765_v11  ;;  %v2545_v37 = vadd.f32 %v9174_v14, %v2314_v1  ;;  %v2315_v26 = vmul.f32 %v9163_v0, %v7089_v57  ;;  %v2073_v30 = vpop.f32.mrb[223].mxu0 }
 0x295   :  { %10316 = vst [vmem:[#allocation25_spill] sm:$0xff] %v9345_v9  ;;  %2830 = vst.msk [vmem:[#allocation2 + $0x381] sm:$0xff] %vm2780_vm2, %v2764_v13  ;;  %v9357_v29 = vpack.c.bf16 %v2764_v13, %v9251_v34  ;;  %v2543_v51 = vadd.f32 %v9174_v14, %v2312_v25  ;;  %v2313_v35 = vmul.f32 %v9163_v0, %v2073_v30  ;;  %7151 = vmatmul.mubr.msk.bf16.gmra.mrb[20].mxu0 %vm2780_vm2, %v9345_v9 }
 0x296   :  { %v2657_v10 = vmax.f32 %v2531_v53, %v2545_v37  ;;  %v2546_v36 = vadd.f32 %v9174_v14, %v2315_v26 }
 0x297   :  { %v2655_v3 = vmax.f32 %v2529_v49, %v2543_v51  ;;  %v2544_v11 = vadd.f32 %v9174_v14, %v2313_v35 }
 0x298   :  { %v2769_v27 = vmax.f32 %v2657_v10, 0.0  ;;  %v2658_v34 = vmax.f32 %v2532_v52, %v2546_v36 }
 0x299   :  { %v2767_v44 = vmax.f32 %v2655_v3, 0.0  ;;  %v2656_v20 = vmax.f32 %v2530_v63, %v2544_v11  ;;  %v9367_v48 = vpop.f32.mrb[224].mxu0 }
 0x29a   :  { %2835 = vst.msk [vmem:[#allocation2 + $0x3a9] sm:$0xff] %vm2780_vm2, %v2769_v27  ;;  %v2770_v0 = vmax.f32 %v2658_v34, 0.0  ;;  %v9370_v19 = vpop.f32.mrb[225].mxu0 }
 0x29b   :  { %2833 = vst.msk [vmem:[#allocation2 + $0x399] sm:$0xff] %vm2780_vm2, %v2767_v44  ;;  %v2768_v59 = vmax.f32 %v2656_v20, 0.0  ;;  %v9373_v39 = vpop.f32.mrb[226].mxu0  ;;  %v2952_v1 = vld [vmem:[#allocation2 + $0x390] sm:$0xff] }
 0x29c   :  { %2836 = vst.msk [vmem:[#allocation2 + $0x3b1] sm:$0xff] %vm2780_vm2, %v2770_v0  ;;  %v9376_v14 = vpack.c.bf16 %v2770_v0, %v2769_v27  ;;  %v9378_v62 = vpop.f32.mrb[227].mxu0  ;;  %v2950_v13 = vld [vmem:[#allocation2 + $0x380] sm:$0xff]  ;;  %v2951_v25 = vld [vmem:[#allocation2 + $0x388] sm:$0xff] }
 0x29d   :  { %2834 = vst.msk [vmem:[#allocation2 + $0x3a1] sm:$0xff] %vm2780_vm2, %v2768_v59  ;;  %v9381_v57 = vpack.c.bf16 %v2768_v59, %v2767_v44  ;;  %v3093_v53 = vpack.c.bf16 %v2950_v13, %v2949_v41  ;;  %v3094_v37 = vpack.c.bf16 %v2952_v1, %v2951_v25  ;;  %v7829_v59 = vld [vmem:[%s10265_s4 + $0x28] sm:$0xff]  }
 0x29f   :  { %7210 = vmatprep.mubr.msk.bf16.mxu1 %vm2780_vm2, %v3093_v53  ;;  %v7831_v53 = vld [vmem:[%s10265_s4 + $0x38] sm:$0xff]  }
 0x2a0   :  { %7211 = vmatmul.mubr.msk.bf16.gmra.mrb[48].mxu1 %vm2780_vm2, %v3094_v37 }
 0x2a1   :  { %v9385_v26 = vpop.f32.mrb[228].mxu0 }
 0x2a2   :  { %v9387_v30 = vpop.f32.mrb[229].mxu0  ;;  %v2953_v52 = vld [vmem:[#allocation2 + $0x398] sm:$0xff] }
 0x2a3   :  { %v9389_v49 = vpop.f32.mrb[230].mxu0  ;;  %v2956_v51 = vld [vmem:[#allocation2 + $0x3b0] sm:$0xff] }
 0x2a4   :  { %v9391_v35 = vpop.f32.mrb[231].mxu0  ;;  %v2954_v10 = vld [vmem:[#allocation2 + $0x3a0] sm:$0xff]  ;;  %v2955_v36 = vld [vmem:[#allocation2 + $0x3a8] sm:$0xff] }
 0x2a5   :  { %v3095_v63 = vpack.c.bf16 %v2954_v10, %v2953_v52  ;;  %v3096_v3 = vpack.c.bf16 %v2956_v51, %v2955_v36  ;;  %v7832_v52 = vld [vmem:[%s10265_s4] sm:$0xff]  }
 0x2a7   :  { %7214 = vmatprep.mubr.msk.bf16.mxu1 %vm2780_vm2, %v3095_v63 }
 0x2a8   :  { %7215 = vmatmul.mubr.msk.bf16.gmra.mrb[52].mxu1 %vm2780_vm2, %v3096_v3 }
 0x2a9   :  { %v9395_v11 = vpop.f32.mrb[232].mxu0  ;;  %7226 = vmatprep.mubr.msk.bf16.mxu1 %vm2780_vm2, %v8288_v55 }
 0x2aa   :  { %v9399_v27 = vpop.f32.mrb[233].mxu0 }
 0x2ab   :  { %v9401_v34 = vpop.f32.mrb[234].mxu0 }
 0x2ac   :  { %v9403_v44 = vpop.f32.mrb[235].mxu0 }
 0x2b0   :  { %7227 = vmatmul.mubr.msk.bf16.vlgmr.msra.gmra.mrb[0].mxu1 %vm2780_vm2, %v8305_v8 }
 0x2b1   :  { %7283 = vmatpush3.bf16.msra.mxu1 %v9093_v2  ;;  %v9408_v20 = vpop.f32.mrb[236].mxu0  ;;  %7230 = vmatprep.mubr.msk.bf16.mxu1 %vm2780_vm2, %v8315_v18  ;;  %v7830_v2 = vld [vmem:[%s10265_s4 + $0x30] sm:$0xff]  }
 0x2b2   :  { %v9412_v0 = vpop.f32.mrb[237].mxu0  ;;  %7284 = vmatprep.subr.bf16.mxu1 %v7829_v59 }
 0x2b3   :  { %v9417_v1 = vpop.f32.mrb[238].mxu0 }
 0x2b4   :  { %v9419_v41 = vpop.f32.mrb[239].mxu0 }
 0x2b5   :  { %7285 = vmatpush3.bf16.msra.mxu1 %v7829_v59 }
 0x2b6   :  { %7286 = vmatprep.subr.bf16.mxu1 %v7830_v2 }
 0x2b8   :  { %7231 = vmatmul.mubr.msk.bf16.gmra.mrb[4].mxu1 %vm2780_vm2, %v8475_v42 }
 0x2b9   :  { %v9426_v13 = vpop.f32.mrb[240].mxu0  ;;  %7234 = vmatprep.mubr.msk.bf16.mxu1 %vm2780_vm2, %v8468_v33  ;;  %7287 = vmatpush3.bf16.msra.mxu1 %v7830_v2 }
 0x2ba   :  { %v9430_v25 = vpop.f32.mrb[241].mxu0  ;;  %7288 = vmatprep.subr.bf16.mxu1 %v7831_v53 }
 0x2bb   :  { %v9435_v37 = vpop.f32.mrb[242].mxu0 }
 0x2bc   :  { %v9437_v51 = vpop.f32.mrb[243].mxu0 }
 0x2bd   :  { %7289 = vmatpush3.bf16.msra.mxu1 %v7831_v53 }
 0x2be   :  { %7346 = vmatprep.subr.bf16.mxu1 %v7832_v52 }
 0x2c0   :  { %7235 = vmatmul.mubr.msk.bf16.gmra.mrb[8].mxu1 %vm2780_vm2, %v8501_v5 }
 0x2c1   :  { %v9444_v10 = vpop.f32.mrb[244].mxu0  ;;  %7238 = vmatprep.mubr.msk.bf16.mxu1 %vm2780_vm2, %v8498_v60 }
 0x2c2   :  { %v9448_v36 = vpop.f32.mrb[245].mxu0 }
 0x2c3   :  { %v9450_v63 = vpop.f32.mrb[246].mxu0 }
 0x2c4   :  { %v9452_v3 = vpop.f32.mrb[247].mxu0 }
 0x2c5   :  { %10317 = vst [vmem:[#allocation26_spill] sm:$0xff] %v9452_v3 }
 0x2c8   :  { %7239 = vmatmul.mubr.msk.bf16.gmra.mrb[12].mxu1 %vm2780_vm2, %v8644_v46 }
 0x2c9   :  { %v9456_v59 = vpop.f32.mrb[248].mxu0  ;;  %7242 = vmatprep.mubr.msk.bf16.mxu1 %vm2780_vm2, %v8663_v17 }
 0x2ca   :  { %10318 = vst [vmem:[#allocation27_spill] sm:$0xff] %v9456_v59  ;;  %v9460_v2 = vpop.f32.mrb[249].mxu0 }
 0x2cb   :  { %v9462_v53 = vpop.f32.mrb[250].mxu0 }
 0x2cc   :  { %10319 = vst [vmem:[#allocation28_spill] sm:$0xff] %v9462_v53  ;;  %v9464_v9 = vpop.f32.mrb[251].mxu0 }
 0x2cd   :  { %10320 = vst [vmem:[#allocation29_spill] sm:$0xff] %v9464_v9 }
 0x2d0   :  { %7243 = vmatmul.mubr.msk.bf16.gmra.mrb[16].mxu1 %vm2780_vm2, %v8673_v16 }
 0x2d1   :  { %v9468_v38 = vpop.f32.mrb[252].mxu0  ;;  %7246 = vmatprep.mubr.msk.bf16.mxu1 %vm2780_vm2, %v8828_v43 }
 0x2d2   :  { %10321 = vst [vmem:[#allocation30_spill] sm:$0xff] %v9468_v38  ;;  %v9472_v4 = vpop.f32.mrb[253].mxu0 }
 0x2d3   :  { %10322 = vst [vmem:[#allocation31_spill] sm:$0xff] %v9472_v4  ;;  %v9474_v59 = vpop.f32.mrb[254].mxu0 }
 0x2d4   :  { %10323 = vst [vmem:[#allocation32_spill] sm:$0xff] %v9474_v59  ;;  %v9476_v3 = vpop.f32.mrb[255].mxu0 }
 0x2d5   :  { %10324 = vst [vmem:[#allocation33_spill] sm:$0xff] %v9476_v3 }
 0x2d8   :  { %7247 = vmatmul.mubr.msk.bf16.gmra.mrb[20].mxu1 %vm2780_vm2, %v8821_v31 }
 0x2d9   :  { %7250 = vmatprep.mubr.msk.bf16.mxu1 %vm2780_vm2, %v8851_v7 }
 0x2e0   :  { %7251 = vmatmul.mubr.msk.bf16.gmra.mrb[24].mxu1 %vm2780_vm2, %v8848_v54 }
 0x2e1   :  { %7254 = vmatprep.mubr.msk.bf16.mxu1 %vm2780_vm2, %v8975_v23 }
 0x2e7   :  { %v9486_v38 = vpop.f32.mrb[0].mxu0 }
 0x2e8   :  { %10325 = vst [vmem:[#allocation34_spill] sm:$0xff] %v9486_v38  ;;  %v9488_v9 = vpop.f32.mrb[1].mxu0  ;;  %7255 = vmatmul.mubr.msk.bf16.gmra.mrb[28].mxu1 %vm2780_vm2, %v8991_v56 }
 0x2e9   :  { %10326 = vst [vmem:[#allocation35_spill] sm:$0xff] %v9488_v9  ;;  %v9492_v3 = vpop.f32.mrb[2].mxu0  ;;  %7258 = vmatprep.mubr.msk.bf16.mxu1 %vm2780_vm2, %v8996_v40 }
 0x2ea   :  { %v9496_v59 = vpop.f32.mrb[3].mxu0 }
 0x2eb   :  { %10327 = vst [vmem:[#allocation36_spill] sm:$0xff] %v9496_v59 }
 0x2f0   :  { %7259 = vmatmul.mubr.msk.bf16.gmra.mrb[32].mxu1 %vm2780_vm2, %v9117_v28 }
 0x2f1   :  { %7262 = vmatprep.mubr.msk.bf16.mxu1 %vm2780_vm2, %v9110_v15 }
 0x2f2   :  { %v9502_v4 = vpop.f32.mrb[4].mxu0 }
 0x2f3   :  { %10328 = vst [vmem:[#allocation37_spill] sm:$0xff] %v9502_v4  ;;  %v9504_v38 = vpop.f32.mrb[5].mxu0 }
 0x2f4   :  { %10329 = vst [vmem:[#allocation38_spill] sm:$0xff] %v9504_v38  ;;  %v9506_v9 = vpop.f32.mrb[6].mxu0  ;;  %v7833_v38 = vld [vmem:[%s10265_s4 + $0x8] sm:$0xff]  }
 0x2f5   :  { %10330 = vst [vmem:[#allocation39_spill] sm:$0xff] %v9506_v9  ;;  %v9508_v53 = vpop.f32.mrb[7].mxu0 }
 0x2f6   :  { %10331 = vst [vmem:[#allocation40_spill] sm:$0xff] %v9508_v53 }
 0x2f8   :  { %7263 = vmatmul.mubr.msk.bf16.gmra.mrb[36].mxu1 %vm2780_vm2, %v9133_v12 }
 0x2f9   :  { %7266 = vmatprep.mubr.msk.bf16.mxu1 %vm2780_vm2, %v9130_v58 }
 0x300   :  { %7267 = vmatmul.mubr.msk.bf16.gmra.mrb[40].mxu1 %vm2780_vm2, %v9242_v45 }
 0x301   :  { %7270 = vmatprep.mubr.msk.bf16.mxu1 %vm2780_vm2, %v9254_v21 }
 0x308   :  { %7271 = vmatmul.mubr.msk.bf16.gmra.mrb[44].mxu1 %vm2780_vm2, %v9259_v32 }
 0x309   :  { %7274 = vmatprep.mubr.msk.bf16.mxu1 %vm2780_vm2, %v9357_v29 }
 0x310   :  { %7275 = vmatmul.mubr.msk.bf16.gmra.mrb[48].mxu1 %vm2780_vm2, %v9350_v22 }
 0x311   :  { %7278 = vmatprep.mubr.msk.bf16.mxu1 %vm2780_vm2, %v9381_v57 }
 0x318   :  { %7279 = vmatmul.mubr.msk.bf16.gmra.mrb[52].mxu1 %vm2780_vm2, %v9376_v14 }
 0x319   :  { %7290 = vmatprep.mubr.msk.bf16.mxu1 %vm2780_vm2, %v8288_v55  ;;  %v7834_v55 = vld [vmem:[%s10265_s4 + $0x10] sm:$0xff]  }
 0x320   :  { %7291 = vmatmul.mubr.msk.bf16.vlgmr.msra.gmra.mrb[56].mxu1 %vm2780_vm2, %v8305_v8  ;;  %v7835_v8 = vld [vmem:[%s10265_s4 + $0x18] sm:$0xff]  }
 0x321   :  { %7347 = vmatpush3.bf16.msra.mxu1 %v7832_v52  ;;  %v9532_v53 = vpop.f32.mrb[8].mxu0  ;;  %7294 = vmatprep.mubr.msk.bf16.mxu1 %vm2780_vm2, %v8315_v18 }
 0x322   :  { %v9536_v9 = vpop.f32.mrb[9].mxu0  ;;  %7348 = vmatprep.subr.bf16.mxu1 %v7833_v38 }
 0x323   :  { %v9541_v4 = vpop.f32.mrb[10].mxu0 }
 0x324   :  { %v9543_v59 = vpop.f32.mrb[11].mxu0 }
 0x325   :  { %10332 = vst [vmem:[#allocation41_spill] sm:$0xff] %v9543_v59  ;;  %7349 = vmatpush3.bf16.msra.mxu1 %v7833_v38 }
 0x326   :  { %7350 = vmatprep.subr.bf16.mxu1 %v7834_v55 }
 0x328   :  { %7295 = vmatmul.mubr.msk.bf16.gmra.mrb[60].mxu1 %vm2780_vm2, %v8475_v42  ;;  %v7836_v42 = vld [vmem:[%s10265_s4 + $0x40] sm:$0xff]  }
 0x329   :  { %7298 = vmatprep.mubr.msk.bf16.mxu1 %vm2780_vm2, %v8468_v33  ;;  %7351 = vmatpush3.bf16.msra.mxu1 %v7834_v55 }
 0x32a   :  { %7352 = vmatprep.subr.bf16.mxu1 %v7835_v8 }
 0x32b   :  { %v9555_v18 = vpop.f32.mrb[12].mxu0 }
 0x32c   :  { %v9557_v38 = vpop.f32.mrb[13].mxu0 }
 0x32d   :  { %v9559_v52 = vpop.f32.mrb[14].mxu0  ;;  %7353 = vmatpush3.bf16.msra.mxu1 %v7835_v8 }
 0x32e   :  { %v9561_v59 = vpop.f32.mrb[15].mxu0  ;;  %7410 = vmatprep.subr.bf16.mxu1 %v7836_v42 }
 0x330   :  { %7299 = vmatmul.mubr.msk.bf16.gmra.mrb[64].mxu1 %vm2780_vm2, %v8501_v5 }
 0x331   :  { %7302 = vmatprep.mubr.msk.bf16.mxu1 %vm2780_vm2, %v8498_v60 }
 0x338   :  { %7303 = vmatmul.mubr.msk.bf16.gmra.mrb[68].mxu1 %vm2780_vm2, %v8644_v46 }
 0x339   :  { %7306 = vmatprep.mubr.msk.bf16.mxu1 %vm2780_vm2, %v8663_v17 }
 0x340   :  { %7307 = vmatmul.mubr.msk.bf16.gmra.mrb[72].mxu1 %vm2780_vm2, %v8673_v16 }
 0x341   :  { %7310 = vmatprep.mubr.msk.bf16.mxu1 %vm2780_vm2, %v8828_v43 }
 0x348   :  { %7311 = vmatmul.mubr.msk.bf16.gmra.mrb[76].mxu1 %vm2780_vm2, %v8821_v31 }
 0x349   :  { %7314 = vmatprep.mubr.msk.bf16.mxu1 %vm2780_vm2, %v8851_v7 }
 0x350   :  { %7315 = vmatmul.mubr.msk.bf16.gmra.mrb[80].mxu1 %vm2780_vm2, %v8848_v54 }
 0x351   :  { %7318 = vmatprep.mubr.msk.bf16.mxu1 %vm2780_vm2, %v8975_v23 }
 0x358   :  { %7319 = vmatmul.mubr.msk.bf16.gmra.mrb[84].mxu1 %vm2780_vm2, %v8991_v56 }
 0x359   :  { %7322 = vmatprep.mubr.msk.bf16.mxu1 %vm2780_vm2, %v8996_v40 }
 0x360   :  { %v9590_v33 = vpop.f32.mrb[16].mxu0  ;;  %7323 = vmatmul.mubr.msk.bf16.gmra.mrb[88].mxu1 %vm2780_vm2, %v9117_v28 }
 0x361   :  { %v9594_v60 = vpop.f32.mrb[17].mxu0  ;;  %7326 = vmatprep.mubr.msk.bf16.mxu1 %vm2780_vm2, %v9110_v15 }
 0x362   :  { %v9598_v5 = vpop.f32.mrb[18].mxu0 }
 0x363   :  { %v9600_v46 = vpop.f32.mrb[19].mxu0 }
 0x368   :  { %v9602_v17 = vpop.f32.mrb[20].mxu0  ;;  %7327 = vmatmul.mubr.msk.bf16.gmra.mrb[92].mxu1 %vm2780_vm2, %v9133_v12 }
 0x369   :  { %v9606_v16 = vpop.f32.mrb[21].mxu0  ;;  %7330 = vmatprep.mubr.msk.bf16.mxu1 %vm2780_vm2, %v9130_v58 }
 0x36a   :  { %v9610_v31 = vpop.f32.mrb[22].mxu0 }
 0x36b   :  { %v9612_v43 = vpop.f32.mrb[23].mxu0 }
 0x370   :  { %7331 = vmatmul.mubr.msk.bf16.gmra.mrb[96].mxu1 %vm2780_vm2, %v9242_v45 }
 0x371   :  { %7334 = vmatprep.mubr.msk.bf16.mxu1 %vm2780_vm2, %v9254_v21 }
 0x378   :  { %7335 = vmatmul.mubr.msk.bf16.gmra.mrb[100].mxu1 %vm2780_vm2, %v9259_v32 }
 0x379   :  { %7338 = vmatprep.mubr.msk.bf16.mxu1 %vm2780_vm2, %v9357_v29 }
 0x380   :  { %7339 = vmatmul.mubr.msk.bf16.gmra.mrb[104].mxu1 %vm2780_vm2, %v9350_v22 }
 0x381   :  { %7342 = vmatprep.mubr.msk.bf16.mxu1 %vm2780_vm2, %v9381_v57 }
 0x383   :  { %v7228_v54 = vpop.f32.mrb[0].mxu1 }
 0x384   :  { %v9627_v7 = vadd.f32 %v7228_v54, %v9367_v48  ;;  %v4023_v23 = vpop.f32.mrb[1].mxu1  ;;  %v10334_v54 = vld [vmem:[#allocation4_spill] sm:$0xff] }
 0x385   :  { %v9630_v56 = vadd.f32 %v4023_v23, %v9370_v19  ;;  %v7229_v40 = vpop.f32.mrb[2].mxu1 }
 0x386   :  { %v9633_v15 = vadd.f32 %v7229_v40, %v9373_v39  ;;  %v4026_v28 = vpop.f32.mrb[3].mxu1 }
 0x387   :  { %v9636_v58 = vadd.f32 %v4026_v28, %v9378_v62 }
 0x388   :  { %7343 = vmatmul.mubr.msk.bf16.gmra.mrb[108].mxu1 %vm2780_vm2, %v9376_v14 }
 0x389   :  { %7354 = vmatprep.mubr.msk.bf16.mxu1 %vm2780_vm2, %v8213_v50  ;;  %v7837_v50 = vld [vmem:[%s10265_s4 + $0x48] sm:$0xff]  }
 0x38b   :  { %v7232_v12 = vpop.f32.mrb[4].mxu1 }
 0x38c   :  { %v9643_v45 = vadd.f32 %v7232_v12, %v9385_v26  ;;  %v4039_v21 = vpop.f32.mrb[5].mxu1 }
 0x38d   :  { %v9646_v32 = vadd.f32 %v4039_v21, %v9387_v30  ;;  %v7233_v22 = vpop.f32.mrb[6].mxu1  ;;  %v10335_v21 = vld [vmem:[#allocation5_spill] sm:$0xff] }
 0x38e   :  { %v9649_v29 = vadd.f32 %v7233_v22, %v9389_v49  ;;  %v4042_v48 = vpop.f32.mrb[7].mxu1  ;;  %v10336_v22 = vld [vmem:[#allocation7_spill] sm:$0xff] }
 0x38f   :  { %v9652_v19 = vadd.f32 %v4042_v48, %v9391_v35  ;;  %v7839_v35 = vld [vmem:[%s10265_s4 + $0x58] sm:$0xff]  }
 0x390   :  { %7355 = vmatmul.mubr.msk.bf16.vlgmr.msra.gmra.mrb[56].mxu1 %vm2780_vm2, %v8249_v24 }
 0x391   :  { %7411 = vmatpush3.bf16.msra.mxu1 %v7836_v42  ;;  %7358 = vmatprep.mubr.msk.bf16.mxu1 %vm2780_vm2, %v8245_v6  ;;  %v7838_v6 = vld [vmem:[%s10265_s4 + $0x50] sm:$0xff]   ;;  %v10333_v42 = vld [vmem:[#allocation3_spill] sm:$0xff] }
 0x392   :  { %7412 = vmatprep.subr.bf16.mxu1 %v7837_v50 }
 0x393   :  { %v7236_v39 = vpop.f32.mrb[8].mxu1 }
 0x394   :  { %v9662_v14 = vadd.f32 %v7236_v39, %v9395_v11  ;;  %v4055_v62 = vpop.f32.mrb[9].mxu1 }
 0x395   :  { %v9665_v57 = vadd.f32 %v4055_v62, %v9399_v27  ;;  %v7237_v26 = vpop.f32.mrb[10].mxu1  ;;  %7413 = vmatpush3.bf16.msra.mxu1 %v7837_v50  ;;  %v10337_v62 = vld [vmem:[#allocation26_spill] sm:$0xff] }
 0x396   :  { %v9668_v24 = vadd.f32 %v7237_v26, %v9401_v34  ;;  %v4058_v30 = vpop.f32.mrb[11].mxu1  ;;  %7414 = vmatprep.subr.bf16.mxu1 %v7838_v6 }
 0x397   :  { %v9674_v49 = vadd.f32 %v4058_v30, %v9403_v44  ;;  %v10338_v30 = vld [vmem:[#allocation6_spill] sm:$0xff] }
 0x398   :  { %7359 = vmatmul.mubr.msk.bf16.gmra.mrb[60].mxu1 %vm2780_vm2, %v8374_v61 }
 0x399   :  { %7362 = vmatprep.mubr.msk.bf16.mxu1 %vm2780_vm2, %v8418_v47  ;;  %7415 = vmatpush3.bf16.msra.mxu1 %v7838_v6  ;;  %v10339_v6 = vld [vmem:[#allocation8_spill] sm:$0xff] }
 0x39a   :  { %7416 = vmatprep.subr.bf16.mxu1 %v7839_v35 }
 0x39b   :  { %v7240_v11 = vpop.f32.mrb[12].mxu1 }
 0x39c   :  { %v9684_v27 = vadd.f32 %v7240_v11, %v9408_v20  ;;  %v4071_v34 = vpop.f32.mrb[13].mxu1 }
 0x39d   :  { %v9687_v44 = vadd.f32 %v4071_v34, %v9412_v0  ;;  %v7241_v55 = vpop.f32.mrb[14].mxu1  ;;  %7417 = vmatpush3.bf16.msra.mxu1 %v7839_v35  ;;  %v10340_v35 = vld [vmem:[#allocation27_spill] sm:$0xff] }
 0x39e   :  { %v9690_v61 = vadd.f32 %v7241_v55, %v9417_v1  ;;  %v4074_v47 = vpop.f32.mrb[15].mxu1  ;;  %v10341_v55 = vld [vmem:[#allocation28_spill] sm:$0xff] }
 0x39f   :  { %v9693_v8 = vadd.f32 %v4074_v47, %v9419_v41 }
 0x3a0   :  { %7363 = vmatmul.mubr.msk.bf16.gmra.mrb[64].mxu1 %vm2780_vm2, %v10333_v42 }
 0x3a1   :  { %7366 = vmatprep.mubr.msk.bf16.mxu1 %vm2780_vm2, %v10334_v54  ;;  %v10342_v54 = vld [vmem:[#allocation29_spill] sm:$0xff] }
 0x3a3   :  { %v7244_v20 = vpop.f32.mrb[16].mxu1 }
 0x3a4   :  { %v9700_v23 = vadd.f32 %v7244_v20, %v9426_v13  ;;  %v4087_v0 = vpop.f32.mrb[17].mxu1 }
 0x3a5   :  { %v9703_v40 = vadd.f32 %v4087_v0, %v9430_v25  ;;  %v7245_v1 = vpop.f32.mrb[18].mxu1  ;;  %v10343_v0 = vld [vmem:[#allocation9_spill] sm:$0xff] }
 0x3a6   :  { %v9706_v28 = vadd.f32 %v7245_v1, %v9435_v37  ;;  %v4090_v41 = vpop.f32.mrb[19].mxu1  ;;  %v10344_v1 = vld [vmem:[#allocation10_spill] sm:$0xff] }
 0x3a7   :  { %v9709_v12 = vadd.f32 %v4090_v41, %v9437_v51 }
 0x3a8   :  { %7367 = vmatmul.mubr.msk.bf16.gmra.mrb[68].mxu1 %vm2780_vm2, %v10335_v21  ;;  %v10345_v21 = vld [vmem:[#allocation30_spill] sm:$0xff] }
 0x3a9   :  { %7370 = vmatprep.mubr.msk.bf16.mxu1 %vm2780_vm2, %v10336_v22 }
 0x3ab   :  { %v7248_v13 = vpop.f32.mrb[20].mxu1 }
 0x3ac   :  { %v9716_v48 = vadd.f32 %v7248_v13, %v9444_v10  ;;  %v4103_v25 = vpop.f32.mrb[21].mxu1  ;;  %v10346_v13 = vld [vmem:[#allocation31_spill] sm:$0xff] }
 0x3ad   :  { %v9719_v50 = vadd.f32 %v4103_v25, %v9448_v36  ;;  %v7249_v37 = vpop.f32.mrb[22].mxu1 }
 0x3ae   :  { %v9722_v39 = vadd.f32 %v7249_v37, %v9450_v63  ;;  %v4106_v51 = vpop.f32.mrb[23].mxu1 }
 0x3af   :  { %v9725_v26 = vadd.f32 %v4106_v51, %v10337_v62  ;;  %v10347_v51 = vld [vmem:[#allocation32_spill] sm:$0xff] }
 0x3b0   :  { %7371 = vmatmul.mubr.msk.bf16.gmra.mrb[72].mxu1 %vm2780_vm2, %v10338_v30 }
 0x3b1   :  { %7374 = vmatprep.mubr.msk.bf16.mxu1 %vm2780_vm2, %v10339_v6  ;;  %v10348_v6 = vld [vmem:[#allocation33_spill] sm:$0xff] }
 0x3b3   :  { %v7252_v10 = vpop.f32.mrb[24].mxu1 }
 0x3b4   :  { %v9732_v11 = vadd.f32 %v7252_v10, %v10340_v35  ;;  %v4119_v36 = vpop.f32.mrb[25].mxu1  ;;  %v10349_v35 = vld [vmem:[#allocation11_spill] sm:$0xff] }
 0x3b5   :  { %v9735_v34 = vadd.f32 %v4119_v36, %v9460_v2  ;;  %v7253_v63 = vpop.f32.mrb[26].mxu1  ;;  %v10350_v36 = vld [vmem:[#allocation12_spill] sm:$0xff] }
 0x3b6   :  { %v9738_v47 = vadd.f32 %v7253_v63, %v10341_v55  ;;  %v4122_v42 = vpop.f32.mrb[27].mxu1  ;;  %v10351_v55 = vld [vmem:[#allocation34_spill] sm:$0xff] }
 0x3b7   :  { %v9741_v20 = vadd.f32 %v4122_v42, %v10342_v54 }
 0x3b8   :  { %7375 = vmatmul.mubr.msk.bf16.gmra.mrb[76].mxu1 %vm2780_vm2, %v10343_v0  ;;  %v10352_v0 = vld [vmem:[#allocation35_spill] sm:$0xff] }
 0x3b9   :  { %7378 = vmatprep.mubr.msk.bf16.mxu1 %vm2780_vm2, %v10344_v1 }
 0x3bb   :  { %v7256_v41 = vpop.f32.mrb[28].mxu1 }
 0x3bc   :  { %v9748_v22 = vadd.f32 %v7256_v41, %v10345_v21  ;;  %v4135_v2 = vpop.f32.mrb[29].mxu1 }
 0x3bd   :  { %v9751_v25 = vadd.f32 %v4135_v2, %v10346_v13  ;;  %v7257_v37 = vpop.f32.mrb[30].mxu1  ;;  %v10353_v13 = vld [vmem:[#allocation36_spill] sm:$0xff] }
 0x3be   :  { %v9754_v62 = vadd.f32 %v7257_v37, %v10347_v51  ;;  %v4138_v30 = vpop.f32.mrb[31].mxu1  ;;  %v10355_v51 = vld [vmem:[#allocation14_spill] sm:$0xff] }
 0x3bf   :  { %v9757_v10 = vadd.f32 %v4138_v30, %v10348_v6  ;;  %v10356_v30 = vld [vmem:[#allocation13_spill] sm:$0xff] }
 0x3c0   :  { %7379 = vmatmul.mubr.msk.bf16.gmra.mrb[80].mxu1 %vm2780_vm2, %v10349_v35  ;;  %v10357_v35 = vld [vmem:[#allocation37_spill] sm:$0xff] }
 0x3c1   :  { %7382 = vmatprep.mubr.msk.bf16.mxu1 %vm2780_vm2, %v10350_v36 }
 0x3c3   :  { %v7260_v63 = vpop.f32.mrb[32].mxu1 }
 0x3c4   :  { %v9764_v42 = vadd.f32 %v7260_v63, %v10351_v55  ;;  %v4151_v54 = vpop.f32.mrb[33].mxu1  ;;  %v10358_v55 = vld [vmem:[#allocation38_spill] sm:$0xff] }
 0x3c5   :  { %v9767_v1 = vadd.f32 %v4151_v54, %v10352_v0  ;;  %v7261_v41 = vpop.f32.mrb[34].mxu1  ;;  %v10359_v0 = vld [vmem:[#allocation39_spill] sm:$0xff] }
 0x3c6   :  { %v9770_v21 = vadd.f32 %v7261_v41, %v9492_v3  ;;  %v4154_v2 = vpop.f32.mrb[35].mxu1 }
 0x3c7   :  { %v9773_v37 = vadd.f32 %v4154_v2, %v10353_v13  ;;  %v10360_v13 = vld [vmem:[#allocation40_spill] sm:$0xff] }
 0x3c8   :  { %7383 = vmatmul.mubr.msk.bf16.gmra.mrb[84].mxu1 %vm2780_vm2, %v10355_v51  ;;  %v10362_v51 = vld [vmem:[#allocation15_spill] sm:$0xff] }
 0x3c9   :  { %10354 = vst [vmem:[#allocation3_spill] sm:$0xff] %v9773_v37  ;;  %7386 = vmatprep.mubr.msk.bf16.mxu1 %vm2780_vm2, %v10356_v30  ;;  %v10363_v30 = vld [vmem:[#allocation16_spill] sm:$0xff] }
 0x3cb   :  { %v7264_v6 = vpop.f32.mrb[36].mxu1 }
 0x3cc   :  { %v9780_v36 = vadd.f32 %v7264_v6, %v10357_v35  ;;  %v4167_v63 = vpop.f32.mrb[37].mxu1 }
 0x3cd   :  { %v9783_v54 = vadd.f32 %v4167_v63, %v10358_v55  ;;  %v7265_v3 = vpop.f32.mrb[38].mxu1 }
 0x3ce   :  { %v9786_v41 = vadd.f32 %v7265_v3, %v10359_v0  ;;  %v4170_v2 = vpop.f32.mrb[39].mxu1 }
 0x3cf   :  { %v9789_v37 = vadd.f32 %v4170_v2, %v10360_v13  ;;  %v10364_v13 = vld [vmem:[#allocation41_spill] sm:$0xff] }
 0x3d0   :  { %7387 = vmatmul.mubr.msk.bf16.gmra.mrb[88].mxu1 %vm2780_vm2, %v10362_v51  ;;  %v10365_v51 = vld [vmem:[#allocation17_spill] sm:$0xff] }
 0x3d1   :  { %10361 = vst [vmem:[#allocation4_spill] sm:$0xff] %v9789_v37  ;;  %7390 = vmatprep.mubr.msk.bf16.mxu1 %vm2780_vm2, %v10363_v30  ;;  %v10366_v30 = vld [vmem:[#allocation18_spill] sm:$0xff] }
 0x3d3   :  { %v7268_v6 = vpop.f32.mrb[40].mxu1 }
 0x3d4   :  { %v9796_v35 = vadd.f32 %v7268_v6, %v9532_v53  ;;  %v4183_v63 = vpop.f32.mrb[41].mxu1 }
 0x3d5   :  { %v9799_v55 = vadd.f32 %v4183_v63, %v9536_v9  ;;  %v7269_v3 = vpop.f32.mrb[42].mxu1 }
 0x3d6   :  { %v9802_v0 = vadd.f32 %v7269_v3, %v9541_v4  ;;  %v4186_v2 = vpop.f32.mrb[43].mxu1 }
 0x3d7   :  { %v9805_v37 = vadd.f32 %v4186_v2, %v10364_v13 }
 0x3d8   :  { %7391 = vmatmul.mubr.msk.bf16.gmra.mrb[92].mxu1 %vm2780_vm2, %v10365_v51  ;;  %v10367_v51 = vld [vmem:[#allocation19_spill] sm:$0xff] }
 0x3d9   :  { %7394 = vmatprep.mubr.msk.bf16.mxu1 %vm2780_vm2, %v10366_v30  ;;  %v10368_v30 = vld [vmem:[#allocation21_spill] sm:$0xff] }
 0x3db   :  { %v7272_v53 = vpop.f32.mrb[44].mxu1 }
 0x3dc   :  { %v9812_v6 = vadd.f32 %v7272_v53, %v9555_v18  ;;  %v4199_v9 = vpop.f32.mrb[45].mxu1 }
 0x3dd   :  { %v9815_v63 = vadd.f32 %v4199_v9, %v9557_v38  ;;  %v7273_v4 = vpop.f32.mrb[46].mxu1 }
 0x3de   :  { %v9818_v3 = vadd.f32 %v7273_v4, %v9559_v52  ;;  %v4202_v2 = vpop.f32.mrb[47].mxu1 }
 0x3df   :  { %v9821_v13 = vadd.f32 %v4202_v2, %v9561_v59 }
 0x3e0   :  { %7395 = vmatmul.mubr.msk.bf16.gmra.mrb[96].mxu1 %vm2780_vm2, %v10367_v51  ;;  %v10373_v51 = vld [vmem:[#allocation20_spill] sm:$0xff] }
 0x3e1   :  { %7398 = vmatprep.mubr.msk.bf16.mxu1 %vm2780_vm2, %v10368_v30  ;;  %v10374_v30 = vld [vmem:[#allocation22_spill] sm:$0xff] }
 0x3e3   :  { %v7276_v18 = vpop.f32.mrb[48].mxu1 }
 0x3e4   :  { %v9828_v53 = vadd.f32 %v7276_v18, %v9590_v33  ;;  %v4215_v38 = vpop.f32.mrb[49].mxu1 }
 0x3e5   :  { %v9831_v9 = vadd.f32 %v4215_v38, %v9594_v60  ;;  %v7277_v52 = vpop.f32.mrb[50].mxu1 }
 0x3e6   :  { %10369 = vst [vmem:[#allocation5_spill] sm:$0xff] %v9828_v53  ;;  %v9834_v4 = vadd.f32 %v7277_v52, %v9598_v5  ;;  %v4218_v59 = vpop.f32.mrb[51].mxu1 }
 0x3e7   :  { %10370 = vst [vmem:[#allocation7_spill] sm:$0xff] %v9831_v9  ;;  %v9837_v2 = vadd.f32 %v4218_v59, %v9600_v46 }
 0x3e8   :  { %10371 = vst [vmem:[#allocation26_spill] sm:$0xff] %v9834_v4  ;;  %7399 = vmatmul.mubr.msk.bf16.gmra.mrb[100].mxu1 %vm2780_vm2, %v10373_v51  ;;  %v10379_v51 = vld [vmem:[#allocation23_spill] sm:$0xff] }
 0x3e9   :  { %10372 = vst [vmem:[#allocation6_spill] sm:$0xff] %v9837_v2  ;;  %7402 = vmatprep.mubr.msk.bf16.mxu1 %vm2780_vm2, %v10374_v30  ;;  %v10380_v30 = vld [vmem:[#allocation24_spill] sm:$0xff]  ;;  %v10381_v2 = vld [vmem:[#allocation25_spill] sm:$0xff] }
 0x3eb   :  { %v7280_v33 = vpop.f32.mrb[52].mxu1 }
 0x3ec   :  { %v9844_v18 = vadd.f32 %v7280_v33, %v9602_v17  ;;  %v4231_v60 = vpop.f32.mrb[53].mxu1  ;;  %v2958_v17 = vld [vmem:[#allocation2 + $0x49] sm:$0xff]  ;;  %v2957_v33 = vld [vmem:[#allocation2 + $0x41] sm:$0xff] }
 0x3ed   :  { %v9847_v38 = vadd.f32 %v4231_v60, %v9606_v16  ;;  %v7281_v5 = vpop.f32.mrb[54].mxu1  ;;  %v2959_v16 = vld [vmem:[#allocation2 + $0x51] sm:$0xff]  ;;  %v2962_v60 = vld [vmem:[#allocation2 + $0x69] sm:$0xff] }
 0x3ee   :  { %10375 = vst [vmem:[#allocation8_spill] sm:$0xff] %v9844_v18  ;;  %v9850_v52 = vadd.f32 %v7281_v5, %v9610_v31  ;;  %v4234_v46 = vpop.f32.mrb[55].mxu1  ;;  %v3097_v18 = vpack.c.bf16 %v2958_v17, %v2957_v33  ;;  %v2960_v31 = vld [vmem:[#allocation2 + $0x59] sm:$0xff]  ;;  %v2965_v17 = vld [vmem:[#allocation2 + $0xc9] sm:$0xff] }
 0x3ef   :  { %10376 = vst [vmem:[#allocation27_spill] sm:$0xff] %v9847_v38  ;;  %v9853_v59 = vadd.f32 %v4234_v46, %v9612_v43  ;;  %v3098_v5 = vpack.c.bf16 %v2960_v31, %v2959_v16  ;;  %v2961_v43 = vld [vmem:[#allocation2 + $0x61] sm:$0xff]  ;;  %v2969_v38 = vld [vmem:[#allocation2 + $0xe9] sm:$0xff]  ;;  %v2970_v16 = vld [vmem:[#allocation2 + $0xf1] sm:$0xff] }
 0x3f0   :  { %10377 = vst [vmem:[#allocation28_spill] sm:$0xff] %v9850_v52  ;;  %7403 = vmatmul.mubr.msk.bf16.gmra.mrb[104].mxu1 %vm2780_vm2, %v10379_v51  ;;  %v3099_v46 = vpack.c.bf16 %v2962_v60, %v2961_v43  ;;  %v2964_v51 = vld [vmem:[#allocation2 + $0xc1] sm:$0xff]  ;;  %v3103_v60 = vpack.c.bf16 %v2970_v16, %v2969_v38  ;;  %v2973_v43 = vld [vmem:[#allocation2 + $0x151] sm:$0xff]  ;;  %v2981_v16 = vld [vmem:[#allocation2 + $0x1d9] sm:$0xff] }
 0x3f1   :  { %10378 = vst [vmem:[#allocation29_spill] sm:$0xff] %v9853_v59  ;;  %7406 = vmatprep.mubr.msk.bf16.mxu1 %vm2780_vm2, %v10380_v30  ;;  %v2966_v30 = vld [vmem:[#allocation2 + $0xd1] sm:$0xff] }
 0x3f2   :  { %v2963_v59 = vld [vmem:[#allocation2 + $0x71] sm:$0xff]  ;;  %v3101_v33 = vpack.c.bf16 %v2966_v30, %v2965_v17  ;;  %v2978_v17 = vld [vmem:[#allocation2 + $0x1c1] sm:$0xff] }
 0x3f3   :  { %v3100_v52 = vpack.c.bf16 %v2964_v51, %v2963_v59  ;;  %v2971_v59 = vld [vmem:[#allocation2 + $0x141] sm:$0xff] }
 0x3f8   :  { %7407 = vmatmul.mubr.msk.bf16.gmra.mrb[108].mxu1 %vm2780_vm2, %v10381_v2  ;;  %v2967_v2 = vld [vmem:[#allocation2 + $0xd9] sm:$0xff] }
 0x3f9   :  { %7418 = vmatprep.mubr.msk.bf16.mxu1 %vm2780_vm2, %v3097_v18  ;;  %v2968_v18 = vld [vmem:[#allocation2 + $0xe1] sm:$0xff] }
 0x3fa   :  { %v3102_v31 = vpack.c.bf16 %v2968_v18, %v2967_v2  ;;  %v2977_v2 = vld [vmem:[#allocation2 + $0x171] sm:$0xff] }
 0x3fb   :  { %v3107_v38 = vpack.c.bf16 %v2978_v17, %v2977_v2  ;;  %v2980_v18 = vld [vmem:[#allocation2 + $0x1d1] sm:$0xff]  ;;  %v2990_v2 = vld [vmem:[#allocation2 + $0x269] sm:$0xff] }
 0x400   :  { %7419 = vmatmul.mubr.msk.bf16.vlgmr.msra.gmra.mrb[56].mxu1 %vm2780_vm2, %v3098_v5  ;;  %v2972_v5 = vld [vmem:[#allocation2 + $0x149] sm:$0xff] }
 0x401   :  { %7422 = vmatprep.mubr.msk.bf16.mxu1 %vm2780_vm2, %v3099_v46  ;;  %v2974_v46 = vld [vmem:[#allocation2 + $0x159] sm:$0xff]  ;;  %v3104_v51 = vpack.c.bf16 %v2972_v5, %v2971_v59  ;;  %v2984_v59 = vld [vmem:[#allocation2 + $0x1f1] sm:$0xff] }
 0x402   :  { %v3105_v30 = vpack.c.bf16 %v2974_v46, %v2973_v43  ;;  %v2983_v46 = vld [vmem:[#allocation2 + $0x1e9] sm:$0xff] }
 0x408   :  { %7423 = vmatmul.mubr.msk.bf16.gmra.mrb[60].mxu1 %vm2780_vm2, %v3100_v52  ;;  %v2976_v52 = vld [vmem:[#allocation2 + $0x169] sm:$0xff] }
 0x409   :  { %7426 = vmatprep.mubr.msk.bf16.mxu1 %vm2780_vm2, %v3101_v33  ;;  %v2975_v33 = vld [vmem:[#allocation2 + $0x161] sm:$0xff] }
 0x40a   :  { %v3106_v4 = vpack.c.bf16 %v2976_v52, %v2975_v33  ;;  %v2985_v52 = vld [vmem:[#allocation2 + $0x241] sm:$0xff]  ;;  %v2988_v33 = vld [vmem:[#allocation2 + $0x259] sm:$0xff] }
 0x410   :  { %7427 = vmatmul.mubr.msk.bf16.gmra.mrb[64].mxu1 %vm2780_vm2, %v3102_v31  ;;  %v2982_v31 = vld [vmem:[#allocation2 + $0x1e1] sm:$0xff] }
 0x411   :  { %7430 = vmatprep.mubr.msk.bf16.mxu1 %vm2780_vm2, %v3103_v60  ;;  %v2979_v60 = vld [vmem:[#allocation2 + $0x1c9] sm:$0xff]  ;;  %v3109_v43 = vpack.c.bf16 %v2982_v31, %v2981_v16  ;;  %v2992_v31 = vld [vmem:[#allocation2 + $0x2c1] sm:$0xff] }
 0x412   :  { %v3108_v5 = vpack.c.bf16 %v2980_v18, %v2979_v60  ;;  %v2989_v18 = vld [vmem:[#allocation2 + $0x261] sm:$0xff]  ;;  %v2994_v60 = vld [vmem:[#allocation2 + $0x2d1] sm:$0xff] }
 0x413   :  { %v3113_v16 = vpack.c.bf16 %v2990_v2, %v2989_v18  ;;  %v3000_v2 = vld [vmem:[#allocation2 + $0x349] sm:$0xff]  ;;  %v3002_v18 = vld [vmem:[#allocation2 + $0x359] sm:$0xff] }
 0x418   :  { %7431 = vmatmul.mubr.msk.bf16.gmra.mrb[68].mxu1 %vm2780_vm2, %v3104_v51  ;;  %v2986_v51 = vld [vmem:[#allocation2 + $0x249] sm:$0xff] }
 0x419   :  { %7434 = vmatprep.mubr.msk.bf16.mxu1 %vm2780_vm2, %v3105_v30  ;;  %v3110_v30 = vpack.c.bf16 %v2984_v59, %v2983_v46  ;;  %v3111_v17 = vpack.c.bf16 %v2986_v51, %v2985_v52  ;;  %v2993_v46 = vld [vmem:[#allocation2 + $0x2c9] sm:$0xff]  ;;  %v2995_v51 = vld [vmem:[#allocation2 + $0x2d9] sm:$0xff] }
 0x41a   :  { %v3115_v59 = vpack.c.bf16 %v2994_v60, %v2993_v46  ;;  %v2997_v52 = vld [vmem:[#allocation2 + $0x2e9] sm:$0xff]  ;;  %v3003_v46 = vld [vmem:[#allocation2 + $0x361] sm:$0xff] }
 0x420   :  { %7435 = vmatmul.mubr.msk.bf16.gmra.mrb[72].mxu1 %vm2780_vm2, %v3106_v4  ;;  %v2987_v4 = vld [vmem:[#allocation2 + $0x251] sm:$0xff] }
 0x421   :  { %7438 = vmatprep.mubr.msk.bf16.mxu1 %vm2780_vm2, %v3107_v38  ;;  %v3112_v38 = vpack.c.bf16 %v2988_v33, %v2987_v4 }
 0x428   :  { %7439 = vmatmul.mubr.msk.bf16.gmra.mrb[76].mxu1 %vm2780_vm2, %v3108_v5  ;;  %v2991_v5 = vld [vmem:[#allocation2 + $0x271] sm:$0xff] }
 0x429   :  { %7442 = vmatprep.mubr.msk.bf16.mxu1 %vm2780_vm2, %v3109_v43  ;;  %v3114_v43 = vpack.c.bf16 %v2992_v31, %v2991_v5  ;;  %v3004_v5 = vld [vmem:[#allocation2 + $0x369] sm:$0xff] }
 0x430   :  { %7443 = vmatmul.mubr.msk.bf16.gmra.mrb[80].mxu1 %vm2780_vm2, %v3110_v30  ;;  %v2996_v30 = vld [vmem:[#allocation2 + $0x2e1] sm:$0xff] }
 0x431   :  { %7446 = vmatprep.mubr.msk.bf16.mxu1 %vm2780_vm2, %v3111_v17  ;;  %v2998_v17 = vld [vmem:[#allocation2 + $0x2f1] sm:$0xff]  ;;  %v3116_v4 = vpack.c.bf16 %v2996_v30, %v2995_v51 }
 0x432   :  { %v3117_v33 = vpack.c.bf16 %v2998_v17, %v2997_v52  ;;  %v3005_v51 = vld [vmem:[#allocation2 + $0x371] sm:$0xff]  ;;  %v3009_v17 = vld [vmem:[#allocation2 + $0x3d9] sm:$0xff] }
 0x433   :  { %v3008_v52 = vld [vmem:[#allocation2 + $0x3d1] sm:$0xff] }
 0x438   :  { %7447 = vmatmul.mubr.msk.bf16.gmra.mrb[84].mxu1 %vm2780_vm2, %v3112_v38  ;;  %v3001_v38 = vld [vmem:[#allocation2 + $0x351] sm:$0xff] }
 0x439   :  { %7450 = vmatprep.mubr.msk.bf16.mxu1 %vm2780_vm2, %v3113_v16  ;;  %v2999_v16 = vld [vmem:[#allocation2 + $0x341] sm:$0xff]  ;;  %v3119_v60 = vpack.c.bf16 %v3002_v18, %v3001_v38  ;;  %v3011_v18 = vld [vmem:[#allocation2 + $0x3e9] sm:$0xff] }
 0x43a   :  { %v3118_v31 = vpack.c.bf16 %v3000_v2, %v2999_v16  ;;  %v3012_v16 = vld [vmem:[#allocation2 + $0x3f1] sm:$0xff] }
 0x440   :  { %7451 = vmatmul.mubr.msk.bf16.gmra.mrb[88].mxu1 %vm2780_vm2, %v3114_v43  ;;  %v3006_v43 = vld [vmem:[#allocation2 + $0x3c1] sm:$0xff] }
 0x441   :  { %7454 = vmatprep.mubr.msk.bf16.mxu1 %vm2780_vm2, %v3115_v59  ;;  %v3120_v59 = vpack.c.bf16 %v3004_v5, %v3003_v46  ;;  %v3121_v30 = vpack.c.bf16 %v3006_v43, %v3005_v51  ;;  %v9899_v43 = vld [vmem:[%s10269_s6] ss:$0 sm:$0xff] }
 0x448   :  { %7455 = vmatmul.mubr.msk.bf16.gmra.mrb[92].mxu1 %vm2780_vm2, %v3116_v4  ;;  %v3010_v4 = vld [vmem:[#allocation2 + $0x3e1] sm:$0xff] }
 0x449   :  { %7458 = vmatprep.mubr.msk.bf16.mxu1 %vm2780_vm2, %v3117_v33  ;;  %v3007_v33 = vld [vmem:[#allocation2 + $0x3c9] sm:$0xff]  ;;  %v3123_v38 = vpack.c.bf16 %v3010_v4, %v3009_v17 }
 0x44a   :  { %v3122_v2 = vpack.c.bf16 %v3008_v52, %v3007_v33 }
 0x450   :  { %7459 = vmatmul.mubr.msk.bf16.gmra.mrb[96].mxu1 %vm2780_vm2, %v3118_v31  ;;  %v3124_v31 = vpack.c.bf16 %v3012_v16, %v3011_v18 }
 0x451   :  { %7462 = vmatprep.mubr.msk.bf16.mxu1 %vm2780_vm2, %v3119_v60  ;;  %v9892_v60 = vld [vmem:[%s10268_s5] ss:$0 sm:$0xff] }
 0x452   :  { %v5222_v5 = vmul.f32 %v9627_v7, %v9892_v60  ;;  %v5220_v46 = vmul.f32 %v9630_v56, %v9892_v60  ;;  %v5223_v51 = vmul.f32 %v9633_v15, %v9892_v60  ;;  %v5221_v17 = vmul.f32 %v9636_v58, %v9892_v60 }
 0x454   :  { %v5285_v33 = vadd.f32 %v9899_v43, %v5222_v5  ;;  %v5283_v18 = vadd.f32 %v9899_v43, %v5220_v46  ;;  %v5224_v46 = vmul.f32 %v9646_v32, %v9892_v60 }
 0x458   :  { %7463 = vmatmul.mubr.msk.bf16.gmra.mrb[100].mxu1 %vm2780_vm2, %v3120_v59 }
 0x459   :  { %7466 = vmatprep.mubr.msk.bf16.mxu1 %vm2780_vm2, %v3121_v30 }
 0x460   :  { %7467 = vmatmul.mubr.msk.bf16.gmra.mrb[104].mxu1 %vm2780_vm2, %v3122_v2 }
 0x461   :  { %7470 = vmatprep.mubr.msk.bf16.mxu1 %vm2780_vm2, %v3123_v38 }
 0x468   :  { %7471 = vmatmul.mubr.msk.bf16.gmra.mrb[108].mxu1 %vm2780_vm2, %v3124_v31  ;;  %v5286_v31 = vadd.f32 %v9899_v43, %v5223_v51  ;;  %v5227_v51 = vmul.f32 %v9649_v29, %v9892_v60 }
 0x4d3   :  { %v7420_v59 = vpop.f32.mrb[56].mxu1 }
 0x4d4   :  { %v5341_v30 = vmul.f32 %v7420_v59, %v9892_v60  ;;  %v4934_v52 = vpop.f32.mrb[57].mxu1 }
 0x4d5   :  { %v5339_v7 = vmul.f32 %v9892_v60, %v4934_v52  ;;  %v7421_v4 = vpop.f32.mrb[58].mxu1  ;;  %v5284_v52 = vadd.f32 %v9899_v43, %v5221_v17 }
 0x4d6   :  { %v5397_v2 = vadd.f32 %v9899_v43, %v5341_v30  ;;  %v5342_v38 = vmul.f32 %v7421_v4, %v9892_v60  ;;  %v4937_v56 = vpop.f32.mrb[59].mxu1  ;;  %v5226_v30 = vmul.f32 %v9643_v45, %v9892_v60 }
 0x4d7   :  { %v5395_v15 = vadd.f32 %v9899_v43, %v5339_v7  ;;  %v5340_v16 = vmul.f32 %v9892_v60, %v4937_v56  ;;  %v5225_v56 = vmul.f32 %v9652_v19, %v9892_v60 }
 0x4d8   :  { %v5453_v59 = vmax.f32 %v5285_v33, %v5397_v2  ;;  %v5398_v58 = vadd.f32 %v9899_v43, %v5342_v38  ;;  %v5289_v32 = vadd.f32 %v9899_v43, %v5226_v30 }
 0x4d9   :  { %v5451_v9 = vmax.f32 %v5283_v18, %v5395_v15  ;;  %v5396_v5 = vadd.f32 %v9899_v43, %v5340_v16 }
 0x4da   :  { %v5454_v4 = vmax.f32 %v5286_v31, %v5398_v58  ;;  %v5509_v33 = vmax.f32 %v5453_v59, 0.0 }
 0x4db   :  { %v5452_v7 = vmax.f32 %v5284_v52, %v5396_v5  ;;  %v7424_v53 = vpop.f32.mrb[60].mxu1  ;;  %v5507_v18 = vmax.f32 %v5451_v9, 0.0  ;;  %v5287_v52 = vadd.f32 %v9899_v43, %v5224_v46  ;;  %v5290_v9 = vadd.f32 %v9899_v43, %v5227_v51 }
 0x4dc   :  { %v5510_v2 = vmax.f32 %v5454_v4, 0.0  ;;  %v5345_v38 = vmul.f32 %v7424_v53, %v9892_v60  ;;  %v4950_v17 = vpop.f32.mrb[61].mxu1 }
 0x4dd   :  { %v5508_v15 = vmax.f32 %v5452_v7, 0.0  ;;  %v5343_v45 = vmul.f32 %v9892_v60, %v4950_v17  ;;  %v7425_v16 = vpop.f32.mrb[62].mxu1  ;;  %v5288_v7 = vadd.f32 %v9899_v43, %v5225_v56 }
 0x4de   :  { %v6400_v31 = vpack.c.bf16 %v5510_v2, %v5509_v33  ;;  %v5401_v58 = vadd.f32 %v9899_v43, %v5345_v38  ;;  %v5346_v29 = vmul.f32 %v7425_v16, %v9892_v60  ;;  %v4953_v59 = vpop.f32.mrb[63].mxu1  ;;  %v5230_v2 = vmul.f32 %v9662_v14, %v9892_v60 }
 0x4df   :  { %v6395_v53 = vpack.c.bf16 %v5508_v15, %v5507_v18  ;;  %v5399_v5 = vadd.f32 %v9899_v43, %v5343_v45  ;;  %v5344_v19 = vmul.f32 %v9892_v60, %v4953_v59  ;;  %v5228_v38 = vmul.f32 %v9665_v57, %v9892_v60 }
 0x4e0   :  { %6532 = vst [vmem:[%s10270_s7 + $0x8] sm:$0xff] %v6400_v31   ;;  %v5457_v30 = vmax.f32 %v5289_v32, %v5401_v58  ;;  %v5402_v4 = vadd.f32 %v9899_v43, %v5346_v29  ;;  %v5231_v15 = vmul.f32 %v9668_v24, %v9892_v60  ;;  %v5229_v31 = vmul.f32 %v9674_v49, %v9892_v60 }
 0x4e1   :  { %6396 = vst [vmem:[%s10270_s7] sm:$0xff] %v6395_v53   ;;  %v5455_v46 = vmax.f32 %v5287_v52, %v5399_v5  ;;  %v5400_v33 = vadd.f32 %v9899_v43, %v5344_v19  ;;  %v5293_v57 = vadd.f32 %v9899_v43, %v5230_v2  ;;  %v5291_v19 = vadd.f32 %v9899_v43, %v5228_v38 }
 0x4e2   :  { %v5458_v51 = vmax.f32 %v5290_v9, %v5402_v4  ;;  %v5513_v56 = vmax.f32 %v5457_v30, 0.0  ;;  %v5294_v4 = vadd.f32 %v9899_v43, %v5231_v15  ;;  %v5234_v38 = vmul.f32 %v9684_v27, %v9892_v60 }
 0x4e3   :  { %v5456_v17 = vmax.f32 %v5288_v7, %v5400_v33  ;;  %v7428_v18 = vpop.f32.mrb[64].mxu1  ;;  %v5511_v58 = vmax.f32 %v5455_v46, 0.0  ;;  %v5292_v33 = vadd.f32 %v9899_v43, %v5229_v31 }
 0x4e4   :  { %v5514_v45 = vmax.f32 %v5458_v51, 0.0  ;;  %v5349_v16 = vmul.f32 %v7428_v18, %v9892_v60  ;;  %v4966_v32 = vpop.f32.mrb[65].mxu1  ;;  %v5232_v18 = vmul.f32 %v9687_v44, %v9892_v60  ;;  %v5297_v44 = vadd.f32 %v9899_v43, %v5234_v38 }
 0x4e5   :  { %v5512_v29 = vmax.f32 %v5456_v17, 0.0  ;;  %v5347_v14 = vmul.f32 %v9892_v60, %v4966_v32  ;;  %v7429_v59 = vpop.f32.mrb[66].mxu1  ;;  %v5236_v38 = vmul.f32 %v9703_v40, %v9892_v60 }
 0x4e6   :  { %v6410_v52 = vpack.c.bf16 %v5514_v45, %v5513_v56  ;;  %v5405_v53 = vadd.f32 %v9899_v43, %v5349_v16  ;;  %v5350_v24 = vmul.f32 %v7429_v59, %v9892_v60  ;;  %v4969_v5 = vpop.f32.mrb[67].mxu1  ;;  %v5235_v45 = vmul.f32 %v9690_v61, %v9892_v60 }
 0x4e7   :  { %v6405_v9 = vpack.c.bf16 %v5512_v29, %v5511_v58  ;;  %v5403_v30 = vadd.f32 %v9899_v43, %v5347_v14  ;;  %v5348_v49 = vmul.f32 %v9892_v60, %v4969_v5  ;;  %v5233_v29 = vmul.f32 %v9693_v8, %v9892_v60 }
 0x4e8   :  { %6534 = vst [vmem:[%s10270_s7 + $0x18] sm:$0xff] %v6410_v52   ;;  %v5461_v7 = vmax.f32 %v5293_v57, %v5405_v53  ;;  %v5406_v46 = vadd.f32 %v9899_v43, %v5350_v24  ;;  %v5295_v5 = vadd.f32 %v9899_v43, %v5232_v18 }
 0x4e9   :  { %6533 = vst [vmem:[%s10270_s7 + $0x10] sm:$0xff] %v6405_v9   ;;  %v5459_v2 = vmax.f32 %v5291_v19, %v5403_v30  ;;  %v5404_v51 = vadd.f32 %v9899_v43, %v5348_v49  ;;  %v5298_v30 = vadd.f32 %v9899_v43, %v5235_v45 }
 0x4ea   :  { %v5462_v17 = vmax.f32 %v5294_v4, %v5406_v46  ;;  %v5517_v16 = vmax.f32 %v5461_v7, 0.0  ;;  %v5296_v7 = vadd.f32 %v9899_v43, %v5233_v29 }
 0x4eb   :  { %v5460_v15 = vmax.f32 %v5292_v33, %v5404_v51  ;;  %v7432_v56 = vpop.f32.mrb[68].mxu1  ;;  %v5515_v14 = vmax.f32 %v5459_v2, 0.0  ;;  %v5238_v2 = vmul.f32 %v9700_v23, %v9892_v60 }
 0x4ec   :  { %v5518_v32 = vmax.f32 %v5462_v17, 0.0  ;;  %v5353_v31 = vmul.f32 %v7432_v56, %v9892_v60  ;;  %v4982_v58 = vpop.f32.mrb[69].mxu1 }
 0x4ed   :  { %v5516_v59 = vmax.f32 %v5460_v15, 0.0  ;;  %v5351_v27 = vmul.f32 %v9892_v60, %v4982_v58  ;;  %v7433_v57 = vpop.f32.mrb[70].mxu1  ;;  %v5239_v15 = vmul.f32 %v9706_v28, %v9892_v60  ;;  %v5301_v40 = vadd.f32 %v9899_v43, %v5238_v2 }
 0x4ee   :  { %v6420_v52 = vpack.c.bf16 %v5518_v32, %v5517_v16  ;;  %v5409_v53 = vadd.f32 %v9899_v43, %v5353_v31  ;;  %v5354_v61 = vmul.f32 %v7433_v57, %v9892_v60  ;;  %v4985_v24 = vpop.f32.mrb[71].mxu1  ;;  %v5237_v31 = vmul.f32 %v9709_v12, %v9892_v60 }
 0x4ef   :  { %v6415_v19 = vpack.c.bf16 %v5516_v59, %v5515_v14  ;;  %v5407_v9 = vadd.f32 %v9899_v43, %v5351_v27  ;;  %v5352_v8 = vmul.f32 %v9892_v60, %v4985_v24 }
 0x4f0   :  { %6536 = vst [vmem:[%s10270_s7 + $0x28] sm:$0xff] %v6420_v52   ;;  %v5465_v49 = vmax.f32 %v5297_v44, %v5409_v53  ;;  %v5410_v4 = vadd.f32 %v9899_v43, %v5354_v61  ;;  %v5299_v44 = vadd.f32 %v9899_v43, %v5236_v38  ;;  %v5302_v61 = vadd.f32 %v9899_v43, %v5239_v15 }
 0x4f1   :  { %6535 = vst [vmem:[%s10270_s7 + $0x20] sm:$0xff] %v6415_v19   ;;  %v5463_v46 = vmax.f32 %v5295_v5, %v5407_v9  ;;  %v5408_v33 = vadd.f32 %v9899_v43, %v5352_v8  ;;  %v5300_v19 = vadd.f32 %v9899_v43, %v5237_v31 }
 0x4f2   :  { %v5466_v51 = vmax.f32 %v5298_v30, %v5410_v4  ;;  %v5521_v56 = vmax.f32 %v5465_v49, 0.0  ;;  %v5242_v30 = vmul.f32 %v9716_v48, %v9892_v60  ;;  %v5240_v4 = vmul.f32 %v9719_v50, %v9892_v60 }
 0x4f3   :  { %v5464_v17 = vmax.f32 %v5296_v7, %v5408_v33  ;;  %v7436_v18 = vpop.f32.mrb[72].mxu1  ;;  %v5519_v58 = vmax.f32 %v5463_v46, 0.0  ;;  %v5243_v33 = vmul.f32 %v9722_v39, %v9892_v60 }
 0x4f4   :  { %v5522_v45 = vmax.f32 %v5466_v51, 0.0  ;;  %v5357_v16 = vmul.f32 %v7436_v18, %v9892_v60  ;;  %v4998_v32 = vpop.f32.mrb[73].mxu1  ;;  %v5241_v18 = vmul.f32 %v9725_v26, %v9892_v60  ;;  %v5305_v50 = vadd.f32 %v9899_v43, %v5242_v30 }
 0x4f5   :  { %v5520_v29 = vmax.f32 %v5464_v17, 0.0  ;;  %v5355_v23 = vmul.f32 %v9892_v60, %v4998_v32  ;;  %v7437_v14 = vpop.f32.mrb[74].mxu1  ;;  %v5245_v30 = vmul.f32 %v9741_v20, %v9892_v60 }
 0x4f6   :  { %v6430_v59 = vpack.c.bf16 %v5522_v45, %v5521_v56  ;;  %v5413_v27 = vadd.f32 %v9899_v43, %v5357_v16  ;;  %v5358_v28 = vmul.f32 %v7437_v14, %v9892_v60  ;;  %v5001_v57 = vpop.f32.mrb[75].mxu1  ;;  %v5306_v14 = vadd.f32 %v9899_v43, %v5243_v33 }
 0x4f7   :  { %v6425_v52 = vpack.c.bf16 %v5520_v29, %v5519_v58  ;;  %v5411_v53 = vadd.f32 %v9899_v43, %v5355_v23  ;;  %v5356_v12 = vmul.f32 %v9892_v60, %v5001_v57  ;;  %v5303_v58 = vadd.f32 %v9899_v43, %v5240_v4 }
 0x4f8   :  { %6538 = vst [vmem:[%s10270_s7 + $0x38] sm:$0xff] %v6430_v59   ;;  %v5469_v24 = vmax.f32 %v5301_v40, %v5413_v27  ;;  %v5414_v5 = vadd.f32 %v9899_v43, %v5358_v28  ;;  %v5304_v27 = vadd.f32 %v9899_v43, %v5241_v18 }
 0x4f9   :  { %6537 = vst [vmem:[%s10270_s7 + $0x30] sm:$0xff] %v6425_v52   ;;  %v5467_v9 = vmax.f32 %v5299_v44, %v5411_v53  ;;  %v5412_v8 = vadd.f32 %v9899_v43, %v5356_v12  ;;  %v5246_v44 = vmul.f32 %v9732_v11, %v9892_v60  ;;  %v5244_v53 = vmul.f32 %v9735_v34, %v9892_v60 }
 0x4fa   :  { %v5470_v49 = vmax.f32 %v5302_v61, %v5414_v5  ;;  %v5525_v2 = vmax.f32 %v5469_v24, 0.0  ;;  %v5247_v24 = vmul.f32 %v9738_v47, %v9892_v60 }
 0x4fb   :  { %v5468_v7 = vmax.f32 %v5300_v19, %v5412_v8  ;;  %v7440_v46 = vpop.f32.mrb[76].mxu1  ;;  %v5523_v15 = vmax.f32 %v5467_v9, 0.0  ;;  %v5309_v34 = vadd.f32 %v9899_v43, %v5246_v44 }
 0x4fc   :  { %v5526_v51 = vmax.f32 %v5470_v49, 0.0  ;;  %v5361_v38 = vmul.f32 %v7440_v46, %v9892_v60  ;;  %v5014_v17 = vpop.f32.mrb[77].mxu1  ;;  %v5310_v18 = vadd.f32 %v9899_v43, %v5247_v24 }
 0x4fd   :  { %v5524_v56 = vmax.f32 %v5468_v7, 0.0  ;;  %v5359_v48 = vmul.f32 %v9892_v60, %v5014_v17  ;;  %v7441_v45 = vpop.f32.mrb[78].mxu1 }
 0x4fe   :  { %v6440_v16 = vpack.c.bf16 %v5526_v51, %v5525_v2  ;;  %v5417_v32 = vadd.f32 %v9899_v43, %v5361_v38  ;;  %v5362_v39 = vmul.f32 %v7441_v45, %v9892_v60  ;;  %v5017_v31 = vpop.f32.mrb[79].mxu1  ;;  %v5307_v51 = vadd.f32 %v9899_v43, %v5244_v53 }
 0x4ff   :  { %v6435_v29 = vpack.c.bf16 %v5524_v56, %v5523_v15  ;;  %v5415_v23 = vadd.f32 %v9899_v43, %v5359_v48  ;;  %v5360_v26 = vmul.f32 %v9892_v60, %v5017_v31  ;;  %v5308_v48 = vadd.f32 %v9899_v43, %v5245_v30 }
 0x500   :  { %6540 = vst [vmem:[%s10270_s7 + $0x48] sm:$0xff] %v6440_v16   ;;  %v5473_v40 = vmax.f32 %v5305_v50, %v5417_v32  ;;  %v5418_v59 = vadd.f32 %v9899_v43, %v5362_v39  ;;  %v5250_v16 = vmul.f32 %v9748_v22, %v9892_v60  ;;  %v5248_v39 = vmul.f32 %v9751_v25, %v9892_v60 }
 0x501   :  { %6539 = vst [vmem:[%s10270_s7 + $0x40] sm:$0xff] %v6435_v29   ;;  %v5471_v28 = vmax.f32 %v5303_v58, %v5415_v23  ;;  %v5416_v57 = vadd.f32 %v9899_v43, %v5360_v26  ;;  %v5251_v29 = vmul.f32 %v9754_v62, %v9892_v60 }
 0x502   :  { %v5474_v52 = vmax.f32 %v5306_v14, %v5418_v59  ;;  %v5529_v5 = vmax.f32 %v5473_v40, 0.0  ;;  %v5249_v59 = vmul.f32 %v9757_v10, %v9892_v60  ;;  %v5313_v25 = vadd.f32 %v9899_v43, %v5250_v16 }
 0x503   :  { %v5472_v12 = vmax.f32 %v5304_v27, %v5416_v57  ;;  %v7444_v61 = vpop.f32.mrb[80].mxu1  ;;  %v5527_v49 = vmax.f32 %v5471_v28, 0.0 }
 0x504   :  { %v5530_v19 = vmax.f32 %v5474_v52, 0.0  ;;  %v5365_v9 = vmul.f32 %v7444_v61, %v9892_v60  ;;  %v5030_v8 = vpop.f32.mrb[81].mxu1 }
 0x505   :  { %v5528_v4 = vmax.f32 %v5472_v12, 0.0  ;;  %v5363_v11 = vmul.f32 %v9892_v60, %v5030_v8  ;;  %v7445_v7 = vpop.f32.mrb[82].mxu1  ;;  %v5311_v12 = vadd.f32 %v9899_v43, %v5248_v39  ;;  %v5312_v8 = vadd.f32 %v9899_v43, %v5249_v59 }
 0x506   :  { %v6450_v46 = vpack.c.bf16 %v5530_v19, %v5529_v5  ;;  %v5421_v33 = vadd.f32 %v9899_v43, %v5365_v9  ;;  %v5366_v47 = vmul.f32 %v7445_v7, %v9892_v60  ;;  %v5033_v2 = vpop.f32.mrb[83].mxu1  ;;  %v5314_v5 = vadd.f32 %v9899_v43, %v5251_v29 }
 0x507   :  { %v6445_v38 = vpack.c.bf16 %v5528_v4, %v5527_v49  ;;  %v5419_v17 = vadd.f32 %v9899_v43, %v5363_v11  ;;  %v5364_v20 = vmul.f32 %v9892_v60, %v5033_v2  ;;  %v5254_v4 = vmul.f32 %v9764_v42, %v9892_v60 }
 0x508   :  { %6542 = vst [vmem:[%s10270_s7 + $0x58] sm:$0xff] %v6450_v46   ;;  %v5477_v15 = vmax.f32 %v5309_v34, %v5421_v33  ;;  %v5422_v56 = vadd.f32 %v9899_v43, %v5366_v47  ;;  %v5252_v7 = vmul.f32 %v9767_v1, %v9892_v60  ;;  %v5255_v33 = vmul.f32 %v9770_v21, %v9892_v60 }
 0x509   :  { %6541 = vst [vmem:[%s10270_s7 + $0x50] sm:$0xff] %v6445_v38   ;;  %v5475_v45 = vmax.f32 %v5307_v51, %v5419_v17  ;;  %v5420_v50 = vadd.f32 %v9899_v43, %v5364_v20  ;;  %v10382_v17 = vld [vmem:[#allocation3_spill] sm:$0xff]  ;;  %v5317_v1 = vadd.f32 %v9899_v43, %v5254_v4  ;;  %v5258_v59 = vmul.f32 %v9780_v36, %v9892_v60 }
 0x50a   :  { %v5478_v32 = vmax.f32 %v5310_v18, %v5422_v56  ;;  %v5533_v23 = vmax.f32 %v5477_v15, 0.0  ;;  %v5253_v20 = vmul.f32 %v10382_v17, %v9892_v60  ;;  %v5315_v16 = vadd.f32 %v9899_v43, %v5252_v7 }
 0x50b   :  { %v5476_v31 = vmax.f32 %v5308_v48, %v5420_v50  ;;  %v7448_v58 = vpop.f32.mrb[84].mxu1  ;;  %v5531_v27 = vmax.f32 %v5475_v45, 0.0  ;;  %v5260_v17 = vmul.f32 %v9799_v55, %v9892_v60 }
 0x50c   :  { %v5534_v26 = vmax.f32 %v5478_v32, 0.0  ;;  %v5369_v14 = vmul.f32 %v7448_v58, %v9892_v60  ;;  %v5046_v40 = vpop.f32.mrb[85].mxu1  ;;  %v5318_v58 = vadd.f32 %v9899_v43, %v5255_v33 }
 0x50d   :  { %v5532_v28 = vmax.f32 %v5476_v31, 0.0  ;;  %v5367_v22 = vmul.f32 %v9892_v60, %v5046_v40  ;;  %v7449_v57 = vpop.f32.mrb[86].mxu1 }
 0x50e   :  { %v6460_v44 = vpack.c.bf16 %v5534_v26, %v5533_v23  ;;  %v5425_v52 = vadd.f32 %v9899_v43, %v5369_v14  ;;  %v5370_v62 = vmul.f32 %v7449_v57, %v9892_v60  ;;  %v5049_v53 = vpop.f32.mrb[87].mxu1  ;;  %v5316_v26 = vadd.f32 %v9899_v43, %v5253_v20 }
 0x50f   :  { %v6455_v61 = vpack.c.bf16 %v5532_v28, %v5531_v27  ;;  %v5423_v24 = vadd.f32 %v9899_v43, %v5367_v22  ;;  %v5368_v10 = vmul.f32 %v9892_v60, %v5049_v53  ;;  %v5256_v28 = vmul.f32 %v9783_v54, %v9892_v60 }
 0x510   :  { %6544 = vst [vmem:[%s10270_s7 + $0x68] sm:$0xff] %v6460_v44   ;;  %v5481_v19 = vmax.f32 %v5313_v25, %v5425_v52  ;;  %v5426_v9 = vadd.f32 %v9899_v43, %v5370_v62  ;;  %v5259_v25 = vmul.f32 %v9786_v41, %v9892_v60  ;;  %v5321_v54 = vadd.f32 %v9899_v43, %v5258_v59 }
 0x511   :  { %6543 = vst [vmem:[%s10270_s7 + $0x60] sm:$0xff] %v6455_v61   ;;  %v5479_v30 = vmax.f32 %v5311_v12, %v5423_v24  ;;  %v5424_v49 = vadd.f32 %v9899_v43, %v5368_v10  ;;  %v10383_v12 = vld [vmem:[#allocation4_spill] sm:$0xff] }
 0x512   :  { %v5482_v11 = vmax.f32 %v5314_v5, %v5426_v9  ;;  %v5537_v47 = vmax.f32 %v5481_v19, 0.0  ;;  %v5257_v61 = vmul.f32 %v10383_v12, %v9892_v60  ;;  %v5322_v7 = vadd.f32 %v9899_v43, %v5259_v25 }
 0x513   :  { %v5480_v34 = vmax.f32 %v5312_v8, %v5424_v49  ;;  %v7452_v46 = vpop.f32.mrb[88].mxu1  ;;  %v5535_v18 = vmax.f32 %v5479_v30, 0.0  ;;  %v5319_v30 = vadd.f32 %v9899_v43, %v5256_v28  ;;  %v5264_v25 = vmul.f32 %v9815_v63, %v9892_v60 }
 0x514   :  { %v5538_v2 = vmax.f32 %v5482_v11, 0.0  ;;  %v5373_v51 = vmul.f32 %v7452_v46, %v9892_v60  ;;  %v5062_v38 = vpop.f32.mrb[89].mxu1  ;;  %v5320_v33 = vadd.f32 %v9899_v43, %v5257_v61 }
 0x515   :  { %v5536_v15 = vmax.f32 %v5480_v34, 0.0  ;;  %v5371_v42 = vmul.f32 %v9892_v60, %v5062_v38  ;;  %v7453_v56 = vpop.f32.mrb[90].mxu1 }
 0x516   :  { %v6470_v48 = vpack.c.bf16 %v5538_v2, %v5537_v47  ;;  %v5429_v45 = vadd.f32 %v9899_v43, %v5373_v51  ;;  %v5374_v21 = vmul.f32 %v7453_v56, %v9892_v60  ;;  %v5065_v50 = vpop.f32.mrb[91].mxu1  ;;  %v5262_v51 = vmul.f32 %v9796_v35, %v9892_v60 }
 0x517   :  { %v6465_v32 = vpack.c.bf16 %v5536_v15, %v5535_v18  ;;  %v5427_v39 = vadd.f32 %v9899_v43, %v5371_v42  ;;  %v5372_v31 = vmul.f32 %v9892_v60, %v5065_v50  ;;  %v5263_v15 = vmul.f32 %v9802_v0, %v9892_v60 }
 0x518   :  { %6546 = vst [vmem:[%s10270_s7 + $0x78] sm:$0xff] %v6470_v48   ;;  %v5485_v29 = vmax.f32 %v5317_v1, %v5429_v45  ;;  %v5430_v23 = vadd.f32 %v9899_v43, %v5374_v21  ;;  %v5261_v45 = vmul.f32 %v9805_v37, %v9892_v60  ;;  %v5325_v55 = vadd.f32 %v9899_v43, %v5262_v51 }
 0x519   :  { %6545 = vst [vmem:[%s10270_s7 + $0x70] sm:$0xff] %v6465_v32   ;;  %v5483_v14 = vmax.f32 %v5315_v16, %v5427_v39  ;;  %v5428_v40 = vadd.f32 %v9899_v43, %v5372_v31 }
 0x51a   :  { %v5486_v27 = vmax.f32 %v5318_v58, %v5430_v23  ;;  %v5541_v44 = vmax.f32 %v5485_v29, 0.0  ;;  %v5323_v58 = vadd.f32 %v9899_v43, %v5260_v17  ;;  %v5324_v59 = vadd.f32 %v9899_v43, %v5261_v45 }
 0x51b   :  { %v5484_v22 = vmax.f32 %v5316_v26, %v5428_v40  ;;  %v7456_v57 = vpop.f32.mrb[92].mxu1  ;;  %v5539_v24 = vmax.f32 %v5483_v14, 0.0  ;;  %v5326_v26 = vadd.f32 %v9899_v43, %v5263_v15  ;;  %v10386_v15 = vld [vmem:[#allocation26_spill] sm:$0xff] }
 0x51c   :  { %v5542_v52 = vmax.f32 %v5486_v27, 0.0  ;;  %v5377_v62 = vmul.f32 %v7456_v57, %v9892_v60  ;;  %v5078_v53 = vpop.f32.mrb[93].mxu1 }
 0x51d   :  { %v5540_v10 = vmax.f32 %v5484_v22, 0.0  ;;  %v5375_v36 = vmul.f32 %v9892_v60, %v5078_v53  ;;  %v7457_v5 = vpop.f32.mrb[94].mxu1  ;;  %v5266_v22 = vmul.f32 %v9812_v6, %v9892_v60 }
 0x51e   :  { %v6480_v19 = vpack.c.bf16 %v5542_v52, %v5541_v44  ;;  %v5433_v9 = vadd.f32 %v9899_v43, %v5377_v62  ;;  %v5378_v41 = vmul.f32 %v7457_v5, %v9892_v60  ;;  %v5081_v8 = vpop.f32.mrb[95].mxu1  ;;  %v5267_v62 = vmul.f32 %v9818_v3, %v9892_v60 }
 0x51f   :  { %v6475_v49 = vpack.c.bf16 %v5540_v10, %v5539_v24  ;;  %v5431_v4 = vadd.f32 %v9899_v43, %v5375_v36  ;;  %v5376_v11 = vmul.f32 %v9892_v60, %v5081_v8  ;;  %v5265_v10 = vmul.f32 %v9821_v13, %v9892_v60 }
 0x520   :  { %6548 = vst [vmem:[%s10270_s7 + $0x88] sm:$0xff] %v6480_v19   ;;  %v5489_v34 = vmax.f32 %v5321_v54, %v5433_v9  ;;  %v5434_v46 = vadd.f32 %v9899_v43, %v5378_v41  ;;  %v5329_v63 = vadd.f32 %v9899_v43, %v5266_v22  ;;  %v5327_v8 = vadd.f32 %v9899_v43, %v5264_v25  ;;  %v10388_v25 = vld [vmem:[#allocation8_spill] sm:$0xff] }
 0x521   :  { %6547 = vst [vmem:[%s10270_s7 + $0x80] sm:$0xff] %v6475_v49   ;;  %v5487_v47 = vmax.f32 %v5319_v30, %v5431_v4  ;;  %v5432_v2 = vadd.f32 %v9899_v43, %v5376_v11  ;;  %v5330_v4 = vadd.f32 %v9899_v43, %v5267_v62  ;;  %v10389_v62 = vld [vmem:[#allocation27_spill] sm:$0xff] }
 0x522   :  { %v5490_v38 = vmax.f32 %v5322_v7, %v5434_v46  ;;  %v5545_v42 = vmax.f32 %v5489_v34, 0.0  ;;  %v5328_v34 = vadd.f32 %v9899_v43, %v5265_v10 }
 0x523   :  { %v5488_v20 = vmax.f32 %v5320_v33, %v5432_v2  ;;  %v7460_v18 = vpop.f32.mrb[96].mxu1  ;;  %v5543_v21 = vmax.f32 %v5487_v47, 0.0  ;;  %v10384_v47 = vld [vmem:[#allocation5_spill] sm:$0xff] }
 0x524   :  { %v5546_v56 = vmax.f32 %v5490_v38, 0.0  ;;  %v5381_v1 = vmul.f32 %v7460_v18, %v9892_v60  ;;  %v5094_v48 = vpop.f32.mrb[97].mxu1  ;;  %v5270_v2 = vmul.f32 %v10384_v47, %v9892_v60  ;;  %v10385_v38 = vld [vmem:[#allocation7_spill] sm:$0xff] }
 0x525   :  { %v5544_v50 = vmax.f32 %v5488_v20, 0.0  ;;  %v5379_v35 = vmul.f32 %v9892_v60, %v5094_v48  ;;  %v7461_v16 = vpop.f32.mrb[98].mxu1  ;;  %v5268_v17 = vmul.f32 %v10385_v38, %v9892_v60 }
 0x526   :  { %v6490_v32 = vpack.c.bf16 %v5546_v56, %v5545_v42  ;;  %v5437_v39 = vadd.f32 %v9899_v43, %v5381_v1  ;;  %v5382_v0 = vmul.f32 %v7461_v16, %v9892_v60  ;;  %v5097_v31 = vpop.f32.mrb[99].mxu1  ;;  %v5271_v42 = vmul.f32 %v10386_v15, %v9892_v60 }
 0x527   :  { %v6485_v29 = vpack.c.bf16 %v5544_v50, %v5543_v21  ;;  %v5435_v23 = vadd.f32 %v9899_v43, %v5379_v35  ;;  %v5380_v37 = vmul.f32 %v9892_v60, %v5097_v31  ;;  %v10387_v21 = vld [vmem:[#allocation6_spill] sm:$0xff] }
 0x528   :  { %6550 = vst [vmem:[%s10270_s7 + $0x98] sm:$0xff] %v6490_v32   ;;  %v5493_v14 = vmax.f32 %v5325_v55, %v5437_v39  ;;  %v5438_v40 = vadd.f32 %v9899_v43, %v5382_v0  ;;  %v5269_v50 = vmul.f32 %v10387_v21, %v9892_v60  ;;  %v5333_v39 = vadd.f32 %v9899_v43, %v5270_v2 }
 0x529   :  { %6549 = vst [vmem:[%s10270_s7 + $0x90] sm:$0xff] %v6485_v29   ;;  %v5491_v27 = vmax.f32 %v5323_v58, %v5435_v23  ;;  %v5436_v28 = vadd.f32 %v9899_v43, %v5380_v37  ;;  %v5331_v23 = vadd.f32 %v9899_v43, %v5268_v17 }
 0x52a   :  { %v5494_v57 = vmax.f32 %v5326_v26, %v5438_v40  ;;  %v5549_v53 = vmax.f32 %v5493_v14, 0.0  ;;  %v5334_v40 = vadd.f32 %v9899_v43, %v5271_v42 }
 0x52b   :  { %v5492_v44 = vmax.f32 %v5324_v59, %v5436_v28  ;;  %v7464_v52 = vpop.f32.mrb[100].mxu1  ;;  %v5547_v36 = vmax.f32 %v5491_v27, 0.0  ;;  %v5332_v28 = vadd.f32 %v9899_v43, %v5269_v50 }
 0x52c   :  { %v5550_v12 = vmax.f32 %v5494_v57, 0.0  ;;  %v5385_v61 = vmul.f32 %v7464_v52, %v9892_v60  ;;  %v5110_v24 = vpop.f32.mrb[101].mxu1 }
 0x52d   :  { %v5548_v5 = vmax.f32 %v5492_v44, 0.0  ;;  %v5383_v6 = vmul.f32 %v9892_v60, %v5110_v24  ;;  %v7465_v54 = vpop.f32.mrb[102].mxu1  ;;  %v5274_v44 = vmul.f32 %v10388_v25, %v9892_v60  ;;  %v10390_v24 = vld [vmem:[#allocation28_spill] sm:$0xff] }
 0x52e   :  { %v6500_v19 = vpack.c.bf16 %v5550_v12, %v5549_v53  ;;  %v5441_v9 = vadd.f32 %v9899_v43, %v5385_v61  ;;  %v5386_v3 = vmul.f32 %v7465_v54, %v9892_v60  ;;  %v5113_v41 = vpop.f32.mrb[103].mxu1  ;;  %v5272_v53 = vmul.f32 %v10389_v62, %v9892_v60 }
 0x52f   :  { %v6495_v30 = vpack.c.bf16 %v5548_v5, %v5547_v36  ;;  %v5439_v49 = vadd.f32 %v9899_v43, %v5383_v6  ;;  %v5384_v13 = vmul.f32 %v9892_v60, %v5113_v41  ;;  %v5275_v10 = vmul.f32 %v10390_v24, %v9892_v60 }
 0x530   :  { %6552 = vst [vmem:[%s10270_s7 + $0xa8] sm:$0xff] %v6500_v19   ;;  %v5497_v11 = vmax.f32 %v5329_v63, %v5441_v9  ;;  %v5442_v7 = vadd.f32 %v9899_v43, %v5386_v3  ;;  %v10391_v63 = vld [vmem:[#allocation29_spill] sm:$0xff] }
 0x531   :  { %6551 = vst [vmem:[%s10270_s7 + $0xa0] sm:$0xff] %v6495_v30   ;;  %v5495_v46 = vmax.f32 %v5327_v8, %v5439_v49  ;;  %v5440_v33 = vadd.f32 %v9899_v43, %v5384_v13  ;;  %v5273_v19 = vmul.f32 %v10391_v63, %v9892_v60  ;;  %v5337_v30 = vadd.f32 %v9899_v43, %v5274_v44 }
 0x532   :  { %v5498_v51 = vmax.f32 %v5330_v4, %v5442_v7  ;;  %v5553_v56 = vmax.f32 %v5497_v11, 0.0  ;;  %v5335_v7 = vadd.f32 %v9899_v43, %v5272_v53  ;;  %v5338_v47 = vadd.f32 %v9899_v43, %v5275_v10 }
 0x533   :  { %v5496_v20 = vmax.f32 %v5328_v34, %v5440_v33  ;;  %v7468_v18 = vpop.f32.mrb[104].mxu1  ;;  %v5551_v35 = vmax.f32 %v5495_v46, 0.0  ;;  %v5336_v38 = vadd.f32 %v9899_v43, %v5273_v19 }
 0x534   :  { %v5554_v1 = vmax.f32 %v5498_v51, 0.0  ;;  %v5389_v48 = vmul.f32 %v7468_v18, %v9892_v60  ;;  %v5126_v45 = vpop.f32.mrb[105].mxu1 }
 0x535   :  { %v5552_v16 = vmax.f32 %v5496_v20, 0.0  ;;  %v5387_v55 = vmul.f32 %v9892_v60, %v5126_v45  ;;  %v7469_v32 = vpop.f32.mrb[106].mxu1 }
 0x536   :  { %v6510_v0 = vpack.c.bf16 %v5554_v1, %v5553_v56  ;;  %v5445_v31 = vadd.f32 %v9899_v43, %v5389_v48  ;;  %v5390_v58 = vmul.f32 %v7469_v32, %v9892_v60  ;;  %v5129_v29 = vpop.f32.mrb[107].mxu1 }
 0x537   :  { %v6505_v37 = vpack.c.bf16 %v5552_v16, %v5551_v35  ;;  %v5443_v26 = vadd.f32 %v9899_v43, %v5387_v55  ;;  %v5388_v14 = vmul.f32 %v9892_v60, %v5129_v29 }
 0x538   :  { %6554 = vst [vmem:[%s10270_s7 + $0xb8] sm:$0xff] %v6510_v0   ;;  %v5501_v59 = vmax.f32 %v5333_v39, %v5445_v31  ;;  %v5446_v27 = vadd.f32 %v9899_v43, %v5390_v58 }
 0x539   :  { %6553 = vst [vmem:[%s10270_s7 + $0xb0] sm:$0xff] %v6505_v37   ;;  %v5499_v22 = vmax.f32 %v5331_v23, %v5443_v26  ;;  %v5444_v57 = vadd.f32 %v9899_v43, %v5388_v14 }
 0x53a   :  { %v5502_v52 = vmax.f32 %v5334_v40, %v5446_v27  ;;  %v5557_v36 = vmax.f32 %v5501_v59, 0.0 }
 0x53b   :  { %v5500_v12 = vmax.f32 %v5332_v28, %v5444_v57  ;;  %v7472_v61 = vpop.f32.mrb[108].mxu1  ;;  %v5555_v9 = vmax.f32 %v5499_v22, 0.0 }
 0x53c   :  { %v5558_v5 = vmax.f32 %v5502_v52, 0.0  ;;  %v5393_v6 = vmul.f32 %v7472_v61, %v9892_v60  ;;  %v5142_v54 = vpop.f32.mrb[109].mxu1 }
 0x53d   :  { %v5556_v3 = vmax.f32 %v5500_v12, 0.0  ;;  %v5391_v41 = vmul.f32 %v9892_v60, %v5142_v54  ;;  %v7473_v8 = vpop.f32.mrb[110].mxu1 }
 0x53e   :  { %v6520_v49 = vpack.c.bf16 %v5558_v5, %v5557_v36  ;;  %v5449_v13 = vadd.f32 %v9899_v43, %v5393_v6  ;;  %v5394_v4 = vmul.f32 %v7473_v8, %v9892_v60  ;;  %v5145_v11 = vpop.f32.mrb[111].mxu1 }
 0x53f   :  { %v6515_v34 = vpack.c.bf16 %v5556_v3, %v5555_v9  ;;  %v5447_v46 = vadd.f32 %v9899_v43, %v5391_v41  ;;  %v5392_v33 = vmul.f32 %v9892_v60, %v5145_v11 }
 0x540   :  { %6556 = vst [vmem:[%s10270_s7 + $0xc8] sm:$0xff] %v6520_v49   ;;  %v5505_v2 = vmax.f32 %v5337_v30, %v5449_v13  ;;  %v5450_v51 = vadd.f32 %v9899_v43, %v5394_v4 }
 0x541   :  { %6555 = vst [vmem:[%s10270_s7 + $0xc0] sm:$0xff] %v6515_v34   ;;  %v5503_v17 = vmax.f32 %v5335_v7, %v5447_v46  ;;  %v5448_v20 = vadd.f32 %v9899_v43, %v5392_v33 }
 0x542   :  { %v5506_v18 = vmax.f32 %v5338_v47, %v5450_v51  ;;  %v5561_v15 = vmax.f32 %v5505_v2, 0.0 }
 0x543   :  { %v5504_v60 = vmax.f32 %v5336_v38, %v5448_v20  ;;  %v5559_v56 = vmax.f32 %v5503_v17, 0.0 }
 0x544   :  { %v5562_v42 = vmax.f32 %v5506_v18, 0.0 }
 0x545   :  { %v5560_v1 = vmax.f32 %v5504_v60, 0.0 }
 0x546   :  { %v6530_v48 = vpack.c.bf16 %v5562_v42, %v5561_v15 }
 0x547   :  { %v6525_v45 = vpack.c.bf16 %v5560_v1, %v5559_v56 }
 0x548   :  { %6558 = vst [vmem:[%s10270_s7 + $0xd8] sm:$0xff] %v6530_v48  }
 0x549   :  { %6557 = vst [vmem:[%s10270_s7 + $0xd0] sm:$0xff] %v6525_v45  }

// kernel: cnn1d_forward.3
= control target key start
LH: loop header
LB: loop body
LE: loop exit
PB: predicated region body
PF: predicated region fallthrough
CT: control target
= control target key end

     0   :  { %vm6761_vm0 = vmmov 0   ;;  %s8296_s1 = inlined_call_operand.vmem [shape: bf16[7168,128], index: 1, kind: input, shape index: {}]   ;;  %s8297_s0 = inlined_call_operand.vmem [shape: bf16[8,7168], index: 0, kind: input, shape index: {}]   ;;  %s8298_s2 = inlined_call_operand.vmem [shape: f32[1,128], index: 2, kind: input, shape index: {}]   ;;  %s8299_s3 = inlined_call_operand.vmem [shape: f32[128,128], index: 3, kind: input, shape index: {}]   ;;  %s8300_s4 = inlined_call_operand.vmem [shape: f32[1,128], index: 4, kind: input, shape index: {}]   ;;  %s8301_s5 = inlined_call_operand.vmem [shape: f32[8,128], index: 5, kind: output, shape index: {}]  }
   0x1   :  { %v6256_v0 = vld [vmem:[%s8296_s1 + $0x40] sm:$0xff]   ;;  %v6260_v4 = vld [vmem:[%s8296_s1 + $0x48] sm:$0xff]   ;;  %v6264_v8 = vld [vmem:[%s8296_s1 + $0x50] sm:$0xff]  }
   0x2   :  { %v6257_v1 = vld [vmem:[%s8296_s1 + $0xc0] sm:$0xff]   ;;  %5561 = vmatprep.subr.bf16.mxu0 %v6256_v0  ;;  %v6261_v5 = vld [vmem:[%s8296_s1 + $0xc8] sm:$0xff]   ;;  %v6265_v9 = vld [vmem:[%s8296_s1 + $0xd0] sm:$0xff]  }
   0x3   :  { %v6258_v2 = vld [vmem:[%s8296_s1] sm:$0xff]   ;;  %5583 = vmatprep.subr.bf16.mxu1 %v6257_v1  ;;  %v6262_v6 = vld [vmem:[%s8296_s1 + $0x8] sm:$0xff]   ;;  %v6266_v10 = vld [vmem:[%s8296_s1 + $0x10] sm:$0xff]  }
   0x4   :  { %v6259_v3 = vld [vmem:[%s8296_s1 + $0x80] sm:$0xff]   ;;  %5562 = vmatpush3.bf16.msra.mxu0 %v6258_v2  ;;  %v6263_v7 = vld [vmem:[%s8296_s1 + $0x88] sm:$0xff]   ;;  %v6267_v11 = vld [vmem:[%s8296_s1 + $0x90] sm:$0xff]  }
   0x5   :  { %5584 = vmatpush3.bf16.msra.mxu1 %v6259_v3  ;;  %5563 = vmatprep.subr.bf16.mxu0 %v6260_v4  ;;  %v6268_v12 = vld [vmem:[%s8296_s1 + $0x58] sm:$0xff]   ;;  %v6272_v16 = vld [vmem:[%s8296_s1 + $0x60] sm:$0xff]   ;;  %v6276_v20 = vld [vmem:[%s8296_s1 + $0x68] sm:$0xff]  }
   0x6   :  { %5585 = vmatprep.subr.bf16.mxu1 %v6261_v5  ;;  %v6269_v13 = vld [vmem:[%s8296_s1 + $0xd8] sm:$0xff]   ;;  %v6273_v17 = vld [vmem:[%s8296_s1 + $0xe0] sm:$0xff]   ;;  %v6277_v21 = vld [vmem:[%s8296_s1 + $0xe8] sm:$0xff]  }
   0x7   :  { %v6270_v14 = vld [vmem:[%s8296_s1 + $0x18] sm:$0xff]   ;;  %v6274_v18 = vld [vmem:[%s8296_s1 + $0x20] sm:$0xff]   ;;  %v6278_v22 = vld [vmem:[%s8296_s1 + $0x28] sm:$0xff]  }
   0x8   :  { %5564 = vmatpush3.bf16.msra.mxu0 %v6262_v6  ;;  %v6271_v15 = vld [vmem:[%s8296_s1 + $0x98] sm:$0xff]   ;;  %v6275_v19 = vld [vmem:[%s8296_s1 + $0xa0] sm:$0xff]   ;;  %v6279_v23 = vld [vmem:[%s8296_s1 + $0xa8] sm:$0xff]  }
   0x9   :  { %5586 = vmatpush3.bf16.msra.mxu1 %v6263_v7  ;;  %5565 = vmatprep.subr.bf16.mxu0 %v6264_v8  ;;  %v6280_v24 = vld [vmem:[%s8296_s1 + $0x70] sm:$0xff]   ;;  %v6284_v28 = vld [vmem:[%s8296_s1 + $0x78] sm:$0xff]   ;;  %v21_v32 = vld [vmem:[%s8297_s0] sm:$0xff] }
   0xa   :  { %5587 = vmatprep.subr.bf16.mxu1 %v6265_v9  ;;  %v6281_v25 = vld [vmem:[%s8296_s1 + $0xf0] sm:$0xff]   ;;  %v6285_v29 = vld [vmem:[%s8296_s1 + $0xf8] sm:$0xff]   ;;  %v22_v33 = vld [vmem:[%s8297_s0 + $0x8] sm:$0xff]  ;;  %v5056_v34 = vcombine.low %v21_v32, %v21_v32  ;;  %v5057_v35 = vcombine.high %v21_v32, %v21_v32 }
   0xb   :  { %v6282_v26 = vld [vmem:[%s8296_s1 + $0x30] sm:$0xff]   ;;  %v6286_v30 = vld [vmem:[%s8296_s1 + $0x38] sm:$0xff]   ;;  %v5058_v36 = vcombine.low %v22_v33, %v22_v33  ;;  %v5059_v37 = vcombine.high %v22_v33, %v22_v33  ;;  %v6292_v38 = vld [vmem:[%s8296_s1 + $0x140] sm:$0xff]  }
   0xc   :  { %5566 = vmatpush3.bf16.msra.mxu0 %v6266_v10  ;;  %v6283_v27 = vld [vmem:[%s8296_s1 + $0xb0] sm:$0xff]   ;;  %v6287_v31 = vld [vmem:[%s8296_s1 + $0xb8] sm:$0xff]   ;;  %v6293_v39 = vld [vmem:[%s8296_s1 + $0x1c0] sm:$0xff]   ;;  %3868 = vmatprep.mubr.bf16.mxu0 %v5057_v35 }
   0xd   :  { %5588 = vmatpush3.bf16.msra.mxu1 %v6267_v11  ;;  %5567 = vmatprep.subr.bf16.mxu0 %v6268_v12  ;;  %v6294_v40 = vld [vmem:[%s8296_s1 + $0x100] sm:$0xff]   ;;  %v6296_v42 = vld [vmem:[%s8296_s1 + $0x148] sm:$0xff]   ;;  %v6300_v46 = vld [vmem:[%s8296_s1 + $0x150] sm:$0xff]  }
   0xe   :  { %5589 = vmatprep.subr.bf16.mxu1 %v6269_v13  ;;  %3908 = vmatprep.mubr.bf16.mxu1 %v5059_v37  ;;  %v6295_v41 = vld [vmem:[%s8296_s1 + $0x180] sm:$0xff]   ;;  %v6297_v43 = vld [vmem:[%s8296_s1 + $0x1c8] sm:$0xff]   ;;  %v6301_v47 = vld [vmem:[%s8296_s1 + $0x1d0] sm:$0xff]  }
   0xf   :  { %v6298_v44 = vld [vmem:[%s8296_s1 + $0x108] sm:$0xff]   ;;  %v6302_v48 = vld [vmem:[%s8296_s1 + $0x110] sm:$0xff]   ;;  %v6304_v50 = vld [vmem:[%s8296_s1 + $0x158] sm:$0xff]  }
  0x10   :  { %5568 = vmatpush3.bf16.msra.mxu0 %v6270_v14  ;;  %v6299_v45 = vld [vmem:[%s8296_s1 + $0x188] sm:$0xff]   ;;  %v6303_v49 = vld [vmem:[%s8296_s1 + $0x190] sm:$0xff]   ;;  %v6305_v51 = vld [vmem:[%s8296_s1 + $0x1d8] sm:$0xff]  }
  0x11   :  { %5590 = vmatpush3.bf16.msra.mxu1 %v6271_v15  ;;  %5569 = vmatprep.subr.bf16.mxu0 %v6272_v16  ;;  %v6306_v52 = vld [vmem:[%s8296_s1 + $0x118] sm:$0xff]   ;;  %v6308_v54 = vld [vmem:[%s8296_s1 + $0x160] sm:$0xff]   ;;  %v6312_v58 = vld [vmem:[%s8296_s1 + $0x168] sm:$0xff]  }
  0x12   :  { %5591 = vmatprep.subr.bf16.mxu1 %v6273_v17  ;;  %v6307_v53 = vld [vmem:[%s8296_s1 + $0x198] sm:$0xff]   ;;  %v6309_v55 = vld [vmem:[%s8296_s1 + $0x1e0] sm:$0xff]   ;;  %v6313_v59 = vld [vmem:[%s8296_s1 + $0x1e8] sm:$0xff]  }
  0x13   :  { %v6310_v56 = vld [vmem:[%s8296_s1 + $0x120] sm:$0xff]   ;;  %v6314_v60 = vld [vmem:[%s8296_s1 + $0x128] sm:$0xff]   ;;  %v6316_v62 = vld [vmem:[%s8296_s1 + $0x170] sm:$0xff]  }
  0x14   :  { %5570 = vmatpush3.bf16.msra.mxu0 %v6274_v18  ;;  %v6311_v57 = vld [vmem:[%s8296_s1 + $0x1a0] sm:$0xff]   ;;  %v6315_v61 = vld [vmem:[%s8296_s1 + $0x1a8] sm:$0xff]   ;;  %v6317_v63 = vld [vmem:[%s8296_s1 + $0x1f0] sm:$0xff]  }
  0x15   :  { %5592 = vmatpush3.bf16.msra.mxu1 %v6275_v19  ;;  %5571 = vmatprep.subr.bf16.mxu0 %v6276_v20  ;;  %v6318_v0 = vld [vmem:[%s8296_s1 + $0x130] sm:$0xff]   ;;  %v6320_v2 = vld [vmem:[%s8296_s1 + $0x178] sm:$0xff]   ;;  %v6328_v12 = vld [vmem:[%s8296_s1 + $0x240] sm:$0xff]  }
  0x16   :  { %5593 = vmatprep.subr.bf16.mxu1 %v6277_v21  ;;  %v6319_v1 = vld [vmem:[%s8296_s1 + $0x1b0] sm:$0xff]   ;;  %v6321_v3 = vld [vmem:[%s8296_s1 + $0x1f8] sm:$0xff]   ;;  %v6329_v13 = vld [vmem:[%s8296_s1 + $0x2c0] sm:$0xff]  }
  0x17   :  { %v6322_v4 = vld [vmem:[%s8296_s1 + $0x138] sm:$0xff]   ;;  %v23_v6 = vld [vmem:[%s8297_s0 + $0x10] sm:$0xff]  ;;  %v6330_v14 = vld [vmem:[%s8296_s1 + $0x200] sm:$0xff]  }
  0x18   :  { %5572 = vmatpush3.bf16.msra.mxu0 %v6278_v22  ;;  %v6323_v5 = vld [vmem:[%s8296_s1 + $0x1b8] sm:$0xff]   ;;  %v5060_v7 = vcombine.low %v23_v6, %v23_v6  ;;  %v5061_v8 = vcombine.high %v23_v6, %v23_v6  ;;  %v6331_v15 = vld [vmem:[%s8296_s1 + $0x280] sm:$0xff]   ;;  %v6332_v16 = vld [vmem:[%s8296_s1 + $0x248] sm:$0xff]  }
  0x19   :  { %5594 = vmatpush3.bf16.msra.mxu1 %v6279_v23  ;;  %5573 = vmatprep.subr.bf16.mxu0 %v6280_v24  ;;  %v24_v9 = vld [vmem:[%s8297_s0 + $0x18] sm:$0xff]  ;;  %v6333_v17 = vld [vmem:[%s8296_s1 + $0x2c8] sm:$0xff]   ;;  %v6336_v20 = vld [vmem:[%s8296_s1 + $0x250] sm:$0xff]  }
  0x1a   :  { %5595 = vmatprep.subr.bf16.mxu1 %v6281_v25  ;;  %v5062_v10 = vcombine.low %v24_v9, %v24_v9  ;;  %v5063_v11 = vcombine.high %v24_v9, %v24_v9  ;;  %v6334_v18 = vld [vmem:[%s8296_s1 + $0x208] sm:$0xff]   ;;  %v6337_v21 = vld [vmem:[%s8296_s1 + $0x2d0] sm:$0xff]   ;;  %v6340_v24 = vld [vmem:[%s8296_s1 + $0x258] sm:$0xff]  }
  0x1b   :  { %v6335_v19 = vld [vmem:[%s8296_s1 + $0x288] sm:$0xff]   ;;  %v6338_v22 = vld [vmem:[%s8296_s1 + $0x210] sm:$0xff]   ;;  %v6341_v25 = vld [vmem:[%s8296_s1 + $0x2d8] sm:$0xff]  }
  0x1c   :  { %5574 = vmatpush3.bf16.msra.mxu0 %v6282_v26  ;;  %v6339_v23 = vld [vmem:[%s8296_s1 + $0x290] sm:$0xff]   ;;  %v6342_v26 = vld [vmem:[%s8296_s1 + $0x218] sm:$0xff]   ;;  %v6348_v32 = vld [vmem:[%s8296_s1 + $0x268] sm:$0xff]  }
  0x1d   :  { %5596 = vmatpush3.bf16.msra.mxu1 %v6283_v27  ;;  %5575 = vmatprep.subr.bf16.mxu0 %v6284_v28  ;;  %v6343_v27 = vld [vmem:[%s8296_s1 + $0x298] sm:$0xff]   ;;  %v6344_v28 = vld [vmem:[%s8296_s1 + $0x260] sm:$0xff]   ;;  %v6349_v33 = vld [vmem:[%s8296_s1 + $0x2e8] sm:$0xff]  }
  0x1e   :  { %5597 = vmatprep.subr.bf16.mxu1 %v6285_v29  ;;  %v6345_v29 = vld [vmem:[%s8296_s1 + $0x2e0] sm:$0xff]   ;;  %v6351_v35 = vld [vmem:[%s8296_s1 + $0x2a8] sm:$0xff]   ;;  %v6353_v37 = vld [vmem:[%s8296_s1 + $0x2f0] sm:$0xff]  }
  0x1f   :  { %v6384_v6 = vld [vmem:[%s8296_s1 + $0x368] sm:$0xff]  }
  0x20   :  { %5576 = vmatpush3.bf16.msra.mxu0 %v6286_v30  ;;  %v6346_v30 = vld [vmem:[%s8296_s1 + $0x220] sm:$0xff]   ;;  %v6387_v9 = vld [vmem:[%s8296_s1 + $0x3a8] sm:$0xff]  }
  0x21   :  { %5598 = vmatpush3.bf16.msra.mxu1 %v6287_v31  ;;  %5605 = vmatprep.subr.bf16.mxu0 %v6292_v38  ;;  %v6347_v31 = vld [vmem:[%s8296_s1 + $0x2a0] sm:$0xff]   ;;  %v6354_v38 = vld [vmem:[%s8296_s1 + $0x230] sm:$0xff]  }
  0x22   :  { %5627 = vmatprep.subr.bf16.mxu1 %v6293_v39  ;;  %v6355_v39 = vld [vmem:[%s8296_s1 + $0x2b0] sm:$0xff]  }
  0x23   :  { %3869 = vmatmul.mubr.bf16.vlgmr.msra.gmra.mrb[0].mxu0 %v5056_v34  ;;  %v6350_v34 = vld [vmem:[%s8296_s1 + $0x228] sm:$0xff]  }
  0x24   :  { %3909 = vmatmul.mubr.bf16.vlgmr.msra.gmra.mrb[0].mxu1 %v5058_v36  ;;  %5606 = vmatpush3.bf16.msra.mxu0 %v6294_v40  ;;  %v6352_v36 = vld [vmem:[%s8296_s1 + $0x270] sm:$0xff]   ;;  %v6356_v40 = vld [vmem:[%s8296_s1 + $0x278] sm:$0xff]  }
  0x25   :  { %5628 = vmatpush3.bf16.msra.mxu1 %v6295_v41  ;;  %5607 = vmatprep.subr.bf16.mxu0 %v6296_v42  ;;  %v6357_v41 = vld [vmem:[%s8296_s1 + $0x2f8] sm:$0xff]  }
  0x26   :  { %5629 = vmatprep.subr.bf16.mxu1 %v6297_v43  ;;  %3948 = vmatprep.mubr.bf16.mxu0 %v5061_v8  ;;  %v6358_v42 = vld [vmem:[%s8296_s1 + $0x238] sm:$0xff]   ;;  %v6386_v8 = vld [vmem:[%s8296_s1 + $0x328] sm:$0xff]  }
  0x27   :  { %3988 = vmatprep.mubr.bf16.mxu1 %v5063_v11  ;;  %v6359_v43 = vld [vmem:[%s8296_s1 + $0x2b8] sm:$0xff]   ;;  %v6389_v11 = vld [vmem:[%s8296_s1 + $0x3f0] sm:$0xff]  }
  0x28   :  { %5608 = vmatpush3.bf16.msra.mxu0 %v6298_v44  ;;  %v25_v44 = vld [vmem:[%s8297_s0 + $0x20] sm:$0xff] }
  0x29   :  { %5630 = vmatpush3.bf16.msra.mxu1 %v6299_v45  ;;  %5609 = vmatprep.subr.bf16.mxu0 %v6300_v46  ;;  %v26_v45 = vld [vmem:[%s8297_s0 + $0x28] sm:$0xff]  ;;  %v5064_v46 = vcombine.low %v25_v44, %v25_v44 }
  0x2a   :  { %5631 = vmatprep.subr.bf16.mxu1 %v6301_v47  ;;  %v5065_v47 = vcombine.high %v25_v44, %v25_v44  ;;  %v6420_v44 = vld [vmem:[%s8296_s1 + $0x468] sm:$0xff]  }
  0x2c   :  { %5610 = vmatpush3.bf16.msra.mxu0 %v6302_v48  ;;  %v5066_v48 = vcombine.low %v26_v45, %v26_v45 }
  0x2d   :  { %5632 = vmatpush3.bf16.msra.mxu1 %v6303_v49  ;;  %5611 = vmatprep.subr.bf16.mxu0 %v6304_v50  ;;  %v5067_v49 = vcombine.high %v26_v45, %v26_v45  ;;  %v6364_v50 = vld [vmem:[%s8296_s1 + $0x340] sm:$0xff]   ;;  %v6421_v45 = vld [vmem:[%s8296_s1 + $0x4e8] sm:$0xff]  }
  0x2e   :  { %5633 = vmatprep.subr.bf16.mxu1 %v6305_v51  ;;  %v6365_v51 = vld [vmem:[%s8296_s1 + $0x3c0] sm:$0xff]  }
  0x30   :  { %5612 = vmatpush3.bf16.msra.mxu0 %v6306_v52  ;;  %v6366_v52 = vld [vmem:[%s8296_s1 + $0x300] sm:$0xff]  }
  0x31   :  { %5634 = vmatpush3.bf16.msra.mxu1 %v6307_v53  ;;  %5613 = vmatprep.subr.bf16.mxu0 %v6308_v54  ;;  %v6367_v53 = vld [vmem:[%s8296_s1 + $0x380] sm:$0xff]   ;;  %v6368_v54 = vld [vmem:[%s8296_s1 + $0x348] sm:$0xff]  }
  0x32   :  { %5635 = vmatprep.subr.bf16.mxu1 %v6309_v55  ;;  %v6369_v55 = vld [vmem:[%s8296_s1 + $0x3c8] sm:$0xff]  }
  0x34   :  { %5614 = vmatpush3.bf16.msra.mxu0 %v6310_v56  ;;  %v6370_v56 = vld [vmem:[%s8296_s1 + $0x308] sm:$0xff]  }
  0x35   :  { %5636 = vmatpush3.bf16.msra.mxu1 %v6311_v57  ;;  %5615 = vmatprep.subr.bf16.mxu0 %v6312_v58  ;;  %v6371_v57 = vld [vmem:[%s8296_s1 + $0x388] sm:$0xff]   ;;  %v6372_v58 = vld [vmem:[%s8296_s1 + $0x350] sm:$0xff]  }
  0x36   :  { %5637 = vmatprep.subr.bf16.mxu1 %v6313_v59  ;;  %v6373_v59 = vld [vmem:[%s8296_s1 + $0x3d0] sm:$0xff]  }
  0x38   :  { %5616 = vmatpush3.bf16.msra.mxu0 %v6314_v60  ;;  %v6374_v60 = vld [vmem:[%s8296_s1 + $0x310] sm:$0xff]  }
  0x39   :  { %5638 = vmatpush3.bf16.msra.mxu1 %v6315_v61  ;;  %5617 = vmatprep.subr.bf16.mxu0 %v6316_v62  ;;  %v6375_v61 = vld [vmem:[%s8296_s1 + $0x390] sm:$0xff]   ;;  %v6376_v62 = vld [vmem:[%s8296_s1 + $0x358] sm:$0xff]  }
  0x3a   :  { %5639 = vmatprep.subr.bf16.mxu1 %v6317_v63  ;;  %v6377_v63 = vld [vmem:[%s8296_s1 + $0x3d8] sm:$0xff]  }
  0x3c   :  { %5618 = vmatpush3.bf16.msra.mxu0 %v6318_v0  ;;  %v6378_v0 = vld [vmem:[%s8296_s1 + $0x318] sm:$0xff]  }
  0x3d   :  { %5640 = vmatpush3.bf16.msra.mxu1 %v6319_v1  ;;  %5619 = vmatprep.subr.bf16.mxu0 %v6320_v2  ;;  %v6379_v1 = vld [vmem:[%s8296_s1 + $0x398] sm:$0xff]   ;;  %v6380_v2 = vld [vmem:[%s8296_s1 + $0x360] sm:$0xff]  }
  0x3e   :  { %5641 = vmatprep.subr.bf16.mxu1 %v6321_v3  ;;  %v6381_v3 = vld [vmem:[%s8296_s1 + $0x3e0] sm:$0xff]  }
  0x40   :  { %5620 = vmatpush3.bf16.msra.mxu0 %v6322_v4  ;;  %v6382_v4 = vld [vmem:[%s8296_s1 + $0x320] sm:$0xff]  }
  0x41   :  { %5642 = vmatpush3.bf16.msra.mxu1 %v6323_v5  ;;  %5649 = vmatprep.subr.bf16.mxu0 %v6328_v12  ;;  %v6383_v5 = vld [vmem:[%s8296_s1 + $0x3a0] sm:$0xff]   ;;  %v6390_v12 = vld [vmem:[%s8296_s1 + $0x330] sm:$0xff]  }
  0x42   :  { %5671 = vmatprep.subr.bf16.mxu1 %v6329_v13  ;;  %v6391_v13 = vld [vmem:[%s8296_s1 + $0x3b0] sm:$0xff]  }
  0x43   :  { %3949 = vmatmul.mubr.bf16.vlgmr.msra.gmra.mrb[4].mxu0 %v5060_v7  ;;  %v6385_v7 = vld [vmem:[%s8296_s1 + $0x3e8] sm:$0xff]  }
  0x44   :  { %3989 = vmatmul.mubr.bf16.vlgmr.msra.gmra.mrb[4].mxu1 %v5062_v10  ;;  %5650 = vmatpush3.bf16.msra.mxu0 %v6330_v14  ;;  %v6388_v10 = vld [vmem:[%s8296_s1 + $0x370] sm:$0xff]   ;;  %v6392_v14 = vld [vmem:[%s8296_s1 + $0x378] sm:$0xff]  }
  0x45   :  { %5672 = vmatpush3.bf16.msra.mxu1 %v6331_v15  ;;  %5651 = vmatprep.subr.bf16.mxu0 %v6332_v16  ;;  %v6393_v15 = vld [vmem:[%s8296_s1 + $0x3f8] sm:$0xff]  }
  0x46   :  { %5673 = vmatprep.subr.bf16.mxu1 %v6333_v17  ;;  %4028 = vmatprep.mubr.bf16.mxu0 %v5065_v47  ;;  %v6394_v16 = vld [vmem:[%s8296_s1 + $0x338] sm:$0xff]   ;;  %v6423_v47 = vld [vmem:[%s8296_s1 + $0x4a8] sm:$0xff]  }
  0x47   :  { %4068 = vmatprep.mubr.bf16.mxu1 %v5067_v49  ;;  %v6395_v17 = vld [vmem:[%s8296_s1 + $0x3b8] sm:$0xff]   ;;  %v6425_v49 = vld [vmem:[%s8296_s1 + $0x4f0] sm:$0xff]  }
  0x48   :  { %5652 = vmatpush3.bf16.msra.mxu0 %v6334_v18  ;;  %v27_v18 = vld [vmem:[%s8297_s0 + $0x30] sm:$0xff] }
  0x49   :  { %5674 = vmatpush3.bf16.msra.mxu1 %v6335_v19  ;;  %5653 = vmatprep.subr.bf16.mxu0 %v6336_v20  ;;  %v28_v19 = vld [vmem:[%s8297_s0 + $0x38] sm:$0xff]  ;;  %v5068_v20 = vcombine.low %v27_v18, %v27_v18 }
  0x4a   :  { %5675 = vmatprep.subr.bf16.mxu1 %v6337_v21  ;;  %v5069_v21 = vcombine.high %v27_v18, %v27_v18  ;;  %v6456_v18 = vld [vmem:[%s8296_s1 + $0x568] sm:$0xff]  }
  0x4c   :  { %5654 = vmatpush3.bf16.msra.mxu0 %v6338_v22  ;;  %v5070_v22 = vcombine.low %v28_v19, %v28_v19 }
  0x4d   :  { %5676 = vmatpush3.bf16.msra.mxu1 %v6339_v23  ;;  %5655 = vmatprep.subr.bf16.mxu0 %v6340_v24  ;;  %v6400_v23 = vld [vmem:[%s8296_s1 + $0x440] sm:$0xff]   ;;  %v5071_v24 = vcombine.high %v28_v19, %v28_v19  ;;  %v6457_v19 = vld [vmem:[%s8296_s1 + $0x5e8] sm:$0xff]  }
  0x4e   :  { %5677 = vmatprep.subr.bf16.mxu1 %v6341_v25  ;;  %v6401_v25 = vld [vmem:[%s8296_s1 + $0x4c0] sm:$0xff]  }
  0x50   :  { %5656 = vmatpush3.bf16.msra.mxu0 %v6342_v26  ;;  %v6402_v26 = vld [vmem:[%s8296_s1 + $0x400] sm:$0xff]  }
  0x51   :  { %5678 = vmatpush3.bf16.msra.mxu1 %v6343_v27  ;;  %5657 = vmatprep.subr.bf16.mxu0 %v6344_v28  ;;  %v6403_v27 = vld [vmem:[%s8296_s1 + $0x480] sm:$0xff]   ;;  %v6404_v28 = vld [vmem:[%s8296_s1 + $0x448] sm:$0xff]  }
  0x52   :  { %5679 = vmatprep.subr.bf16.mxu1 %v6345_v29  ;;  %v6405_v29 = vld [vmem:[%s8296_s1 + $0x4c8] sm:$0xff]  }
  0x54   :  { %5658 = vmatpush3.bf16.msra.mxu0 %v6346_v30  ;;  %v6406_v30 = vld [vmem:[%s8296_s1 + $0x408] sm:$0xff]  }
  0x55   :  { %5680 = vmatpush3.bf16.msra.mxu1 %v6347_v31  ;;  %5659 = vmatprep.subr.bf16.mxu0 %v6348_v32  ;;  %v6407_v31 = vld [vmem:[%s8296_s1 + $0x488] sm:$0xff]   ;;  %v6408_v32 = vld [vmem:[%s8296_s1 + $0x450] sm:$0xff]  }
  0x56   :  { %5681 = vmatprep.subr.bf16.mxu1 %v6349_v33  ;;  %v6409_v33 = vld [vmem:[%s8296_s1 + $0x4d0] sm:$0xff]  }
  0x58   :  { %5660 = vmatpush3.bf16.msra.mxu0 %v6350_v34  ;;  %v6410_v34 = vld [vmem:[%s8296_s1 + $0x410] sm:$0xff]  }
  0x59   :  { %5682 = vmatpush3.bf16.msra.mxu1 %v6351_v35  ;;  %5661 = vmatprep.subr.bf16.mxu0 %v6352_v36  ;;  %v6411_v35 = vld [vmem:[%s8296_s1 + $0x490] sm:$0xff]   ;;  %v6412_v36 = vld [vmem:[%s8296_s1 + $0x458] sm:$0xff]  }
  0x5a   :  { %5683 = vmatprep.subr.bf16.mxu1 %v6353_v37  ;;  %v6413_v37 = vld [vmem:[%s8296_s1 + $0x4d8] sm:$0xff]  }
  0x5c   :  { %5662 = vmatpush3.bf16.msra.mxu0 %v6354_v38  ;;  %v6414_v38 = vld [vmem:[%s8296_s1 + $0x418] sm:$0xff]  }
  0x5d   :  { %5684 = vmatpush3.bf16.msra.mxu1 %v6355_v39  ;;  %5663 = vmatprep.subr.bf16.mxu0 %v6356_v40  ;;  %v6415_v39 = vld [vmem:[%s8296_s1 + $0x498] sm:$0xff]   ;;  %v6416_v40 = vld [vmem:[%s8296_s1 + $0x460] sm:$0xff]  }
  0x5e   :  { %5685 = vmatprep.subr.bf16.mxu1 %v6357_v41  ;;  %v6417_v41 = vld [vmem:[%s8296_s1 + $0x4e0] sm:$0xff]  }
  0x60   :  { %5664 = vmatpush3.bf16.msra.mxu0 %v6358_v42  ;;  %v6418_v42 = vld [vmem:[%s8296_s1 + $0x420] sm:$0xff]  }
  0x61   :  { %5686 = vmatpush3.bf16.msra.mxu1 %v6359_v43  ;;  %5693 = vmatprep.subr.bf16.mxu0 %v6364_v50  ;;  %v6419_v43 = vld [vmem:[%s8296_s1 + $0x4a0] sm:$0xff]   ;;  %v6426_v50 = vld [vmem:[%s8296_s1 + $0x430] sm:$0xff]  }
  0x62   :  { %5715 = vmatprep.subr.bf16.mxu1 %v6365_v51  ;;  %v6427_v51 = vld [vmem:[%s8296_s1 + $0x4b0] sm:$0xff]  }
  0x63   :  { %4029 = vmatmul.mubr.bf16.vlgmr.msra.gmra.mrb[8].mxu0 %v5064_v46  ;;  %v6422_v46 = vld [vmem:[%s8296_s1 + $0x428] sm:$0xff]  }
  0x64   :  { %4069 = vmatmul.mubr.bf16.vlgmr.msra.gmra.mrb[8].mxu1 %v5066_v48  ;;  %5694 = vmatpush3.bf16.msra.mxu0 %v6366_v52  ;;  %v6424_v48 = vld [vmem:[%s8296_s1 + $0x470] sm:$0xff]   ;;  %v6428_v52 = vld [vmem:[%s8296_s1 + $0x478] sm:$0xff]  }
  0x65   :  { %5716 = vmatpush3.bf16.msra.mxu1 %v6367_v53  ;;  %5695 = vmatprep.subr.bf16.mxu0 %v6368_v54  ;;  %v6429_v53 = vld [vmem:[%s8296_s1 + $0x4f8] sm:$0xff]  }
  0x66   :  { %5717 = vmatprep.subr.bf16.mxu1 %v6369_v55  ;;  %4108 = vmatprep.mubr.bf16.mxu0 %v5069_v21  ;;  %v6430_v54 = vld [vmem:[%s8296_s1 + $0x438] sm:$0xff]   ;;  %v6459_v21 = vld [vmem:[%s8296_s1 + $0x5a8] sm:$0xff]  }
  0x67   :  { %4148 = vmatprep.mubr.bf16.mxu1 %v5071_v24  ;;  %v6431_v55 = vld [vmem:[%s8296_s1 + $0x4b8] sm:$0xff]   ;;  %v6462_v24 = vld [vmem:[%s8296_s1 + $0x530] sm:$0xff]  }
  0x68   :  { %5696 = vmatpush3.bf16.msra.mxu0 %v6370_v56  ;;  %v29_v56 = vld [vmem:[%s8297_s0 + $0x40] sm:$0xff] }
  0x69   :  { %5718 = vmatpush3.bf16.msra.mxu1 %v6371_v57  ;;  %5697 = vmatprep.subr.bf16.mxu0 %v6372_v58  ;;  %v5072_v57 = vcombine.low %v29_v56, %v29_v56  ;;  %v5073_v58 = vcombine.high %v29_v56, %v29_v56  ;;  %v6492_v56 = vld [vmem:[%s8296_s1 + $0x668] sm:$0xff]  }
  0x6a   :  { %5719 = vmatprep.subr.bf16.mxu1 %v6373_v59  ;;  %v30_v59 = vld [vmem:[%s8297_s0 + $0x48] sm:$0xff] }
  0x6c   :  { %5698 = vmatpush3.bf16.msra.mxu0 %v6374_v60  ;;  %v5074_v60 = vcombine.low %v30_v59, %v30_v59 }
  0x6d   :  { %5720 = vmatpush3.bf16.msra.mxu1 %v6375_v61  ;;  %5699 = vmatprep.subr.bf16.mxu0 %v6376_v62  ;;  %v5075_v61 = vcombine.high %v30_v59, %v30_v59  ;;  %v6436_v62 = vld [vmem:[%s8296_s1 + $0x540] sm:$0xff]   ;;  %v6495_v59 = vld [vmem:[%s8296_s1 + $0x6a8] sm:$0xff]  }
  0x6e   :  { %5721 = vmatprep.subr.bf16.mxu1 %v6377_v63  ;;  %v6437_v63 = vld [vmem:[%s8296_s1 + $0x5c0] sm:$0xff]  }
  0x70   :  { %5700 = vmatpush3.bf16.msra.mxu0 %v6378_v0  ;;  %v6438_v0 = vld [vmem:[%s8296_s1 + $0x500] sm:$0xff]  }
  0x71   :  { %5722 = vmatpush3.bf16.msra.mxu1 %v6379_v1  ;;  %5701 = vmatprep.subr.bf16.mxu0 %v6380_v2  ;;  %v6439_v1 = vld [vmem:[%s8296_s1 + $0x580] sm:$0xff]   ;;  %v6440_v2 = vld [vmem:[%s8296_s1 + $0x548] sm:$0xff]  }
  0x72   :  { %5723 = vmatprep.subr.bf16.mxu1 %v6381_v3  ;;  %v6441_v3 = vld [vmem:[%s8296_s1 + $0x5c8] sm:$0xff]  }
  0x74   :  { %5702 = vmatpush3.bf16.msra.mxu0 %v6382_v4  ;;  %v6442_v4 = vld [vmem:[%s8296_s1 + $0x508] sm:$0xff]  }
  0x75   :  { %5724 = vmatpush3.bf16.msra.mxu1 %v6383_v5  ;;  %5703 = vmatprep.subr.bf16.mxu0 %v6384_v6  ;;  %v6443_v5 = vld [vmem:[%s8296_s1 + $0x588] sm:$0xff]   ;;  %v6444_v6 = vld [vmem:[%s8296_s1 + $0x550] sm:$0xff]  }
  0x76   :  { %5725 = vmatprep.subr.bf16.mxu1 %v6385_v7  ;;  %v6445_v7 = vld [vmem:[%s8296_s1 + $0x5d0] sm:$0xff]  }
  0x78   :  { %5704 = vmatpush3.bf16.msra.mxu0 %v6386_v8  ;;  %v6446_v8 = vld [vmem:[%s8296_s1 + $0x510] sm:$0xff]  }
  0x79   :  { %5726 = vmatpush3.bf16.msra.mxu1 %v6387_v9  ;;  %5705 = vmatprep.subr.bf16.mxu0 %v6388_v10  ;;  %v6447_v9 = vld [vmem:[%s8296_s1 + $0x590] sm:$0xff]   ;;  %v6448_v10 = vld [vmem:[%s8296_s1 + $0x558] sm:$0xff]  }
  0x7a   :  { %5727 = vmatprep.subr.bf16.mxu1 %v6389_v11  ;;  %v6449_v11 = vld [vmem:[%s8296_s1 + $0x5d8] sm:$0xff]  }
  0x7c   :  { %5706 = vmatpush3.bf16.msra.mxu0 %v6390_v12  ;;  %v6450_v12 = vld [vmem:[%s8296_s1 + $0x518] sm:$0xff]  }
  0x7d   :  { %5728 = vmatpush3.bf16.msra.mxu1 %v6391_v13  ;;  %5707 = vmatprep.subr.bf16.mxu0 %v6392_v14  ;;  %v6451_v13 = vld [vmem:[%s8296_s1 + $0x598] sm:$0xff]   ;;  %v6452_v14 = vld [vmem:[%s8296_s1 + $0x560] sm:$0xff]  }
  0x7e   :  { %5729 = vmatprep.subr.bf16.mxu1 %v6393_v15  ;;  %v6453_v15 = vld [vmem:[%s8296_s1 + $0x5e0] sm:$0xff]  }
  0x80   :  { %5708 = vmatpush3.bf16.msra.mxu0 %v6394_v16  ;;  %v6454_v16 = vld [vmem:[%s8296_s1 + $0x520] sm:$0xff]  }
  0x81   :  { %5730 = vmatpush3.bf16.msra.mxu1 %v6395_v17  ;;  %5737 = vmatprep.subr.bf16.mxu0 %v6400_v23  ;;  %v6455_v17 = vld [vmem:[%s8296_s1 + $0x5a0] sm:$0xff]   ;;  %v6461_v23 = vld [vmem:[%s8296_s1 + $0x5f0] sm:$0xff]  }
  0x82   :  { %5759 = vmatprep.subr.bf16.mxu1 %v6401_v25  ;;  %v6463_v25 = vld [vmem:[%s8296_s1 + $0x5b0] sm:$0xff]  }
  0x83   :  { %4109 = vmatmul.mubr.bf16.vlgmr.msra.gmra.mrb[12].mxu0 %v5068_v20  ;;  %v6458_v20 = vld [vmem:[%s8296_s1 + $0x528] sm:$0xff]  }
  0x84   :  { %4149 = vmatmul.mubr.bf16.vlgmr.msra.gmra.mrb[12].mxu1 %v5070_v22  ;;  %5738 = vmatpush3.bf16.msra.mxu0 %v6402_v26  ;;  %v6460_v22 = vld [vmem:[%s8296_s1 + $0x570] sm:$0xff]   ;;  %v6464_v26 = vld [vmem:[%s8296_s1 + $0x578] sm:$0xff]  }
  0x85   :  { %5760 = vmatpush3.bf16.msra.mxu1 %v6403_v27  ;;  %5739 = vmatprep.subr.bf16.mxu0 %v6404_v28  ;;  %v6465_v27 = vld [vmem:[%s8296_s1 + $0x5f8] sm:$0xff]  }
  0x86   :  { %5761 = vmatprep.subr.bf16.mxu1 %v6405_v29  ;;  %4188 = vmatprep.mubr.bf16.mxu0 %v5073_v58  ;;  %v6466_v28 = vld [vmem:[%s8296_s1 + $0x538] sm:$0xff]   ;;  %v6494_v58 = vld [vmem:[%s8296_s1 + $0x628] sm:$0xff]  }
  0x87   :  { %4228 = vmatprep.mubr.bf16.mxu1 %v5075_v61  ;;  %v6467_v29 = vld [vmem:[%s8296_s1 + $0x5b8] sm:$0xff]   ;;  %v6497_v61 = vld [vmem:[%s8296_s1 + $0x6f0] sm:$0xff]  }
  0x88   :  { %5740 = vmatpush3.bf16.msra.mxu0 %v6406_v30  ;;  %v31_v30 = vld [vmem:[%s8297_s0 + $0x50] sm:$0xff] }
  0x89   :  { %5762 = vmatpush3.bf16.msra.mxu1 %v6407_v31  ;;  %5741 = vmatprep.subr.bf16.mxu0 %v6408_v32  ;;  %v32_v31 = vld [vmem:[%s8297_s0 + $0x58] sm:$0xff]  ;;  %v5076_v32 = vcombine.low %v31_v30, %v31_v30 }
  0x8a   :  { %5763 = vmatprep.subr.bf16.mxu1 %v6409_v33  ;;  %v5077_v33 = vcombine.high %v31_v30, %v31_v30  ;;  %v6527_v30 = vld [vmem:[%s8296_s1 + $0x7a0] sm:$0xff]  }
  0x8c   :  { %5742 = vmatpush3.bf16.msra.mxu0 %v6410_v34  ;;  %v5078_v34 = vcombine.low %v32_v31, %v32_v31 }
  0x8d   :  { %5764 = vmatpush3.bf16.msra.mxu1 %v6411_v35  ;;  %5743 = vmatprep.subr.bf16.mxu0 %v6412_v36  ;;  %v5079_v35 = vcombine.high %v32_v31, %v32_v31  ;;  %v6472_v36 = vld [vmem:[%s8296_s1 + $0x640] sm:$0xff]  }
  0x8e   :  { %5765 = vmatprep.subr.bf16.mxu1 %v6413_v37  ;;  %v6473_v37 = vld [vmem:[%s8296_s1 + $0x6c0] sm:$0xff]  }
  0x90   :  { %5744 = vmatpush3.bf16.msra.mxu0 %v6414_v38  ;;  %v6474_v38 = vld [vmem:[%s8296_s1 + $0x600] sm:$0xff]  }
  0x91   :  { %5766 = vmatpush3.bf16.msra.mxu1 %v6415_v39  ;;  %5745 = vmatprep.subr.bf16.mxu0 %v6416_v40  ;;  %v6475_v39 = vld [vmem:[%s8296_s1 + $0x680] sm:$0xff]   ;;  %v6476_v40 = vld [vmem:[%s8296_s1 + $0x648] sm:$0xff]  }
  0x92   :  { %5767 = vmatprep.subr.bf16.mxu1 %v6417_v41  ;;  %v6477_v41 = vld [vmem:[%s8296_s1 + $0x6c8] sm:$0xff]  }
  0x94   :  { %5746 = vmatpush3.bf16.msra.mxu0 %v6418_v42  ;;  %v6478_v42 = vld [vmem:[%s8296_s1 + $0x608] sm:$0xff]  }
  0x95   :  { %5768 = vmatpush3.bf16.msra.mxu1 %v6419_v43  ;;  %5747 = vmatprep.subr.bf16.mxu0 %v6420_v44  ;;  %v6479_v43 = vld [vmem:[%s8296_s1 + $0x688] sm:$0xff]   ;;  %v6480_v44 = vld [vmem:[%s8296_s1 + $0x650] sm:$0xff]  }
  0x96   :  { %5769 = vmatprep.subr.bf16.mxu1 %v6421_v45  ;;  %v6481_v45 = vld [vmem:[%s8296_s1 + $0x6d0] sm:$0xff]  }
  0x98   :  { %5748 = vmatpush3.bf16.msra.mxu0 %v6422_v46  ;;  %v6482_v46 = vld [vmem:[%s8296_s1 + $0x610] sm:$0xff]  }
  0x99   :  { %5770 = vmatpush3.bf16.msra.mxu1 %v6423_v47  ;;  %5749 = vmatprep.subr.bf16.mxu0 %v6424_v48  ;;  %v6483_v47 = vld [vmem:[%s8296_s1 + $0x690] sm:$0xff]   ;;  %v6484_v48 = vld [vmem:[%s8296_s1 + $0x658] sm:$0xff]  }
  0x9a   :  { %5771 = vmatprep.subr.bf16.mxu1 %v6425_v49  ;;  %v6485_v49 = vld [vmem:[%s8296_s1 + $0x6d8] sm:$0xff]  }
  0x9c   :  { %5750 = vmatpush3.bf16.msra.mxu0 %v6426_v50  ;;  %v6486_v50 = vld [vmem:[%s8296_s1 + $0x618] sm:$0xff]  }
  0x9d   :  { %5772 = vmatpush3.bf16.msra.mxu1 %v6427_v51  ;;  %5751 = vmatprep.subr.bf16.mxu0 %v6428_v52  ;;  %v6487_v51 = vld [vmem:[%s8296_s1 + $0x698] sm:$0xff]   ;;  %v6488_v52 = vld [vmem:[%s8296_s1 + $0x660] sm:$0xff]  }
  0x9e   :  { %5773 = vmatprep.subr.bf16.mxu1 %v6429_v53  ;;  %v6489_v53 = vld [vmem:[%s8296_s1 + $0x6e0] sm:$0xff]  }
  0xa0   :  { %5752 = vmatpush3.bf16.msra.mxu0 %v6430_v54  ;;  %v6490_v54 = vld [vmem:[%s8296_s1 + $0x620] sm:$0xff]  }
  0xa1   :  { %5774 = vmatpush3.bf16.msra.mxu1 %v6431_v55  ;;  %5781 = vmatprep.subr.bf16.mxu0 %v6436_v62  ;;  %v6491_v55 = vld [vmem:[%s8296_s1 + $0x6a0] sm:$0xff]   ;;  %v6498_v62 = vld [vmem:[%s8296_s1 + $0x630] sm:$0xff]  }
  0xa2   :  { %5803 = vmatprep.subr.bf16.mxu1 %v6437_v63  ;;  %v6499_v63 = vld [vmem:[%s8296_s1 + $0x6b0] sm:$0xff]  }
  0xa3   :  { %4189 = vmatmul.mubr.bf16.vlgmr.msra.gmra.mrb[16].mxu0 %v5072_v57  ;;  %v6493_v57 = vld [vmem:[%s8296_s1 + $0x6e8] sm:$0xff]  }
  0xa4   :  { %4229 = vmatmul.mubr.bf16.vlgmr.msra.gmra.mrb[16].mxu1 %v5074_v60  ;;  %5782 = vmatpush3.bf16.msra.mxu0 %v6438_v0  ;;  %v6496_v60 = vld [vmem:[%s8296_s1 + $0x670] sm:$0xff]   ;;  %v6500_v0 = vld [vmem:[%s8296_s1 + $0x678] sm:$0xff]  }
  0xa5   :  { %5804 = vmatpush3.bf16.msra.mxu1 %v6439_v1  ;;  %5783 = vmatprep.subr.bf16.mxu0 %v6440_v2  ;;  %v6501_v1 = vld [vmem:[%s8296_s1 + $0x6f8] sm:$0xff]  }
  0xa6   :  { %5805 = vmatprep.subr.bf16.mxu1 %v6441_v3  ;;  %4268 = vmatprep.mubr.bf16.mxu0 %v5077_v33  ;;  %v6502_v2 = vld [vmem:[%s8296_s1 + $0x638] sm:$0xff]  }
  0xa7   :  { %4308 = vmatprep.mubr.bf16.mxu1 %v5079_v35  ;;  %v6503_v3 = vld [vmem:[%s8296_s1 + $0x6b8] sm:$0xff]  }
  0xa8   :  { %5784 = vmatpush3.bf16.msra.mxu0 %v6442_v4  ;;  %v33_v4 = vld [vmem:[%s8297_s0 + $0x60] sm:$0xff] }
  0xa9   :  { %5806 = vmatpush3.bf16.msra.mxu1 %v6443_v5  ;;  %5785 = vmatprep.subr.bf16.mxu0 %v6444_v6  ;;  %v34_v5 = vld [vmem:[%s8297_s0 + $0x68] sm:$0xff]  ;;  %v5080_v6 = vcombine.low %v33_v4, %v33_v4 }
  0xaa   :  { %5807 = vmatprep.subr.bf16.mxu1 %v6445_v7  ;;  %v5081_v7 = vcombine.high %v33_v4, %v33_v4  ;;  %v6551_v4 = vld [vmem:[%s8296_s1 + $0x888] sm:$0xff]  }
  0xac   :  { %5786 = vmatpush3.bf16.msra.mxu0 %v6446_v8  ;;  %v5082_v8 = vcombine.low %v34_v5, %v34_v5 }
  0xad   :  { %5808 = vmatpush3.bf16.msra.mxu1 %v6447_v9  ;;  %5787 = vmatprep.subr.bf16.mxu0 %v6448_v10  ;;  %v6508_v9 = vld [vmem:[%s8296_s1 + $0x740] sm:$0xff]   ;;  %v5083_v10 = vcombine.high %v34_v5, %v34_v5  ;;  %v6552_v5 = vld [vmem:[%s8296_s1 + $0x850] sm:$0xff]  }
  0xae   :  { %5809 = vmatprep.subr.bf16.mxu1 %v6449_v11  ;;  %v6509_v11 = vld [vmem:[%s8296_s1 + $0x7c0] sm:$0xff]  }
  0xb0   :  { %5788 = vmatpush3.bf16.msra.mxu0 %v6450_v12  ;;  %v6510_v12 = vld [vmem:[%s8296_s1 + $0x700] sm:$0xff]  }
  0xb1   :  { %5810 = vmatpush3.bf16.msra.mxu1 %v6451_v13  ;;  %5789 = vmatprep.subr.bf16.mxu0 %v6452_v14  ;;  %v6511_v13 = vld [vmem:[%s8296_s1 + $0x780] sm:$0xff]   ;;  %v6512_v14 = vld [vmem:[%s8296_s1 + $0x748] sm:$0xff]  }
  0xb2   :  { %5811 = vmatprep.subr.bf16.mxu1 %v6453_v15  ;;  %v6513_v15 = vld [vmem:[%s8296_s1 + $0x7c8] sm:$0xff]  }
  0xb4   :  { %5790 = vmatpush3.bf16.msra.mxu0 %v6454_v16  ;;  %v6514_v16 = vld [vmem:[%s8296_s1 + $0x708] sm:$0xff]  }
  0xb5   :  { %5812 = vmatpush3.bf16.msra.mxu1 %v6455_v17  ;;  %5791 = vmatprep.subr.bf16.mxu0 %v6456_v18  ;;  %v6515_v17 = vld [vmem:[%s8296_s1 + $0x788] sm:$0xff]   ;;  %v6516_v18 = vld [vmem:[%s8296_s1 + $0x750] sm:$0xff]  }
  0xb6   :  { %5813 = vmatprep.subr.bf16.mxu1 %v6457_v19  ;;  %v6517_v19 = vld [vmem:[%s8296_s1 + $0x7d0] sm:$0xff]  }
  0xb8   :  { %5792 = vmatpush3.bf16.msra.mxu0 %v6458_v20  ;;  %v6518_v20 = vld [vmem:[%s8296_s1 + $0x710] sm:$0xff]  }
  0xb9   :  { %5814 = vmatpush3.bf16.msra.mxu1 %v6459_v21  ;;  %5793 = vmatprep.subr.bf16.mxu0 %v6460_v22  ;;  %v6519_v21 = vld [vmem:[%s8296_s1 + $0x790] sm:$0xff]   ;;  %v6520_v22 = vld [vmem:[%s8296_s1 + $0x758] sm:$0xff]  }
  0xba   :  { %5815 = vmatprep.subr.bf16.mxu1 %v6461_v23  ;;  %v6521_v23 = vld [vmem:[%s8296_s1 + $0x7d8] sm:$0xff]  }
  0xbc   :  { %5794 = vmatpush3.bf16.msra.mxu0 %v6462_v24  ;;  %v6522_v24 = vld [vmem:[%s8296_s1 + $0x718] sm:$0xff]  }
  0xbd   :  { %5816 = vmatpush3.bf16.msra.mxu1 %v6463_v25  ;;  %5795 = vmatprep.subr.bf16.mxu0 %v6464_v26  ;;  %v6523_v25 = vld [vmem:[%s8296_s1 + $0x798] sm:$0xff]   ;;  %v6524_v26 = vld [vmem:[%s8296_s1 + $0x760] sm:$0xff]  }
  0xbe   :  { %5817 = vmatprep.subr.bf16.mxu1 %v6465_v27  ;;  %v6525_v27 = vld [vmem:[%s8296_s1 + $0x7e0] sm:$0xff]  }
  0xc0   :  { %5796 = vmatpush3.bf16.msra.mxu0 %v6466_v28  ;;  %v6526_v28 = vld [vmem:[%s8296_s1 + $0x720] sm:$0xff]  }
  0xc1   :  { %5818 = vmatpush3.bf16.msra.mxu1 %v6467_v29  ;;  %5825 = vmatprep.subr.bf16.mxu0 %v6472_v36 }
  0xc2   :  { %5847 = vmatprep.subr.bf16.mxu1 %v6473_v37  ;;  %v6528_v37 = vld [vmem:[%s8296_s1 + $0x768] sm:$0xff]  }
  0xc3   :  { %4269 = vmatmul.mubr.bf16.vlgmr.msra.gmra.mrb[20].mxu0 %v5076_v32  ;;  %v5055_v32 = vld [vmem:[%s8298_s2] ss:$0 sm:$0xff] }
  0xc4   :  { %4309 = vmatmul.mubr.bf16.vlgmr.msra.gmra.mrb[20].mxu1 %v5078_v34  ;;  %5826 = vmatpush3.bf16.msra.mxu0 %v6474_v38 }
  0xc5   :  { %5848 = vmatpush3.bf16.msra.mxu1 %v6475_v39  ;;  %5827 = vmatprep.subr.bf16.mxu0 %v6476_v40  ;;  %v6529_v39 = vld [vmem:[%s8296_s1 + $0x7e8] sm:$0xff]  }
  0xc6   :  { %5849 = vmatprep.subr.bf16.mxu1 %v6477_v41  ;;  %4348 = vmatprep.mubr.bf16.mxu0 %v5081_v7  ;;  %v6554_v7 = vld [vmem:[%s8296_s1 + $0x810] sm:$0xff]  }
  0xc7   :  { %4388 = vmatprep.mubr.bf16.mxu1 %v5083_v10  ;;  %v6557_v10 = vld [vmem:[%s8296_s1 + $0x8d8] sm:$0xff]  }
  0xc8   :  { %5828 = vmatpush3.bf16.msra.mxu0 %v6478_v42  ;;  %v6530_v42 = vld [vmem:[%s8296_s1 + $0x728] sm:$0xff]  }
  0xc9   :  { %5850 = vmatpush3.bf16.msra.mxu1 %v6479_v43  ;;  %5829 = vmatprep.subr.bf16.mxu0 %v6480_v44  ;;  %v6531_v44 = vld [vmem:[%s8296_s1 + $0x7a8] sm:$0xff]  }
  0xca   :  { %5851 = vmatprep.subr.bf16.mxu1 %v6481_v45 }
  0xcc   :  { %5830 = vmatpush3.bf16.msra.mxu0 %v6482_v46 }
  0xcd   :  { %5852 = vmatpush3.bf16.msra.mxu1 %v6483_v47  ;;  %5831 = vmatprep.subr.bf16.mxu0 %v6484_v48  ;;  %v6532_v47 = vld [vmem:[%s8296_s1 + $0x770] sm:$0xff]  }
  0xce   :  { %5853 = vmatprep.subr.bf16.mxu1 %v6485_v49  ;;  %v6533_v48 = vld [vmem:[%s8296_s1 + $0x7f0] sm:$0xff]  }
  0xcf   :  { %v6534_v49 = vld [vmem:[%s8296_s1 + $0x730] sm:$0xff]  }
  0xd0   :  { %5832 = vmatpush3.bf16.msra.mxu0 %v6486_v50  ;;  %v6535_v50 = vld [vmem:[%s8296_s1 + $0x7b0] sm:$0xff]  }
  0xd1   :  { %5854 = vmatpush3.bf16.msra.mxu1 %v6487_v51  ;;  %5833 = vmatprep.subr.bf16.mxu0 %v6488_v52  ;;  %v6536_v51 = vld [vmem:[%s8296_s1 + $0x778] sm:$0xff]  }
  0xd2   :  { %5855 = vmatprep.subr.bf16.mxu1 %v6489_v53  ;;  %v6537_v52 = vld [vmem:[%s8296_s1 + $0x7f8] sm:$0xff]  }
  0xd3   :  { %v6538_v53 = vld [vmem:[%s8296_s1 + $0x738] sm:$0xff]  }
  0xd4   :  { %5834 = vmatpush3.bf16.msra.mxu0 %v6490_v54  ;;  %v6539_v54 = vld [vmem:[%s8296_s1 + $0x7b8] sm:$0xff]  }
  0xd5   :  { %5856 = vmatpush3.bf16.msra.mxu1 %v6491_v55  ;;  %5835 = vmatprep.subr.bf16.mxu0 %v6492_v56  ;;  %v35_v55 = vld [vmem:[%s8297_s0 + $0x70] sm:$0xff]  ;;  %v36_v56 = vld [vmem:[%s8297_s0 + $0x78] sm:$0xff] }
  0xd6   :  { %5857 = vmatprep.subr.bf16.mxu1 %v6493_v57  ;;  %v5084_v57 = vcombine.low %v35_v55, %v35_v55 }
  0xd8   :  { %5836 = vmatpush3.bf16.msra.mxu0 %v6494_v58  ;;  %v5085_v58 = vcombine.high %v35_v55, %v35_v55  ;;  %v6588_v55 = vld [vmem:[%s8296_s1 + $0x950] sm:$0xff]  }
  0xd9   :  { %5858 = vmatpush3.bf16.msra.mxu1 %v6495_v59  ;;  %5837 = vmatprep.subr.bf16.mxu0 %v6496_v60  ;;  %v5086_v59 = vcombine.low %v36_v56, %v36_v56  ;;  %v5087_v60 = vcombine.high %v36_v56, %v36_v56  ;;  %v6589_v56 = vld [vmem:[%s8296_s1 + $0x9d0] sm:$0xff]  }
  0xda   :  { %5859 = vmatprep.subr.bf16.mxu1 %v6497_v61  ;;  %v6544_v61 = vld [vmem:[%s8296_s1 + $0x840] sm:$0xff]  }
  0xdc   :  { %5838 = vmatpush3.bf16.msra.mxu0 %v6498_v62  ;;  %v6545_v62 = vld [vmem:[%s8296_s1 + $0x8c0] sm:$0xff]  }
  0xdd   :  { %5860 = vmatpush3.bf16.msra.mxu1 %v6499_v63  ;;  %5839 = vmatprep.subr.bf16.mxu0 %v6500_v0  ;;  %v6546_v63 = vld [vmem:[%s8296_s1 + $0x800] sm:$0xff]  }
  0xde   :  { %5861 = vmatprep.subr.bf16.mxu1 %v6501_v1  ;;  %v6547_v0 = vld [vmem:[%s8296_s1 + $0x880] sm:$0xff]   ;;  %v6548_v1 = vld [vmem:[%s8296_s1 + $0x848] sm:$0xff]  }
  0xe0   :  { %5840 = vmatpush3.bf16.msra.mxu0 %v6502_v2  ;;  %v6549_v2 = vld [vmem:[%s8296_s1 + $0x8c8] sm:$0xff]  }
  0xe1   :  { %5862 = vmatpush3.bf16.msra.mxu1 %v6503_v3  ;;  %5869 = vmatprep.subr.bf16.mxu0 %v6508_v9  ;;  %v6550_v3 = vld [vmem:[%s8296_s1 + $0x808] sm:$0xff]   ;;  %v6556_v9 = vld [vmem:[%s8296_s1 + $0x858] sm:$0xff]  }
  0xe2   :  { %5891 = vmatprep.subr.bf16.mxu1 %v6509_v11  ;;  %v6558_v11 = vld [vmem:[%s8296_s1 + $0x818] sm:$0xff]  }
  0xe3   :  { %4349 = vmatmul.mubr.bf16.vlgmr.msra.gmra.mrb[24].mxu0 %v5080_v6  ;;  %v6553_v6 = vld [vmem:[%s8296_s1 + $0x8d0] sm:$0xff]  }
  0xe4   :  { %4389 = vmatmul.mubr.bf16.vlgmr.msra.gmra.mrb[24].mxu1 %v5082_v8  ;;  %5870 = vmatpush3.bf16.msra.mxu0 %v6510_v12  ;;  %v6555_v8 = vld [vmem:[%s8296_s1 + $0x890] sm:$0xff]   ;;  %v6559_v12 = vld [vmem:[%s8296_s1 + $0x898] sm:$0xff]  }
  0xe5   :  { %5892 = vmatpush3.bf16.msra.mxu1 %v6511_v13  ;;  %5871 = vmatprep.subr.bf16.mxu0 %v6512_v14  ;;  %v6560_v13 = vld [vmem:[%s8296_s1 + $0x860] sm:$0xff]  }
  0xe6   :  { %5893 = vmatprep.subr.bf16.mxu1 %v6513_v15  ;;  %4428 = vmatprep.mubr.bf16.mxu0 %v5085_v58  ;;  %v6561_v14 = vld [vmem:[%s8296_s1 + $0x8e0] sm:$0xff]   ;;  %v6591_v58 = vld [vmem:[%s8296_s1 + $0x990] sm:$0xff]  }
  0xe7   :  { %4468 = vmatprep.mubr.bf16.mxu1 %v5087_v60  ;;  %v6562_v15 = vld [vmem:[%s8296_s1 + $0x820] sm:$0xff]   ;;  %v6593_v60 = vld [vmem:[%s8296_s1 + $0x9d8] sm:$0xff]  }
  0xe8   :  { %5872 = vmatpush3.bf16.msra.mxu0 %v6514_v16 }
  0xe9   :  { %5894 = vmatpush3.bf16.msra.mxu1 %v6515_v17  ;;  %5873 = vmatprep.subr.bf16.mxu0 %v6516_v18  ;;  %v6563_v17 = vld [vmem:[%s8296_s1 + $0x8a0] sm:$0xff]  }
  0xea   :  { %5895 = vmatprep.subr.bf16.mxu1 %v6517_v19 }
  0xec   :  { %5874 = vmatpush3.bf16.msra.mxu0 %v6518_v20 }
  0xed   :  { %5896 = vmatpush3.bf16.msra.mxu1 %v6519_v21  ;;  %5875 = vmatprep.subr.bf16.mxu0 %v6520_v22 }
  0xee   :  { %5897 = vmatprep.subr.bf16.mxu1 %v6521_v23  ;;  %v6564_v23 = vld [vmem:[%s8296_s1 + $0x868] sm:$0xff]  }
  0xf0   :  { %5876 = vmatpush3.bf16.msra.mxu0 %v6522_v24 }
  0xf1   :  { %5898 = vmatpush3.bf16.msra.mxu1 %v6523_v25  ;;  %5877 = vmatprep.subr.bf16.mxu0 %v6524_v26  ;;  %v6565_v25 = vld [vmem:[%s8296_s1 + $0x8e8] sm:$0xff]  }
  0xf2   :  { %5899 = vmatprep.subr.bf16.mxu1 %v6525_v27 }
  0xf4   :  { %5878 = vmatpush3.bf16.msra.mxu0 %v6526_v28  ;;  %v6566_v28 = vld [vmem:[%s8296_s1 + $0x828] sm:$0xff]  }
  0xf5   :  { %5900 = vmatpush3.bf16.msra.mxu1 %v6527_v30  ;;  %5879 = vmatprep.subr.bf16.mxu0 %v6528_v37  ;;  %v6567_v30 = vld [vmem:[%s8296_s1 + $0x8a8] sm:$0xff]   ;;  %v6572_v37 = vld [vmem:[%s8296_s1 + $0x878] sm:$0xff]  }
  0xf6   :  { %v5577_v29 = vpop.f32.mrb[0].mxu0  ;;  %5901 = vmatprep.subr.bf16.mxu1 %v6529_v39  ;;  %v6574_v39 = vld [vmem:[%s8296_s1 + $0x838] sm:$0xff]  }
  0xf7   :  { %v5599_v31 = vpop.f32.mrb[0].mxu1  ;;  %v5578_v33 = vpop.f32.mrb[1].mxu0 }
  0xf8   :  { %v5600_v34 = vpop.f32.mrb[1].mxu1  ;;  %v5579_v35 = vadd.f32 %v5578_v33, %v5577_v29  ;;  %v5580_v38 = vpop.f32.mrb[2].mxu0  ;;  %5880 = vmatpush3.bf16.msra.mxu0 %v6530_v42  ;;  %v6568_v33 = vld [vmem:[%s8296_s1 + $0x870] sm:$0xff]   ;;  %v38_v42 = vld [vmem:[%s8297_s0 + $0x88] sm:$0xff] }
  0xf9   :  { %v5601_v36 = vadd.f32 %v5600_v34, %v5599_v31  ;;  %v5602_v40 = vpop.f32.mrb[2].mxu1  ;;  %v5581_v43 = vpop.f32.mrb[3].mxu0  ;;  %5902 = vmatpush3.bf16.msra.mxu1 %v6531_v44  ;;  %5881 = vmatprep.subr.bf16.mxu0 %v6532_v47  ;;  %v6569_v34 = vld [vmem:[%s8296_s1 + $0x8f0] sm:$0xff]   ;;  %v6573_v38 = vld [vmem:[%s8296_s1 + $0x8f8] sm:$0xff]   ;;  %v6580_v47 = vld [vmem:[%s8296_s1 + $0x940] sm:$0xff]  }
  0xfa   :  { %v3871_v41 = vadd.f32 %v5579_v35, %v5055_v32  ;;  %v5603_v45 = vpop.f32.mrb[3].mxu1  ;;  %5903 = vmatprep.subr.bf16.mxu1 %v6533_v48  ;;  %v6570_v35 = vld [vmem:[%s8296_s1 + $0x830] sm:$0xff]   ;;  %v6575_v40 = vld [vmem:[%s8296_s1 + $0x8b8] sm:$0xff]   ;;  %v6581_v48 = vld [vmem:[%s8296_s1 + $0x9c0] sm:$0xff]  }
  0xfb   :  { %v5090_v45 = vcombine.low %v38_v42, %v38_v42 }
  0xfc   :  { %v7582_v46 = vadd.f32 %v5601_v36, %v3871_v41  ;;  %5882 = vmatpush3.bf16.msra.mxu0 %v6534_v49  ;;  %v6571_v36 = vld [vmem:[%s8296_s1 + $0x8b0] sm:$0xff]   ;;  %v37_v41 = vld [vmem:[%s8297_s0 + $0x80] sm:$0xff] }
  0xfd   :  { %5904 = vmatpush3.bf16.msra.mxu1 %v6535_v50  ;;  %5883 = vmatprep.subr.bf16.mxu0 %v6536_v51  ;;  %v5088_v43 = vcombine.low %v37_v41, %v37_v41  ;;  %v5089_v44 = vcombine.high %v37_v41, %v37_v41  ;;  %v6582_v49 = vld [vmem:[%s8296_s1 + $0x900] sm:$0xff]   ;;  %v6584_v51 = vld [vmem:[%s8296_s1 + $0x948] sm:$0xff]   ;;  %v6624_v41 = vld [vmem:[%s8296_s1 + $0xa50] sm:$0xff]  }
  0xfe   :  { %5905 = vmatprep.subr.bf16.mxu1 %v6537_v52  ;;  %v6583_v50 = vld [vmem:[%s8296_s1 + $0x980] sm:$0xff]   ;;  %v6585_v52 = vld [vmem:[%s8296_s1 + $0x9c8] sm:$0xff]  }
 0x100   :  { %5884 = vmatpush3.bf16.msra.mxu0 %v6538_v53  ;;  %v6586_v53 = vld [vmem:[%s8296_s1 + $0x908] sm:$0xff]  }
 0x101   :  { %5906 = vmatpush3.bf16.msra.mxu1 %v6539_v54  ;;  %5913 = vmatprep.subr.bf16.mxu0 %v6544_v61  ;;  %v6587_v54 = vld [vmem:[%s8296_s1 + $0x988] sm:$0xff]   ;;  %v6594_v61 = vld [vmem:[%s8296_s1 + $0x918] sm:$0xff]  }
 0x102   :  { %5935 = vmatprep.subr.bf16.mxu1 %v6545_v62  ;;  %v6595_v62 = vld [vmem:[%s8296_s1 + $0x998] sm:$0xff]  }
 0x103   :  { %4429 = vmatmul.mubr.bf16.vlgmr.msra.gmra.mrb[28].mxu0 %v5084_v57  ;;  %v6590_v57 = vld [vmem:[%s8296_s1 + $0x910] sm:$0xff]  }
 0x104   :  { %4469 = vmatmul.mubr.bf16.vlgmr.msra.gmra.mrb[28].mxu1 %v5086_v59  ;;  %5914 = vmatpush3.bf16.msra.mxu0 %v6546_v63  ;;  %v6592_v59 = vld [vmem:[%s8296_s1 + $0x958] sm:$0xff]   ;;  %v6596_v63 = vld [vmem:[%s8296_s1 + $0x960] sm:$0xff]  }
 0x105   :  { %5936 = vmatpush3.bf16.msra.mxu1 %v6547_v0  ;;  %5915 = vmatprep.subr.bf16.mxu0 %v6548_v1  ;;  %v6597_v0 = vld [vmem:[%s8296_s1 + $0x9e0] sm:$0xff]  }
 0x106   :  { %5937 = vmatprep.subr.bf16.mxu1 %v6549_v2  ;;  %4508 = vmatprep.mubr.bf16.mxu0 %v5089_v44  ;;  %v6598_v2 = vld [vmem:[%s8296_s1 + $0x920] sm:$0xff]   ;;  %v6627_v44 = vld [vmem:[%s8296_s1 + $0xa90] sm:$0xff]  }
 0x108   :  { %5916 = vmatpush3.bf16.msra.mxu0 %v6550_v3 }
 0x109   :  { %5938 = vmatpush3.bf16.msra.mxu1 %v6551_v4  ;;  %5917 = vmatprep.subr.bf16.mxu0 %v6552_v5  ;;  %v6599_v4 = vld [vmem:[%s8296_s1 + $0x9a0] sm:$0xff]  }
 0x10a   :  { %5939 = vmatprep.subr.bf16.mxu1 %v6553_v6 }
 0x10c   :  { %5918 = vmatpush3.bf16.msra.mxu0 %v6554_v7 }
 0x10d   :  { %5940 = vmatpush3.bf16.msra.mxu1 %v6555_v8  ;;  %5919 = vmatprep.subr.bf16.mxu0 %v6556_v9  ;;  %v6600_v8 = vld [vmem:[%s8296_s1 + $0x968] sm:$0xff]  }
 0x10e   :  { %5941 = vmatprep.subr.bf16.mxu1 %v6557_v10  ;;  %v6601_v10 = vld [vmem:[%s8296_s1 + $0x9e8] sm:$0xff]  }
 0x110   :  { %5920 = vmatpush3.bf16.msra.mxu0 %v6558_v11 }
 0x111   :  { %5942 = vmatpush3.bf16.msra.mxu1 %v6559_v12  ;;  %5921 = vmatprep.subr.bf16.mxu0 %v6560_v13 }
 0x112   :  { %5943 = vmatprep.subr.bf16.mxu1 %v6561_v14  ;;  %v6602_v14 = vld [vmem:[%s8296_s1 + $0x928] sm:$0xff]  }
 0x114   :  { %5922 = vmatpush3.bf16.msra.mxu0 %v6562_v15  ;;  %v6603_v15 = vld [vmem:[%s8296_s1 + $0x9a8] sm:$0xff]  }
 0x115   :  { %5944 = vmatpush3.bf16.msra.mxu1 %v6563_v17  ;;  %5923 = vmatprep.subr.bf16.mxu0 %v6564_v23  ;;  %v6608_v23 = vld [vmem:[%s8296_s1 + $0x978] sm:$0xff]  }
 0x116   :  { %v5621_v16 = vpop.f32.mrb[4].mxu0  ;;  %5945 = vmatprep.subr.bf16.mxu1 %v6565_v25  ;;  %v6610_v25 = vld [vmem:[%s8296_s1 + $0x938] sm:$0xff]  }
 0x117   :  { %v5643_v18 = vpop.f32.mrb[4].mxu1  ;;  %v5622_v19 = vpop.f32.mrb[5].mxu0 }
 0x118   :  { %v5644_v20 = vpop.f32.mrb[5].mxu1  ;;  %v5623_v21 = vadd.f32 %v5622_v19, %v5621_v16  ;;  %v5624_v24 = vpop.f32.mrb[6].mxu0  ;;  %5924 = vmatpush3.bf16.msra.mxu0 %v6566_v28  ;;  %v6604_v19 = vld [vmem:[%s8296_s1 + $0x970] sm:$0xff]   ;;  %v40_v28 = vld [vmem:[%s8297_s0 + $0x98] sm:$0xff] }
 0x119   :  { %v5645_v22 = vadd.f32 %v5644_v20, %v5643_v18  ;;  %v5646_v26 = vpop.f32.mrb[6].mxu1  ;;  %v5625_v29 = vpop.f32.mrb[7].mxu0  ;;  %5946 = vmatpush3.bf16.msra.mxu1 %v6567_v30  ;;  %5925 = vmatprep.subr.bf16.mxu0 %v6568_v33  ;;  %v6605_v20 = vld [vmem:[%s8296_s1 + $0x9f0] sm:$0xff]   ;;  %v6609_v24 = vld [vmem:[%s8296_s1 + $0x9f8] sm:$0xff]   ;;  %v5095_v33 = vcombine.high %v40_v28, %v40_v28 }
 0x11a   :  { %v3951_v27 = vadd.f32 %v5623_v21, %v7582_v46  ;;  %v5647_v31 = vpop.f32.mrb[7].mxu1  ;;  %5947 = vmatprep.subr.bf16.mxu1 %v6569_v34  ;;  %v5091_v46 = vcombine.high %v38_v42, %v38_v42  ;;  %v6606_v21 = vld [vmem:[%s8296_s1 + $0x930] sm:$0xff]   ;;  %v6611_v26 = vld [vmem:[%s8296_s1 + $0x9b8] sm:$0xff]   ;;  %v6617_v34 = vld [vmem:[%s8296_s1 + $0xac0] sm:$0xff]  }
 0x11b   :  { %v5094_v31 = vcombine.low %v40_v28, %v40_v28  ;;  %v6625_v42 = vld [vmem:[%s8296_s1 + $0xad0] sm:$0xff]  }
 0x11c   :  { %v7687_v32 = vadd.f32 %v5645_v22, %v3951_v27  ;;  %5926 = vmatpush3.bf16.msra.mxu0 %v6570_v35  ;;  %4548 = vmatprep.mubr.bf16.mxu1 %v5091_v46  ;;  %v6607_v22 = vld [vmem:[%s8296_s1 + $0x9b0] sm:$0xff]   ;;  %v6618_v35 = vld [vmem:[%s8296_s1 + $0xa00] sm:$0xff]   ;;  %v6629_v46 = vld [vmem:[%s8296_s1 + $0xad8] sm:$0xff]  }
 0x11d   :  { %5948 = vmatpush3.bf16.msra.mxu1 %v6571_v36  ;;  %5927 = vmatprep.subr.bf16.mxu0 %v6572_v37  ;;  %v39_v27 = vld [vmem:[%s8297_s0 + $0x90] sm:$0xff]  ;;  %v6619_v36 = vld [vmem:[%s8296_s1 + $0xa80] sm:$0xff]   ;;  %v6620_v37 = vld [vmem:[%s8296_s1 + $0xa48] sm:$0xff]  }
 0x11e   :  { %5949 = vmatprep.subr.bf16.mxu1 %v6573_v38  ;;  %v5092_v29 = vcombine.low %v39_v27, %v39_v27  ;;  %v5093_v30 = vcombine.high %v39_v27, %v39_v27  ;;  %v6621_v38 = vld [vmem:[%s8296_s1 + $0xac8] sm:$0xff]   ;;  %v6660_v27 = vld [vmem:[%s8296_s1 + $0xb50] sm:$0xff]  }
 0x11f   :  { %v6661_v28 = vld [vmem:[%s8296_s1 + $0xbd0] sm:$0xff]  }
 0x120   :  { %5928 = vmatpush3.bf16.msra.mxu0 %v6574_v39  ;;  %v6622_v39 = vld [vmem:[%s8296_s1 + $0xa08] sm:$0xff]  }
 0x121   :  { %5950 = vmatpush3.bf16.msra.mxu1 %v6575_v40  ;;  %5957 = vmatprep.subr.bf16.mxu0 %v6580_v47  ;;  %v6623_v40 = vld [vmem:[%s8296_s1 + $0xa88] sm:$0xff]   ;;  %v6630_v47 = vld [vmem:[%s8296_s1 + $0xa18] sm:$0xff]  }
 0x122   :  { %5979 = vmatprep.subr.bf16.mxu1 %v6581_v48  ;;  %v6631_v48 = vld [vmem:[%s8296_s1 + $0xa98] sm:$0xff]  }
 0x123   :  { %4509 = vmatmul.mubr.bf16.vlgmr.msra.gmra.mrb[32].mxu0 %v5088_v43  ;;  %v6626_v43 = vld [vmem:[%s8296_s1 + $0xa10] sm:$0xff]  }
 0x124   :  { %4549 = vmatmul.mubr.bf16.vlgmr.msra.gmra.mrb[32].mxu1 %v5090_v45  ;;  %5958 = vmatpush3.bf16.msra.mxu0 %v6582_v49  ;;  %v6628_v45 = vld [vmem:[%s8296_s1 + $0xa58] sm:$0xff]   ;;  %v6632_v49 = vld [vmem:[%s8296_s1 + $0xa60] sm:$0xff]  }
 0x125   :  { %5980 = vmatpush3.bf16.msra.mxu1 %v6583_v50  ;;  %5959 = vmatprep.subr.bf16.mxu0 %v6584_v51  ;;  %v6633_v50 = vld [vmem:[%s8296_s1 + $0xae0] sm:$0xff]  }
 0x126   :  { %5981 = vmatprep.subr.bf16.mxu1 %v6585_v52  ;;  %4588 = vmatprep.mubr.bf16.mxu0 %v5093_v30  ;;  %v6634_v52 = vld [vmem:[%s8296_s1 + $0xa20] sm:$0xff]   ;;  %v6663_v30 = vld [vmem:[%s8296_s1 + $0xb90] sm:$0xff]  }
 0x127   :  { %4628 = vmatprep.mubr.bf16.mxu1 %v5095_v33  ;;  %v6666_v33 = vld [vmem:[%s8296_s1 + $0xb18] sm:$0xff]  }
 0x128   :  { %5960 = vmatpush3.bf16.msra.mxu0 %v6586_v53 }
 0x129   :  { %5982 = vmatpush3.bf16.msra.mxu1 %v6587_v54  ;;  %5961 = vmatprep.subr.bf16.mxu0 %v6588_v55  ;;  %v6635_v54 = vld [vmem:[%s8296_s1 + $0xaa0] sm:$0xff]  }
 0x12a   :  { %5983 = vmatprep.subr.bf16.mxu1 %v6589_v56 }
 0x12c   :  { %5962 = vmatpush3.bf16.msra.mxu0 %v6590_v57  ;;  %v6636_v57 = vld [vmem:[%s8296_s1 + $0xa68] sm:$0xff]  }
 0x12d   :  { %5984 = vmatpush3.bf16.msra.mxu1 %v6591_v58  ;;  %5963 = vmatprep.subr.bf16.mxu0 %v6592_v59 }
 0x12e   :  { %5985 = vmatprep.subr.bf16.mxu1 %v6593_v60  ;;  %v6637_v60 = vld [vmem:[%s8296_s1 + $0xae8] sm:$0xff]  }
 0x130   :  { %5964 = vmatpush3.bf16.msra.mxu0 %v6594_v61 }
 0x131   :  { %5986 = vmatpush3.bf16.msra.mxu1 %v6595_v62  ;;  %5965 = vmatprep.subr.bf16.mxu0 %v6596_v63  ;;  %v6638_v63 = vld [vmem:[%s8296_s1 + $0xa28] sm:$0xff]  }
 0x132   :  { %5987 = vmatprep.subr.bf16.mxu1 %v6597_v0 }
 0x134   :  { %5966 = vmatpush3.bf16.msra.mxu0 %v6598_v2 }
 0x135   :  { %5988 = vmatpush3.bf16.msra.mxu1 %v6599_v4  ;;  %5967 = vmatprep.subr.bf16.mxu0 %v6600_v8  ;;  %v6640_v4 = vld [vmem:[%s8296_s1 + $0xa70] sm:$0xff]  }
 0x136   :  { %v5665_v1 = vpop.f32.mrb[8].mxu0  ;;  %5989 = vmatprep.subr.bf16.mxu1 %v6601_v10  ;;  %v6643_v8 = vld [vmem:[%s8296_s1 + $0xab0] sm:$0xff]   ;;  %v6645_v10 = vld [vmem:[%s8296_s1 + $0xaf8] sm:$0xff]  }
 0x137   :  { %v5687_v3 = vpop.f32.mrb[8].mxu1  ;;  %v5666_v5 = vpop.f32.mrb[9].mxu0 }
 0x138   :  { %v5667_v6 = vadd.f32 %v5666_v5, %v5665_v1  ;;  %v5688_v7 = vpop.f32.mrb[9].mxu1  ;;  %v5668_v11 = vpop.f32.mrb[10].mxu0  ;;  %5968 = vmatpush3.bf16.msra.mxu0 %v6602_v14  ;;  %v6639_v1 = vld [vmem:[%s8296_s1 + $0xaa8] sm:$0xff]  }
 0x139   :  { %v5689_v9 = vadd.f32 %v5688_v7, %v5687_v3  ;;  %v5690_v13 = vpop.f32.mrb[10].mxu1  ;;  %v5669_v16 = vpop.f32.mrb[11].mxu0  ;;  %5990 = vmatpush3.bf16.msra.mxu1 %v6603_v15  ;;  %5969 = vmatprep.subr.bf16.mxu0 %v6604_v19  ;;  %v6642_v7 = vld [vmem:[%s8296_s1 + $0xa30] sm:$0xff]   ;;  %v6646_v11 = vld [vmem:[%s8296_s1 + $0xa38] sm:$0xff]   ;;  %v6652_v19 = vld [vmem:[%s8296_s1 + $0xb40] sm:$0xff]  }
 0x13a   :  { %v4031_v12 = vadd.f32 %v5667_v6, %v7687_v32  ;;  %v5691_v18 = vpop.f32.mrb[11].mxu1  ;;  %5991 = vmatprep.subr.bf16.mxu1 %v6605_v20  ;;  %v6616_v32 = vld [vmem:[%s8296_s1 + $0xa40] sm:$0xff]   ;;  %v6641_v6 = vld [vmem:[%s8296_s1 + $0xaf0] sm:$0xff]   ;;  %v42_v16 = vld [vmem:[%s8297_s0 + $0xa8] sm:$0xff] }
 0x13b   :  { %v41_v13 = vld [vmem:[%s8297_s0 + $0xa0] sm:$0xff]  ;;  %v5099_v18 = vcombine.high %v42_v16, %v42_v16 }
 0x13c   :  { %v7792_v17 = vadd.f32 %v5689_v9, %v4031_v12  ;;  %5970 = vmatpush3.bf16.msra.mxu0 %v6606_v21  ;;  %v6644_v9 = vld [vmem:[%s8296_s1 + $0xa78] sm:$0xff]   ;;  %v5096_v14 = vcombine.low %v41_v13, %v41_v13  ;;  %v5097_v15 = vcombine.high %v41_v13, %v41_v13  ;;  %v6653_v20 = vld [vmem:[%s8296_s1 + $0xbc0] sm:$0xff]   ;;  %v6696_v13 = vld [vmem:[%s8296_s1 + $0xc50] sm:$0xff]  }
 0x13d   :  { %5992 = vmatpush3.bf16.msra.mxu1 %v6607_v22  ;;  %5971 = vmatprep.subr.bf16.mxu0 %v6608_v23  ;;  %v6647_v12 = vld [vmem:[%s8296_s1 + $0xab8] sm:$0xff]   ;;  %v6654_v21 = vld [vmem:[%s8296_s1 + $0xb00] sm:$0xff]   ;;  %v6656_v23 = vld [vmem:[%s8296_s1 + $0xb48] sm:$0xff]  }
 0x13e   :  { %5993 = vmatprep.subr.bf16.mxu1 %v6609_v24  ;;  %v6655_v22 = vld [vmem:[%s8296_s1 + $0xb80] sm:$0xff]   ;;  %v6657_v24 = vld [vmem:[%s8296_s1 + $0xbc8] sm:$0xff]  }
 0x140   :  { %5972 = vmatpush3.bf16.msra.mxu0 %v6610_v25  ;;  %v6658_v25 = vld [vmem:[%s8296_s1 + $0xb08] sm:$0xff]  }
 0x141   :  { %5994 = vmatpush3.bf16.msra.mxu1 %v6611_v26  ;;  %6001 = vmatprep.subr.bf16.mxu0 %v6616_v32  ;;  %v6659_v26 = vld [vmem:[%s8296_s1 + $0xb88] sm:$0xff]   ;;  %v6665_v32 = vld [vmem:[%s8296_s1 + $0xbd8] sm:$0xff]  }
 0x142   :  { %6023 = vmatprep.subr.bf16.mxu1 %v6617_v34  ;;  %v6667_v34 = vld [vmem:[%s8296_s1 + $0xb98] sm:$0xff]  }
 0x143   :  { %4589 = vmatmul.mubr.bf16.vlgmr.msra.gmra.mrb[36].mxu0 %v5092_v29  ;;  %v6662_v29 = vld [vmem:[%s8296_s1 + $0xb10] sm:$0xff]  }
 0x144   :  { %4629 = vmatmul.mubr.bf16.vlgmr.msra.gmra.mrb[36].mxu1 %v5094_v31  ;;  %6002 = vmatpush3.bf16.msra.mxu0 %v6618_v35  ;;  %v6664_v31 = vld [vmem:[%s8296_s1 + $0xb58] sm:$0xff]   ;;  %v6668_v35 = vld [vmem:[%s8296_s1 + $0xb60] sm:$0xff]  }
 0x145   :  { %6024 = vmatpush3.bf16.msra.mxu1 %v6619_v36  ;;  %6003 = vmatprep.subr.bf16.mxu0 %v6620_v37  ;;  %v6669_v36 = vld [vmem:[%s8296_s1 + $0xbe0] sm:$0xff]  }
 0x146   :  { %6025 = vmatprep.subr.bf16.mxu1 %v6621_v38  ;;  %4668 = vmatprep.mubr.bf16.mxu0 %v5097_v15  ;;  %v6670_v38 = vld [vmem:[%s8296_s1 + $0xb20] sm:$0xff]   ;;  %v6698_v15 = vld [vmem:[%s8296_s1 + $0xc10] sm:$0xff]  }
 0x147   :  { %4708 = vmatprep.mubr.bf16.mxu1 %v5099_v18  ;;  %v6701_v18 = vld [vmem:[%s8296_s1 + $0xcd8] sm:$0xff]  }
 0x148   :  { %6004 = vmatpush3.bf16.msra.mxu0 %v6622_v39 }
 0x149   :  { %6026 = vmatpush3.bf16.msra.mxu1 %v6623_v40  ;;  %6005 = vmatprep.subr.bf16.mxu0 %v6624_v41  ;;  %v6671_v40 = vld [vmem:[%s8296_s1 + $0xba0] sm:$0xff]  }
 0x14a   :  { %6027 = vmatprep.subr.bf16.mxu1 %v6625_v42 }
 0x14c   :  { %6006 = vmatpush3.bf16.msra.mxu0 %v6626_v43  ;;  %v6672_v43 = vld [vmem:[%s8296_s1 + $0xb68] sm:$0xff]  }
 0x14d   :  { %6028 = vmatpush3.bf16.msra.mxu1 %v6627_v44  ;;  %6007 = vmatprep.subr.bf16.mxu0 %v6628_v45 }
 0x14e   :  { %6029 = vmatprep.subr.bf16.mxu1 %v6629_v46  ;;  %v6673_v46 = vld [vmem:[%s8296_s1 + $0xbe8] sm:$0xff]  }
 0x150   :  { %6008 = vmatpush3.bf16.msra.mxu0 %v6630_v47 }
 0x151   :  { %6030 = vmatpush3.bf16.msra.mxu1 %v6631_v48  ;;  %6009 = vmatprep.subr.bf16.mxu0 %v6632_v49  ;;  %v6674_v49 = vld [vmem:[%s8296_s1 + $0xb28] sm:$0xff]  }
 0x152   :  { %6031 = vmatprep.subr.bf16.mxu1 %v6633_v50 }
 0x154   :  { %6010 = vmatpush3.bf16.msra.mxu0 %v6634_v52 }
 0x155   :  { %6032 = vmatpush3.bf16.msra.mxu1 %v6635_v54  ;;  %6011 = vmatprep.subr.bf16.mxu0 %v6636_v57  ;;  %v6676_v54 = vld [vmem:[%s8296_s1 + $0xb70] sm:$0xff]  }
 0x156   :  { %v5709_v51 = vpop.f32.mrb[12].mxu0  ;;  %6033 = vmatprep.subr.bf16.mxu1 %v6637_v60  ;;  %v6678_v57 = vld [vmem:[%s8296_s1 + $0xb30] sm:$0xff]   ;;  %v6681_v60 = vld [vmem:[%s8296_s1 + $0xbf8] sm:$0xff]  }
 0x157   :  { %v5731_v53 = vpop.f32.mrb[12].mxu1  ;;  %v5710_v55 = vpop.f32.mrb[13].mxu0 }
 0x158   :  { %v5732_v56 = vpop.f32.mrb[13].mxu1  ;;  %v5711_v58 = vadd.f32 %v5710_v55, %v5709_v51  ;;  %v5712_v61 = vpop.f32.mrb[14].mxu0  ;;  %6012 = vmatpush3.bf16.msra.mxu0 %v6638_v63  ;;  %v6675_v51 = vld [vmem:[%s8296_s1 + $0xba8] sm:$0xff]   ;;  %v43_v63 = vld [vmem:[%s8297_s0 + $0xb0] sm:$0xff] }
 0x159   :  { %v5733_v59 = vadd.f32 %v5732_v56, %v5731_v53  ;;  %v5734_v62 = vpop.f32.mrb[14].mxu1  ;;  %v5713_v2 = vpop.f32.mrb[15].mxu0  ;;  %6034 = vmatpush3.bf16.msra.mxu1 %v6639_v1  ;;  %6013 = vmatprep.subr.bf16.mxu0 %v6640_v4  ;;  %v6677_v56 = vld [vmem:[%s8296_s1 + $0xbf0] sm:$0xff]   ;;  %v6682_v61 = vld [vmem:[%s8296_s1 + $0xb38] sm:$0xff]   ;;  %v5100_v1 = vcombine.low %v43_v63, %v43_v63 }
 0x15a   :  { %v4111_v0 = vadd.f32 %v5711_v58, %v7792_v17  ;;  %v5735_v3 = vpop.f32.mrb[15].mxu1  ;;  %6035 = vmatprep.subr.bf16.mxu1 %v6641_v6  ;;  %v5098_v17 = vcombine.low %v42_v16, %v42_v16  ;;  %v6679_v58 = vld [vmem:[%s8296_s1 + $0xbb0] sm:$0xff]   ;;  %v6683_v62 = vld [vmem:[%s8296_s1 + $0xbb8] sm:$0xff]   ;;  %v5101_v2 = vcombine.high %v43_v63, %v43_v63  ;;  %v6689_v6 = vld [vmem:[%s8296_s1 + $0xcc0] sm:$0xff]  }
 0x15b   :  { %v6699_v16 = vld [vmem:[%s8296_s1 + $0xc90] sm:$0xff]  }
 0x15c   :  { %v7900_v5 = vadd.f32 %v5733_v59, %v4111_v0  ;;  %6014 = vmatpush3.bf16.msra.mxu0 %v6642_v7  ;;  %v6680_v59 = vld [vmem:[%s8296_s1 + $0xb78] sm:$0xff]   ;;  %v6690_v7 = vld [vmem:[%s8296_s1 + $0xc00] sm:$0xff]   ;;  %v6732_v63 = vld [vmem:[%s8296_s1 + $0xd50] sm:$0xff]  }
 0x15d   :  { %6036 = vmatpush3.bf16.msra.mxu1 %v6643_v8  ;;  %6015 = vmatprep.subr.bf16.mxu0 %v6644_v9  ;;  %v44_v0 = vld [vmem:[%s8297_s0 + $0xb8] sm:$0xff]  ;;  %v6691_v8 = vld [vmem:[%s8296_s1 + $0xc80] sm:$0xff]   ;;  %v6692_v9 = vld [vmem:[%s8296_s1 + $0xc48] sm:$0xff]  }
 0x15e   :  { %6037 = vmatprep.subr.bf16.mxu1 %v6645_v10  ;;  %v5102_v3 = vcombine.low %v44_v0, %v44_v0  ;;  %v5103_v4 = vcombine.high %v44_v0, %v44_v0  ;;  %v6693_v10 = vld [vmem:[%s8296_s1 + $0xcc8] sm:$0xff]   ;;  %v6733_v0 = vld [vmem:[%s8296_s1 + $0xdd0] sm:$0xff]  }
 0x160   :  { %6016 = vmatpush3.bf16.msra.mxu0 %v6646_v11  ;;  %v6694_v11 = vld [vmem:[%s8296_s1 + $0xc08] sm:$0xff]  }
 0x161   :  { %6038 = vmatpush3.bf16.msra.mxu1 %v6647_v12  ;;  %6045 = vmatprep.subr.bf16.mxu0 %v6652_v19  ;;  %v6695_v12 = vld [vmem:[%s8296_s1 + $0xc88] sm:$0xff]   ;;  %v6702_v19 = vld [vmem:[%s8296_s1 + $0xc18] sm:$0xff]  }
 0x162   :  { %6067 = vmatprep.subr.bf16.mxu1 %v6653_v20  ;;  %v6703_v20 = vld [vmem:[%s8296_s1 + $0xc98] sm:$0xff]  }
 0x163   :  { %4669 = vmatmul.mubr.bf16.vlgmr.msra.gmra.mrb[40].mxu0 %v5096_v14  ;;  %v6697_v14 = vld [vmem:[%s8296_s1 + $0xcd0] sm:$0xff]  }
 0x164   :  { %4709 = vmatmul.mubr.bf16.vlgmr.msra.gmra.mrb[40].mxu1 %v5098_v17  ;;  %6046 = vmatpush3.bf16.msra.mxu0 %v6654_v21  ;;  %v6700_v17 = vld [vmem:[%s8296_s1 + $0xc58] sm:$0xff]   ;;  %v6704_v21 = vld [vmem:[%s8296_s1 + $0xc60] sm:$0xff]  }
 0x165   :  { %6068 = vmatpush3.bf16.msra.mxu1 %v6655_v22  ;;  %6047 = vmatprep.subr.bf16.mxu0 %v6656_v23  ;;  %v6705_v22 = vld [vmem:[%s8296_s1 + $0xce0] sm:$0xff]  }
 0x166   :  { %6069 = vmatprep.subr.bf16.mxu1 %v6657_v24  ;;  %4748 = vmatprep.mubr.bf16.mxu0 %v5101_v2  ;;  %v6706_v24 = vld [vmem:[%s8296_s1 + $0xc20] sm:$0xff]   ;;  %v6735_v2 = vld [vmem:[%s8296_s1 + $0xd90] sm:$0xff]  }
 0x167   :  { %4788 = vmatprep.mubr.bf16.mxu1 %v5103_v4  ;;  %v6737_v4 = vld [vmem:[%s8296_s1 + $0xdd8] sm:$0xff]  }
 0x168   :  { %6048 = vmatpush3.bf16.msra.mxu0 %v6658_v25 }
 0x169   :  { %6070 = vmatpush3.bf16.msra.mxu1 %v6659_v26  ;;  %6049 = vmatprep.subr.bf16.mxu0 %v6660_v27  ;;  %v6707_v26 = vld [vmem:[%s8296_s1 + $0xca0] sm:$0xff]  }
 0x16a   :  { %6071 = vmatprep.subr.bf16.mxu1 %v6661_v28 }
 0x16c   :  { %6050 = vmatpush3.bf16.msra.mxu0 %v6662_v29 }
 0x16d   :  { %6072 = vmatpush3.bf16.msra.mxu1 %v6663_v30  ;;  %6051 = vmatprep.subr.bf16.mxu0 %v6664_v31  ;;  %v6708_v30 = vld [vmem:[%s8296_s1 + $0xc68] sm:$0xff]  }
 0x16e   :  { %6073 = vmatprep.subr.bf16.mxu1 %v6665_v32  ;;  %v6709_v32 = vld [vmem:[%s8296_s1 + $0xce8] sm:$0xff]  }
 0x170   :  { %6052 = vmatpush3.bf16.msra.mxu0 %v6666_v33 }
 0x171   :  { %6074 = vmatpush3.bf16.msra.mxu1 %v6667_v34  ;;  %6053 = vmatprep.subr.bf16.mxu0 %v6668_v35 }
 0x172   :  { %6075 = vmatprep.subr.bf16.mxu1 %v6669_v36  ;;  %v6710_v36 = vld [vmem:[%s8296_s1 + $0xc28] sm:$0xff]  }
 0x174   :  { %6054 = vmatpush3.bf16.msra.mxu0 %v6670_v38 }
 0x175   :  { %6076 = vmatpush3.bf16.msra.mxu1 %v6671_v40  ;;  %6055 = vmatprep.subr.bf16.mxu0 %v6672_v43  ;;  %v6714_v43 = vld [vmem:[%s8296_s1 + $0xc30] sm:$0xff]  }
 0x176   :  { %v5753_v37 = vpop.f32.mrb[16].mxu0  ;;  %6077 = vmatprep.subr.bf16.mxu1 %v6673_v46  ;;  %v6717_v46 = vld [vmem:[%s8296_s1 + $0xcf8] sm:$0xff]  }
 0x177   :  { %v5775_v39 = vpop.f32.mrb[16].mxu1  ;;  %v5754_v41 = vpop.f32.mrb[17].mxu0 }
 0x178   :  { %v5776_v42 = vpop.f32.mrb[17].mxu1  ;;  %v5755_v44 = vadd.f32 %v5754_v41, %v5753_v37  ;;  %v5756_v47 = vpop.f32.mrb[18].mxu0  ;;  %6056 = vmatpush3.bf16.msra.mxu0 %v6674_v49  ;;  %v6711_v37 = vld [vmem:[%s8296_s1 + $0xca8] sm:$0xff]   ;;  %v6712_v41 = vld [vmem:[%s8296_s1 + $0xc70] sm:$0xff]   ;;  %v45_v49 = vld [vmem:[%s8297_s0 + $0xc0] sm:$0xff] }
 0x179   :  { %v5777_v45 = vadd.f32 %v5776_v42, %v5775_v39  ;;  %v5778_v48 = vpop.f32.mrb[18].mxu1  ;;  %v5757_v52 = vpop.f32.mrb[19].mxu0  ;;  %6078 = vmatpush3.bf16.msra.mxu1 %v6675_v51  ;;  %6057 = vmatprep.subr.bf16.mxu0 %v6676_v54  ;;  %v6713_v42 = vld [vmem:[%s8296_s1 + $0xcf0] sm:$0xff]   ;;  %v6718_v47 = vld [vmem:[%s8296_s1 + $0xc38] sm:$0xff]   ;;  %v5104_v51 = vcombine.low %v45_v49, %v45_v49  ;;  %v6724_v54 = vld [vmem:[%s8296_s1 + $0xd40] sm:$0xff]  }
 0x17a   :  { %v4191_v50 = vadd.f32 %v5755_v44, %v7900_v5  ;;  %v5779_v53 = vpop.f32.mrb[19].mxu1  ;;  %6079 = vmatprep.subr.bf16.mxu1 %v6677_v56  ;;  %v6688_v5 = vld [vmem:[%s8296_s1 + $0xc40] sm:$0xff]   ;;  %v6715_v44 = vld [vmem:[%s8296_s1 + $0xcb0] sm:$0xff]   ;;  %v6719_v48 = vld [vmem:[%s8296_s1 + $0xcb8] sm:$0xff]   ;;  %v5105_v52 = vcombine.high %v45_v49, %v45_v49 }
 0x17b   :  { %v6725_v56 = vld [vmem:[%s8296_s1 + $0xdc0] sm:$0xff]  }
 0x17c   :  { %v8005_v55 = vadd.f32 %v5777_v45, %v4191_v50  ;;  %6058 = vmatpush3.bf16.msra.mxu0 %v6678_v57  ;;  %v6716_v45 = vld [vmem:[%s8296_s1 + $0xc78] sm:$0xff]   ;;  %v46_v50 = vld [vmem:[%s8297_s0 + $0xc8] sm:$0xff]  ;;  %v6726_v57 = vld [vmem:[%s8296_s1 + $0xd00] sm:$0xff]  }
 0x17d   :  { %6080 = vmatpush3.bf16.msra.mxu1 %v6679_v58  ;;  %6059 = vmatprep.subr.bf16.mxu0 %v6680_v59  ;;  %v5106_v53 = vcombine.low %v46_v50, %v46_v50  ;;  %v6727_v58 = vld [vmem:[%s8296_s1 + $0xd80] sm:$0xff]   ;;  %v6728_v59 = vld [vmem:[%s8296_s1 + $0xd48] sm:$0xff]  }
 0x17e   :  { %6081 = vmatprep.subr.bf16.mxu1 %v6681_v60  ;;  %v6729_v60 = vld [vmem:[%s8296_s1 + $0xdc8] sm:$0xff]  }
 0x180   :  { %6060 = vmatpush3.bf16.msra.mxu0 %v6682_v61  ;;  %v6730_v61 = vld [vmem:[%s8296_s1 + $0xd08] sm:$0xff]  }
 0x181   :  { %6082 = vmatpush3.bf16.msra.mxu1 %v6683_v62  ;;  %6089 = vmatprep.subr.bf16.mxu0 %v6688_v5  ;;  %v6731_v62 = vld [vmem:[%s8296_s1 + $0xd88] sm:$0xff]   ;;  %v6738_v5 = vld [vmem:[%s8296_s1 + $0xd18] sm:$0xff]  }
 0x182   :  { %6111 = vmatprep.subr.bf16.mxu1 %v6689_v6  ;;  %v6739_v6 = vld [vmem:[%s8296_s1 + $0xd98] sm:$0xff]  }
 0x183   :  { %4749 = vmatmul.mubr.bf16.vlgmr.msra.gmra.mrb[44].mxu0 %v5100_v1  ;;  %v6734_v1 = vld [vmem:[%s8296_s1 + $0xd10] sm:$0xff]  }
 0x184   :  { %4789 = vmatmul.mubr.bf16.vlgmr.msra.gmra.mrb[44].mxu1 %v5102_v3  ;;  %6090 = vmatpush3.bf16.msra.mxu0 %v6690_v7  ;;  %v6736_v3 = vld [vmem:[%s8296_s1 + $0xd58] sm:$0xff]   ;;  %v6740_v7 = vld [vmem:[%s8296_s1 + $0xd60] sm:$0xff]  }
 0x185   :  { %6112 = vmatpush3.bf16.msra.mxu1 %v6691_v8  ;;  %6091 = vmatprep.subr.bf16.mxu0 %v6692_v9  ;;  %v6741_v8 = vld [vmem:[%s8296_s1 + $0xde0] sm:$0xff]  }
 0x186   :  { %6113 = vmatprep.subr.bf16.mxu1 %v6693_v10  ;;  %4828 = vmatprep.mubr.bf16.mxu0 %v5105_v52  ;;  %v6742_v10 = vld [vmem:[%s8296_s1 + $0xd20] sm:$0xff]  }
 0x188   :  { %6092 = vmatpush3.bf16.msra.mxu0 %v6694_v11 }
 0x189   :  { %6114 = vmatpush3.bf16.msra.mxu1 %v6695_v12  ;;  %6093 = vmatprep.subr.bf16.mxu0 %v6696_v13  ;;  %v6743_v12 = vld [vmem:[%s8296_s1 + $0xda0] sm:$0xff]  }
 0x18a   :  { %6115 = vmatprep.subr.bf16.mxu1 %v6697_v14 }
 0x18c   :  { %6094 = vmatpush3.bf16.msra.mxu0 %v6698_v15  ;;  %v6744_v15 = vld [vmem:[%s8296_s1 + $0xd68] sm:$0xff]  }
 0x18d   :  { %6116 = vmatpush3.bf16.msra.mxu1 %v6699_v16  ;;  %6095 = vmatprep.subr.bf16.mxu0 %v6700_v17 }
 0x18e   :  { %6117 = vmatprep.subr.bf16.mxu1 %v6701_v18  ;;  %v6745_v18 = vld [vmem:[%s8296_s1 + $0xde8] sm:$0xff]  }
 0x190   :  { %6096 = vmatpush3.bf16.msra.mxu0 %v6702_v19 }
 0x191   :  { %6118 = vmatpush3.bf16.msra.mxu1 %v6703_v20  ;;  %6097 = vmatprep.subr.bf16.mxu0 %v6704_v21  ;;  %v6746_v21 = vld [vmem:[%s8296_s1 + $0xd28] sm:$0xff]  }
 0x192   :  { %6119 = vmatprep.subr.bf16.mxu1 %v6705_v22 }
 0x194   :  { %6098 = vmatpush3.bf16.msra.mxu0 %v6706_v24 }
 0x195   :  { %6120 = vmatpush3.bf16.msra.mxu1 %v6707_v26  ;;  %6099 = vmatprep.subr.bf16.mxu0 %v6708_v30  ;;  %v6748_v26 = vld [vmem:[%s8296_s1 + $0xd70] sm:$0xff]  }
 0x196   :  { %v5797_v23 = vpop.f32.mrb[20].mxu0  ;;  %6121 = vmatprep.subr.bf16.mxu1 %v6709_v32  ;;  %v6751_v30 = vld [vmem:[%s8296_s1 + $0xdb0] sm:$0xff]   ;;  %v6753_v32 = vld [vmem:[%s8296_s1 + $0xdf8] sm:$0xff]  }
 0x197   :  { %v5819_v25 = vpop.f32.mrb[20].mxu1  ;;  %v5798_v27 = vpop.f32.mrb[21].mxu0 }
 0x198   :  { %v5799_v28 = vadd.f32 %v5798_v27, %v5797_v23  ;;  %v5820_v29 = vpop.f32.mrb[21].mxu1  ;;  %v5800_v33 = vpop.f32.mrb[22].mxu0  ;;  %6100 = vmatpush3.bf16.msra.mxu0 %v6710_v36  ;;  %v6747_v23 = vld [vmem:[%s8296_s1 + $0xda8] sm:$0xff]  }
 0x199   :  { %v5821_v31 = vadd.f32 %v5820_v29, %v5819_v25  ;;  %v5822_v35 = vpop.f32.mrb[22].mxu1  ;;  %v5801_v38 = vpop.f32.mrb[23].mxu0  ;;  %6122 = vmatpush3.bf16.msra.mxu1 %v6711_v37  ;;  %6101 = vmatprep.subr.bf16.mxu0 %v6712_v41  ;;  %v6750_v29 = vld [vmem:[%s8296_s1 + $0xd30] sm:$0xff]   ;;  %v6754_v33 = vld [vmem:[%s8296_s1 + $0xd38] sm:$0xff]  }
 0x19a   :  { %v4271_v34 = vadd.f32 %v5799_v28, %v8005_v55  ;;  %v5823_v40 = vpop.f32.mrb[23].mxu1  ;;  %6123 = vmatprep.subr.bf16.mxu1 %v6713_v42  ;;  %v5107_v55 = vcombine.high %v46_v50, %v46_v50  ;;  %v6749_v28 = vld [vmem:[%s8296_s1 + $0xdf0] sm:$0xff]   ;;  %v48_v38 = vld [vmem:[%s8297_s0 + $0xd8] sm:$0xff] }
 0x19b   :  { %v47_v35 = vld [vmem:[%s8297_s0 + $0xd0] sm:$0xff]  ;;  %v5111_v40 = vcombine.high %v48_v38, %v48_v38 }
 0x19c   :  { %v8107_v39 = vadd.f32 %v5821_v31, %v4271_v34  ;;  %6102 = vmatpush3.bf16.msra.mxu0 %v6714_v43  ;;  %4868 = vmatprep.mubr.bf16.mxu1 %v5107_v55  ;;  %v6752_v31 = vld [vmem:[%s8296_s1 + $0xd78] sm:$0xff]   ;;  %v5108_v36 = vcombine.low %v47_v35, %v47_v35  ;;  %v5109_v37 = vcombine.high %v47_v35, %v47_v35  ;;  %v4971_v35 = vld [vmem:[%s8299_s3 + $0x70] sm:$0xff] }
 0x19d   :  { %6124 = vmatpush3.bf16.msra.mxu1 %v6715_v44  ;;  %6103 = vmatprep.subr.bf16.mxu0 %v6716_v45  ;;  %v6755_v34 = vld [vmem:[%s8296_s1 + $0xdb8] sm:$0xff]  }
 0x19e   :  { %6125 = vmatprep.subr.bf16.mxu1 %v6717_v46 }
 0x1a0   :  { %6104 = vmatpush3.bf16.msra.mxu0 %v6718_v47 }
 0x1a1   :  { %6126 = vmatpush3.bf16.msra.mxu1 %v6719_v48  ;;  %6133 = vmatprep.subr.bf16.mxu0 %v6724_v54 }
 0x1a2   :  { %6155 = vmatprep.subr.bf16.mxu1 %v6725_v56 }
 0x1a3   :  { %4829 = vmatmul.mubr.bf16.vlgmr.msra.gmra.mrb[48].mxu0 %v5104_v51 }
 0x1a4   :  { %4869 = vmatmul.mubr.bf16.vlgmr.msra.gmra.mrb[48].mxu1 %v5106_v53  ;;  %6134 = vmatpush3.bf16.msra.mxu0 %v6726_v57 }
 0x1a5   :  { %6156 = vmatpush3.bf16.msra.mxu1 %v6727_v58  ;;  %6135 = vmatprep.subr.bf16.mxu0 %v6728_v59 }
 0x1a6   :  { %6157 = vmatprep.subr.bf16.mxu1 %v6729_v60  ;;  %4908 = vmatprep.mubr.bf16.mxu0 %v5109_v37 }
 0x1a7   :  { %4948 = vmatprep.mubr.bf16.mxu1 %v5111_v40 }
 0x1a8   :  { %6136 = vmatpush3.bf16.msra.mxu0 %v6730_v61 }
 0x1a9   :  { %6158 = vmatpush3.bf16.msra.mxu1 %v6731_v62  ;;  %6137 = vmatprep.subr.bf16.mxu0 %v6732_v63 }
 0x1aa   :  { %6159 = vmatprep.subr.bf16.mxu1 %v6733_v0 }
 0x1ac   :  { %6138 = vmatpush3.bf16.msra.mxu0 %v6734_v1  ;;  %v6760_v1 = vmov 0.0|0.0  }
 0x1ad   :  { %6160 = vmatpush3.bf16.msra.mxu1 %v6735_v2  ;;  %6139 = vmatprep.subr.bf16.mxu0 %v6736_v3  ;;  %v4957_v2 = vld [vmem:[%s8299_s3] sm:$0xff]  ;;  %v4958_v3 = vld [vmem:[%s8299_s3 + $0x8] sm:$0xff] }
 0x1ae   :  { %6161 = vmatprep.subr.bf16.mxu1 %v6737_v4  ;;  %v4959_v4 = vld [vmem:[%s8299_s3 + $0x10] sm:$0xff] }
 0x1b0   :  { %6140 = vmatpush3.bf16.msra.mxu0 %v6738_v5  ;;  %v6230_v5 = vpack.c.bf16 %v4958_v3, %v4957_v2 }
 0x1b1   :  { %6162 = vmatpush3.bf16.msra.mxu1 %v6739_v6  ;;  %6141 = vmatprep.subr.bf16.mxu0 %v6740_v7  ;;  %v4960_v6 = vld [vmem:[%s8299_s3 + $0x18] sm:$0xff] }
 0x1b2   :  { %6163 = vmatprep.subr.bf16.mxu1 %v6741_v8  ;;  %v6233_v7 = vpack.c.bf16 %v4960_v6, %v4959_v4  ;;  %v4961_v8 = vld [vmem:[%s8299_s3 + $0x20] sm:$0xff] }
 0x1b4   :  { %6142 = vmatpush3.bf16.msra.mxu0 %v6742_v10 }
 0x1b5   :  { %6164 = vmatpush3.bf16.msra.mxu1 %v6743_v12  ;;  %6143 = vmatprep.subr.bf16.mxu0 %v6744_v15  ;;  %v4964_v12 = vld [vmem:[%s8299_s3 + $0x38] sm:$0xff]  ;;  %v4966_v15 = vld [vmem:[%s8299_s3 + $0x48] sm:$0xff] }
 0x1b6   :  { %v5841_v9 = vpop.f32.mrb[24].mxu0  ;;  %6165 = vmatprep.subr.bf16.mxu1 %v6745_v18  ;;  %v4968_v18 = vld [vmem:[%s8299_s3 + $0x58] sm:$0xff] }
 0x1b7   :  { %v5863_v11 = vpop.f32.mrb[24].mxu1  ;;  %v5842_v13 = vpop.f32.mrb[25].mxu0 }
 0x1b8   :  { %v5864_v14 = vpop.f32.mrb[25].mxu1  ;;  %v5843_v16 = vadd.f32 %v5842_v13, %v5841_v9  ;;  %v5844_v19 = vpop.f32.mrb[26].mxu0  ;;  %6144 = vmatpush3.bf16.msra.mxu0 %v6746_v21  ;;  %v4962_v9 = vld [vmem:[%s8299_s3 + $0x28] sm:$0xff] }
 0x1b9   :  { %v5865_v17 = vadd.f32 %v5864_v14, %v5863_v11  ;;  %v5866_v20 = vpop.f32.mrb[26].mxu1  ;;  %v5845_v24 = vpop.f32.mrb[27].mxu0  ;;  %6166 = vmatpush3.bf16.msra.mxu1 %v6747_v23  ;;  %6145 = vmatprep.subr.bf16.mxu0 %v6748_v26  ;;  %v6236_v10 = vpack.c.bf16 %v4962_v9, %v4961_v8  ;;  %v4963_v11 = vld [vmem:[%s8299_s3 + $0x30] sm:$0xff]  ;;  %v4965_v14 = vld [vmem:[%s8299_s3 + $0x40] sm:$0xff] }
 0x1ba   :  { %v4351_v22 = vadd.f32 %v5843_v16, %v8107_v39  ;;  %v5867_v25 = vpop.f32.mrb[27].mxu1  ;;  %6167 = vmatprep.subr.bf16.mxu1 %v6749_v28  ;;  %v5110_v39 = vcombine.low %v48_v38, %v48_v38  ;;  %v6239_v13 = vpack.c.bf16 %v4964_v12, %v4963_v11  ;;  %v6242_v16 = vpack.c.bf16 %v4966_v15, %v4965_v14 }
 0x1bb   :  { %v6762_v38 = vmov 0.0  }
 0x1bc   :  { %v4391_v27 = vadd.f32 %v5865_v17, %v4351_v22  ;;  %6146 = vmatpush3.bf16.msra.mxu0 %v6750_v29  ;;  %v4967_v17 = vld [vmem:[%s8299_s3 + $0x50] sm:$0xff]  ;;  %v4969_v29 = vld [vmem:[%s8299_s3 + $0x60] sm:$0xff] }
 0x1bd   :  { %6168 = vmatpush3.bf16.msra.mxu1 %v6751_v30  ;;  %6147 = vmatprep.subr.bf16.mxu0 %v6752_v31  ;;  %v6245_v19 = vpack.c.bf16 %v4968_v18, %v4967_v17  ;;  %v4970_v30 = vld [vmem:[%s8299_s3 + $0x68] sm:$0xff] }
 0x1be   :  { %6169 = vmatprep.subr.bf16.mxu1 %v6753_v32 }
 0x1c0   :  { %6148 = vmatpush3.bf16.msra.mxu0 %v6754_v33  ;;  %v6248_v33 = vpack.c.bf16 %v4970_v30, %v4969_v29 }
 0x1c1   :  { %6170 = vmatpush3.bf16.msra.mxu1 %v6755_v34  ;;  %6229 = vmatprep.subr.bf16.mxu0 %v6760_v1 }
 0x1c3   :  { %4909 = vmatmul.mubr.bf16.vlgmr.msra.gmra.mrb[52].mxu0 %v5108_v36  ;;  %v4972_v36 = vld [vmem:[%s8299_s3 + $0x78] sm:$0xff] }
 0x1c4   :  { %4949 = vmatmul.mubr.bf16.vlgmr.msra.gmra.mrb[52].mxu1 %v5110_v39  ;;  %6231 = vmatpush3.bf16.msra.mxu0 %v6230_v5  ;;  %v6251_v37 = vpack.c.bf16 %v4972_v36, %v4971_v35 }
 0x1c5   :  { %6232 = vmatprep.subr.bf16.mxu0 %v6760_v1  ;;  %6226 = vmatprep.mubr.msk.f32.mxu0 %vm6761_vm0, %v6762_v38 }
 0x1c8   :  { %6234 = vmatpush3.bf16.msra.mxu0 %v6233_v7 }
 0x1c9   :  { %6235 = vmatprep.subr.bf16.mxu0 %v6760_v1 }
 0x1cc   :  { %6237 = vmatpush3.bf16.msra.mxu0 %v6236_v10 }
 0x1cd   :  { %6238 = vmatprep.subr.bf16.mxu0 %v6760_v1 }
 0x1d0   :  { %6240 = vmatpush3.bf16.msra.mxu0 %v6239_v13 }
 0x1d1   :  { %6241 = vmatprep.subr.bf16.mxu0 %v6760_v1 }
 0x1d4   :  { %6243 = vmatpush3.bf16.msra.mxu0 %v6242_v16 }
 0x1d5   :  { %6244 = vmatprep.subr.bf16.mxu0 %v6760_v1 }
 0x1d6   :  { %v5885_v41 = vpop.f32.mrb[28].mxu0 }
 0x1d7   :  { %v5907_v42 = vpop.f32.mrb[28].mxu1  ;;  %v5886_v43 = vpop.f32.mrb[29].mxu0 }
 0x1d8   :  { %v5887_v44 = vadd.f32 %v5886_v43, %v5885_v41  ;;  %v5908_v45 = vpop.f32.mrb[29].mxu1  ;;  %v5888_v46 = vpop.f32.mrb[30].mxu0  ;;  %6246 = vmatpush3.bf16.msra.mxu0 %v6245_v19 }
 0x1d9   :  { %v5909_v47 = vadd.f32 %v5908_v45, %v5907_v42  ;;  %v5910_v48 = vpop.f32.mrb[30].mxu1  ;;  %v5889_v49 = vpop.f32.mrb[31].mxu0  ;;  %6247 = vmatprep.subr.bf16.mxu0 %v6760_v1 }
 0x1da   :  { %v4431_v50 = vadd.f32 %v5887_v44, %v4391_v27  ;;  %v5911_v51 = vpop.f32.mrb[31].mxu1 }
 0x1dc   :  { %v4471_v52 = vadd.f32 %v5909_v47, %v4431_v50  ;;  %6249 = vmatpush3.bf16.msra.mxu0 %v6248_v33 }
 0x1dd   :  { %6250 = vmatprep.subr.bf16.mxu0 %v6760_v1 }
 0x1e0   :  { %6252 = vmatpush3.bf16.msra.mxu0 %v6251_v37 }
 0x1f6   :  { %v5929_v53 = vpop.f32.mrb[32].mxu0 }
 0x1f7   :  { %v5951_v54 = vpop.f32.mrb[32].mxu1  ;;  %v5930_v55 = vpop.f32.mrb[33].mxu0 }
 0x1f8   :  { %v5931_v56 = vadd.f32 %v5930_v55, %v5929_v53  ;;  %v5952_v57 = vpop.f32.mrb[33].mxu1  ;;  %v5932_v58 = vpop.f32.mrb[34].mxu0 }
 0x1f9   :  { %v5953_v59 = vadd.f32 %v5952_v57, %v5951_v54  ;;  %v5954_v60 = vpop.f32.mrb[34].mxu1  ;;  %v5933_v61 = vpop.f32.mrb[35].mxu0 }
 0x1fa   :  { %v4511_v62 = vadd.f32 %v5931_v56, %v4471_v52  ;;  %v5955_v63 = vpop.f32.mrb[35].mxu1 }
 0x1fc   :  { %v4551_v0 = vadd.f32 %v5953_v59, %v4511_v62 }
 0x216   :  { %v5973_v20 = vpop.f32.mrb[36].mxu0 }
 0x217   :  { %v5995_v21 = vpop.f32.mrb[36].mxu1  ;;  %v5974_v22 = vpop.f32.mrb[37].mxu0 }
 0x218   :  { %v5975_v23 = vadd.f32 %v5974_v22, %v5973_v20  ;;  %v5996_v24 = vpop.f32.mrb[37].mxu1  ;;  %v5976_v25 = vpop.f32.mrb[38].mxu0 }
 0x219   :  { %v5997_v26 = vadd.f32 %v5996_v24, %v5995_v21  ;;  %v5998_v27 = vpop.f32.mrb[38].mxu1  ;;  %v5977_v28 = vpop.f32.mrb[39].mxu0  ;;  %v5560_v24 = vld [vmem:[%s8300_s4] ss:$0 sm:$0xff] }
 0x21a   :  { %v4591_v31 = vadd.f32 %v5975_v23, %v4551_v0  ;;  %v5999_v32 = vpop.f32.mrb[39].mxu1 }
 0x21c   :  { %v4631_v34 = vadd.f32 %v5997_v26, %v4591_v31 }
 0x236   :  { %v6017_v39 = vpop.f32.mrb[40].mxu0 }
 0x237   :  { %v6039_v40 = vpop.f32.mrb[40].mxu1  ;;  %v6018_v41 = vpop.f32.mrb[41].mxu0 }
 0x238   :  { %v6040_v42 = vpop.f32.mrb[41].mxu1  ;;  %v6019_v43 = vadd.f32 %v6018_v41, %v6017_v39  ;;  %v6020_v45 = vpop.f32.mrb[42].mxu0 }
 0x239   :  { %v6041_v44 = vadd.f32 %v6040_v42, %v6039_v40  ;;  %v6042_v46 = vpop.f32.mrb[42].mxu1  ;;  %v6021_v47 = vpop.f32.mrb[43].mxu0 }
 0x23a   :  { %v6043_v48 = vpop.f32.mrb[43].mxu1  ;;  %v4671_v49 = vadd.f32 %v6019_v43, %v4631_v34 }
 0x23c   :  { %v4711_v50 = vadd.f32 %v6041_v44, %v4671_v49 }
 0x256   :  { %v6061_v51 = vpop.f32.mrb[44].mxu0 }
 0x257   :  { %v6083_v52 = vpop.f32.mrb[44].mxu1  ;;  %v6062_v53 = vpop.f32.mrb[45].mxu0 }
 0x258   :  { %v6063_v54 = vadd.f32 %v6062_v53, %v6061_v51  ;;  %v6084_v55 = vpop.f32.mrb[45].mxu1  ;;  %v6064_v56 = vpop.f32.mrb[46].mxu0 }
 0x259   :  { %v6085_v57 = vadd.f32 %v6084_v55, %v6083_v52  ;;  %v6086_v58 = vpop.f32.mrb[46].mxu1  ;;  %v6065_v59 = vpop.f32.mrb[47].mxu0 }
 0x25a   :  { %v4751_v60 = vadd.f32 %v6063_v54, %v4711_v50  ;;  %v6087_v61 = vpop.f32.mrb[47].mxu1 }
 0x25c   :  { %v4791_v62 = vadd.f32 %v6085_v57, %v4751_v60 }
 0x276   :  { %v6105_v63 = vpop.f32.mrb[48].mxu0 }
 0x277   :  { %v6127_v0 = vpop.f32.mrb[48].mxu1  ;;  %v6106_v1 = vpop.f32.mrb[49].mxu0 }
 0x278   :  { %v6107_v2 = vadd.f32 %v6106_v1, %v6105_v63  ;;  %v6128_v3 = vpop.f32.mrb[49].mxu1  ;;  %v6108_v4 = vpop.f32.mrb[50].mxu0 }
 0x279   :  { %v6129_v5 = vadd.f32 %v6128_v3, %v6127_v0  ;;  %v6130_v6 = vpop.f32.mrb[50].mxu1  ;;  %v6109_v7 = vpop.f32.mrb[51].mxu0 }
 0x27a   :  { %v4831_v8 = vadd.f32 %v6107_v2, %v4791_v62  ;;  %v6131_v9 = vpop.f32.mrb[51].mxu1 }
 0x27c   :  { %v4871_v10 = vadd.f32 %v6129_v5, %v4831_v8 }
 0x296   :  { %v6149_v11 = vpop.f32.mrb[52].mxu0 }
 0x297   :  { %v6171_v12 = vpop.f32.mrb[52].mxu1  ;;  %v6150_v13 = vpop.f32.mrb[53].mxu0 }
 0x298   :  { %v6172_v14 = vpop.f32.mrb[53].mxu1  ;;  %v6151_v15 = vadd.f32 %v6150_v13, %v6149_v11  ;;  %v6152_v17 = vpop.f32.mrb[54].mxu0 }
 0x299   :  { %v6173_v16 = vadd.f32 %v6172_v14, %v6171_v12  ;;  %v6174_v18 = vpop.f32.mrb[54].mxu1  ;;  %v6153_v19 = vpop.f32.mrb[55].mxu0 }
 0x29a   :  { %v6175_v20 = vpop.f32.mrb[55].mxu1  ;;  %v4911_v21 = vadd.f32 %v6151_v15, %v4871_v10 }
 0x29c   :  { %v4951_v22 = vadd.f32 %v6173_v16, %v4911_v21 }
 0x29e   :  { %v4956_v23 = vmax.f32 %v4951_v22, 0.0 }
 0x2a0   :  { %6227 = vmatmul.mubr.f32.vlgmr.msra.gmra.mrb[56].mxu0 %v4956_v23 }
 0x373   :  { %v5046_v25 = vpop.f32.mrb[56].mxu0 }
 0x374   :  { %v5047_v26 = vadd.f32 %v5560_v24, %v5046_v25  ;;  %v6228_v27 = vpop.f32.mrb[57].mxu0 }
 0x376   :  { %5050 = vst [vmem:[%s8301_s5] sm:$0xff] %v5047_v26 }

</bundles_post_ra>
